<compile_context>
chip_gen: v5e
topology: v5e:2x2
jax: 0.10.0
libtpu: 0.0.40
codegen_flags: <defaults>
</compile_context>

<pallas_src>
import functools
import math

import jax
import jax.numpy as jnp
from jax.experimental import pallas as pl
from jax.experimental.pallas import tpu as pltpu

_PI = math.pi
_INV_PI = 1.0 / math.pi
EPSILON_RENDER = 0.1
EPSILON_L1 = 0.01
RANDOM_CONFIGURATION_COUNT = 3
SPECULAR_CONFIGURATION_COUNT = 6

_LANES = 128
_MAX_TILE_R = 256   # 12ch * 256 * 128 * 4B = 1.5 MiB per input block
_STRIP = 8          # compute strip: 8 sublane-rows x 128 lanes = 1 vreg per value


def _normalize3(vx, vy, vz):
    inv = jax.lax.rsqrt(vx * vx + vy * vy + vz * vz + 1e-12)   # EUP rsqrt
    return vx * inv, vy * inv, vz * inv


def _ggx_DG(NH2, NV, NL, rough):
    """GGX normal distribution D times Smith visibility G1(l)*G1(v) (channel-invariant)."""
    alpha = rough * rough
    a2 = alpha * alpha
    denom = jnp.maximum(NH2 * (a2 - 1.0) + 1.0, 0.001)
    D = a2 * pl.reciprocal(_PI * denom * denom, approx=True)                    # EUP
    k = jnp.maximum(alpha * 0.5, 1e-4)
    g1_l = pl.reciprocal(jnp.maximum(NL * (1.0 - k) + k, 0.001), approx=True)   # EUP
    g1_v = pl.reciprocal(jnp.maximum(NV * (1.0 - k) + k, 0.001), approx=True)   # EUP
    return D * g1_l * g1_v


def _mixed_loss_kernel(scene_ref, coord_ref, in_ref, tgt_ref,
                       rend_ref, l1_ref, rend_acc_ref, l1_acc_ref,
                       *, n_scenes, strip, single_rough):
    """One grid step = (batch element, half-split, pixel-row tile).

    scene_ref : SMEM (B*n_scenes*9,) f32 flattened [cam_xyz, light_pos_xyz, light_rgb]
    coord_ref : VMEM (2, tile_r, 128) pixel-plane coordinates (cx, cy), plane z = 0
    in_ref / tgt_ref : VMEM (1, 12, tile_r, 128) lane-dense SVBRDF tiles
    rend_ref / l1_ref : VMEM (1, 1, 1) per-(b,p) partial sums, written on last tile
    rend_acc_ref / l1_acc_ref : VMEM (strip, 128) running accumulators across tiles
    """
    b = pl.program_id(0)
    t = pl.program_id(2)

    @pl.when(t == 0)
    def _init():
        rend_acc_ref[...] = jnp.zeros_like(rend_acc_ref)
        l1_acc_ref[...] = jnp.zeros_like(l1_acc_ref)

    # Hoist the (cheap) scalar scene reads out of the strip loop: 9 scalars x n_scenes.
    scene_vals = []
    for n in range(n_scenes):
        base = (b * n_scenes + n) * 9
        scene_vals.append(tuple(scene_ref[base + j] for j in range(9)))

    tile_r = in_ref.shape[2]
    nstrips = tile_r // strip

    def strip_body(s):
        if isinstance(s, int):
            srow = s * strip
        else:
            srow = pl.multiple_of(s * strip, strip)
        sl = pl.ds(srow, strip)

        cx = coord_ref[0, sl, :]            # (strip, 128)
        cy = coord_ref[1, sl, :]

        def ic(c): return in_ref[0, c, sl, :]
        def tc(c): return tgt_ref[0, c, sl, :]

        # ---------------- SVBRDF L1 term (scene independent) ----------------
        l1 = jnp.zeros_like(cx)
        for c in range(3):
            l1 = l1 + jnp.abs(ic(c) - tc(c))                                   # normals
            l1 = l1 + jnp.abs(jnp.log((ic(3 + c) + EPSILON_L1) *
                                      pl.reciprocal(tc(3 + c) + EPSILON_L1,
                                                    approx=True)))             # diffuse
            l1 = l1 + jnp.abs(ic(6 + c) - tc(6 + c))                           # roughness
            l1 = l1 + jnp.abs(jnp.log((ic(9 + c) + EPSILON_L1) *
                                      pl.reciprocal(tc(9 + c) + EPSILON_L1,
                                                    approx=True)))             # specular

        # ---------------- rendering L1 term (all scenes, one strip) ----------------
        nxi, nyi, nzi = ic(0), ic(1), ic(2)
        nxt, nyt, nzt = tc(0), tc(1), tc(2)
        di = (ic(3), ic(4), ic(5)); dt = (tc(3), tc(4), tc(5))
        si = (ic(9), ic(10), ic(11)); st = (tc(9), tc(10), tc(11))

        rend = jnp.zeros_like(cx)
        for n in range(n_scenes):           # static unrolled scene loop
            camx, camy, camz, lpx, lpy, lpz, lr, lg, lb = scene_vals[n]
            lcol = (lr, lg, lb)

            # Per-pixel view (wo) and light (wi) directions; material plane is z = 0.
            wox, woy, woz = _normalize3(camx - cx, camy - cy, camz)
            rlx, rly = lpx - cx, lpy - cy
            wix, wiy, wiz = _normalize3(rlx, rly, lpz)
            dist_sq = rlx * rlx + rly * rly + lpz * lpz
            falloff = pl.reciprocal(jnp.maximum(dist_sq, 1e-12), approx=True)  # EUP

            hx, hy, hz = _normalize3((wix + wox) * 0.5, (wiy + woy) * 0.5,
                                     (wiz + woz) * 0.5)

            # Channel- and normal-invariant pieces.
            VH = jnp.maximum(wox * hx + woy * hy + woz * hz, 0.001)
            omvh = 1.0 - VH
            x2 = omvh * omvh
            x5 = x2 * x2 * omvh             # (1-VH)^5 computed once per scene

            def dots(nx, ny, nz):
                NH = jnp.maximum(nx * hx + ny * hy + nz * hz, 0.001)
                NV = jnp.maximum(nx * wox + ny * woy + nz * woz, 0.001)
                ndl = nx * wix + ny * wiy + nz * wiz
                return NH * NH, NV, jnp.maximum(ndl, 0.001), jnp.maximum(ndl, 0.0)

            NH2i, NVi, NLi, LNi = dots(nxi, nyi, nzi)
            NH2t, NVt, NLt, LNt = dots(nxt, nyt, nzt)

            if single_rough:
                # Roughness is one channel tiled to RGB -> hoist D*G out of channel loop.
                DGi = (_ggx_DG(NH2i, NVi, NLi, ic(6)),) * 3
                DGt = (_ggx_DG(NH2t, NVt, NLt, tc(6)),) * 3
            else:
                DGi = tuple(_ggx_DG(NH2i, NVi, NLi, ic(6 + c)) for c in range(3))
                DGt = tuple(_ggx_DG(NH2t, NVt, NLt, tc(6 + c)) for c in range(3))

            for c in range(3):
                li = lcol[c] * falloff
                Fi = si[c] + (1.0 - si[c]) * x5          # Schlick Fresnel
                Ft = st[c] + (1.0 - st[c]) * x5
                fi = di[c] * ((1.0 - si[c]) * _INV_PI) + 0.25 * DGi[c] * Fi
                ft = dt[c] * ((1.0 - st[c]) * _INV_PI) + 0.25 * DGt[c] * Ft
                ai = fi * LNi * li + EPSILON_RENDER
                at = ft * LNt * li + EPSILON_RENDER
                # |log(ai) - log(at)| == |log(ai / at)|  -> one log + one EUP recip.
                rend = rend + jnp.abs(jnp.log(ai * pl.reciprocal(at, approx=True)))

        rend_acc_ref[...] = rend_acc_ref[...] + rend
        l1_acc_ref[...] = l1_acc_ref[...] + l1

    if nstrips == 1:
        strip_body(0)
    else:
        pl.loop(0, nstrips)(strip_body)

    # Single cross-lane reduction + scalar-ish store, only on the last tile.
    @pl.when(t == pl.num_programs(2) - 1)
    def _fin():
        rend_ref[...] = jnp.broadcast_to(jnp.sum(rend_acc_ref[...]), (1, 1, 1))
        l1_ref[...] = jnp.broadcast_to(jnp.sum(l1_acc_ref[...]), (1, 1, 1))


def _pick_tile_r(R):
    """Largest multiple-of-8 divisor of R that is <= _MAX_TILE_R (else whole R if small)."""
    if R <= _MAX_TILE_R:
        return R
    for d in range(_MAX_TILE_R, 7, -1):
        if R % d == 0 and d % 8 == 0:
            return d
    # No aligned divisor: fall back to whole-R block (rare; keeps correctness).
    return R


def mixed_loss(input_svbrdf, target_svbrdf, scenes, l1_weight=0.1,
               single_channel_roughness=True):
    """input/target: (B, 12, H, W) float32; scenes: (B, N, 9) float32."""
    B, C, H, W = input_svbrdf.shape
    assert C == 12, "expected 12-channel SVBRDF (normals, diffuse, rough, spec)"
    assert H > 1 and W > 1, "coordinate grid requires H > 1 and W > 1"
    HW = H * W
    assert HW % _LANES == 0, "H*W must be a multiple of 128 for the lane-dense layout"
    R = HW // _LANES
    N = scenes.shape[1]

    tile_r = _pick_tile_r(R)
    num_tiles = R // tile_r
    # Second parallel axis so v7x's 2 TensorCores are busy even at B == 1.
    P = 2 if (num_tiles >= 2 and num_tiles % 2 == 0) else 1
    T = num_tiles // P
    strip = _STRIP if tile_r % _STRIP == 0 else tile_r

    inp = input_svbrdf.astype(jnp.float32).reshape(B, C, R, _LANES)
    tgt = target_svbrdf.astype(jnp.float32).reshape(B, C, R, _LANES)
    scenes_flat = scenes.astype(jnp.float32).reshape(B * N * 9)   # 1D SMEM (no 2D padding)

    # Pixel-centre coordinates of the [-1,1]^2 material plane (y flipped), lane-dense.
    col = jnp.arange(W, dtype=jnp.float32)
    row = jnp.arange(H, dtype=jnp.float32)
    cx = jnp.broadcast_to(-1.0 + 2.0 * col / (W - 1), (H, W))
    cy = jnp.broadcast_to((1.0 - 2.0 * row / (H - 1))[:, None], (H, W))
    coords = jnp.stack([cx, cy], axis=0).reshape(2, R, _LANES)

    kernel = functools.partial(_mixed_loss_kernel, n_scenes=N, strip=strip,
                               single_rough=bool(single_channel_roughness))

    rend_part, l1_part = pl.pallas_call(
        kernel,
        out_shape=(jax.ShapeDtypeStruct((B * P, 1, 1), jnp.float32),
                   jax.ShapeDtypeStruct((B * P, 1, 1), jnp.float32)),
        grid=(B, P, T),
        in_specs=[
            pl.BlockSpec(memory_space=pltpu.SMEM),                                   # scene table
            pl.BlockSpec((2, tile_r, _LANES), lambda b, p, t: (0, p * T + t, 0)),    # pixel coords
            pl.BlockSpec((1, C, tile_r, _LANES), lambda b, p, t: (b, 0, p * T + t, 0)),  # input
            pl.BlockSpec((1, C, tile_r, _LANES), lambda b, p, t: (b, 0, p * T + t, 0)),  # target
        ],
        out_specs=[
            pl.BlockSpec((1, 1, 1), lambda b, p, t: (b * P + p, 0, 0)),              # rendering
            pl.BlockSpec((1, 1, 1), lambda b, p, t: (b * P + p, 0, 0)),              # L1
        ],
        scratch_shapes=[pltpu.VMEM((strip, _LANES), jnp.float32),
                        pltpu.VMEM((strip, _LANES), jnp.float32)],
        compiler_params=pltpu.CompilerParams(
            dimension_semantics=("parallel", "parallel", "arbitrary"),
            vmem_limit_bytes=32 * 1024 * 1024),
    )(scenes_flat, coords, inp, tgt)

    # RenderingLoss: mean over B * N * 3 * H * W log-rendered pixels.
    rendering = jnp.sum(rend_part) / jnp.float32(B * N * 3 * H * W)
    # SVBRDFL1Loss: sum of 4 means, each over B * 3 * H * W elements.
    svbrdf_l1 = jnp.sum(l1_part) / jnp.float32(B * 3 * H * W)
    return l1_weight * svbrdf_l1 + rendering


# -------------------- deterministic scene generation (glue) --------------------

def _generate_normalized_random_direction(key, count, min_eps=0.001, max_eps=0.05):
    k1, k2 = jax.random.split(key)
    r1 = jax.random.uniform(k1, (count, 1), minval=min_eps, maxval=1.0 - max_eps)
    r2 = jax.random.uniform(k2, (count, 1))
    r = jnp.sqrt(r1)
    phi = 2.0 * _PI * r2
    x = r * jnp.cos(phi)
    y = r * jnp.sin(phi)
    z = jnp.sqrt(1.0 - r * r)
    return jnp.concatenate([x, y, z], axis=-1)


def generate_scenes(key,
                    random_count=RANDOM_CONFIGURATION_COUNT,
                    specular_count=SPECULAR_CONFIGURATION_COUNT):
    """Deterministic analog of env.generate_random_scenes + generate_specular_scenes.

    Returns an (N, 9) float32 array: [camera_xyz, light_pos_xyz, light_color_rgb].
    """
    k1, k2, k3, k4, k5, k6 = jax.random.split(key, 6)

    view_r = _generate_normalized_random_direction(k1, random_count, 0.001, 0.1)
    light_r = _generate_normalized_random_direction(k2, random_count, 0.001, 0.1)
    col_r = jnp.full((random_count, 3), 20.0)

    view_s = _generate_normalized_random_direction(k3, specular_count, 0.001, 0.1)
    light_s = view_s * jnp.array([-1.0, -1.0, 1.0])
    dist_v = jnp.exp(jax.random.normal(k4, (specular_count, 1)) * 0.75 + 0.5)
    dist_l = jnp.exp(jax.random.normal(k5, (specular_count, 1)) * 0.75 + 0.5)
    shift_xy = jax.random.uniform(k6, (specular_count, 2), minval=-1.0, maxval=1.0)
    shift = jnp.concatenate([shift_xy, jnp.full((specular_count, 1), 1e-4)], axis=-1)
    view_s = view_s * dist_v + shift
    light_s = light_s * dist_l + shift
    col_s = jnp.full((specular_count, 3), 50.0)

    cam = jnp.concatenate([view_r, view_s], axis=0)
    lpos = jnp.concatenate([light_r, light_s], axis=0)
    lcol = jnp.concatenate([col_r, col_s], axis=0)
    return jnp.concatenate([cam, lpos, lcol], axis=-1).astype(jnp.float32)


def _make_svbrdf(key, B, H, W):
    kn, kd, kr, ks = jax.random.split(key, 4)
    nraw = jax.random.normal(kn, (B, 3, H, W))
    nraw = nraw.at[:, 2].set(jnp.abs(nraw[:, 2]) + 0.5)
    normals = nraw / jnp.linalg.norm(nraw, axis=1, keepdims=True)
    diffuse = jax.random.uniform(kd, (B, 3, H, W), minval=0.05, maxval=0.95)
    rough1 = jax.random.uniform(kr, (B, 1, H, W), minval=0.1, maxval=0.9)
    roughness = jnp.tile(rough1, (1, 3, 1, 1))
    specular = jax.random.uniform(ks, (B, 3, H, W), minval=0.02, maxval=0.6)
    return jnp.concatenate([normals, diffuse, roughness, specular], axis=1
                           ).astype(jnp.float32)


if __name__ == "__main__":
    B, H, W = 2, 16, 16
    key = jax.random.PRNGKey(0)
    k_in, k_tgt, k_scene = jax.random.split(key, 3)

    input_svbrdf = _make_svbrdf(k_in, B, H, W)     # (2, 12, 16, 16)
    target_svbrdf = _make_svbrdf(k_tgt, B, H, W)   # (2, 12, 16, 16)

    # Scenes are regenerated per batch element (as in the torch forward loop).
    scene_keys = jax.random.split(k_scene, B)
    scenes = jnp.stack([generate_scenes(scene_keys[i]) for i in range(B)], axis=0)

    loss = mixed_loss(input_svbrdf, target_svbrdf, scenes, l1_weight=0.1)
    loss = jax.block_until_ready(loss)
    assert loss.shape == () and jnp.isfinite(loss)
    print("KERNEL_OK")
</pallas_src>

<mosaic_0001>
module attributes {stable_mosaic.version = 11 : i64} {
  func.func @_mixed_loss_kernel(%arg0: i32, %arg1: i32, %arg2: i32, %arg3: memref<162xf32, #tpu.memory_space<smem>>, %arg4: memref<2x2x128xf32, #tpu.memory_space<vmem>>, %arg5: memref<1x12x2x128xf32, #tpu.memory_space<vmem>>, %arg6: memref<1x12x2x128xf32, #tpu.memory_space<vmem>>, %arg7: memref<1x1x1xf32, #tpu.memory_space<vmem>>, %arg8: memref<1x1x1xf32, #tpu.memory_space<vmem>>, %arg9: memref<2x128xf32, #tpu.memory_space<vmem>>, %arg10: memref<2x128xf32, #tpu.memory_space<vmem>>) attributes {dimension_semantics = [#tpu.dimension_semantics<parallel>, #tpu.dimension_semantics<parallel>, #tpu.dimension_semantics<arbitrary>], iteration_bounds = array<i64: 2, 1, 1>, scalar_prefetch = 0 : i64, scratch_operands = 2 : i64, tpu.core_type = #tpu.core_type<tc>, window_params = [{transform_indices = @transform_0, window_bounds = array<i64: 162>}, {transform_indices = @transform_1, window_bounds = array<i64: 2, 2, 128>}, {transform_indices = @transform_2, window_bounds = array<i64: 1, 12, 2, 128>}, {transform_indices = @transform_3, window_bounds = array<i64: 1, 12, 2, 128>}, {transform_indices = @transform_4, window_bounds = array<i64: 1, 1, 1>}, {transform_indices = @transform_5, window_bounds = array<i64: 1, 1, 1>}]} {
    %c0_i32 = arith.constant 0 : i32
    %0 = arith.cmpi eq, %arg2, %c0_i32 : i32
    %1 = arith.extui %0 : i1 to i32
    %c0_i32_0 = arith.constant 0 : i32
    %2 = arith.cmpi ne, %1, %c0_i32_0 : i32
    scf.if %2 {
      %cst_960 = arith.constant 0.000000e+00 : f32
      %3306 = vector.broadcast %cst_960 : f32 to vector<2x128xf32>
      %c0_961 = arith.constant 0 : index
      %c0_962 = arith.constant 0 : index
      %3307 = vector.load %arg9[%c0_961, %c0_962] : memref<2x128xf32, #tpu.memory_space<vmem>>, vector<2x128xf32>
      tpu.vector_store %arg9[%c0_961, %c0_962], %3306 {strides = array<i32>} : memref<2x128xf32, #tpu.memory_space<vmem>>, vector<2x128xf32>,
      %cst_963 = arith.constant 0.000000e+00 : f32
      %3308 = vector.broadcast %cst_963 : f32 to vector<2x128xf32>
      %c0_964 = arith.constant 0 : index
      %c0_965 = arith.constant 0 : index
      %3309 = vector.load %arg10[%c0_964, %c0_965] : memref<2x128xf32, #tpu.memory_space<vmem>>, vector<2x128xf32>
      tpu.vector_store %arg10[%c0_964, %c0_965], %3308 {strides = array<i32>} : memref<2x128xf32, #tpu.memory_space<vmem>>, vector<2x128xf32>,
    } else {
    }
    %c9_i32 = arith.constant 9 : i32
    %3 = arith.muli %arg0, %c9_i32 : i32
    %c0_i32_1 = arith.constant 0 : i32
    %4 = arith.addi %3, %c0_i32_1 : i32
    %c9_i32_2 = arith.constant 9 : i32
    %5 = arith.muli %4, %c9_i32_2 : i32
    %c0_i32_3 = arith.constant 0 : i32
    %6 = arith.addi %5, %c0_i32_3 : i32
    %7 = arith.index_cast %6 : i32 to index
    %8 = memref.load %arg3[%7] : memref<162xf32, #tpu.memory_space<smem>>
    %c1_i32 = arith.constant 1 : i32
    %9 = arith.addi %5, %c1_i32 : i32
    %10 = arith.index_cast %9 : i32 to index
    %11 = memref.load %arg3[%10] : memref<162xf32, #tpu.memory_space<smem>>
    %c2_i32 = arith.constant 2 : i32
    %12 = arith.addi %5, %c2_i32 : i32
    %13 = arith.index_cast %12 : i32 to index
    %14 = memref.load %arg3[%13] : memref<162xf32, #tpu.memory_space<smem>>
    %c3_i32 = arith.constant 3 : i32
    %15 = arith.addi %5, %c3_i32 : i32
    %16 = arith.index_cast %15 : i32 to index
    %17 = memref.load %arg3[%16] : memref<162xf32, #tpu.memory_space<smem>>
    %c4_i32 = arith.constant 4 : i32
    %18 = arith.addi %5, %c4_i32 : i32
    %19 = arith.index_cast %18 : i32 to index
    %20 = memref.load %arg3[%19] : memref<162xf32, #tpu.memory_space<smem>>
    %c5_i32 = arith.constant 5 : i32
    %21 = arith.addi %5, %c5_i32 : i32
    %22 = arith.index_cast %21 : i32 to index
    %23 = memref.load %arg3[%22] : memref<162xf32, #tpu.memory_space<smem>>
    %c6_i32 = arith.constant 6 : i32
    %24 = arith.addi %5, %c6_i32 : i32
    %25 = arith.index_cast %24 : i32 to index
    %26 = memref.load %arg3[%25] : memref<162xf32, #tpu.memory_space<smem>>
    %c7_i32 = arith.constant 7 : i32
    %27 = arith.addi %5, %c7_i32 : i32
    %28 = arith.index_cast %27 : i32 to index
    %29 = memref.load %arg3[%28] : memref<162xf32, #tpu.memory_space<smem>>
    %c8_i32 = arith.constant 8 : i32
    %30 = arith.addi %5, %c8_i32 : i32
    %31 = arith.index_cast %30 : i32 to index
    %32 = memref.load %arg3[%31] : memref<162xf32, #tpu.memory_space<smem>>
    %c9_i32_4 = arith.constant 9 : i32
    %33 = arith.muli %arg0, %c9_i32_4 : i32
    %c1_i32_5 = arith.constant 1 : i32
    %34 = arith.addi %33, %c1_i32_5 : i32
    %c9_i32_6 = arith.constant 9 : i32
    %35 = arith.muli %34, %c9_i32_6 : i32
    %c0_i32_7 = arith.constant 0 : i32
    %36 = arith.addi %35, %c0_i32_7 : i32
    %37 = arith.index_cast %36 : i32 to index
    %38 = memref.load %arg3[%37] : memref<162xf32, #tpu.memory_space<smem>>
    %c1_i32_8 = arith.constant 1 : i32
    %39 = arith.addi %35, %c1_i32_8 : i32
    %40 = arith.index_cast %39 : i32 to index
    %41 = memref.load %arg3[%40] : memref<162xf32, #tpu.memory_space<smem>>
    %c2_i32_9 = arith.constant 2 : i32
    %42 = arith.addi %35, %c2_i32_9 : i32
    %43 = arith.index_cast %42 : i32 to index
    %44 = memref.load %arg3[%43] : memref<162xf32, #tpu.memory_space<smem>>
    %c3_i32_10 = arith.constant 3 : i32
    %45 = arith.addi %35, %c3_i32_10 : i32
    %46 = arith.index_cast %45 : i32 to index
    %47 = memref.load %arg3[%46] : memref<162xf32, #tpu.memory_space<smem>>
    %c4_i32_11 = arith.constant 4 : i32
    %48 = arith.addi %35, %c4_i32_11 : i32
    %49 = arith.index_cast %48 : i32 to index
    %50 = memref.load %arg3[%49] : memref<162xf32, #tpu.memory_space<smem>>
    %c5_i32_12 = arith.constant 5 : i32
    %51 = arith.addi %35, %c5_i32_12 : i32
    %52 = arith.index_cast %51 : i32 to index
    %53 = memref.load %arg3[%52] : memref<162xf32, #tpu.memory_space<smem>>
    %c6_i32_13 = arith.constant 6 : i32
    %54 = arith.addi %35, %c6_i32_13 : i32
    %55 = arith.index_cast %54 : i32 to index
    %56 = memref.load %arg3[%55] : memref<162xf32, #tpu.memory_space<smem>>
    %c7_i32_14 = arith.constant 7 : i32
    %57 = arith.addi %35, %c7_i32_14 : i32
    %58 = arith.index_cast %57 : i32 to index
    %59 = memref.load %arg3[%58] : memref<162xf32, #tpu.memory_space<smem>>
    %c8_i32_15 = arith.constant 8 : i32
    %60 = arith.addi %35, %c8_i32_15 : i32
    %61 = arith.index_cast %60 : i32 to index
    %62 = memref.load %arg3[%61] : memref<162xf32, #tpu.memory_space<smem>>
    %c9_i32_16 = arith.constant 9 : i32
    %63 = arith.muli %arg0, %c9_i32_16 : i32
    %c2_i32_17 = arith.constant 2 : i32
    %64 = arith.addi %63, %c2_i32_17 : i32
    %c9_i32_18 = arith.constant 9 : i32
    %65 = arith.muli %64, %c9_i32_18 : i32
    %c0_i32_19 = arith.constant 0 : i32
    %66 = arith.addi %65, %c0_i32_19 : i32
    %67 = arith.index_cast %66 : i32 to index
    %68 = memref.load %arg3[%67] : memref<162xf32, #tpu.memory_space<smem>>
    %c1_i32_20 = arith.constant 1 : i32
    %69 = arith.addi %65, %c1_i32_20 : i32
    %70 = arith.index_cast %69 : i32 to index
    %71 = memref.load %arg3[%70] : memref<162xf32, #tpu.memory_space<smem>>
    %c2_i32_21 = arith.constant 2 : i32
    %72 = arith.addi %65, %c2_i32_21 : i32
    %73 = arith.index_cast %72 : i32 to index
    %74 = memref.load %arg3[%73] : memref<162xf32, #tpu.memory_space<smem>>
    %c3_i32_22 = arith.constant 3 : i32
    %75 = arith.addi %65, %c3_i32_22 : i32
    %76 = arith.index_cast %75 : i32 to index
    %77 = memref.load %arg3[%76] : memref<162xf32, #tpu.memory_space<smem>>
    %c4_i32_23 = arith.constant 4 : i32
    %78 = arith.addi %65, %c4_i32_23 : i32
    %79 = arith.index_cast %78 : i32 to index
    %80 = memref.load %arg3[%79] : memref<162xf32, #tpu.memory_space<smem>>
    %c5_i32_24 = arith.constant 5 : i32
    %81 = arith.addi %65, %c5_i32_24 : i32
    %82 = arith.index_cast %81 : i32 to index
    %83 = memref.load %arg3[%82] : memref<162xf32, #tpu.memory_space<smem>>
    %c6_i32_25 = arith.constant 6 : i32
    %84 = arith.addi %65, %c6_i32_25 : i32
    %85 = arith.index_cast %84 : i32 to index
    %86 = memref.load %arg3[%85] : memref<162xf32, #tpu.memory_space<smem>>
    %c7_i32_26 = arith.constant 7 : i32
    %87 = arith.addi %65, %c7_i32_26 : i32
    %88 = arith.index_cast %87 : i32 to index
    %89 = memref.load %arg3[%88] : memref<162xf32, #tpu.memory_space<smem>>
    %c8_i32_27 = arith.constant 8 : i32
    %90 = arith.addi %65, %c8_i32_27 : i32
    %91 = arith.index_cast %90 : i32 to index
    %92 = memref.load %arg3[%91] : memref<162xf32, #tpu.memory_space<smem>>
    %c9_i32_28 = arith.constant 9 : i32
    %93 = arith.muli %arg0, %c9_i32_28 : i32
    %c3_i32_29 = arith.constant 3 : i32
    %94 = arith.addi %93, %c3_i32_29 : i32
    %c9_i32_30 = arith.constant 9 : i32
    %95 = arith.muli %94, %c9_i32_30 : i32
    %c0_i32_31 = arith.constant 0 : i32
    %96 = arith.addi %95, %c0_i32_31 : i32
    %97 = arith.index_cast %96 : i32 to index
    %98 = memref.load %arg3[%97] : memref<162xf32, #tpu.memory_space<smem>>
    %c1_i32_32 = arith.constant 1 : i32
    %99 = arith.addi %95, %c1_i32_32 : i32
    %100 = arith.index_cast %99 : i32 to index
    %101 = memref.load %arg3[%100] : memref<162xf32, #tpu.memory_space<smem>>
    %c2_i32_33 = arith.constant 2 : i32
    %102 = arith.addi %95, %c2_i32_33 : i32
    %103 = arith.index_cast %102 : i32 to index
    %104 = memref.load %arg3[%103] : memref<162xf32, #tpu.memory_space<smem>>
    %c3_i32_34 = arith.constant 3 : i32
    %105 = arith.addi %95, %c3_i32_34 : i32
    %106 = arith.index_cast %105 : i32 to index
    %107 = memref.load %arg3[%106] : memref<162xf32, #tpu.memory_space<smem>>
    %c4_i32_35 = arith.constant 4 : i32
    %108 = arith.addi %95, %c4_i32_35 : i32
    %109 = arith.index_cast %108 : i32 to index
    %110 = memref.load %arg3[%109] : memref<162xf32, #tpu.memory_space<smem>>
    %c5_i32_36 = arith.constant 5 : i32
    %111 = arith.addi %95, %c5_i32_36 : i32
    %112 = arith.index_cast %111 : i32 to index
    %113 = memref.load %arg3[%112] : memref<162xf32, #tpu.memory_space<smem>>
    %c6_i32_37 = arith.constant 6 : i32
    %114 = arith.addi %95, %c6_i32_37 : i32
    %115 = arith.index_cast %114 : i32 to index
    %116 = memref.load %arg3[%115] : memref<162xf32, #tpu.memory_space<smem>>
    %c7_i32_38 = arith.constant 7 : i32
    %117 = arith.addi %95, %c7_i32_38 : i32
    %118 = arith.index_cast %117 : i32 to index
    %119 = memref.load %arg3[%118] : memref<162xf32, #tpu.memory_space<smem>>
    %c8_i32_39 = arith.constant 8 : i32
    %120 = arith.addi %95, %c8_i32_39 : i32
    %121 = arith.index_cast %120 : i32 to index
    %122 = memref.load %arg3[%121] : memref<162xf32, #tpu.memory_space<smem>>
    %c9_i32_40 = arith.constant 9 : i32
    %123 = arith.muli %arg0, %c9_i32_40 : i32
    %c4_i32_41 = arith.constant 4 : i32
    %124 = arith.addi %123, %c4_i32_41 : i32
    %c9_i32_42 = arith.constant 9 : i32
    %125 = arith.muli %124, %c9_i32_42 : i32
    %c0_i32_43 = arith.constant 0 : i32
    %126 = arith.addi %125, %c0_i32_43 : i32
    %127 = arith.index_cast %126 : i32 to index
    %128 = memref.load %arg3[%127] : memref<162xf32, #tpu.memory_space<smem>>
    %c1_i32_44 = arith.constant 1 : i32
    %129 = arith.addi %125, %c1_i32_44 : i32
    %130 = arith.index_cast %129 : i32 to index
    %131 = memref.load %arg3[%130] : memref<162xf32, #tpu.memory_space<smem>>
    %c2_i32_45 = arith.constant 2 : i32
    %132 = arith.addi %125, %c2_i32_45 : i32
    %133 = arith.index_cast %132 : i32 to index
    %134 = memref.load %arg3[%133] : memref<162xf32, #tpu.memory_space<smem>>
    %c3_i32_46 = arith.constant 3 : i32
    %135 = arith.addi %125, %c3_i32_46 : i32
    %136 = arith.index_cast %135 : i32 to index
    %137 = memref.load %arg3[%136] : memref<162xf32, #tpu.memory_space<smem>>
    %c4_i32_47 = arith.constant 4 : i32
    %138 = arith.addi %125, %c4_i32_47 : i32
    %139 = arith.index_cast %138 : i32 to index
    %140 = memref.load %arg3[%139] : memref<162xf32, #tpu.memory_space<smem>>
    %c5_i32_48 = arith.constant 5 : i32
    %141 = arith.addi %125, %c5_i32_48 : i32
    %142 = arith.index_cast %141 : i32 to index
    %143 = memref.load %arg3[%142] : memref<162xf32, #tpu.memory_space<smem>>
    %c6_i32_49 = arith.constant 6 : i32
    %144 = arith.addi %125, %c6_i32_49 : i32
    %145 = arith.index_cast %144 : i32 to index
    %146 = memref.load %arg3[%145] : memref<162xf32, #tpu.memory_space<smem>>
    %c7_i32_50 = arith.constant 7 : i32
    %147 = arith.addi %125, %c7_i32_50 : i32
    %148 = arith.index_cast %147 : i32 to index
    %149 = memref.load %arg3[%148] : memref<162xf32, #tpu.memory_space<smem>>
    %c8_i32_51 = arith.constant 8 : i32
    %150 = arith.addi %125, %c8_i32_51 : i32
    %151 = arith.index_cast %150 : i32 to index
    %152 = memref.load %arg3[%151] : memref<162xf32, #tpu.memory_space<smem>>
    %c9_i32_52 = arith.constant 9 : i32
    %153 = arith.muli %arg0, %c9_i32_52 : i32
    %c5_i32_53 = arith.constant 5 : i32
    %154 = arith.addi %153, %c5_i32_53 : i32
    %c9_i32_54 = arith.constant 9 : i32
    %155 = arith.muli %154, %c9_i32_54 : i32
    %c0_i32_55 = arith.constant 0 : i32
    %156 = arith.addi %155, %c0_i32_55 : i32
    %157 = arith.index_cast %156 : i32 to index
    %158 = memref.load %arg3[%157] : memref<162xf32, #tpu.memory_space<smem>>
    %c1_i32_56 = arith.constant 1 : i32
    %159 = arith.addi %155, %c1_i32_56 : i32
    %160 = arith.index_cast %159 : i32 to index
    %161 = memref.load %arg3[%160] : memref<162xf32, #tpu.memory_space<smem>>
    %c2_i32_57 = arith.constant 2 : i32
    %162 = arith.addi %155, %c2_i32_57 : i32
    %163 = arith.index_cast %162 : i32 to index
    %164 = memref.load %arg3[%163] : memref<162xf32, #tpu.memory_space<smem>>
    %c3_i32_58 = arith.constant 3 : i32
    %165 = arith.addi %155, %c3_i32_58 : i32
    %166 = arith.index_cast %165 : i32 to index
    %167 = memref.load %arg3[%166] : memref<162xf32, #tpu.memory_space<smem>>
    %c4_i32_59 = arith.constant 4 : i32
    %168 = arith.addi %155, %c4_i32_59 : i32
    %169 = arith.index_cast %168 : i32 to index
    %170 = memref.load %arg3[%169] : memref<162xf32, #tpu.memory_space<smem>>
    %c5_i32_60 = arith.constant 5 : i32
    %171 = arith.addi %155, %c5_i32_60 : i32
    %172 = arith.index_cast %171 : i32 to index
    %173 = memref.load %arg3[%172] : memref<162xf32, #tpu.memory_space<smem>>
    %c6_i32_61 = arith.constant 6 : i32
    %174 = arith.addi %155, %c6_i32_61 : i32
    %175 = arith.index_cast %174 : i32 to index
    %176 = memref.load %arg3[%175] : memref<162xf32, #tpu.memory_space<smem>>
    %c7_i32_62 = arith.constant 7 : i32
    %177 = arith.addi %155, %c7_i32_62 : i32
    %178 = arith.index_cast %177 : i32 to index
    %179 = memref.load %arg3[%178] : memref<162xf32, #tpu.memory_space<smem>>
    %c8_i32_63 = arith.constant 8 : i32
    %180 = arith.addi %155, %c8_i32_63 : i32
    %181 = arith.index_cast %180 : i32 to index
    %182 = memref.load %arg3[%181] : memref<162xf32, #tpu.memory_space<smem>>
    %c9_i32_64 = arith.constant 9 : i32
    %183 = arith.muli %arg0, %c9_i32_64 : i32
    %c6_i32_65 = arith.constant 6 : i32
    %184 = arith.addi %183, %c6_i32_65 : i32
    %c9_i32_66 = arith.constant 9 : i32
    %185 = arith.muli %184, %c9_i32_66 : i32
    %c0_i32_67 = arith.constant 0 : i32
    %186 = arith.addi %185, %c0_i32_67 : i32
    %187 = arith.index_cast %186 : i32 to index
    %188 = memref.load %arg3[%187] : memref<162xf32, #tpu.memory_space<smem>>
    %c1_i32_68 = arith.constant 1 : i32
    %189 = arith.addi %185, %c1_i32_68 : i32
    %190 = arith.index_cast %189 : i32 to index
    %191 = memref.load %arg3[%190] : memref<162xf32, #tpu.memory_space<smem>>
    %c2_i32_69 = arith.constant 2 : i32
    %192 = arith.addi %185, %c2_i32_69 : i32
    %193 = arith.index_cast %192 : i32 to index
    %194 = memref.load %arg3[%193] : memref<162xf32, #tpu.memory_space<smem>>
    %c3_i32_70 = arith.constant 3 : i32
    %195 = arith.addi %185, %c3_i32_70 : i32
    %196 = arith.index_cast %195 : i32 to index
    %197 = memref.load %arg3[%196] : memref<162xf32, #tpu.memory_space<smem>>
    %c4_i32_71 = arith.constant 4 : i32
    %198 = arith.addi %185, %c4_i32_71 : i32
    %199 = arith.index_cast %198 : i32 to index
    %200 = memref.load %arg3[%199] : memref<162xf32, #tpu.memory_space<smem>>
    %c5_i32_72 = arith.constant 5 : i32
    %201 = arith.addi %185, %c5_i32_72 : i32
    %202 = arith.index_cast %201 : i32 to index
    %203 = memref.load %arg3[%202] : memref<162xf32, #tpu.memory_space<smem>>
    %c6_i32_73 = arith.constant 6 : i32
    %204 = arith.addi %185, %c6_i32_73 : i32
    %205 = arith.index_cast %204 : i32 to index
    %206 = memref.load %arg3[%205] : memref<162xf32, #tpu.memory_space<smem>>
    %c7_i32_74 = arith.constant 7 : i32
    %207 = arith.addi %185, %c7_i32_74 : i32
    %208 = arith.index_cast %207 : i32 to index
    %209 = memref.load %arg3[%208] : memref<162xf32, #tpu.memory_space<smem>>
    %c8_i32_75 = arith.constant 8 : i32
    %210 = arith.addi %185, %c8_i32_75 : i32
    %211 = arith.index_cast %210 : i32 to index
    %212 = memref.load %arg3[%211] : memref<162xf32, #tpu.memory_space<smem>>
    %c9_i32_76 = arith.constant 9 : i32
    %213 = arith.muli %arg0, %c9_i32_76 : i32
    %c7_i32_77 = arith.constant 7 : i32
    %214 = arith.addi %213, %c7_i32_77 : i32
    %c9_i32_78 = arith.constant 9 : i32
    %215 = arith.muli %214, %c9_i32_78 : i32
    %c0_i32_79 = arith.constant 0 : i32
    %216 = arith.addi %215, %c0_i32_79 : i32
    %217 = arith.index_cast %216 : i32 to index
    %218 = memref.load %arg3[%217] : memref<162xf32, #tpu.memory_space<smem>>
    %c1_i32_80 = arith.constant 1 : i32
    %219 = arith.addi %215, %c1_i32_80 : i32
    %220 = arith.index_cast %219 : i32 to index
    %221 = memref.load %arg3[%220] : memref<162xf32, #tpu.memory_space<smem>>
    %c2_i32_81 = arith.constant 2 : i32
    %222 = arith.addi %215, %c2_i32_81 : i32
    %223 = arith.index_cast %222 : i32 to index
    %224 = memref.load %arg3[%223] : memref<162xf32, #tpu.memory_space<smem>>
    %c3_i32_82 = arith.constant 3 : i32
    %225 = arith.addi %215, %c3_i32_82 : i32
    %226 = arith.index_cast %225 : i32 to index
    %227 = memref.load %arg3[%226] : memref<162xf32, #tpu.memory_space<smem>>
    %c4_i32_83 = arith.constant 4 : i32
    %228 = arith.addi %215, %c4_i32_83 : i32
    %229 = arith.index_cast %228 : i32 to index
    %230 = memref.load %arg3[%229] : memref<162xf32, #tpu.memory_space<smem>>
    %c5_i32_84 = arith.constant 5 : i32
    %231 = arith.addi %215, %c5_i32_84 : i32
    %232 = arith.index_cast %231 : i32 to index
    %233 = memref.load %arg3[%232] : memref<162xf32, #tpu.memory_space<smem>>
    %c6_i32_85 = arith.constant 6 : i32
    %234 = arith.addi %215, %c6_i32_85 : i32
    %235 = arith.index_cast %234 : i32 to index
    %236 = memref.load %arg3[%235] : memref<162xf32, #tpu.memory_space<smem>>
    %c7_i32_86 = arith.constant 7 : i32
    %237 = arith.addi %215, %c7_i32_86 : i32
    %238 = arith.index_cast %237 : i32 to index
    %239 = memref.load %arg3[%238] : memref<162xf32, #tpu.memory_space<smem>>
    %c8_i32_87 = arith.constant 8 : i32
    %240 = arith.addi %215, %c8_i32_87 : i32
    %241 = arith.index_cast %240 : i32 to index
    %242 = memref.load %arg3[%241] : memref<162xf32, #tpu.memory_space<smem>>
    %c9_i32_88 = arith.constant 9 : i32
    %243 = arith.muli %arg0, %c9_i32_88 : i32
    %c8_i32_89 = arith.constant 8 : i32
    %244 = arith.addi %243, %c8_i32_89 : i32
    %c9_i32_90 = arith.constant 9 : i32
    %245 = arith.muli %244, %c9_i32_90 : i32
    %c0_i32_91 = arith.constant 0 : i32
    %246 = arith.addi %245, %c0_i32_91 : i32
    %247 = arith.index_cast %246 : i32 to index
    %248 = memref.load %arg3[%247] : memref<162xf32, #tpu.memory_space<smem>>
    %c1_i32_92 = arith.constant 1 : i32
    %249 = arith.addi %245, %c1_i32_92 : i32
    %250 = arith.index_cast %249 : i32 to index
    %251 = memref.load %arg3[%250] : memref<162xf32, #tpu.memory_space<smem>>
    %c2_i32_93 = arith.constant 2 : i32
    %252 = arith.addi %245, %c2_i32_93 : i32
    %253 = arith.index_cast %252 : i32 to index
    %254 = memref.load %arg3[%253] : memref<162xf32, #tpu.memory_space<smem>>
    %c3_i32_94 = arith.constant 3 : i32
    %255 = arith.addi %245, %c3_i32_94 : i32
    %256 = arith.index_cast %255 : i32 to index
    %257 = memref.load %arg3[%256] : memref<162xf32, #tpu.memory_space<smem>>
    %c4_i32_95 = arith.constant 4 : i32
    %258 = arith.addi %245, %c4_i32_95 : i32
    %259 = arith.index_cast %258 : i32 to index
    %260 = memref.load %arg3[%259] : memref<162xf32, #tpu.memory_space<smem>>
    %c5_i32_96 = arith.constant 5 : i32
    %261 = arith.addi %245, %c5_i32_96 : i32
    %262 = arith.index_cast %261 : i32 to index
    %263 = memref.load %arg3[%262] : memref<162xf32, #tpu.memory_space<smem>>
    %c6_i32_97 = arith.constant 6 : i32
    %264 = arith.addi %245, %c6_i32_97 : i32
    %265 = arith.index_cast %264 : i32 to index
    %266 = memref.load %arg3[%265] : memref<162xf32, #tpu.memory_space<smem>>
    %c7_i32_98 = arith.constant 7 : i32
    %267 = arith.addi %245, %c7_i32_98 : i32
    %268 = arith.index_cast %267 : i32 to index
    %269 = memref.load %arg3[%268] : memref<162xf32, #tpu.memory_space<smem>>
    %c8_i32_99 = arith.constant 8 : i32
    %270 = arith.addi %245, %c8_i32_99 : i32
    %271 = arith.index_cast %270 : i32 to index
    %272 = memref.load %arg3[%271] : memref<162xf32, #tpu.memory_space<smem>>
    %c0 = arith.constant 0 : index
    %c0_100 = arith.constant 0 : index
    %c0_101 = arith.constant 0 : index
    %273 = vector.load %arg4[%c0, %c0_100, %c0_101] : memref<2x2x128xf32, #tpu.memory_space<vmem>>, vector<1x2x128xf32>
    %274 = vector.shape_cast %273 : vector<1x2x128xf32> to vector<2x128xf32>
    %c1 = arith.constant 1 : index
    %c0_102 = arith.constant 0 : index
    %c0_103 = arith.constant 0 : index
    %275 = vector.load %arg4[%c1, %c0_102, %c0_103] : memref<2x2x128xf32, #tpu.memory_space<vmem>>, vector<1x2x128xf32>
    %276 = vector.shape_cast %275 : vector<1x2x128xf32> to vector<2x128xf32>
    %cst = arith.constant 0.000000e+00 : f32
    %277 = vector.broadcast %cst : f32 to vector<2x128xf32>
    %c0_104 = arith.constant 0 : index
    %c0_105 = arith.constant 0 : index
    %c0_106 = arith.constant 0 : index
    %c0_107 = arith.constant 0 : index
    %278 = vector.load %arg5[%c0_104, %c0_105, %c0_106, %c0_107] : memref<1x12x2x128xf32, #tpu.memory_space<vmem>>, vector<1x1x2x128xf32>
    %279 = vector.shape_cast %278 : vector<1x1x2x128xf32> to vector<2x128xf32>
    %c0_108 = arith.constant 0 : index
    %c0_109 = arith.constant 0 : index
    %c0_110 = arith.constant 0 : index
    %c0_111 = arith.constant 0 : index
    %280 = vector.load %arg6[%c0_108, %c0_109, %c0_110, %c0_111] : memref<1x12x2x128xf32, #tpu.memory_space<vmem>>, vector<1x1x2x128xf32>
    %281 = vector.shape_cast %280 : vector<1x1x2x128xf32> to vector<2x128xf32>
    %282 = arith.subf %279, %281 : vector<2x128xf32>
    %283 = math.absf %282 : vector<2x128xf32>
    %284 = arith.addf %277, %283 : vector<2x128xf32>
    %c0_112 = arith.constant 0 : index
    %c3 = arith.constant 3 : index
    %c0_113 = arith.constant 0 : index
    %c0_114 = arith.constant 0 : index
    %285 = vector.load %arg5[%c0_112, %c3, %c0_113, %c0_114] : memref<1x12x2x128xf32, #tpu.memory_space<vmem>>, vector<1x1x2x128xf32>
    %286 = vector.shape_cast %285 : vector<1x1x2x128xf32> to vector<2x128xf32>
    %cst_115 = arith.constant 0.00999999977 : f32
    %287 = vector.broadcast %cst_115 : f32 to vector<2x128xf32>
    %288 = arith.addf %286, %287 : vector<2x128xf32>
    %c0_116 = arith.constant 0 : index
    %c3_117 = arith.constant 3 : index
    %c0_118 = arith.constant 0 : index
    %c0_119 = arith.constant 0 : index
    %289 = vector.load %arg6[%c0_116, %c3_117, %c0_118, %c0_119] : memref<1x12x2x128xf32, #tpu.memory_space<vmem>>, vector<1x1x2x128xf32>
    %290 = vector.shape_cast %289 : vector<1x1x2x128xf32> to vector<2x128xf32>
    %cst_120 = arith.constant 0.00999999977 : f32
    %291 = vector.broadcast %cst_120 : f32 to vector<2x128xf32>
    %292 = arith.addf %290, %291 : vector<2x128xf32>
    %293 = tpu.reciprocal %292 {approx = true} : vector<2x128xf32> -> vector<2x128xf32>
    %294 = arith.mulf %288, %293 : vector<2x128xf32>
    %295 = math.log %294 : vector<2x128xf32>
    %296 = math.absf %295 : vector<2x128xf32>
    %297 = arith.addf %284, %296 : vector<2x128xf32>
    %c0_121 = arith.constant 0 : index
    %c6 = arith.constant 6 : index
    %c0_122 = arith.constant 0 : index
    %c0_123 = arith.constant 0 : index
    %298 = vector.load %arg5[%c0_121, %c6, %c0_122, %c0_123] : memref<1x12x2x128xf32, #tpu.memory_space<vmem>>, vector<1x1x2x128xf32>
    %299 = vector.shape_cast %298 : vector<1x1x2x128xf32> to vector<2x128xf32>
    %c0_124 = arith.constant 0 : index
    %c6_125 = arith.constant 6 : index
    %c0_126 = arith.constant 0 : index
    %c0_127 = arith.constant 0 : index
    %300 = vector.load %arg6[%c0_124, %c6_125, %c0_126, %c0_127] : memref<1x12x2x128xf32, #tpu.memory_space<vmem>>, vector<1x1x2x128xf32>
    %301 = vector.shape_cast %300 : vector<1x1x2x128xf32> to vector<2x128xf32>
    %302 = arith.subf %299, %301 : vector<2x128xf32>
    %303 = math.absf %302 : vector<2x128xf32>
    %304 = arith.addf %297, %303 : vector<2x128xf32>
    %c0_128 = arith.constant 0 : index
    %c9 = arith.constant 9 : index
    %c0_129 = arith.constant 0 : index
    %c0_130 = arith.constant 0 : index
    %305 = vector.load %arg5[%c0_128, %c9, %c0_129, %c0_130] : memref<1x12x2x128xf32, #tpu.memory_space<vmem>>, vector<1x1x2x128xf32>
    %306 = vector.shape_cast %305 : vector<1x1x2x128xf32> to vector<2x128xf32>
    %cst_131 = arith.constant 0.00999999977 : f32
    %307 = vector.broadcast %cst_131 : f32 to vector<2x128xf32>
    %308 = arith.addf %306, %307 : vector<2x128xf32>
    %c0_132 = arith.constant 0 : index
    %c9_133 = arith.constant 9 : index
    %c0_134 = arith.constant 0 : index
    %c0_135 = arith.constant 0 : index
    %309 = vector.load %arg6[%c0_132, %c9_133, %c0_134, %c0_135] : memref<1x12x2x128xf32, #tpu.memory_space<vmem>>, vector<1x1x2x128xf32>
    %310 = vector.shape_cast %309 : vector<1x1x2x128xf32> to vector<2x128xf32>
    %cst_136 = arith.constant 0.00999999977 : f32
    %311 = vector.broadcast %cst_136 : f32 to vector<2x128xf32>
    %312 = arith.addf %310, %311 : vector<2x128xf32>
    %313 = tpu.reciprocal %312 {approx = true} : vector<2x128xf32> -> vector<2x128xf32>
    %314 = arith.mulf %308, %313 : vector<2x128xf32>
    %315 = math.log %314 : vector<2x128xf32>
    %316 = math.absf %315 : vector<2x128xf32>
    %317 = arith.addf %304, %316 : vector<2x128xf32>
    %c0_137 = arith.constant 0 : index
    %c1_138 = arith.constant 1 : index
    %c0_139 = arith.constant 0 : index
    %c0_140 = arith.constant 0 : index
    %318 = vector.load %arg5[%c0_137, %c1_138, %c0_139, %c0_140] : memref<1x12x2x128xf32, #tpu.memory_space<vmem>>, vector<1x1x2x128xf32>
    %319 = vector.shape_cast %318 : vector<1x1x2x128xf32> to vector<2x128xf32>
    %c0_141 = arith.constant 0 : index
    %c1_142 = arith.constant 1 : index
    %c0_143 = arith.constant 0 : index
    %c0_144 = arith.constant 0 : index
    %320 = vector.load %arg6[%c0_141, %c1_142, %c0_143, %c0_144] : memref<1x12x2x128xf32, #tpu.memory_space<vmem>>, vector<1x1x2x128xf32>
    %321 = vector.shape_cast %320 : vector<1x1x2x128xf32> to vector<2x128xf32>
    %322 = arith.subf %319, %321 : vector<2x128xf32>
    %323 = math.absf %322 : vector<2x128xf32>
    %324 = arith.addf %317, %323 : vector<2x128xf32>
    %c0_145 = arith.constant 0 : index
    %c4 = arith.constant 4 : index
    %c0_146 = arith.constant 0 : index
    %c0_147 = arith.constant 0 : index
    %325 = vector.load %arg5[%c0_145, %c4, %c0_146, %c0_147] : memref<1x12x2x128xf32, #tpu.memory_space<vmem>>, vector<1x1x2x128xf32>
    %326 = vector.shape_cast %325 : vector<1x1x2x128xf32> to vector<2x128xf32>
    %cst_148 = arith.constant 0.00999999977 : f32
    %327 = vector.broadcast %cst_148 : f32 to vector<2x128xf32>
    %328 = arith.addf %326, %327 : vector<2x128xf32>
    %c0_149 = arith.constant 0 : index
    %c4_150 = arith.constant 4 : index
    %c0_151 = arith.constant 0 : index
    %c0_152 = arith.constant 0 : index
    %329 = vector.load %arg6[%c0_149, %c4_150, %c0_151, %c0_152] : memref<1x12x2x128xf32, #tpu.memory_space<vmem>>, vector<1x1x2x128xf32>
    %330 = vector.shape_cast %329 : vector<1x1x2x128xf32> to vector<2x128xf32>
    %cst_153 = arith.constant 0.00999999977 : f32
    %331 = vector.broadcast %cst_153 : f32 to vector<2x128xf32>
    %332 = arith.addf %330, %331 : vector<2x128xf32>
    %333 = tpu.reciprocal %332 {approx = true} : vector<2x128xf32> -> vector<2x128xf32>
    %334 = arith.mulf %328, %333 : vector<2x128xf32>
    %335 = math.log %334 : vector<2x128xf32>
    %336 = math.absf %335 : vector<2x128xf32>
    %337 = arith.addf %324, %336 : vector<2x128xf32>
    %c0_154 = arith.constant 0 : index
    %c7 = arith.constant 7 : index
    %c0_155 = arith.constant 0 : index
    %c0_156 = arith.constant 0 : index
    %338 = vector.load %arg5[%c0_154, %c7, %c0_155, %c0_156] : memref<1x12x2x128xf32, #tpu.memory_space<vmem>>, vector<1x1x2x128xf32>
    %339 = vector.shape_cast %338 : vector<1x1x2x128xf32> to vector<2x128xf32>
    %c0_157 = arith.constant 0 : index
    %c7_158 = arith.constant 7 : index
    %c0_159 = arith.constant 0 : index
    %c0_160 = arith.constant 0 : index
    %340 = vector.load %arg6[%c0_157, %c7_158, %c0_159, %c0_160] : memref<1x12x2x128xf32, #tpu.memory_space<vmem>>, vector<1x1x2x128xf32>
    %341 = vector.shape_cast %340 : vector<1x1x2x128xf32> to vector<2x128xf32>
    %342 = arith.subf %339, %341 : vector<2x128xf32>
    %343 = math.absf %342 : vector<2x128xf32>
    %344 = arith.addf %337, %343 : vector<2x128xf32>
    %c0_161 = arith.constant 0 : index
    %c10 = arith.constant 10 : index
    %c0_162 = arith.constant 0 : index
    %c0_163 = arith.constant 0 : index
    %345 = vector.load %arg5[%c0_161, %c10, %c0_162, %c0_163] : memref<1x12x2x128xf32, #tpu.memory_space<vmem>>, vector<1x1x2x128xf32>
    %346 = vector.shape_cast %345 : vector<1x1x2x128xf32> to vector<2x128xf32>
    %cst_164 = arith.constant 0.00999999977 : f32
    %347 = vector.broadcast %cst_164 : f32 to vector<2x128xf32>
    %348 = arith.addf %346, %347 : vector<2x128xf32>
    %c0_165 = arith.constant 0 : index
    %c10_166 = arith.constant 10 : index
    %c0_167 = arith.constant 0 : index
    %c0_168 = arith.constant 0 : index
    %349 = vector.load %arg6[%c0_165, %c10_166, %c0_167, %c0_168] : memref<1x12x2x128xf32, #tpu.memory_space<vmem>>, vector<1x1x2x128xf32>
    %350 = vector.shape_cast %349 : vector<1x1x2x128xf32> to vector<2x128xf32>
    %cst_169 = arith.constant 0.00999999977 : f32
    %351 = vector.broadcast %cst_169 : f32 to vector<2x128xf32>
    %352 = arith.addf %350, %351 : vector<2x128xf32>
    %353 = tpu.reciprocal %352 {approx = true} : vector<2x128xf32> -> vector<2x128xf32>
    %354 = arith.mulf %348, %353 : vector<2x128xf32>
    %355 = math.log %354 : vector<2x128xf32>
    %356 = math.absf %355 : vector<2x128xf32>
    %357 = arith.addf %344, %356 : vector<2x128xf32>
    %c0_170 = arith.constant 0 : index
    %c2 = arith.constant 2 : index
    %c0_171 = arith.constant 0 : index
    %c0_172 = arith.constant 0 : index
    %358 = vector.load %arg5[%c0_170, %c2, %c0_171, %c0_172] : memref<1x12x2x128xf32, #tpu.memory_space<vmem>>, vector<1x1x2x128xf32>
    %359 = vector.shape_cast %358 : vector<1x1x2x128xf32> to vector<2x128xf32>
    %c0_173 = arith.constant 0 : index
    %c2_174 = arith.constant 2 : index
    %c0_175 = arith.constant 0 : index
    %c0_176 = arith.constant 0 : index
    %360 = vector.load %arg6[%c0_173, %c2_174, %c0_175, %c0_176] : memref<1x12x2x128xf32, #tpu.memory_space<vmem>>, vector<1x1x2x128xf32>
    %361 = vector.shape_cast %360 : vector<1x1x2x128xf32> to vector<2x128xf32>
    %362 = arith.subf %359, %361 : vector<2x128xf32>
    %363 = math.absf %362 : vector<2x128xf32>
    %364 = arith.addf %357, %363 : vector<2x128xf32>
    %c0_177 = arith.constant 0 : index
    %c5 = arith.constant 5 : index
    %c0_178 = arith.constant 0 : index
    %c0_179 = arith.constant 0 : index
    %365 = vector.load %arg5[%c0_177, %c5, %c0_178, %c0_179] : memref<1x12x2x128xf32, #tpu.memory_space<vmem>>, vector<1x1x2x128xf32>
    %366 = vector.shape_cast %365 : vector<1x1x2x128xf32> to vector<2x128xf32>
    %cst_180 = arith.constant 0.00999999977 : f32
    %367 = vector.broadcast %cst_180 : f32 to vector<2x128xf32>
    %368 = arith.addf %366, %367 : vector<2x128xf32>
    %c0_181 = arith.constant 0 : index
    %c5_182 = arith.constant 5 : index
    %c0_183 = arith.constant 0 : index
    %c0_184 = arith.constant 0 : index
    %369 = vector.load %arg6[%c0_181, %c5_182, %c0_183, %c0_184] : memref<1x12x2x128xf32, #tpu.memory_space<vmem>>, vector<1x1x2x128xf32>
    %370 = vector.shape_cast %369 : vector<1x1x2x128xf32> to vector<2x128xf32>
    %cst_185 = arith.constant 0.00999999977 : f32
    %371 = vector.broadcast %cst_185 : f32 to vector<2x128xf32>
    %372 = arith.addf %370, %371 : vector<2x128xf32>
    %373 = tpu.reciprocal %372 {approx = true} : vector<2x128xf32> -> vector<2x128xf32>
    %374 = arith.mulf %368, %373 : vector<2x128xf32>
    %375 = math.log %374 : vector<2x128xf32>
    %376 = math.absf %375 : vector<2x128xf32>
    %377 = arith.addf %364, %376 : vector<2x128xf32>
    %c0_186 = arith.constant 0 : index
    %c8 = arith.constant 8 : index
    %c0_187 = arith.constant 0 : index
    %c0_188 = arith.constant 0 : index
    %378 = vector.load %arg5[%c0_186, %c8, %c0_187, %c0_188] : memref<1x12x2x128xf32, #tpu.memory_space<vmem>>, vector<1x1x2x128xf32>
    %379 = vector.shape_cast %378 : vector<1x1x2x128xf32> to vector<2x128xf32>
    %c0_189 = arith.constant 0 : index
    %c8_190 = arith.constant 8 : index
    %c0_191 = arith.constant 0 : index
    %c0_192 = arith.constant 0 : index
    %380 = vector.load %arg6[%c0_189, %c8_190, %c0_191, %c0_192] : memref<1x12x2x128xf32, #tpu.memory_space<vmem>>, vector<1x1x2x128xf32>
    %381 = vector.shape_cast %380 : vector<1x1x2x128xf32> to vector<2x128xf32>
    %382 = arith.subf %379, %381 : vector<2x128xf32>
    %383 = math.absf %382 : vector<2x128xf32>
    %384 = arith.addf %377, %383 : vector<2x128xf32>
    %c0_193 = arith.constant 0 : index
    %c11 = arith.constant 11 : index
    %c0_194 = arith.constant 0 : index
    %c0_195 = arith.constant 0 : index
    %385 = vector.load %arg5[%c0_193, %c11, %c0_194, %c0_195] : memref<1x12x2x128xf32, #tpu.memory_space<vmem>>, vector<1x1x2x128xf32>
    %386 = vector.shape_cast %385 : vector<1x1x2x128xf32> to vector<2x128xf32>
    %cst_196 = arith.constant 0.00999999977 : f32
    %387 = vector.broadcast %cst_196 : f32 to vector<2x128xf32>
    %388 = arith.addf %386, %387 : vector<2x128xf32>
    %c0_197 = arith.constant 0 : index
    %c11_198 = arith.constant 11 : index
    %c0_199 = arith.constant 0 : index
    %c0_200 = arith.constant 0 : index
    %389 = vector.load %arg6[%c0_197, %c11_198, %c0_199, %c0_200] : memref<1x12x2x128xf32, #tpu.memory_space<vmem>>, vector<1x1x2x128xf32>
    %390 = vector.shape_cast %389 : vector<1x1x2x128xf32> to vector<2x128xf32>
    %cst_201 = arith.constant 0.00999999977 : f32
    %391 = vector.broadcast %cst_201 : f32 to vector<2x128xf32>
    %392 = arith.addf %390, %391 : vector<2x128xf32>
    %393 = tpu.reciprocal %392 {approx = true} : vector<2x128xf32> -> vector<2x128xf32>
    %394 = arith.mulf %388, %393 : vector<2x128xf32>
    %395 = math.log %394 : vector<2x128xf32>
    %396 = math.absf %395 : vector<2x128xf32>
    %397 = arith.addf %384, %396 : vector<2x128xf32>
    %c0_202 = arith.constant 0 : index
    %c0_203 = arith.constant 0 : index
    %c0_204 = arith.constant 0 : index
    %c0_205 = arith.constant 0 : index
    %398 = vector.load %arg5[%c0_202, %c0_203, %c0_204, %c0_205] : memref<1x12x2x128xf32, #tpu.memory_space<vmem>>, vector<1x1x2x128xf32>
    %399 = vector.shape_cast %398 : vector<1x1x2x128xf32> to vector<2x128xf32>
    %c0_206 = arith.constant 0 : index
    %c1_207 = arith.constant 1 : index
    %c0_208 = arith.constant 0 : index
    %c0_209 = arith.constant 0 : index
    %400 = vector.load %arg5[%c0_206, %c1_207, %c0_208, %c0_209] : memref<1x12x2x128xf32, #tpu.memory_space<vmem>>, vector<1x1x2x128xf32>
    %401 = vector.shape_cast %400 : vector<1x1x2x128xf32> to vector<2x128xf32>
    %c0_210 = arith.constant 0 : index
    %c2_211 = arith.constant 2 : index
    %c0_212 = arith.constant 0 : index
    %c0_213 = arith.constant 0 : index
    %402 = vector.load %arg5[%c0_210, %c2_211, %c0_212, %c0_213] : memref<1x12x2x128xf32, #tpu.memory_space<vmem>>, vector<1x1x2x128xf32>
    %403 = vector.shape_cast %402 : vector<1x1x2x128xf32> to vector<2x128xf32>
    %c0_214 = arith.constant 0 : index
    %c0_215 = arith.constant 0 : index
    %c0_216 = arith.constant 0 : index
    %c0_217 = arith.constant 0 : index
    %404 = vector.load %arg6[%c0_214, %c0_215, %c0_216, %c0_217] : memref<1x12x2x128xf32, #tpu.memory_space<vmem>>, vector<1x1x2x128xf32>
    %405 = vector.shape_cast %404 : vector<1x1x2x128xf32> to vector<2x128xf32>
    %c0_218 = arith.constant 0 : index
    %c1_219 = arith.constant 1 : index
    %c0_220 = arith.constant 0 : index
    %c0_221 = arith.constant 0 : index
    %406 = vector.load %arg6[%c0_218, %c1_219, %c0_220, %c0_221] : memref<1x12x2x128xf32, #tpu.memory_space<vmem>>, vector<1x1x2x128xf32>
    %407 = vector.shape_cast %406 : vector<1x1x2x128xf32> to vector<2x128xf32>
    %c0_222 = arith.constant 0 : index
    %c2_223 = arith.constant 2 : index
    %c0_224 = arith.constant 0 : index
    %c0_225 = arith.constant 0 : index
    %408 = vector.load %arg6[%c0_222, %c2_223, %c0_224, %c0_225] : memref<1x12x2x128xf32, #tpu.memory_space<vmem>>, vector<1x1x2x128xf32>
    %409 = vector.shape_cast %408 : vector<1x1x2x128xf32> to vector<2x128xf32>
    %c0_226 = arith.constant 0 : index
    %c3_227 = arith.constant 3 : index
    %c0_228 = arith.constant 0 : index
    %c0_229 = arith.constant 0 : index
    %410 = vector.load %arg5[%c0_226, %c3_227, %c0_228, %c0_229] : memref<1x12x2x128xf32, #tpu.memory_space<vmem>>, vector<1x1x2x128xf32>
    %411 = vector.shape_cast %410 : vector<1x1x2x128xf32> to vector<2x128xf32>
    %c0_230 = arith.constant 0 : index
    %c4_231 = arith.constant 4 : index
    %c0_232 = arith.constant 0 : index
    %c0_233 = arith.constant 0 : index
    %412 = vector.load %arg5[%c0_230, %c4_231, %c0_232, %c0_233] : memref<1x12x2x128xf32, #tpu.memory_space<vmem>>, vector<1x1x2x128xf32>
    %413 = vector.shape_cast %412 : vector<1x1x2x128xf32> to vector<2x128xf32>
    %c0_234 = arith.constant 0 : index
    %c5_235 = arith.constant 5 : index
    %c0_236 = arith.constant 0 : index
    %c0_237 = arith.constant 0 : index
    %414 = vector.load %arg5[%c0_234, %c5_235, %c0_236, %c0_237] : memref<1x12x2x128xf32, #tpu.memory_space<vmem>>, vector<1x1x2x128xf32>
    %415 = vector.shape_cast %414 : vector<1x1x2x128xf32> to vector<2x128xf32>
    %c0_238 = arith.constant 0 : index
    %c3_239 = arith.constant 3 : index
    %c0_240 = arith.constant 0 : index
    %c0_241 = arith.constant 0 : index
    %416 = vector.load %arg6[%c0_238, %c3_239, %c0_240, %c0_241] : memref<1x12x2x128xf32, #tpu.memory_space<vmem>>, vector<1x1x2x128xf32>
    %417 = vector.shape_cast %416 : vector<1x1x2x128xf32> to vector<2x128xf32>
    %c0_242 = arith.constant 0 : index
    %c4_243 = arith.constant 4 : index
    %c0_244 = arith.constant 0 : index
    %c0_245 = arith.constant 0 : index
    %418 = vector.load %arg6[%c0_242, %c4_243, %c0_244, %c0_245] : memref<1x12x2x128xf32, #tpu.memory_space<vmem>>, vector<1x1x2x128xf32>
    %419 = vector.shape_cast %418 : vector<1x1x2x128xf32> to vector<2x128xf32>
    %c0_246 = arith.constant 0 : index
    %c5_247 = arith.constant 5 : index
    %c0_248 = arith.constant 0 : index
    %c0_249 = arith.constant 0 : index
    %420 = vector.load %arg6[%c0_246, %c5_247, %c0_248, %c0_249] : memref<1x12x2x128xf32, #tpu.memory_space<vmem>>, vector<1x1x2x128xf32>
    %421 = vector.shape_cast %420 : vector<1x1x2x128xf32> to vector<2x128xf32>
    %c0_250 = arith.constant 0 : index
    %c9_251 = arith.constant 9 : index
    %c0_252 = arith.constant 0 : index
    %c0_253 = arith.constant 0 : index
    %422 = vector.load %arg5[%c0_250, %c9_251, %c0_252, %c0_253] : memref<1x12x2x128xf32, #tpu.memory_space<vmem>>, vector<1x1x2x128xf32>
    %423 = vector.shape_cast %422 : vector<1x1x2x128xf32> to vector<2x128xf32>
    %c0_254 = arith.constant 0 : index
    %c10_255 = arith.constant 10 : index
    %c0_256 = arith.constant 0 : index
    %c0_257 = arith.constant 0 : index
    %424 = vector.load %arg5[%c0_254, %c10_255, %c0_256, %c0_257] : memref<1x12x2x128xf32, #tpu.memory_space<vmem>>, vector<1x1x2x128xf32>
    %425 = vector.shape_cast %424 : vector<1x1x2x128xf32> to vector<2x128xf32>
    %c0_258 = arith.constant 0 : index
    %c11_259 = arith.constant 11 : index
    %c0_260 = arith.constant 0 : index
    %c0_261 = arith.constant 0 : index
    %426 = vector.load %arg5[%c0_258, %c11_259, %c0_260, %c0_261] : memref<1x12x2x128xf32, #tpu.memory_space<vmem>>, vector<1x1x2x128xf32>
    %427 = vector.shape_cast %426 : vector<1x1x2x128xf32> to vector<2x128xf32>
    %c0_262 = arith.constant 0 : index
    %c9_263 = arith.constant 9 : index
    %c0_264 = arith.constant 0 : index
    %c0_265 = arith.constant 0 : index
    %428 = vector.load %arg6[%c0_262, %c9_263, %c0_264, %c0_265] : memref<1x12x2x128xf32, #tpu.memory_space<vmem>>, vector<1x1x2x128xf32>
    %429 = vector.shape_cast %428 : vector<1x1x2x128xf32> to vector<2x128xf32>
    %c0_266 = arith.constant 0 : index
    %c10_267 = arith.constant 10 : index
    %c0_268 = arith.constant 0 : index
    %c0_269 = arith.constant 0 : index
    %430 = vector.load %arg6[%c0_266, %c10_267, %c0_268, %c0_269] : memref<1x12x2x128xf32, #tpu.memory_space<vmem>>, vector<1x1x2x128xf32>
    %431 = vector.shape_cast %430 : vector<1x1x2x128xf32> to vector<2x128xf32>
    %c0_270 = arith.constant 0 : index
    %c11_271 = arith.constant 11 : index
    %c0_272 = arith.constant 0 : index
    %c0_273 = arith.constant 0 : index
    %432 = vector.load %arg6[%c0_270, %c11_271, %c0_272, %c0_273] : memref<1x12x2x128xf32, #tpu.memory_space<vmem>>, vector<1x1x2x128xf32>
    %433 = vector.shape_cast %432 : vector<1x1x2x128xf32> to vector<2x128xf32>
    %cst_274 = arith.constant 0.000000e+00 : f32
    %434 = vector.broadcast %cst_274 : f32 to vector<2x128xf32>
    %435 = vector.broadcast %8 : f32 to vector<2x128xf32>
    %436 = arith.subf %435, %274 : vector<2x128xf32>
    %437 = vector.broadcast %11 : f32 to vector<2x128xf32>
    %438 = arith.subf %437, %276 : vector<2x128xf32>
    %439 = arith.mulf %436, %436 : vector<2x128xf32>
    %440 = arith.mulf %438, %438 : vector<2x128xf32>
    %441 = arith.addf %439, %440 : vector<2x128xf32>
    %442 = arith.mulf %14, %14 : f32
    %443 = vector.broadcast %442 : f32 to vector<2x128xf32>
    %444 = arith.addf %441, %443 : vector<2x128xf32>
    %cst_275 = arith.constant 9.99999996E-13 : f32
    %445 = vector.broadcast %cst_275 : f32 to vector<2x128xf32>
    %446 = arith.addf %444, %445 : vector<2x128xf32>
    %447 = math.rsqrt %446 : vector<2x128xf32>
    %448 = arith.mulf %436, %447 : vector<2x128xf32>
    %449 = arith.mulf %438, %447 : vector<2x128xf32>
    %450 = vector.broadcast %14 : f32 to vector<2x128xf32>
    %451 = arith.mulf %450, %447 : vector<2x128xf32>
    %452 = vector.broadcast %17 : f32 to vector<2x128xf32>
    %453 = arith.subf %452, %274 : vector<2x128xf32>
    %454 = vector.broadcast %20 : f32 to vector<2x128xf32>
    %455 = arith.subf %454, %276 : vector<2x128xf32>
    %456 = arith.mulf %453, %453 : vector<2x128xf32>
    %457 = arith.mulf %455, %455 : vector<2x128xf32>
    %458 = arith.addf %456, %457 : vector<2x128xf32>
    %459 = arith.mulf %23, %23 : f32
    %460 = vector.broadcast %459 : f32 to vector<2x128xf32>
    %461 = arith.addf %458, %460 : vector<2x128xf32>
    %cst_276 = arith.constant 9.99999996E-13 : f32
    %462 = vector.broadcast %cst_276 : f32 to vector<2x128xf32>
    %463 = arith.addf %461, %462 : vector<2x128xf32>
    %464 = math.rsqrt %463 : vector<2x128xf32>
    %465 = arith.mulf %453, %464 : vector<2x128xf32>
    %466 = arith.mulf %455, %464 : vector<2x128xf32>
    %467 = vector.broadcast %23 : f32 to vector<2x128xf32>
    %468 = arith.mulf %467, %464 : vector<2x128xf32>
    %469 = arith.mulf %453, %453 : vector<2x128xf32>
    %470 = arith.mulf %455, %455 : vector<2x128xf32>
    %471 = arith.addf %469, %470 : vector<2x128xf32>
    %472 = arith.mulf %23, %23 : f32
    %473 = vector.broadcast %472 : f32 to vector<2x128xf32>
    %474 = arith.addf %471, %473 : vector<2x128xf32>
    %cst_277 = arith.constant 9.99999996E-13 : f32
    %475 = vector.broadcast %cst_277 : f32 to vector<2x128xf32>
    %476 = arith.maximumf %474, %475 : vector<2x128xf32>
    %477 = tpu.reciprocal %476 {approx = true} : vector<2x128xf32> -> vector<2x128xf32>
    %478 = arith.addf %465, %448 : vector<2x128xf32>
    %cst_278 = arith.constant 5.000000e-01 : f32
    %479 = vector.broadcast %cst_278 : f32 to vector<2x128xf32>
    %480 = arith.mulf %478, %479 : vector<2x128xf32>
    %481 = arith.addf %466, %449 : vector<2x128xf32>
    %cst_279 = arith.constant 5.000000e-01 : f32
    %482 = vector.broadcast %cst_279 : f32 to vector<2x128xf32>
    %483 = arith.mulf %481, %482 : vector<2x128xf32>
    %484 = arith.addf %468, %451 : vector<2x128xf32>
    %cst_280 = arith.constant 5.000000e-01 : f32
    %485 = vector.broadcast %cst_280 : f32 to vector<2x128xf32>
    %486 = arith.mulf %484, %485 : vector<2x128xf32>
    %487 = arith.mulf %480, %480 : vector<2x128xf32>
    %488 = arith.mulf %483, %483 : vector<2x128xf32>
    %489 = arith.addf %487, %488 : vector<2x128xf32>
    %490 = arith.mulf %486, %486 : vector<2x128xf32>
    %491 = arith.addf %489, %490 : vector<2x128xf32>
    %cst_281 = arith.constant 9.99999996E-13 : f32
    %492 = vector.broadcast %cst_281 : f32 to vector<2x128xf32>
    %493 = arith.addf %491, %492 : vector<2x128xf32>
    %494 = math.rsqrt %493 : vector<2x128xf32>
    %495 = arith.mulf %480, %494 : vector<2x128xf32>
    %496 = arith.mulf %483, %494 : vector<2x128xf32>
    %497 = arith.mulf %486, %494 : vector<2x128xf32>
    %498 = arith.mulf %448, %495 : vector<2x128xf32>
    %499 = arith.mulf %449, %496 : vector<2x128xf32>
    %500 = arith.addf %498, %499 : vector<2x128xf32>
    %501 = arith.mulf %451, %497 : vector<2x128xf32>
    %502 = arith.addf %500, %501 : vector<2x128xf32>
    %cst_282 = arith.constant 1.000000e-03 : f32
    %503 = vector.broadcast %cst_282 : f32 to vector<2x128xf32>
    %504 = arith.maximumf %502, %503 : vector<2x128xf32>
    %cst_283 = arith.constant 1.000000e+00 : f32
    %505 = vector.broadcast %cst_283 : f32 to vector<2x128xf32>
    %506 = arith.subf %505, %504 : vector<2x128xf32>
    %507 = arith.mulf %506, %506 : vector<2x128xf32>
    %508 = arith.mulf %507, %507 : vector<2x128xf32>
    %509 = arith.mulf %508, %506 : vector<2x128xf32>
    %510 = arith.mulf %399, %495 : vector<2x128xf32>
    %511 = arith.mulf %401, %496 : vector<2x128xf32>
    %512 = arith.addf %510, %511 : vector<2x128xf32>
    %513 = arith.mulf %403, %497 : vector<2x128xf32>
    %514 = arith.addf %512, %513 : vector<2x128xf32>
    %cst_284 = arith.constant 1.000000e-03 : f32
    %515 = vector.broadcast %cst_284 : f32 to vector<2x128xf32>
    %516 = arith.maximumf %514, %515 : vector<2x128xf32>
    %517 = arith.mulf %399, %448 : vector<2x128xf32>
    %518 = arith.mulf %401, %449 : vector<2x128xf32>
    %519 = arith.addf %517, %518 : vector<2x128xf32>
    %520 = arith.mulf %403, %451 : vector<2x128xf32>
    %521 = arith.addf %519, %520 : vector<2x128xf32>
    %cst_285 = arith.constant 1.000000e-03 : f32
    %522 = vector.broadcast %cst_285 : f32 to vector<2x128xf32>
    %523 = arith.maximumf %521, %522 : vector<2x128xf32>
    %524 = arith.mulf %399, %465 : vector<2x128xf32>
    %525 = arith.mulf %401, %466 : vector<2x128xf32>
    %526 = arith.addf %524, %525 : vector<2x128xf32>
    %527 = arith.mulf %403, %468 : vector<2x128xf32>
    %528 = arith.addf %526, %527 : vector<2x128xf32>
    %529 = arith.mulf %516, %516 : vector<2x128xf32>
    %cst_286 = arith.constant 1.000000e-03 : f32
    %530 = vector.broadcast %cst_286 : f32 to vector<2x128xf32>
    %531 = arith.maximumf %528, %530 : vector<2x128xf32>
    %cst_287 = arith.constant 0.000000e+00 : f32
    %532 = vector.broadcast %cst_287 : f32 to vector<2x128xf32>
    %533 = arith.maximumf %528, %532 : vector<2x128xf32>
    %534 = arith.mulf %405, %495 : vector<2x128xf32>
    %535 = arith.mulf %407, %496 : vector<2x128xf32>
    %536 = arith.addf %534, %535 : vector<2x128xf32>
    %537 = arith.mulf %409, %497 : vector<2x128xf32>
    %538 = arith.addf %536, %537 : vector<2x128xf32>
    %cst_288 = arith.constant 1.000000e-03 : f32
    %539 = vector.broadcast %cst_288 : f32 to vector<2x128xf32>
    %540 = arith.maximumf %538, %539 : vector<2x128xf32>
    %541 = arith.mulf %405, %448 : vector<2x128xf32>
    %542 = arith.mulf %407, %449 : vector<2x128xf32>
    %543 = arith.addf %541, %542 : vector<2x128xf32>
    %544 = arith.mulf %409, %451 : vector<2x128xf32>
    %545 = arith.addf %543, %544 : vector<2x128xf32>
    %cst_289 = arith.constant 1.000000e-03 : f32
    %546 = vector.broadcast %cst_289 : f32 to vector<2x128xf32>
    %547 = arith.maximumf %545, %546 : vector<2x128xf32>
    %548 = arith.mulf %405, %465 : vector<2x128xf32>
    %549 = arith.mulf %407, %466 : vector<2x128xf32>
    %550 = arith.addf %548, %549 : vector<2x128xf32>
    %551 = arith.mulf %409, %468 : vector<2x128xf32>
    %552 = arith.addf %550, %551 : vector<2x128xf32>
    %553 = arith.mulf %540, %540 : vector<2x128xf32>
    %cst_290 = arith.constant 1.000000e-03 : f32
    %554 = vector.broadcast %cst_290 : f32 to vector<2x128xf32>
    %555 = arith.maximumf %552, %554 : vector<2x128xf32>
    %cst_291 = arith.constant 0.000000e+00 : f32
    %556 = vector.broadcast %cst_291 : f32 to vector<2x128xf32>
    %557 = arith.maximumf %552, %556 : vector<2x128xf32>
    %c0_292 = arith.constant 0 : index
    %c6_293 = arith.constant 6 : index
    %c0_294 = arith.constant 0 : index
    %c0_295 = arith.constant 0 : index
    %558 = vector.load %arg5[%c0_292, %c6_293, %c0_294, %c0_295] : memref<1x12x2x128xf32, #tpu.memory_space<vmem>>, vector<1x1x2x128xf32>
    %559 = vector.shape_cast %558 : vector<1x1x2x128xf32> to vector<2x128xf32>
    %560 = arith.mulf %559, %559 : vector<2x128xf32>
    %561 = arith.mulf %560, %560 : vector<2x128xf32>
    %cst_296 = arith.constant 1.000000e+00 : f32
    %562 = vector.broadcast %cst_296 : f32 to vector<2x128xf32>
    %563 = arith.subf %561, %562 : vector<2x128xf32>
    %564 = arith.mulf %529, %563 : vector<2x128xf32>
    %cst_297 = arith.constant 1.000000e+00 : f32
    %565 = vector.broadcast %cst_297 : f32 to vector<2x128xf32>
    %566 = arith.addf %564, %565 : vector<2x128xf32>
    %cst_298 = arith.constant 1.000000e-03 : f32
    %567 = vector.broadcast %cst_298 : f32 to vector<2x128xf32>
    %568 = arith.maximumf %566, %567 : vector<2x128xf32>
    %cst_299 = arith.constant 3.14159274 : f32
    %569 = vector.broadcast %cst_299 : f32 to vector<2x128xf32>
    %570 = arith.mulf %569, %568 : vector<2x128xf32>
    %571 = arith.mulf %570, %568 : vector<2x128xf32>
    %572 = tpu.reciprocal %571 {approx = true} : vector<2x128xf32> -> vector<2x128xf32>
    %573 = arith.mulf %561, %572 : vector<2x128xf32>
    %cst_300 = arith.constant 5.000000e-01 : f32
    %574 = vector.broadcast %cst_300 : f32 to vector<2x128xf32>
    %575 = arith.mulf %560, %574 : vector<2x128xf32>
    %cst_301 = arith.constant 9.99999974E-5 : f32
    %576 = vector.broadcast %cst_301 : f32 to vector<2x128xf32>
    %577 = arith.maximumf %575, %576 : vector<2x128xf32>
    %cst_302 = arith.constant 1.000000e+00 : f32
    %578 = vector.broadcast %cst_302 : f32 to vector<2x128xf32>
    %579 = arith.subf %578, %577 : vector<2x128xf32>
    %580 = arith.mulf %531, %579 : vector<2x128xf32>
    %581 = arith.addf %580, %577 : vector<2x128xf32>
    %cst_303 = arith.constant 1.000000e-03 : f32
    %582 = vector.broadcast %cst_303 : f32 to vector<2x128xf32>
    %583 = arith.maximumf %581, %582 : vector<2x128xf32>
    %584 = tpu.reciprocal %583 {approx = true} : vector<2x128xf32> -> vector<2x128xf32>
    %cst_304 = arith.constant 1.000000e+00 : f32
    %585 = vector.broadcast %cst_304 : f32 to vector<2x128xf32>
    %586 = arith.subf %585, %577 : vector<2x128xf32>
    %587 = arith.mulf %523, %586 : vector<2x128xf32>
    %588 = arith.addf %587, %577 : vector<2x128xf32>
    %cst_305 = arith.constant 1.000000e-03 : f32
    %589 = vector.broadcast %cst_305 : f32 to vector<2x128xf32>
    %590 = arith.maximumf %588, %589 : vector<2x128xf32>
    %591 = tpu.reciprocal %590 {approx = true} : vector<2x128xf32> -> vector<2x128xf32>
    %592 = arith.mulf %573, %584 : vector<2x128xf32>
    %593 = arith.mulf %592, %591 : vector<2x128xf32>
    %c0_306 = arith.constant 0 : index
    %c6_307 = arith.constant 6 : index
    %c0_308 = arith.constant 0 : index
    %c0_309 = arith.constant 0 : index
    %594 = vector.load %arg6[%c0_306, %c6_307, %c0_308, %c0_309] : memref<1x12x2x128xf32, #tpu.memory_space<vmem>>, vector<1x1x2x128xf32>
    %595 = vector.shape_cast %594 : vector<1x1x2x128xf32> to vector<2x128xf32>
    %596 = arith.mulf %595, %595 : vector<2x128xf32>
    %597 = arith.mulf %596, %596 : vector<2x128xf32>
    %cst_310 = arith.constant 1.000000e+00 : f32
    %598 = vector.broadcast %cst_310 : f32 to vector<2x128xf32>
    %599 = arith.subf %597, %598 : vector<2x128xf32>
    %600 = arith.mulf %553, %599 : vector<2x128xf32>
    %cst_311 = arith.constant 1.000000e+00 : f32
    %601 = vector.broadcast %cst_311 : f32 to vector<2x128xf32>
    %602 = arith.addf %600, %601 : vector<2x128xf32>
    %cst_312 = arith.constant 1.000000e-03 : f32
    %603 = vector.broadcast %cst_312 : f32 to vector<2x128xf32>
    %604 = arith.maximumf %602, %603 : vector<2x128xf32>
    %cst_313 = arith.constant 3.14159274 : f32
    %605 = vector.broadcast %cst_313 : f32 to vector<2x128xf32>
    %606 = arith.mulf %605, %604 : vector<2x128xf32>
    %607 = arith.mulf %606, %604 : vector<2x128xf32>
    %608 = tpu.reciprocal %607 {approx = true} : vector<2x128xf32> -> vector<2x128xf32>
    %609 = arith.mulf %597, %608 : vector<2x128xf32>
    %cst_314 = arith.constant 5.000000e-01 : f32
    %610 = vector.broadcast %cst_314 : f32 to vector<2x128xf32>
    %611 = arith.mulf %596, %610 : vector<2x128xf32>
    %cst_315 = arith.constant 9.99999974E-5 : f32
    %612 = vector.broadcast %cst_315 : f32 to vector<2x128xf32>
    %613 = arith.maximumf %611, %612 : vector<2x128xf32>
    %cst_316 = arith.constant 1.000000e+00 : f32
    %614 = vector.broadcast %cst_316 : f32 to vector<2x128xf32>
    %615 = arith.subf %614, %613 : vector<2x128xf32>
    %616 = arith.mulf %555, %615 : vector<2x128xf32>
    %617 = arith.addf %616, %613 : vector<2x128xf32>
    %cst_317 = arith.constant 1.000000e-03 : f32
    %618 = vector.broadcast %cst_317 : f32 to vector<2x128xf32>
    %619 = arith.maximumf %617, %618 : vector<2x128xf32>
    %620 = tpu.reciprocal %619 {approx = true} : vector<2x128xf32> -> vector<2x128xf32>
    %cst_318 = arith.constant 1.000000e+00 : f32
    %621 = vector.broadcast %cst_318 : f32 to vector<2x128xf32>
    %622 = arith.subf %621, %613 : vector<2x128xf32>
    %623 = arith.mulf %547, %622 : vector<2x128xf32>
    %624 = arith.addf %623, %613 : vector<2x128xf32>
    %cst_319 = arith.constant 1.000000e-03 : f32
    %625 = vector.broadcast %cst_319 : f32 to vector<2x128xf32>
    %626 = arith.maximumf %624, %625 : vector<2x128xf32>
    %627 = tpu.reciprocal %626 {approx = true} : vector<2x128xf32> -> vector<2x128xf32>
    %628 = arith.mulf %609, %620 : vector<2x128xf32>
    %629 = arith.mulf %628, %627 : vector<2x128xf32>
    %630 = vector.broadcast %26 : f32 to vector<2x128xf32>
    %631 = arith.mulf %630, %477 : vector<2x128xf32>
    %cst_320 = arith.constant 1.000000e+00 : f32
    %632 = vector.broadcast %cst_320 : f32 to vector<2x128xf32>
    %633 = arith.subf %632, %423 : vector<2x128xf32>
    %634 = arith.mulf %633, %509 : vector<2x128xf32>
    %635 = arith.addf %423, %634 : vector<2x128xf32>
    %cst_321 = arith.constant 1.000000e+00 : f32
    %636 = vector.broadcast %cst_321 : f32 to vector<2x128xf32>
    %637 = arith.subf %636, %429 : vector<2x128xf32>
    %638 = arith.mulf %637, %509 : vector<2x128xf32>
    %639 = arith.addf %429, %638 : vector<2x128xf32>
    %cst_322 = arith.constant 1.000000e+00 : f32
    %640 = vector.broadcast %cst_322 : f32 to vector<2x128xf32>
    %641 = arith.subf %640, %423 : vector<2x128xf32>
    %cst_323 = arith.constant 0.318309873 : f32
    %642 = vector.broadcast %cst_323 : f32 to vector<2x128xf32>
    %643 = arith.mulf %641, %642 : vector<2x128xf32>
    %644 = arith.mulf %411, %643 : vector<2x128xf32>
    %cst_324 = arith.constant 2.500000e-01 : f32
    %645 = vector.broadcast %cst_324 : f32 to vector<2x128xf32>
    %646 = arith.mulf %645, %593 : vector<2x128xf32>
    %647 = arith.mulf %646, %635 : vector<2x128xf32>
    %648 = arith.addf %644, %647 : vector<2x128xf32>
    %cst_325 = arith.constant 1.000000e+00 : f32
    %649 = vector.broadcast %cst_325 : f32 to vector<2x128xf32>
    %650 = arith.subf %649, %429 : vector<2x128xf32>
    %cst_326 = arith.constant 0.318309873 : f32
    %651 = vector.broadcast %cst_326 : f32 to vector<2x128xf32>
    %652 = arith.mulf %650, %651 : vector<2x128xf32>
    %653 = arith.mulf %417, %652 : vector<2x128xf32>
    %cst_327 = arith.constant 2.500000e-01 : f32
    %654 = vector.broadcast %cst_327 : f32 to vector<2x128xf32>
    %655 = arith.mulf %654, %629 : vector<2x128xf32>
    %656 = arith.mulf %655, %639 : vector<2x128xf32>
    %657 = arith.addf %653, %656 : vector<2x128xf32>
    %658 = arith.mulf %648, %533 : vector<2x128xf32>
    %659 = arith.mulf %658, %631 : vector<2x128xf32>
    %cst_328 = arith.constant 1.000000e-01 : f32
    %660 = vector.broadcast %cst_328 : f32 to vector<2x128xf32>
    %661 = arith.addf %659, %660 : vector<2x128xf32>
    %662 = arith.mulf %657, %557 : vector<2x128xf32>
    %663 = arith.mulf %662, %631 : vector<2x128xf32>
    %cst_329 = arith.constant 1.000000e-01 : f32
    %664 = vector.broadcast %cst_329 : f32 to vector<2x128xf32>
    %665 = arith.addf %663, %664 : vector<2x128xf32>
    %666 = tpu.reciprocal %665 {approx = true} : vector<2x128xf32> -> vector<2x128xf32>
    %667 = arith.mulf %661, %666 : vector<2x128xf32>
    %668 = math.log %667 : vector<2x128xf32>
    %669 = math.absf %668 : vector<2x128xf32>
    %670 = arith.addf %434, %669 : vector<2x128xf32>
    %671 = vector.broadcast %29 : f32 to vector<2x128xf32>
    %672 = arith.mulf %671, %477 : vector<2x128xf32>
    %cst_330 = arith.constant 1.000000e+00 : f32
    %673 = vector.broadcast %cst_330 : f32 to vector<2x128xf32>
    %674 = arith.subf %673, %425 : vector<2x128xf32>
    %675 = arith.mulf %674, %509 : vector<2x128xf32>
    %676 = arith.addf %425, %675 : vector<2x128xf32>
    %cst_331 = arith.constant 1.000000e+00 : f32
    %677 = vector.broadcast %cst_331 : f32 to vector<2x128xf32>
    %678 = arith.subf %677, %431 : vector<2x128xf32>
    %679 = arith.mulf %678, %509 : vector<2x128xf32>
    %680 = arith.addf %431, %679 : vector<2x128xf32>
    %cst_332 = arith.constant 1.000000e+00 : f32
    %681 = vector.broadcast %cst_332 : f32 to vector<2x128xf32>
    %682 = arith.subf %681, %425 : vector<2x128xf32>
    %cst_333 = arith.constant 0.318309873 : f32
    %683 = vector.broadcast %cst_333 : f32 to vector<2x128xf32>
    %684 = arith.mulf %682, %683 : vector<2x128xf32>
    %685 = arith.mulf %413, %684 : vector<2x128xf32>
    %cst_334 = arith.constant 2.500000e-01 : f32
    %686 = vector.broadcast %cst_334 : f32 to vector<2x128xf32>
    %687 = arith.mulf %686, %593 : vector<2x128xf32>
    %688 = arith.mulf %687, %676 : vector<2x128xf32>
    %689 = arith.addf %685, %688 : vector<2x128xf32>
    %cst_335 = arith.constant 1.000000e+00 : f32
    %690 = vector.broadcast %cst_335 : f32 to vector<2x128xf32>
    %691 = arith.subf %690, %431 : vector<2x128xf32>
    %cst_336 = arith.constant 0.318309873 : f32
    %692 = vector.broadcast %cst_336 : f32 to vector<2x128xf32>
    %693 = arith.mulf %691, %692 : vector<2x128xf32>
    %694 = arith.mulf %419, %693 : vector<2x128xf32>
    %cst_337 = arith.constant 2.500000e-01 : f32
    %695 = vector.broadcast %cst_337 : f32 to vector<2x128xf32>
    %696 = arith.mulf %695, %629 : vector<2x128xf32>
    %697 = arith.mulf %696, %680 : vector<2x128xf32>
    %698 = arith.addf %694, %697 : vector<2x128xf32>
    %699 = arith.mulf %689, %533 : vector<2x128xf32>
    %700 = arith.mulf %699, %672 : vector<2x128xf32>
    %cst_338 = arith.constant 1.000000e-01 : f32
    %701 = vector.broadcast %cst_338 : f32 to vector<2x128xf32>
    %702 = arith.addf %700, %701 : vector<2x128xf32>
    %703 = arith.mulf %698, %557 : vector<2x128xf32>
    %704 = arith.mulf %703, %672 : vector<2x128xf32>
    %cst_339 = arith.constant 1.000000e-01 : f32
    %705 = vector.broadcast %cst_339 : f32 to vector<2x128xf32>
    %706 = arith.addf %704, %705 : vector<2x128xf32>
    %707 = tpu.reciprocal %706 {approx = true} : vector<2x128xf32> -> vector<2x128xf32>
    %708 = arith.mulf %702, %707 : vector<2x128xf32>
    %709 = math.log %708 : vector<2x128xf32>
    %710 = math.absf %709 : vector<2x128xf32>
    %711 = arith.addf %670, %710 : vector<2x128xf32>
    %712 = vector.broadcast %32 : f32 to vector<2x128xf32>
    %713 = arith.mulf %712, %477 : vector<2x128xf32>
    %cst_340 = arith.constant 1.000000e+00 : f32
    %714 = vector.broadcast %cst_340 : f32 to vector<2x128xf32>
    %715 = arith.subf %714, %427 : vector<2x128xf32>
    %716 = arith.mulf %715, %509 : vector<2x128xf32>
    %717 = arith.addf %427, %716 : vector<2x128xf32>
    %cst_341 = arith.constant 1.000000e+00 : f32
    %718 = vector.broadcast %cst_341 : f32 to vector<2x128xf32>
    %719 = arith.subf %718, %433 : vector<2x128xf32>
    %720 = arith.mulf %719, %509 : vector<2x128xf32>
    %721 = arith.addf %433, %720 : vector<2x128xf32>
    %cst_342 = arith.constant 1.000000e+00 : f32
    %722 = vector.broadcast %cst_342 : f32 to vector<2x128xf32>
    %723 = arith.subf %722, %427 : vector<2x128xf32>
    %cst_343 = arith.constant 0.318309873 : f32
    %724 = vector.broadcast %cst_343 : f32 to vector<2x128xf32>
    %725 = arith.mulf %723, %724 : vector<2x128xf32>
    %726 = arith.mulf %415, %725 : vector<2x128xf32>
    %cst_344 = arith.constant 2.500000e-01 : f32
    %727 = vector.broadcast %cst_344 : f32 to vector<2x128xf32>
    %728 = arith.mulf %727, %593 : vector<2x128xf32>
    %729 = arith.mulf %728, %717 : vector<2x128xf32>
    %730 = arith.addf %726, %729 : vector<2x128xf32>
    %cst_345 = arith.constant 1.000000e+00 : f32
    %731 = vector.broadcast %cst_345 : f32 to vector<2x128xf32>
    %732 = arith.subf %731, %433 : vector<2x128xf32>
    %cst_346 = arith.constant 0.318309873 : f32
    %733 = vector.broadcast %cst_346 : f32 to vector<2x128xf32>
    %734 = arith.mulf %732, %733 : vector<2x128xf32>
    %735 = arith.mulf %421, %734 : vector<2x128xf32>
    %cst_347 = arith.constant 2.500000e-01 : f32
    %736 = vector.broadcast %cst_347 : f32 to vector<2x128xf32>
    %737 = arith.mulf %736, %629 : vector<2x128xf32>
    %738 = arith.mulf %737, %721 : vector<2x128xf32>
    %739 = arith.addf %735, %738 : vector<2x128xf32>
    %740 = arith.mulf %730, %533 : vector<2x128xf32>
    %741 = arith.mulf %740, %713 : vector<2x128xf32>
    %cst_348 = arith.constant 1.000000e-01 : f32
    %742 = vector.broadcast %cst_348 : f32 to vector<2x128xf32>
    %743 = arith.addf %741, %742 : vector<2x128xf32>
    %744 = arith.mulf %739, %557 : vector<2x128xf32>
    %745 = arith.mulf %744, %713 : vector<2x128xf32>
    %cst_349 = arith.constant 1.000000e-01 : f32
    %746 = vector.broadcast %cst_349 : f32 to vector<2x128xf32>
    %747 = arith.addf %745, %746 : vector<2x128xf32>
    %748 = tpu.reciprocal %747 {approx = true} : vector<2x128xf32> -> vector<2x128xf32>
    %749 = arith.mulf %743, %748 : vector<2x128xf32>
    %750 = math.log %749 : vector<2x128xf32>
    %751 = math.absf %750 : vector<2x128xf32>
    %752 = arith.addf %711, %751 : vector<2x128xf32>
    %753 = vector.broadcast %38 : f32 to vector<2x128xf32>
    %754 = arith.subf %753, %274 : vector<2x128xf32>
    %755 = vector.broadcast %41 : f32 to vector<2x128xf32>
    %756 = arith.subf %755, %276 : vector<2x128xf32>
    %757 = arith.mulf %754, %754 : vector<2x128xf32>
    %758 = arith.mulf %756, %756 : vector<2x128xf32>
    %759 = arith.addf %757, %758 : vector<2x128xf32>
    %760 = arith.mulf %44, %44 : f32
    %761 = vector.broadcast %760 : f32 to vector<2x128xf32>
    %762 = arith.addf %759, %761 : vector<2x128xf32>
    %cst_350 = arith.constant 9.99999996E-13 : f32
    %763 = vector.broadcast %cst_350 : f32 to vector<2x128xf32>
    %764 = arith.addf %762, %763 : vector<2x128xf32>
    %765 = math.rsqrt %764 : vector<2x128xf32>
    %766 = arith.mulf %754, %765 : vector<2x128xf32>
    %767 = arith.mulf %756, %765 : vector<2x128xf32>
    %768 = vector.broadcast %44 : f32 to vector<2x128xf32>
    %769 = arith.mulf %768, %765 : vector<2x128xf32>
    %770 = vector.broadcast %47 : f32 to vector<2x128xf32>
    %771 = arith.subf %770, %274 : vector<2x128xf32>
    %772 = vector.broadcast %50 : f32 to vector<2x128xf32>
    %773 = arith.subf %772, %276 : vector<2x128xf32>
    %774 = arith.mulf %771, %771 : vector<2x128xf32>
    %775 = arith.mulf %773, %773 : vector<2x128xf32>
    %776 = arith.addf %774, %775 : vector<2x128xf32>
    %777 = arith.mulf %53, %53 : f32
    %778 = vector.broadcast %777 : f32 to vector<2x128xf32>
    %779 = arith.addf %776, %778 : vector<2x128xf32>
    %cst_351 = arith.constant 9.99999996E-13 : f32
    %780 = vector.broadcast %cst_351 : f32 to vector<2x128xf32>
    %781 = arith.addf %779, %780 : vector<2x128xf32>
    %782 = math.rsqrt %781 : vector<2x128xf32>
    %783 = arith.mulf %771, %782 : vector<2x128xf32>
    %784 = arith.mulf %773, %782 : vector<2x128xf32>
    %785 = vector.broadcast %53 : f32 to vector<2x128xf32>
    %786 = arith.mulf %785, %782 : vector<2x128xf32>
    %787 = arith.mulf %771, %771 : vector<2x128xf32>
    %788 = arith.mulf %773, %773 : vector<2x128xf32>
    %789 = arith.addf %787, %788 : vector<2x128xf32>
    %790 = arith.mulf %53, %53 : f32
    %791 = vector.broadcast %790 : f32 to vector<2x128xf32>
    %792 = arith.addf %789, %791 : vector<2x128xf32>
    %cst_352 = arith.constant 9.99999996E-13 : f32
    %793 = vector.broadcast %cst_352 : f32 to vector<2x128xf32>
    %794 = arith.maximumf %792, %793 : vector<2x128xf32>
    %795 = tpu.reciprocal %794 {approx = true} : vector<2x128xf32> -> vector<2x128xf32>
    %796 = arith.addf %783, %766 : vector<2x128xf32>
    %cst_353 = arith.constant 5.000000e-01 : f32
    %797 = vector.broadcast %cst_353 : f32 to vector<2x128xf32>
    %798 = arith.mulf %796, %797 : vector<2x128xf32>
    %799 = arith.addf %784, %767 : vector<2x128xf32>
    %cst_354 = arith.constant 5.000000e-01 : f32
    %800 = vector.broadcast %cst_354 : f32 to vector<2x128xf32>
    %801 = arith.mulf %799, %800 : vector<2x128xf32>
    %802 = arith.addf %786, %769 : vector<2x128xf32>
    %cst_355 = arith.constant 5.000000e-01 : f32
    %803 = vector.broadcast %cst_355 : f32 to vector<2x128xf32>
    %804 = arith.mulf %802, %803 : vector<2x128xf32>
    %805 = arith.mulf %798, %798 : vector<2x128xf32>
    %806 = arith.mulf %801, %801 : vector<2x128xf32>
    %807 = arith.addf %805, %806 : vector<2x128xf32>
    %808 = arith.mulf %804, %804 : vector<2x128xf32>
    %809 = arith.addf %807, %808 : vector<2x128xf32>
    %cst_356 = arith.constant 9.99999996E-13 : f32
    %810 = vector.broadcast %cst_356 : f32 to vector<2x128xf32>
    %811 = arith.addf %809, %810 : vector<2x128xf32>
    %812 = math.rsqrt %811 : vector<2x128xf32>
    %813 = arith.mulf %798, %812 : vector<2x128xf32>
    %814 = arith.mulf %801, %812 : vector<2x128xf32>
    %815 = arith.mulf %804, %812 : vector<2x128xf32>
    %816 = arith.mulf %766, %813 : vector<2x128xf32>
    %817 = arith.mulf %767, %814 : vector<2x128xf32>
    %818 = arith.addf %816, %817 : vector<2x128xf32>
    %819 = arith.mulf %769, %815 : vector<2x128xf32>
    %820 = arith.addf %818, %819 : vector<2x128xf32>
    %cst_357 = arith.constant 1.000000e-03 : f32
    %821 = vector.broadcast %cst_357 : f32 to vector<2x128xf32>
    %822 = arith.maximumf %820, %821 : vector<2x128xf32>
    %cst_358 = arith.constant 1.000000e+00 : f32
    %823 = vector.broadcast %cst_358 : f32 to vector<2x128xf32>
    %824 = arith.subf %823, %822 : vector<2x128xf32>
    %825 = arith.mulf %824, %824 : vector<2x128xf32>
    %826 = arith.mulf %825, %825 : vector<2x128xf32>
    %827 = arith.mulf %826, %824 : vector<2x128xf32>
    %828 = arith.mulf %399, %813 : vector<2x128xf32>
    %829 = arith.mulf %401, %814 : vector<2x128xf32>
    %830 = arith.addf %828, %829 : vector<2x128xf32>
    %831 = arith.mulf %403, %815 : vector<2x128xf32>
    %832 = arith.addf %830, %831 : vector<2x128xf32>
    %cst_359 = arith.constant 1.000000e-03 : f32
    %833 = vector.broadcast %cst_359 : f32 to vector<2x128xf32>
    %834 = arith.maximumf %832, %833 : vector<2x128xf32>
    %835 = arith.mulf %399, %766 : vector<2x128xf32>
    %836 = arith.mulf %401, %767 : vector<2x128xf32>
    %837 = arith.addf %835, %836 : vector<2x128xf32>
    %838 = arith.mulf %403, %769 : vector<2x128xf32>
    %839 = arith.addf %837, %838 : vector<2x128xf32>
    %cst_360 = arith.constant 1.000000e-03 : f32
    %840 = vector.broadcast %cst_360 : f32 to vector<2x128xf32>
    %841 = arith.maximumf %839, %840 : vector<2x128xf32>
    %842 = arith.mulf %399, %783 : vector<2x128xf32>
    %843 = arith.mulf %401, %784 : vector<2x128xf32>
    %844 = arith.addf %842, %843 : vector<2x128xf32>
    %845 = arith.mulf %403, %786 : vector<2x128xf32>
    %846 = arith.addf %844, %845 : vector<2x128xf32>
    %847 = arith.mulf %834, %834 : vector<2x128xf32>
    %cst_361 = arith.constant 1.000000e-03 : f32
    %848 = vector.broadcast %cst_361 : f32 to vector<2x128xf32>
    %849 = arith.maximumf %846, %848 : vector<2x128xf32>
    %cst_362 = arith.constant 0.000000e+00 : f32
    %850 = vector.broadcast %cst_362 : f32 to vector<2x128xf32>
    %851 = arith.maximumf %846, %850 : vector<2x128xf32>
    %852 = arith.mulf %405, %813 : vector<2x128xf32>
    %853 = arith.mulf %407, %814 : vector<2x128xf32>
    %854 = arith.addf %852, %853 : vector<2x128xf32>
    %855 = arith.mulf %409, %815 : vector<2x128xf32>
    %856 = arith.addf %854, %855 : vector<2x128xf32>
    %cst_363 = arith.constant 1.000000e-03 : f32
    %857 = vector.broadcast %cst_363 : f32 to vector<2x128xf32>
    %858 = arith.maximumf %856, %857 : vector<2x128xf32>
    %859 = arith.mulf %405, %766 : vector<2x128xf32>
    %860 = arith.mulf %407, %767 : vector<2x128xf32>
    %861 = arith.addf %859, %860 : vector<2x128xf32>
    %862 = arith.mulf %409, %769 : vector<2x128xf32>
    %863 = arith.addf %861, %862 : vector<2x128xf32>
    %cst_364 = arith.constant 1.000000e-03 : f32
    %864 = vector.broadcast %cst_364 : f32 to vector<2x128xf32>
    %865 = arith.maximumf %863, %864 : vector<2x128xf32>
    %866 = arith.mulf %405, %783 : vector<2x128xf32>
    %867 = arith.mulf %407, %784 : vector<2x128xf32>
    %868 = arith.addf %866, %867 : vector<2x128xf32>
    %869 = arith.mulf %409, %786 : vector<2x128xf32>
    %870 = arith.addf %868, %869 : vector<2x128xf32>
    %871 = arith.mulf %858, %858 : vector<2x128xf32>
    %cst_365 = arith.constant 1.000000e-03 : f32
    %872 = vector.broadcast %cst_365 : f32 to vector<2x128xf32>
    %873 = arith.maximumf %870, %872 : vector<2x128xf32>
    %cst_366 = arith.constant 0.000000e+00 : f32
    %874 = vector.broadcast %cst_366 : f32 to vector<2x128xf32>
    %875 = arith.maximumf %870, %874 : vector<2x128xf32>
    %c0_367 = arith.constant 0 : index
    %c6_368 = arith.constant 6 : index
    %c0_369 = arith.constant 0 : index
    %c0_370 = arith.constant 0 : index
    %876 = vector.load %arg5[%c0_367, %c6_368, %c0_369, %c0_370] : memref<1x12x2x128xf32, #tpu.memory_space<vmem>>, vector<1x1x2x128xf32>
    %877 = vector.shape_cast %876 : vector<1x1x2x128xf32> to vector<2x128xf32>
    %878 = arith.mulf %877, %877 : vector<2x128xf32>
    %879 = arith.mulf %878, %878 : vector<2x128xf32>
    %cst_371 = arith.constant 1.000000e+00 : f32
    %880 = vector.broadcast %cst_371 : f32 to vector<2x128xf32>
    %881 = arith.subf %879, %880 : vector<2x128xf32>
    %882 = arith.mulf %847, %881 : vector<2x128xf32>
    %cst_372 = arith.constant 1.000000e+00 : f32
    %883 = vector.broadcast %cst_372 : f32 to vector<2x128xf32>
    %884 = arith.addf %882, %883 : vector<2x128xf32>
    %cst_373 = arith.constant 1.000000e-03 : f32
    %885 = vector.broadcast %cst_373 : f32 to vector<2x128xf32>
    %886 = arith.maximumf %884, %885 : vector<2x128xf32>
    %cst_374 = arith.constant 3.14159274 : f32
    %887 = vector.broadcast %cst_374 : f32 to vector<2x128xf32>
    %888 = arith.mulf %887, %886 : vector<2x128xf32>
    %889 = arith.mulf %888, %886 : vector<2x128xf32>
    %890 = tpu.reciprocal %889 {approx = true} : vector<2x128xf32> -> vector<2x128xf32>
    %891 = arith.mulf %879, %890 : vector<2x128xf32>
    %cst_375 = arith.constant 5.000000e-01 : f32
    %892 = vector.broadcast %cst_375 : f32 to vector<2x128xf32>
    %893 = arith.mulf %878, %892 : vector<2x128xf32>
    %cst_376 = arith.constant 9.99999974E-5 : f32
    %894 = vector.broadcast %cst_376 : f32 to vector<2x128xf32>
    %895 = arith.maximumf %893, %894 : vector<2x128xf32>
    %cst_377 = arith.constant 1.000000e+00 : f32
    %896 = vector.broadcast %cst_377 : f32 to vector<2x128xf32>
    %897 = arith.subf %896, %895 : vector<2x128xf32>
    %898 = arith.mulf %849, %897 : vector<2x128xf32>
    %899 = arith.addf %898, %895 : vector<2x128xf32>
    %cst_378 = arith.constant 1.000000e-03 : f32
    %900 = vector.broadcast %cst_378 : f32 to vector<2x128xf32>
    %901 = arith.maximumf %899, %900 : vector<2x128xf32>
    %902 = tpu.reciprocal %901 {approx = true} : vector<2x128xf32> -> vector<2x128xf32>
    %cst_379 = arith.constant 1.000000e+00 : f32
    %903 = vector.broadcast %cst_379 : f32 to vector<2x128xf32>
    %904 = arith.subf %903, %895 : vector<2x128xf32>
    %905 = arith.mulf %841, %904 : vector<2x128xf32>
    %906 = arith.addf %905, %895 : vector<2x128xf32>
    %cst_380 = arith.constant 1.000000e-03 : f32
    %907 = vector.broadcast %cst_380 : f32 to vector<2x128xf32>
    %908 = arith.maximumf %906, %907 : vector<2x128xf32>
    %909 = tpu.reciprocal %908 {approx = true} : vector<2x128xf32> -> vector<2x128xf32>
    %910 = arith.mulf %891, %902 : vector<2x128xf32>
    %911 = arith.mulf %910, %909 : vector<2x128xf32>
    %c0_381 = arith.constant 0 : index
    %c6_382 = arith.constant 6 : index
    %c0_383 = arith.constant 0 : index
    %c0_384 = arith.constant 0 : index
    %912 = vector.load %arg6[%c0_381, %c6_382, %c0_383, %c0_384] : memref<1x12x2x128xf32, #tpu.memory_space<vmem>>, vector<1x1x2x128xf32>
    %913 = vector.shape_cast %912 : vector<1x1x2x128xf32> to vector<2x128xf32>
    %914 = arith.mulf %913, %913 : vector<2x128xf32>
    %915 = arith.mulf %914, %914 : vector<2x128xf32>
    %cst_385 = arith.constant 1.000000e+00 : f32
    %916 = vector.broadcast %cst_385 : f32 to vector<2x128xf32>
    %917 = arith.subf %915, %916 : vector<2x128xf32>
    %918 = arith.mulf %871, %917 : vector<2x128xf32>
    %cst_386 = arith.constant 1.000000e+00 : f32
    %919 = vector.broadcast %cst_386 : f32 to vector<2x128xf32>
    %920 = arith.addf %918, %919 : vector<2x128xf32>
    %cst_387 = arith.constant 1.000000e-03 : f32
    %921 = vector.broadcast %cst_387 : f32 to vector<2x128xf32>
    %922 = arith.maximumf %920, %921 : vector<2x128xf32>
    %cst_388 = arith.constant 3.14159274 : f32
    %923 = vector.broadcast %cst_388 : f32 to vector<2x128xf32>
    %924 = arith.mulf %923, %922 : vector<2x128xf32>
    %925 = arith.mulf %924, %922 : vector<2x128xf32>
    %926 = tpu.reciprocal %925 {approx = true} : vector<2x128xf32> -> vector<2x128xf32>
    %927 = arith.mulf %915, %926 : vector<2x128xf32>
    %cst_389 = arith.constant 5.000000e-01 : f32
    %928 = vector.broadcast %cst_389 : f32 to vector<2x128xf32>
    %929 = arith.mulf %914, %928 : vector<2x128xf32>
    %cst_390 = arith.constant 9.99999974E-5 : f32
    %930 = vector.broadcast %cst_390 : f32 to vector<2x128xf32>
    %931 = arith.maximumf %929, %930 : vector<2x128xf32>
    %cst_391 = arith.constant 1.000000e+00 : f32
    %932 = vector.broadcast %cst_391 : f32 to vector<2x128xf32>
    %933 = arith.subf %932, %931 : vector<2x128xf32>
    %934 = arith.mulf %873, %933 : vector<2x128xf32>
    %935 = arith.addf %934, %931 : vector<2x128xf32>
    %cst_392 = arith.constant 1.000000e-03 : f32
    %936 = vector.broadcast %cst_392 : f32 to vector<2x128xf32>
    %937 = arith.maximumf %935, %936 : vector<2x128xf32>
    %938 = tpu.reciprocal %937 {approx = true} : vector<2x128xf32> -> vector<2x128xf32>
    %cst_393 = arith.constant 1.000000e+00 : f32
    %939 = vector.broadcast %cst_393 : f32 to vector<2x128xf32>
    %940 = arith.subf %939, %931 : vector<2x128xf32>
    %941 = arith.mulf %865, %940 : vector<2x128xf32>
    %942 = arith.addf %941, %931 : vector<2x128xf32>
    %cst_394 = arith.constant 1.000000e-03 : f32
    %943 = vector.broadcast %cst_394 : f32 to vector<2x128xf32>
    %944 = arith.maximumf %942, %943 : vector<2x128xf32>
    %945 = tpu.reciprocal %944 {approx = true} : vector<2x128xf32> -> vector<2x128xf32>
    %946 = arith.mulf %927, %938 : vector<2x128xf32>
    %947 = arith.mulf %946, %945 : vector<2x128xf32>
    %948 = vector.broadcast %56 : f32 to vector<2x128xf32>
    %949 = arith.mulf %948, %795 : vector<2x128xf32>
    %cst_395 = arith.constant 1.000000e+00 : f32
    %950 = vector.broadcast %cst_395 : f32 to vector<2x128xf32>
    %951 = arith.subf %950, %423 : vector<2x128xf32>
    %952 = arith.mulf %951, %827 : vector<2x128xf32>
    %953 = arith.addf %423, %952 : vector<2x128xf32>
    %cst_396 = arith.constant 1.000000e+00 : f32
    %954 = vector.broadcast %cst_396 : f32 to vector<2x128xf32>
    %955 = arith.subf %954, %429 : vector<2x128xf32>
    %956 = arith.mulf %955, %827 : vector<2x128xf32>
    %957 = arith.addf %429, %956 : vector<2x128xf32>
    %cst_397 = arith.constant 1.000000e+00 : f32
    %958 = vector.broadcast %cst_397 : f32 to vector<2x128xf32>
    %959 = arith.subf %958, %423 : vector<2x128xf32>
    %cst_398 = arith.constant 0.318309873 : f32
    %960 = vector.broadcast %cst_398 : f32 to vector<2x128xf32>
    %961 = arith.mulf %959, %960 : vector<2x128xf32>
    %962 = arith.mulf %411, %961 : vector<2x128xf32>
    %cst_399 = arith.constant 2.500000e-01 : f32
    %963 = vector.broadcast %cst_399 : f32 to vector<2x128xf32>
    %964 = arith.mulf %963, %911 : vector<2x128xf32>
    %965 = arith.mulf %964, %953 : vector<2x128xf32>
    %966 = arith.addf %962, %965 : vector<2x128xf32>
    %cst_400 = arith.constant 1.000000e+00 : f32
    %967 = vector.broadcast %cst_400 : f32 to vector<2x128xf32>
    %968 = arith.subf %967, %429 : vector<2x128xf32>
    %cst_401 = arith.constant 0.318309873 : f32
    %969 = vector.broadcast %cst_401 : f32 to vector<2x128xf32>
    %970 = arith.mulf %968, %969 : vector<2x128xf32>
    %971 = arith.mulf %417, %970 : vector<2x128xf32>
    %cst_402 = arith.constant 2.500000e-01 : f32
    %972 = vector.broadcast %cst_402 : f32 to vector<2x128xf32>
    %973 = arith.mulf %972, %947 : vector<2x128xf32>
    %974 = arith.mulf %973, %957 : vector<2x128xf32>
    %975 = arith.addf %971, %974 : vector<2x128xf32>
    %976 = arith.mulf %966, %851 : vector<2x128xf32>
    %977 = arith.mulf %976, %949 : vector<2x128xf32>
    %cst_403 = arith.constant 1.000000e-01 : f32
    %978 = vector.broadcast %cst_403 : f32 to vector<2x128xf32>
    %979 = arith.addf %977, %978 : vector<2x128xf32>
    %980 = arith.mulf %975, %875 : vector<2x128xf32>
    %981 = arith.mulf %980, %949 : vector<2x128xf32>
    %cst_404 = arith.constant 1.000000e-01 : f32
    %982 = vector.broadcast %cst_404 : f32 to vector<2x128xf32>
    %983 = arith.addf %981, %982 : vector<2x128xf32>
    %984 = tpu.reciprocal %983 {approx = true} : vector<2x128xf32> -> vector<2x128xf32>
    %985 = arith.mulf %979, %984 : vector<2x128xf32>
    %986 = math.log %985 : vector<2x128xf32>
    %987 = math.absf %986 : vector<2x128xf32>
    %988 = arith.addf %752, %987 : vector<2x128xf32>
    %989 = vector.broadcast %59 : f32 to vector<2x128xf32>
    %990 = arith.mulf %989, %795 : vector<2x128xf32>
    %cst_405 = arith.constant 1.000000e+00 : f32
    %991 = vector.broadcast %cst_405 : f32 to vector<2x128xf32>
    %992 = arith.subf %991, %425 : vector<2x128xf32>
    %993 = arith.mulf %992, %827 : vector<2x128xf32>
    %994 = arith.addf %425, %993 : vector<2x128xf32>
    %cst_406 = arith.constant 1.000000e+00 : f32
    %995 = vector.broadcast %cst_406 : f32 to vector<2x128xf32>
    %996 = arith.subf %995, %431 : vector<2x128xf32>
    %997 = arith.mulf %996, %827 : vector<2x128xf32>
    %998 = arith.addf %431, %997 : vector<2x128xf32>
    %cst_407 = arith.constant 1.000000e+00 : f32
    %999 = vector.broadcast %cst_407 : f32 to vector<2x128xf32>
    %1000 = arith.subf %999, %425 : vector<2x128xf32>
    %cst_408 = arith.constant 0.318309873 : f32
    %1001 = vector.broadcast %cst_408 : f32 to vector<2x128xf32>
    %1002 = arith.mulf %1000, %1001 : vector<2x128xf32>
    %1003 = arith.mulf %413, %1002 : vector<2x128xf32>
    %cst_409 = arith.constant 2.500000e-01 : f32
    %1004 = vector.broadcast %cst_409 : f32 to vector<2x128xf32>
    %1005 = arith.mulf %1004, %911 : vector<2x128xf32>
    %1006 = arith.mulf %1005, %994 : vector<2x128xf32>
    %1007 = arith.addf %1003, %1006 : vector<2x128xf32>
    %cst_410 = arith.constant 1.000000e+00 : f32
    %1008 = vector.broadcast %cst_410 : f32 to vector<2x128xf32>
    %1009 = arith.subf %1008, %431 : vector<2x128xf32>
    %cst_411 = arith.constant 0.318309873 : f32
    %1010 = vector.broadcast %cst_411 : f32 to vector<2x128xf32>
    %1011 = arith.mulf %1009, %1010 : vector<2x128xf32>
    %1012 = arith.mulf %419, %1011 : vector<2x128xf32>
    %cst_412 = arith.constant 2.500000e-01 : f32
    %1013 = vector.broadcast %cst_412 : f32 to vector<2x128xf32>
    %1014 = arith.mulf %1013, %947 : vector<2x128xf32>
    %1015 = arith.mulf %1014, %998 : vector<2x128xf32>
    %1016 = arith.addf %1012, %1015 : vector<2x128xf32>
    %1017 = arith.mulf %1007, %851 : vector<2x128xf32>
    %1018 = arith.mulf %1017, %990 : vector<2x128xf32>
    %cst_413 = arith.constant 1.000000e-01 : f32
    %1019 = vector.broadcast %cst_413 : f32 to vector<2x128xf32>
    %1020 = arith.addf %1018, %1019 : vector<2x128xf32>
    %1021 = arith.mulf %1016, %875 : vector<2x128xf32>
    %1022 = arith.mulf %1021, %990 : vector<2x128xf32>
    %cst_414 = arith.constant 1.000000e-01 : f32
    %1023 = vector.broadcast %cst_414 : f32 to vector<2x128xf32>
    %1024 = arith.addf %1022, %1023 : vector<2x128xf32>
    %1025 = tpu.reciprocal %1024 {approx = true} : vector<2x128xf32> -> vector<2x128xf32>
    %1026 = arith.mulf %1020, %1025 : vector<2x128xf32>
    %1027 = math.log %1026 : vector<2x128xf32>
    %1028 = math.absf %1027 : vector<2x128xf32>
    %1029 = arith.addf %988, %1028 : vector<2x128xf32>
    %1030 = vector.broadcast %62 : f32 to vector<2x128xf32>
    %1031 = arith.mulf %1030, %795 : vector<2x128xf32>
    %cst_415 = arith.constant 1.000000e+00 : f32
    %1032 = vector.broadcast %cst_415 : f32 to vector<2x128xf32>
    %1033 = arith.subf %1032, %427 : vector<2x128xf32>
    %1034 = arith.mulf %1033, %827 : vector<2x128xf32>
    %1035 = arith.addf %427, %1034 : vector<2x128xf32>
    %cst_416 = arith.constant 1.000000e+00 : f32
    %1036 = vector.broadcast %cst_416 : f32 to vector<2x128xf32>
    %1037 = arith.subf %1036, %433 : vector<2x128xf32>
    %1038 = arith.mulf %1037, %827 : vector<2x128xf32>
    %1039 = arith.addf %433, %1038 : vector<2x128xf32>
    %cst_417 = arith.constant 1.000000e+00 : f32
    %1040 = vector.broadcast %cst_417 : f32 to vector<2x128xf32>
    %1041 = arith.subf %1040, %427 : vector<2x128xf32>
    %cst_418 = arith.constant 0.318309873 : f32
    %1042 = vector.broadcast %cst_418 : f32 to vector<2x128xf32>
    %1043 = arith.mulf %1041, %1042 : vector<2x128xf32>
    %1044 = arith.mulf %415, %1043 : vector<2x128xf32>
    %cst_419 = arith.constant 2.500000e-01 : f32
    %1045 = vector.broadcast %cst_419 : f32 to vector<2x128xf32>
    %1046 = arith.mulf %1045, %911 : vector<2x128xf32>
    %1047 = arith.mulf %1046, %1035 : vector<2x128xf32>
    %1048 = arith.addf %1044, %1047 : vector<2x128xf32>
    %cst_420 = arith.constant 1.000000e+00 : f32
    %1049 = vector.broadcast %cst_420 : f32 to vector<2x128xf32>
    %1050 = arith.subf %1049, %433 : vector<2x128xf32>
    %cst_421 = arith.constant 0.318309873 : f32
    %1051 = vector.broadcast %cst_421 : f32 to vector<2x128xf32>
    %1052 = arith.mulf %1050, %1051 : vector<2x128xf32>
    %1053 = arith.mulf %421, %1052 : vector<2x128xf32>
    %cst_422 = arith.constant 2.500000e-01 : f32
    %1054 = vector.broadcast %cst_422 : f32 to vector<2x128xf32>
    %1055 = arith.mulf %1054, %947 : vector<2x128xf32>
    %1056 = arith.mulf %1055, %1039 : vector<2x128xf32>
    %1057 = arith.addf %1053, %1056 : vector<2x128xf32>
    %1058 = arith.mulf %1048, %851 : vector<2x128xf32>
    %1059 = arith.mulf %1058, %1031 : vector<2x128xf32>
    %cst_423 = arith.constant 1.000000e-01 : f32
    %1060 = vector.broadcast %cst_423 : f32 to vector<2x128xf32>
    %1061 = arith.addf %1059, %1060 : vector<2x128xf32>
    %1062 = arith.mulf %1057, %875 : vector<2x128xf32>
    %1063 = arith.mulf %1062, %1031 : vector<2x128xf32>
    %cst_424 = arith.constant 1.000000e-01 : f32
    %1064 = vector.broadcast %cst_424 : f32 to vector<2x128xf32>
    %1065 = arith.addf %1063, %1064 : vector<2x128xf32>
    %1066 = tpu.reciprocal %1065 {approx = true} : vector<2x128xf32> -> vector<2x128xf32>
    %1067 = arith.mulf %1061, %1066 : vector<2x128xf32>
    %1068 = math.log %1067 : vector<2x128xf32>
    %1069 = math.absf %1068 : vector<2x128xf32>
    %1070 = arith.addf %1029, %1069 : vector<2x128xf32>
    %1071 = vector.broadcast %68 : f32 to vector<2x128xf32>
    %1072 = arith.subf %1071, %274 : vector<2x128xf32>
    %1073 = vector.broadcast %71 : f32 to vector<2x128xf32>
    %1074 = arith.subf %1073, %276 : vector<2x128xf32>
    %1075 = arith.mulf %1072, %1072 : vector<2x128xf32>
    %1076 = arith.mulf %1074, %1074 : vector<2x128xf32>
    %1077 = arith.addf %1075, %1076 : vector<2x128xf32>
    %1078 = arith.mulf %74, %74 : f32
    %1079 = vector.broadcast %1078 : f32 to vector<2x128xf32>
    %1080 = arith.addf %1077, %1079 : vector<2x128xf32>
    %cst_425 = arith.constant 9.99999996E-13 : f32
    %1081 = vector.broadcast %cst_425 : f32 to vector<2x128xf32>
    %1082 = arith.addf %1080, %1081 : vector<2x128xf32>
    %1083 = math.rsqrt %1082 : vector<2x128xf32>
    %1084 = arith.mulf %1072, %1083 : vector<2x128xf32>
    %1085 = arith.mulf %1074, %1083 : vector<2x128xf32>
    %1086 = vector.broadcast %74 : f32 to vector<2x128xf32>
    %1087 = arith.mulf %1086, %1083 : vector<2x128xf32>
    %1088 = vector.broadcast %77 : f32 to vector<2x128xf32>
    %1089 = arith.subf %1088, %274 : vector<2x128xf32>
    %1090 = vector.broadcast %80 : f32 to vector<2x128xf32>
    %1091 = arith.subf %1090, %276 : vector<2x128xf32>
    %1092 = arith.mulf %1089, %1089 : vector<2x128xf32>
    %1093 = arith.mulf %1091, %1091 : vector<2x128xf32>
    %1094 = arith.addf %1092, %1093 : vector<2x128xf32>
    %1095 = arith.mulf %83, %83 : f32
    %1096 = vector.broadcast %1095 : f32 to vector<2x128xf32>
    %1097 = arith.addf %1094, %1096 : vector<2x128xf32>
    %cst_426 = arith.constant 9.99999996E-13 : f32
    %1098 = vector.broadcast %cst_426 : f32 to vector<2x128xf32>
    %1099 = arith.addf %1097, %1098 : vector<2x128xf32>
    %1100 = math.rsqrt %1099 : vector<2x128xf32>
    %1101 = arith.mulf %1089, %1100 : vector<2x128xf32>
    %1102 = arith.mulf %1091, %1100 : vector<2x128xf32>
    %1103 = vector.broadcast %83 : f32 to vector<2x128xf32>
    %1104 = arith.mulf %1103, %1100 : vector<2x128xf32>
    %1105 = arith.mulf %1089, %1089 : vector<2x128xf32>
    %1106 = arith.mulf %1091, %1091 : vector<2x128xf32>
    %1107 = arith.addf %1105, %1106 : vector<2x128xf32>
    %1108 = arith.mulf %83, %83 : f32
    %1109 = vector.broadcast %1108 : f32 to vector<2x128xf32>
    %1110 = arith.addf %1107, %1109 : vector<2x128xf32>
    %cst_427 = arith.constant 9.99999996E-13 : f32
    %1111 = vector.broadcast %cst_427 : f32 to vector<2x128xf32>
    %1112 = arith.maximumf %1110, %1111 : vector<2x128xf32>
    %1113 = tpu.reciprocal %1112 {approx = true} : vector<2x128xf32> -> vector<2x128xf32>
    %1114 = arith.addf %1101, %1084 : vector<2x128xf32>
    %cst_428 = arith.constant 5.000000e-01 : f32
    %1115 = vector.broadcast %cst_428 : f32 to vector<2x128xf32>
    %1116 = arith.mulf %1114, %1115 : vector<2x128xf32>
    %1117 = arith.addf %1102, %1085 : vector<2x128xf32>
    %cst_429 = arith.constant 5.000000e-01 : f32
    %1118 = vector.broadcast %cst_429 : f32 to vector<2x128xf32>
    %1119 = arith.mulf %1117, %1118 : vector<2x128xf32>
    %1120 = arith.addf %1104, %1087 : vector<2x128xf32>
    %cst_430 = arith.constant 5.000000e-01 : f32
    %1121 = vector.broadcast %cst_430 : f32 to vector<2x128xf32>
    %1122 = arith.mulf %1120, %1121 : vector<2x128xf32>
    %1123 = arith.mulf %1116, %1116 : vector<2x128xf32>
    %1124 = arith.mulf %1119, %1119 : vector<2x128xf32>
    %1125 = arith.addf %1123, %1124 : vector<2x128xf32>
    %1126 = arith.mulf %1122, %1122 : vector<2x128xf32>
    %1127 = arith.addf %1125, %1126 : vector<2x128xf32>
    %cst_431 = arith.constant 9.99999996E-13 : f32
    %1128 = vector.broadcast %cst_431 : f32 to vector<2x128xf32>
    %1129 = arith.addf %1127, %1128 : vector<2x128xf32>
    %1130 = math.rsqrt %1129 : vector<2x128xf32>
    %1131 = arith.mulf %1116, %1130 : vector<2x128xf32>
    %1132 = arith.mulf %1119, %1130 : vector<2x128xf32>
    %1133 = arith.mulf %1122, %1130 : vector<2x128xf32>
    %1134 = arith.mulf %1084, %1131 : vector<2x128xf32>
    %1135 = arith.mulf %1085, %1132 : vector<2x128xf32>
    %1136 = arith.addf %1134, %1135 : vector<2x128xf32>
    %1137 = arith.mulf %1087, %1133 : vector<2x128xf32>
    %1138 = arith.addf %1136, %1137 : vector<2x128xf32>
    %cst_432 = arith.constant 1.000000e-03 : f32
    %1139 = vector.broadcast %cst_432 : f32 to vector<2x128xf32>
    %1140 = arith.maximumf %1138, %1139 : vector<2x128xf32>
    %cst_433 = arith.constant 1.000000e+00 : f32
    %1141 = vector.broadcast %cst_433 : f32 to vector<2x128xf32>
    %1142 = arith.subf %1141, %1140 : vector<2x128xf32>
    %1143 = arith.mulf %1142, %1142 : vector<2x128xf32>
    %1144 = arith.mulf %1143, %1143 : vector<2x128xf32>
    %1145 = arith.mulf %1144, %1142 : vector<2x128xf32>
    %1146 = arith.mulf %399, %1131 : vector<2x128xf32>
    %1147 = arith.mulf %401, %1132 : vector<2x128xf32>
    %1148 = arith.addf %1146, %1147 : vector<2x128xf32>
    %1149 = arith.mulf %403, %1133 : vector<2x128xf32>
    %1150 = arith.addf %1148, %1149 : vector<2x128xf32>
    %cst_434 = arith.constant 1.000000e-03 : f32
    %1151 = vector.broadcast %cst_434 : f32 to vector<2x128xf32>
    %1152 = arith.maximumf %1150, %1151 : vector<2x128xf32>
    %1153 = arith.mulf %399, %1084 : vector<2x128xf32>
    %1154 = arith.mulf %401, %1085 : vector<2x128xf32>
    %1155 = arith.addf %1153, %1154 : vector<2x128xf32>
    %1156 = arith.mulf %403, %1087 : vector<2x128xf32>
    %1157 = arith.addf %1155, %1156 : vector<2x128xf32>
    %cst_435 = arith.constant 1.000000e-03 : f32
    %1158 = vector.broadcast %cst_435 : f32 to vector<2x128xf32>
    %1159 = arith.maximumf %1157, %1158 : vector<2x128xf32>
    %1160 = arith.mulf %399, %1101 : vector<2x128xf32>
    %1161 = arith.mulf %401, %1102 : vector<2x128xf32>
    %1162 = arith.addf %1160, %1161 : vector<2x128xf32>
    %1163 = arith.mulf %403, %1104 : vector<2x128xf32>
    %1164 = arith.addf %1162, %1163 : vector<2x128xf32>
    %1165 = arith.mulf %1152, %1152 : vector<2x128xf32>
    %cst_436 = arith.constant 1.000000e-03 : f32
    %1166 = vector.broadcast %cst_436 : f32 to vector<2x128xf32>
    %1167 = arith.maximumf %1164, %1166 : vector<2x128xf32>
    %cst_437 = arith.constant 0.000000e+00 : f32
    %1168 = vector.broadcast %cst_437 : f32 to vector<2x128xf32>
    %1169 = arith.maximumf %1164, %1168 : vector<2x128xf32>
    %1170 = arith.mulf %405, %1131 : vector<2x128xf32>
    %1171 = arith.mulf %407, %1132 : vector<2x128xf32>
    %1172 = arith.addf %1170, %1171 : vector<2x128xf32>
    %1173 = arith.mulf %409, %1133 : vector<2x128xf32>
    %1174 = arith.addf %1172, %1173 : vector<2x128xf32>
    %cst_438 = arith.constant 1.000000e-03 : f32
    %1175 = vector.broadcast %cst_438 : f32 to vector<2x128xf32>
    %1176 = arith.maximumf %1174, %1175 : vector<2x128xf32>
    %1177 = arith.mulf %405, %1084 : vector<2x128xf32>
    %1178 = arith.mulf %407, %1085 : vector<2x128xf32>
    %1179 = arith.addf %1177, %1178 : vector<2x128xf32>
    %1180 = arith.mulf %409, %1087 : vector<2x128xf32>
    %1181 = arith.addf %1179, %1180 : vector<2x128xf32>
    %cst_439 = arith.constant 1.000000e-03 : f32
    %1182 = vector.broadcast %cst_439 : f32 to vector<2x128xf32>
    %1183 = arith.maximumf %1181, %1182 : vector<2x128xf32>
    %1184 = arith.mulf %405, %1101 : vector<2x128xf32>
    %1185 = arith.mulf %407, %1102 : vector<2x128xf32>
    %1186 = arith.addf %1184, %1185 : vector<2x128xf32>
    %1187 = arith.mulf %409, %1104 : vector<2x128xf32>
    %1188 = arith.addf %1186, %1187 : vector<2x128xf32>
    %1189 = arith.mulf %1176, %1176 : vector<2x128xf32>
    %cst_440 = arith.constant 1.000000e-03 : f32
    %1190 = vector.broadcast %cst_440 : f32 to vector<2x128xf32>
    %1191 = arith.maximumf %1188, %1190 : vector<2x128xf32>
    %cst_441 = arith.constant 0.000000e+00 : f32
    %1192 = vector.broadcast %cst_441 : f32 to vector<2x128xf32>
    %1193 = arith.maximumf %1188, %1192 : vector<2x128xf32>
    %c0_442 = arith.constant 0 : index
    %c6_443 = arith.constant 6 : index
    %c0_444 = arith.constant 0 : index
    %c0_445 = arith.constant 0 : index
    %1194 = vector.load %arg5[%c0_442, %c6_443, %c0_444, %c0_445] : memref<1x12x2x128xf32, #tpu.memory_space<vmem>>, vector<1x1x2x128xf32>
    %1195 = vector.shape_cast %1194 : vector<1x1x2x128xf32> to vector<2x128xf32>
    %1196 = arith.mulf %1195, %1195 : vector<2x128xf32>
    %1197 = arith.mulf %1196, %1196 : vector<2x128xf32>
    %cst_446 = arith.constant 1.000000e+00 : f32
    %1198 = vector.broadcast %cst_446 : f32 to vector<2x128xf32>
    %1199 = arith.subf %1197, %1198 : vector<2x128xf32>
    %1200 = arith.mulf %1165, %1199 : vector<2x128xf32>
    %cst_447 = arith.constant 1.000000e+00 : f32
    %1201 = vector.broadcast %cst_447 : f32 to vector<2x128xf32>
    %1202 = arith.addf %1200, %1201 : vector<2x128xf32>
    %cst_448 = arith.constant 1.000000e-03 : f32
    %1203 = vector.broadcast %cst_448 : f32 to vector<2x128xf32>
    %1204 = arith.maximumf %1202, %1203 : vector<2x128xf32>
    %cst_449 = arith.constant 3.14159274 : f32
    %1205 = vector.broadcast %cst_449 : f32 to vector<2x128xf32>
    %1206 = arith.mulf %1205, %1204 : vector<2x128xf32>
    %1207 = arith.mulf %1206, %1204 : vector<2x128xf32>
    %1208 = tpu.reciprocal %1207 {approx = true} : vector<2x128xf32> -> vector<2x128xf32>
    %1209 = arith.mulf %1197, %1208 : vector<2x128xf32>
    %cst_450 = arith.constant 5.000000e-01 : f32
    %1210 = vector.broadcast %cst_450 : f32 to vector<2x128xf32>
    %1211 = arith.mulf %1196, %1210 : vector<2x128xf32>
    %cst_451 = arith.constant 9.99999974E-5 : f32
    %1212 = vector.broadcast %cst_451 : f32 to vector<2x128xf32>
    %1213 = arith.maximumf %1211, %1212 : vector<2x128xf32>
    %cst_452 = arith.constant 1.000000e+00 : f32
    %1214 = vector.broadcast %cst_452 : f32 to vector<2x128xf32>
    %1215 = arith.subf %1214, %1213 : vector<2x128xf32>
    %1216 = arith.mulf %1167, %1215 : vector<2x128xf32>
    %1217 = arith.addf %1216, %1213 : vector<2x128xf32>
    %cst_453 = arith.constant 1.000000e-03 : f32
    %1218 = vector.broadcast %cst_453 : f32 to vector<2x128xf32>
    %1219 = arith.maximumf %1217, %1218 : vector<2x128xf32>
    %1220 = tpu.reciprocal %1219 {approx = true} : vector<2x128xf32> -> vector<2x128xf32>
    %cst_454 = arith.constant 1.000000e+00 : f32
    %1221 = vector.broadcast %cst_454 : f32 to vector<2x128xf32>
    %1222 = arith.subf %1221, %1213 : vector<2x128xf32>
    %1223 = arith.mulf %1159, %1222 : vector<2x128xf32>
    %1224 = arith.addf %1223, %1213 : vector<2x128xf32>
    %cst_455 = arith.constant 1.000000e-03 : f32
    %1225 = vector.broadcast %cst_455 : f32 to vector<2x128xf32>
    %1226 = arith.maximumf %1224, %1225 : vector<2x128xf32>
    %1227 = tpu.reciprocal %1226 {approx = true} : vector<2x128xf32> -> vector<2x128xf32>
    %1228 = arith.mulf %1209, %1220 : vector<2x128xf32>
    %1229 = arith.mulf %1228, %1227 : vector<2x128xf32>
    %c0_456 = arith.constant 0 : index
    %c6_457 = arith.constant 6 : index
    %c0_458 = arith.constant 0 : index
    %c0_459 = arith.constant 0 : index
    %1230 = vector.load %arg6[%c0_456, %c6_457, %c0_458, %c0_459] : memref<1x12x2x128xf32, #tpu.memory_space<vmem>>, vector<1x1x2x128xf32>
    %1231 = vector.shape_cast %1230 : vector<1x1x2x128xf32> to vector<2x128xf32>
    %1232 = arith.mulf %1231, %1231 : vector<2x128xf32>
    %1233 = arith.mulf %1232, %1232 : vector<2x128xf32>
    %cst_460 = arith.constant 1.000000e+00 : f32
    %1234 = vector.broadcast %cst_460 : f32 to vector<2x128xf32>
    %1235 = arith.subf %1233, %1234 : vector<2x128xf32>
    %1236 = arith.mulf %1189, %1235 : vector<2x128xf32>
    %cst_461 = arith.constant 1.000000e+00 : f32
    %1237 = vector.broadcast %cst_461 : f32 to vector<2x128xf32>
    %1238 = arith.addf %1236, %1237 : vector<2x128xf32>
    %cst_462 = arith.constant 1.000000e-03 : f32
    %1239 = vector.broadcast %cst_462 : f32 to vector<2x128xf32>
    %1240 = arith.maximumf %1238, %1239 : vector<2x128xf32>
    %cst_463 = arith.constant 3.14159274 : f32
    %1241 = vector.broadcast %cst_463 : f32 to vector<2x128xf32>
    %1242 = arith.mulf %1241, %1240 : vector<2x128xf32>
    %1243 = arith.mulf %1242, %1240 : vector<2x128xf32>
    %1244 = tpu.reciprocal %1243 {approx = true} : vector<2x128xf32> -> vector<2x128xf32>
    %1245 = arith.mulf %1233, %1244 : vector<2x128xf32>
    %cst_464 = arith.constant 5.000000e-01 : f32
    %1246 = vector.broadcast %cst_464 : f32 to vector<2x128xf32>
    %1247 = arith.mulf %1232, %1246 : vector<2x128xf32>
    %cst_465 = arith.constant 9.99999974E-5 : f32
    %1248 = vector.broadcast %cst_465 : f32 to vector<2x128xf32>
    %1249 = arith.maximumf %1247, %1248 : vector<2x128xf32>
    %cst_466 = arith.constant 1.000000e+00 : f32
    %1250 = vector.broadcast %cst_466 : f32 to vector<2x128xf32>
    %1251 = arith.subf %1250, %1249 : vector<2x128xf32>
    %1252 = arith.mulf %1191, %1251 : vector<2x128xf32>
    %1253 = arith.addf %1252, %1249 : vector<2x128xf32>
    %cst_467 = arith.constant 1.000000e-03 : f32
    %1254 = vector.broadcast %cst_467 : f32 to vector<2x128xf32>
    %1255 = arith.maximumf %1253, %1254 : vector<2x128xf32>
    %1256 = tpu.reciprocal %1255 {approx = true} : vector<2x128xf32> -> vector<2x128xf32>
    %cst_468 = arith.constant 1.000000e+00 : f32
    %1257 = vector.broadcast %cst_468 : f32 to vector<2x128xf32>
    %1258 = arith.subf %1257, %1249 : vector<2x128xf32>
    %1259 = arith.mulf %1183, %1258 : vector<2x128xf32>
    %1260 = arith.addf %1259, %1249 : vector<2x128xf32>
    %cst_469 = arith.constant 1.000000e-03 : f32
    %1261 = vector.broadcast %cst_469 : f32 to vector<2x128xf32>
    %1262 = arith.maximumf %1260, %1261 : vector<2x128xf32>
    %1263 = tpu.reciprocal %1262 {approx = true} : vector<2x128xf32> -> vector<2x128xf32>
    %1264 = arith.mulf %1245, %1256 : vector<2x128xf32>
    %1265 = arith.mulf %1264, %1263 : vector<2x128xf32>
    %1266 = vector.broadcast %86 : f32 to vector<2x128xf32>
    %1267 = arith.mulf %1266, %1113 : vector<2x128xf32>
    %cst_470 = arith.constant 1.000000e+00 : f32
    %1268 = vector.broadcast %cst_470 : f32 to vector<2x128xf32>
    %1269 = arith.subf %1268, %423 : vector<2x128xf32>
    %1270 = arith.mulf %1269, %1145 : vector<2x128xf32>
    %1271 = arith.addf %423, %1270 : vector<2x128xf32>
    %cst_471 = arith.constant 1.000000e+00 : f32
    %1272 = vector.broadcast %cst_471 : f32 to vector<2x128xf32>
    %1273 = arith.subf %1272, %429 : vector<2x128xf32>
    %1274 = arith.mulf %1273, %1145 : vector<2x128xf32>
    %1275 = arith.addf %429, %1274 : vector<2x128xf32>
    %cst_472 = arith.constant 1.000000e+00 : f32
    %1276 = vector.broadcast %cst_472 : f32 to vector<2x128xf32>
    %1277 = arith.subf %1276, %423 : vector<2x128xf32>
    %cst_473 = arith.constant 0.318309873 : f32
    %1278 = vector.broadcast %cst_473 : f32 to vector<2x128xf32>
    %1279 = arith.mulf %1277, %1278 : vector<2x128xf32>
    %1280 = arith.mulf %411, %1279 : vector<2x128xf32>
    %cst_474 = arith.constant 2.500000e-01 : f32
    %1281 = vector.broadcast %cst_474 : f32 to vector<2x128xf32>
    %1282 = arith.mulf %1281, %1229 : vector<2x128xf32>
    %1283 = arith.mulf %1282, %1271 : vector<2x128xf32>
    %1284 = arith.addf %1280, %1283 : vector<2x128xf32>
    %cst_475 = arith.constant 1.000000e+00 : f32
    %1285 = vector.broadcast %cst_475 : f32 to vector<2x128xf32>
    %1286 = arith.subf %1285, %429 : vector<2x128xf32>
    %cst_476 = arith.constant 0.318309873 : f32
    %1287 = vector.broadcast %cst_476 : f32 to vector<2x128xf32>
    %1288 = arith.mulf %1286, %1287 : vector<2x128xf32>
    %1289 = arith.mulf %417, %1288 : vector<2x128xf32>
    %cst_477 = arith.constant 2.500000e-01 : f32
    %1290 = vector.broadcast %cst_477 : f32 to vector<2x128xf32>
    %1291 = arith.mulf %1290, %1265 : vector<2x128xf32>
    %1292 = arith.mulf %1291, %1275 : vector<2x128xf32>
    %1293 = arith.addf %1289, %1292 : vector<2x128xf32>
    %1294 = arith.mulf %1284, %1169 : vector<2x128xf32>
    %1295 = arith.mulf %1294, %1267 : vector<2x128xf32>
    %cst_478 = arith.constant 1.000000e-01 : f32
    %1296 = vector.broadcast %cst_478 : f32 to vector<2x128xf32>
    %1297 = arith.addf %1295, %1296 : vector<2x128xf32>
    %1298 = arith.mulf %1293, %1193 : vector<2x128xf32>
    %1299 = arith.mulf %1298, %1267 : vector<2x128xf32>
    %cst_479 = arith.constant 1.000000e-01 : f32
    %1300 = vector.broadcast %cst_479 : f32 to vector<2x128xf32>
    %1301 = arith.addf %1299, %1300 : vector<2x128xf32>
    %1302 = tpu.reciprocal %1301 {approx = true} : vector<2x128xf32> -> vector<2x128xf32>
    %1303 = arith.mulf %1297, %1302 : vector<2x128xf32>
    %1304 = math.log %1303 : vector<2x128xf32>
    %1305 = math.absf %1304 : vector<2x128xf32>
    %1306 = arith.addf %1070, %1305 : vector<2x128xf32>
    %1307 = vector.broadcast %89 : f32 to vector<2x128xf32>
    %1308 = arith.mulf %1307, %1113 : vector<2x128xf32>
    %cst_480 = arith.constant 1.000000e+00 : f32
    %1309 = vector.broadcast %cst_480 : f32 to vector<2x128xf32>
    %1310 = arith.subf %1309, %425 : vector<2x128xf32>
    %1311 = arith.mulf %1310, %1145 : vector<2x128xf32>
    %1312 = arith.addf %425, %1311 : vector<2x128xf32>
    %cst_481 = arith.constant 1.000000e+00 : f32
    %1313 = vector.broadcast %cst_481 : f32 to vector<2x128xf32>
    %1314 = arith.subf %1313, %431 : vector<2x128xf32>
    %1315 = arith.mulf %1314, %1145 : vector<2x128xf32>
    %1316 = arith.addf %431, %1315 : vector<2x128xf32>
    %cst_482 = arith.constant 1.000000e+00 : f32
    %1317 = vector.broadcast %cst_482 : f32 to vector<2x128xf32>
    %1318 = arith.subf %1317, %425 : vector<2x128xf32>
    %cst_483 = arith.constant 0.318309873 : f32
    %1319 = vector.broadcast %cst_483 : f32 to vector<2x128xf32>
    %1320 = arith.mulf %1318, %1319 : vector<2x128xf32>
    %1321 = arith.mulf %413, %1320 : vector<2x128xf32>
    %cst_484 = arith.constant 2.500000e-01 : f32
    %1322 = vector.broadcast %cst_484 : f32 to vector<2x128xf32>
    %1323 = arith.mulf %1322, %1229 : vector<2x128xf32>
    %1324 = arith.mulf %1323, %1312 : vector<2x128xf32>
    %1325 = arith.addf %1321, %1324 : vector<2x128xf32>
    %cst_485 = arith.constant 1.000000e+00 : f32
    %1326 = vector.broadcast %cst_485 : f32 to vector<2x128xf32>
    %1327 = arith.subf %1326, %431 : vector<2x128xf32>
    %cst_486 = arith.constant 0.318309873 : f32
    %1328 = vector.broadcast %cst_486 : f32 to vector<2x128xf32>
    %1329 = arith.mulf %1327, %1328 : vector<2x128xf32>
    %1330 = arith.mulf %419, %1329 : vector<2x128xf32>
    %cst_487 = arith.constant 2.500000e-01 : f32
    %1331 = vector.broadcast %cst_487 : f32 to vector<2x128xf32>
    %1332 = arith.mulf %1331, %1265 : vector<2x128xf32>
    %1333 = arith.mulf %1332, %1316 : vector<2x128xf32>
    %1334 = arith.addf %1330, %1333 : vector<2x128xf32>
    %1335 = arith.mulf %1325, %1169 : vector<2x128xf32>
    %1336 = arith.mulf %1335, %1308 : vector<2x128xf32>
    %cst_488 = arith.constant 1.000000e-01 : f32
    %1337 = vector.broadcast %cst_488 : f32 to vector<2x128xf32>
    %1338 = arith.addf %1336, %1337 : vector<2x128xf32>
    %1339 = arith.mulf %1334, %1193 : vector<2x128xf32>
    %1340 = arith.mulf %1339, %1308 : vector<2x128xf32>
    %cst_489 = arith.constant 1.000000e-01 : f32
    %1341 = vector.broadcast %cst_489 : f32 to vector<2x128xf32>
    %1342 = arith.addf %1340, %1341 : vector<2x128xf32>
    %1343 = tpu.reciprocal %1342 {approx = true} : vector<2x128xf32> -> vector<2x128xf32>
    %1344 = arith.mulf %1338, %1343 : vector<2x128xf32>
    %1345 = math.log %1344 : vector<2x128xf32>
    %1346 = math.absf %1345 : vector<2x128xf32>
    %1347 = arith.addf %1306, %1346 : vector<2x128xf32>
    %1348 = vector.broadcast %92 : f32 to vector<2x128xf32>
    %1349 = arith.mulf %1348, %1113 : vector<2x128xf32>
    %cst_490 = arith.constant 1.000000e+00 : f32
    %1350 = vector.broadcast %cst_490 : f32 to vector<2x128xf32>
    %1351 = arith.subf %1350, %427 : vector<2x128xf32>
    %1352 = arith.mulf %1351, %1145 : vector<2x128xf32>
    %1353 = arith.addf %427, %1352 : vector<2x128xf32>
    %cst_491 = arith.constant 1.000000e+00 : f32
    %1354 = vector.broadcast %cst_491 : f32 to vector<2x128xf32>
    %1355 = arith.subf %1354, %433 : vector<2x128xf32>
    %1356 = arith.mulf %1355, %1145 : vector<2x128xf32>
    %1357 = arith.addf %433, %1356 : vector<2x128xf32>
    %cst_492 = arith.constant 1.000000e+00 : f32
    %1358 = vector.broadcast %cst_492 : f32 to vector<2x128xf32>
    %1359 = arith.subf %1358, %427 : vector<2x128xf32>
    %cst_493 = arith.constant 0.318309873 : f32
    %1360 = vector.broadcast %cst_493 : f32 to vector<2x128xf32>
    %1361 = arith.mulf %1359, %1360 : vector<2x128xf32>
    %1362 = arith.mulf %415, %1361 : vector<2x128xf32>
    %cst_494 = arith.constant 2.500000e-01 : f32
    %1363 = vector.broadcast %cst_494 : f32 to vector<2x128xf32>
    %1364 = arith.mulf %1363, %1229 : vector<2x128xf32>
    %1365 = arith.mulf %1364, %1353 : vector<2x128xf32>
    %1366 = arith.addf %1362, %1365 : vector<2x128xf32>
    %cst_495 = arith.constant 1.000000e+00 : f32
    %1367 = vector.broadcast %cst_495 : f32 to vector<2x128xf32>
    %1368 = arith.subf %1367, %433 : vector<2x128xf32>
    %cst_496 = arith.constant 0.318309873 : f32
    %1369 = vector.broadcast %cst_496 : f32 to vector<2x128xf32>
    %1370 = arith.mulf %1368, %1369 : vector<2x128xf32>
    %1371 = arith.mulf %421, %1370 : vector<2x128xf32>
    %cst_497 = arith.constant 2.500000e-01 : f32
    %1372 = vector.broadcast %cst_497 : f32 to vector<2x128xf32>
    %1373 = arith.mulf %1372, %1265 : vector<2x128xf32>
    %1374 = arith.mulf %1373, %1357 : vector<2x128xf32>
    %1375 = arith.addf %1371, %1374 : vector<2x128xf32>
    %1376 = arith.mulf %1366, %1169 : vector<2x128xf32>
    %1377 = arith.mulf %1376, %1349 : vector<2x128xf32>
    %cst_498 = arith.constant 1.000000e-01 : f32
    %1378 = vector.broadcast %cst_498 : f32 to vector<2x128xf32>
    %1379 = arith.addf %1377, %1378 : vector<2x128xf32>
    %1380 = arith.mulf %1375, %1193 : vector<2x128xf32>
    %1381 = arith.mulf %1380, %1349 : vector<2x128xf32>
    %cst_499 = arith.constant 1.000000e-01 : f32
    %1382 = vector.broadcast %cst_499 : f32 to vector<2x128xf32>
    %1383 = arith.addf %1381, %1382 : vector<2x128xf32>
    %1384 = tpu.reciprocal %1383 {approx = true} : vector<2x128xf32> -> vector<2x128xf32>
    %1385 = arith.mulf %1379, %1384 : vector<2x128xf32>
    %1386 = math.log %1385 : vector<2x128xf32>
    %1387 = math.absf %1386 : vector<2x128xf32>
    %1388 = arith.addf %1347, %1387 : vector<2x128xf32>
    %1389 = vector.broadcast %98 : f32 to vector<2x128xf32>
    %1390 = arith.subf %1389, %274 : vector<2x128xf32>
    %1391 = vector.broadcast %101 : f32 to vector<2x128xf32>
    %1392 = arith.subf %1391, %276 : vector<2x128xf32>
    %1393 = arith.mulf %1390, %1390 : vector<2x128xf32>
    %1394 = arith.mulf %1392, %1392 : vector<2x128xf32>
    %1395 = arith.addf %1393, %1394 : vector<2x128xf32>
    %1396 = arith.mulf %104, %104 : f32
    %1397 = vector.broadcast %1396 : f32 to vector<2x128xf32>
    %1398 = arith.addf %1395, %1397 : vector<2x128xf32>
    %cst_500 = arith.constant 9.99999996E-13 : f32
    %1399 = vector.broadcast %cst_500 : f32 to vector<2x128xf32>
    %1400 = arith.addf %1398, %1399 : vector<2x128xf32>
    %1401 = math.rsqrt %1400 : vector<2x128xf32>
    %1402 = arith.mulf %1390, %1401 : vector<2x128xf32>
    %1403 = arith.mulf %1392, %1401 : vector<2x128xf32>
    %1404 = vector.broadcast %104 : f32 to vector<2x128xf32>
    %1405 = arith.mulf %1404, %1401 : vector<2x128xf32>
    %1406 = vector.broadcast %107 : f32 to vector<2x128xf32>
    %1407 = arith.subf %1406, %274 : vector<2x128xf32>
    %1408 = vector.broadcast %110 : f32 to vector<2x128xf32>
    %1409 = arith.subf %1408, %276 : vector<2x128xf32>
    %1410 = arith.mulf %1407, %1407 : vector<2x128xf32>
    %1411 = arith.mulf %1409, %1409 : vector<2x128xf32>
    %1412 = arith.addf %1410, %1411 : vector<2x128xf32>
    %1413 = arith.mulf %113, %113 : f32
    %1414 = vector.broadcast %1413 : f32 to vector<2x128xf32>
    %1415 = arith.addf %1412, %1414 : vector<2x128xf32>
    %cst_501 = arith.constant 9.99999996E-13 : f32
    %1416 = vector.broadcast %cst_501 : f32 to vector<2x128xf32>
    %1417 = arith.addf %1415, %1416 : vector<2x128xf32>
    %1418 = math.rsqrt %1417 : vector<2x128xf32>
    %1419 = arith.mulf %1407, %1418 : vector<2x128xf32>
    %1420 = arith.mulf %1409, %1418 : vector<2x128xf32>
    %1421 = vector.broadcast %113 : f32 to vector<2x128xf32>
    %1422 = arith.mulf %1421, %1418 : vector<2x128xf32>
    %1423 = arith.mulf %1407, %1407 : vector<2x128xf32>
    %1424 = arith.mulf %1409, %1409 : vector<2x128xf32>
    %1425 = arith.addf %1423, %1424 : vector<2x128xf32>
    %1426 = arith.mulf %113, %113 : f32
    %1427 = vector.broadcast %1426 : f32 to vector<2x128xf32>
    %1428 = arith.addf %1425, %1427 : vector<2x128xf32>
    %cst_502 = arith.constant 9.99999996E-13 : f32
    %1429 = vector.broadcast %cst_502 : f32 to vector<2x128xf32>
    %1430 = arith.maximumf %1428, %1429 : vector<2x128xf32>
    %1431 = tpu.reciprocal %1430 {approx = true} : vector<2x128xf32> -> vector<2x128xf32>
    %1432 = arith.addf %1419, %1402 : vector<2x128xf32>
    %cst_503 = arith.constant 5.000000e-01 : f32
    %1433 = vector.broadcast %cst_503 : f32 to vector<2x128xf32>
    %1434 = arith.mulf %1432, %1433 : vector<2x128xf32>
    %1435 = arith.addf %1420, %1403 : vector<2x128xf32>
    %cst_504 = arith.constant 5.000000e-01 : f32
    %1436 = vector.broadcast %cst_504 : f32 to vector<2x128xf32>
    %1437 = arith.mulf %1435, %1436 : vector<2x128xf32>
    %1438 = arith.addf %1422, %1405 : vector<2x128xf32>
    %cst_505 = arith.constant 5.000000e-01 : f32
    %1439 = vector.broadcast %cst_505 : f32 to vector<2x128xf32>
    %1440 = arith.mulf %1438, %1439 : vector<2x128xf32>
    %1441 = arith.mulf %1434, %1434 : vector<2x128xf32>
    %1442 = arith.mulf %1437, %1437 : vector<2x128xf32>
    %1443 = arith.addf %1441, %1442 : vector<2x128xf32>
    %1444 = arith.mulf %1440, %1440 : vector<2x128xf32>
    %1445 = arith.addf %1443, %1444 : vector<2x128xf32>
    %cst_506 = arith.constant 9.99999996E-13 : f32
    %1446 = vector.broadcast %cst_506 : f32 to vector<2x128xf32>
    %1447 = arith.addf %1445, %1446 : vector<2x128xf32>
    %1448 = math.rsqrt %1447 : vector<2x128xf32>
    %1449 = arith.mulf %1434, %1448 : vector<2x128xf32>
    %1450 = arith.mulf %1437, %1448 : vector<2x128xf32>
    %1451 = arith.mulf %1440, %1448 : vector<2x128xf32>
    %1452 = arith.mulf %1402, %1449 : vector<2x128xf32>
    %1453 = arith.mulf %1403, %1450 : vector<2x128xf32>
    %1454 = arith.addf %1452, %1453 : vector<2x128xf32>
    %1455 = arith.mulf %1405, %1451 : vector<2x128xf32>
    %1456 = arith.addf %1454, %1455 : vector<2x128xf32>
    %cst_507 = arith.constant 1.000000e-03 : f32
    %1457 = vector.broadcast %cst_507 : f32 to vector<2x128xf32>
    %1458 = arith.maximumf %1456, %1457 : vector<2x128xf32>
    %cst_508 = arith.constant 1.000000e+00 : f32
    %1459 = vector.broadcast %cst_508 : f32 to vector<2x128xf32>
    %1460 = arith.subf %1459, %1458 : vector<2x128xf32>
    %1461 = arith.mulf %1460, %1460 : vector<2x128xf32>
    %1462 = arith.mulf %1461, %1461 : vector<2x128xf32>
    %1463 = arith.mulf %1462, %1460 : vector<2x128xf32>
    %1464 = arith.mulf %399, %1449 : vector<2x128xf32>
    %1465 = arith.mulf %401, %1450 : vector<2x128xf32>
    %1466 = arith.addf %1464, %1465 : vector<2x128xf32>
    %1467 = arith.mulf %403, %1451 : vector<2x128xf32>
    %1468 = arith.addf %1466, %1467 : vector<2x128xf32>
    %cst_509 = arith.constant 1.000000e-03 : f32
    %1469 = vector.broadcast %cst_509 : f32 to vector<2x128xf32>
    %1470 = arith.maximumf %1468, %1469 : vector<2x128xf32>
    %1471 = arith.mulf %399, %1402 : vector<2x128xf32>
    %1472 = arith.mulf %401, %1403 : vector<2x128xf32>
    %1473 = arith.addf %1471, %1472 : vector<2x128xf32>
    %1474 = arith.mulf %403, %1405 : vector<2x128xf32>
    %1475 = arith.addf %1473, %1474 : vector<2x128xf32>
    %cst_510 = arith.constant 1.000000e-03 : f32
    %1476 = vector.broadcast %cst_510 : f32 to vector<2x128xf32>
    %1477 = arith.maximumf %1475, %1476 : vector<2x128xf32>
    %1478 = arith.mulf %399, %1419 : vector<2x128xf32>
    %1479 = arith.mulf %401, %1420 : vector<2x128xf32>
    %1480 = arith.addf %1478, %1479 : vector<2x128xf32>
    %1481 = arith.mulf %403, %1422 : vector<2x128xf32>
    %1482 = arith.addf %1480, %1481 : vector<2x128xf32>
    %1483 = arith.mulf %1470, %1470 : vector<2x128xf32>
    %cst_511 = arith.constant 1.000000e-03 : f32
    %1484 = vector.broadcast %cst_511 : f32 to vector<2x128xf32>
    %1485 = arith.maximumf %1482, %1484 : vector<2x128xf32>
    %cst_512 = arith.constant 0.000000e+00 : f32
    %1486 = vector.broadcast %cst_512 : f32 to vector<2x128xf32>
    %1487 = arith.maximumf %1482, %1486 : vector<2x128xf32>
    %1488 = arith.mulf %405, %1449 : vector<2x128xf32>
    %1489 = arith.mulf %407, %1450 : vector<2x128xf32>
    %1490 = arith.addf %1488, %1489 : vector<2x128xf32>
    %1491 = arith.mulf %409, %1451 : vector<2x128xf32>
    %1492 = arith.addf %1490, %1491 : vector<2x128xf32>
    %cst_513 = arith.constant 1.000000e-03 : f32
    %1493 = vector.broadcast %cst_513 : f32 to vector<2x128xf32>
    %1494 = arith.maximumf %1492, %1493 : vector<2x128xf32>
    %1495 = arith.mulf %405, %1402 : vector<2x128xf32>
    %1496 = arith.mulf %407, %1403 : vector<2x128xf32>
    %1497 = arith.addf %1495, %1496 : vector<2x128xf32>
    %1498 = arith.mulf %409, %1405 : vector<2x128xf32>
    %1499 = arith.addf %1497, %1498 : vector<2x128xf32>
    %cst_514 = arith.constant 1.000000e-03 : f32
    %1500 = vector.broadcast %cst_514 : f32 to vector<2x128xf32>
    %1501 = arith.maximumf %1499, %1500 : vector<2x128xf32>
    %1502 = arith.mulf %405, %1419 : vector<2x128xf32>
    %1503 = arith.mulf %407, %1420 : vector<2x128xf32>
    %1504 = arith.addf %1502, %1503 : vector<2x128xf32>
    %1505 = arith.mulf %409, %1422 : vector<2x128xf32>
    %1506 = arith.addf %1504, %1505 : vector<2x128xf32>
    %1507 = arith.mulf %1494, %1494 : vector<2x128xf32>
    %cst_515 = arith.constant 1.000000e-03 : f32
    %1508 = vector.broadcast %cst_515 : f32 to vector<2x128xf32>
    %1509 = arith.maximumf %1506, %1508 : vector<2x128xf32>
    %cst_516 = arith.constant 0.000000e+00 : f32
    %1510 = vector.broadcast %cst_516 : f32 to vector<2x128xf32>
    %1511 = arith.maximumf %1506, %1510 : vector<2x128xf32>
    %c0_517 = arith.constant 0 : index
    %c6_518 = arith.constant 6 : index
    %c0_519 = arith.constant 0 : index
    %c0_520 = arith.constant 0 : index
    %1512 = vector.load %arg5[%c0_517, %c6_518, %c0_519, %c0_520] : memref<1x12x2x128xf32, #tpu.memory_space<vmem>>, vector<1x1x2x128xf32>
    %1513 = vector.shape_cast %1512 : vector<1x1x2x128xf32> to vector<2x128xf32>
    %1514 = arith.mulf %1513, %1513 : vector<2x128xf32>
    %1515 = arith.mulf %1514, %1514 : vector<2x128xf32>
    %cst_521 = arith.constant 1.000000e+00 : f32
    %1516 = vector.broadcast %cst_521 : f32 to vector<2x128xf32>
    %1517 = arith.subf %1515, %1516 : vector<2x128xf32>
    %1518 = arith.mulf %1483, %1517 : vector<2x128xf32>
    %cst_522 = arith.constant 1.000000e+00 : f32
    %1519 = vector.broadcast %cst_522 : f32 to vector<2x128xf32>
    %1520 = arith.addf %1518, %1519 : vector<2x128xf32>
    %cst_523 = arith.constant 1.000000e-03 : f32
    %1521 = vector.broadcast %cst_523 : f32 to vector<2x128xf32>
    %1522 = arith.maximumf %1520, %1521 : vector<2x128xf32>
    %cst_524 = arith.constant 3.14159274 : f32
    %1523 = vector.broadcast %cst_524 : f32 to vector<2x128xf32>
    %1524 = arith.mulf %1523, %1522 : vector<2x128xf32>
    %1525 = arith.mulf %1524, %1522 : vector<2x128xf32>
    %1526 = tpu.reciprocal %1525 {approx = true} : vector<2x128xf32> -> vector<2x128xf32>
    %1527 = arith.mulf %1515, %1526 : vector<2x128xf32>
    %cst_525 = arith.constant 5.000000e-01 : f32
    %1528 = vector.broadcast %cst_525 : f32 to vector<2x128xf32>
    %1529 = arith.mulf %1514, %1528 : vector<2x128xf32>
    %cst_526 = arith.constant 9.99999974E-5 : f32
    %1530 = vector.broadcast %cst_526 : f32 to vector<2x128xf32>
    %1531 = arith.maximumf %1529, %1530 : vector<2x128xf32>
    %cst_527 = arith.constant 1.000000e+00 : f32
    %1532 = vector.broadcast %cst_527 : f32 to vector<2x128xf32>
    %1533 = arith.subf %1532, %1531 : vector<2x128xf32>
    %1534 = arith.mulf %1485, %1533 : vector<2x128xf32>
    %1535 = arith.addf %1534, %1531 : vector<2x128xf32>
    %cst_528 = arith.constant 1.000000e-03 : f32
    %1536 = vector.broadcast %cst_528 : f32 to vector<2x128xf32>
    %1537 = arith.maximumf %1535, %1536 : vector<2x128xf32>
    %1538 = tpu.reciprocal %1537 {approx = true} : vector<2x128xf32> -> vector<2x128xf32>
    %cst_529 = arith.constant 1.000000e+00 : f32
    %1539 = vector.broadcast %cst_529 : f32 to vector<2x128xf32>
    %1540 = arith.subf %1539, %1531 : vector<2x128xf32>
    %1541 = arith.mulf %1477, %1540 : vector<2x128xf32>
    %1542 = arith.addf %1541, %1531 : vector<2x128xf32>
    %cst_530 = arith.constant 1.000000e-03 : f32
    %1543 = vector.broadcast %cst_530 : f32 to vector<2x128xf32>
    %1544 = arith.maximumf %1542, %1543 : vector<2x128xf32>
    %1545 = tpu.reciprocal %1544 {approx = true} : vector<2x128xf32> -> vector<2x128xf32>
    %1546 = arith.mulf %1527, %1538 : vector<2x128xf32>
    %1547 = arith.mulf %1546, %1545 : vector<2x128xf32>
    %c0_531 = arith.constant 0 : index
    %c6_532 = arith.constant 6 : index
    %c0_533 = arith.constant 0 : index
    %c0_534 = arith.constant 0 : index
    %1548 = vector.load %arg6[%c0_531, %c6_532, %c0_533, %c0_534] : memref<1x12x2x128xf32, #tpu.memory_space<vmem>>, vector<1x1x2x128xf32>
    %1549 = vector.shape_cast %1548 : vector<1x1x2x128xf32> to vector<2x128xf32>
    %1550 = arith.mulf %1549, %1549 : vector<2x128xf32>
    %1551 = arith.mulf %1550, %1550 : vector<2x128xf32>
    %cst_535 = arith.constant 1.000000e+00 : f32
    %1552 = vector.broadcast %cst_535 : f32 to vector<2x128xf32>
    %1553 = arith.subf %1551, %1552 : vector<2x128xf32>
    %1554 = arith.mulf %1507, %1553 : vector<2x128xf32>
    %cst_536 = arith.constant 1.000000e+00 : f32
    %1555 = vector.broadcast %cst_536 : f32 to vector<2x128xf32>
    %1556 = arith.addf %1554, %1555 : vector<2x128xf32>
    %cst_537 = arith.constant 1.000000e-03 : f32
    %1557 = vector.broadcast %cst_537 : f32 to vector<2x128xf32>
    %1558 = arith.maximumf %1556, %1557 : vector<2x128xf32>
    %cst_538 = arith.constant 3.14159274 : f32
    %1559 = vector.broadcast %cst_538 : f32 to vector<2x128xf32>
    %1560 = arith.mulf %1559, %1558 : vector<2x128xf32>
    %1561 = arith.mulf %1560, %1558 : vector<2x128xf32>
    %1562 = tpu.reciprocal %1561 {approx = true} : vector<2x128xf32> -> vector<2x128xf32>
    %1563 = arith.mulf %1551, %1562 : vector<2x128xf32>
    %cst_539 = arith.constant 5.000000e-01 : f32
    %1564 = vector.broadcast %cst_539 : f32 to vector<2x128xf32>
    %1565 = arith.mulf %1550, %1564 : vector<2x128xf32>
    %cst_540 = arith.constant 9.99999974E-5 : f32
    %1566 = vector.broadcast %cst_540 : f32 to vector<2x128xf32>
    %1567 = arith.maximumf %1565, %1566 : vector<2x128xf32>
    %cst_541 = arith.constant 1.000000e+00 : f32
    %1568 = vector.broadcast %cst_541 : f32 to vector<2x128xf32>
    %1569 = arith.subf %1568, %1567 : vector<2x128xf32>
    %1570 = arith.mulf %1509, %1569 : vector<2x128xf32>
    %1571 = arith.addf %1570, %1567 : vector<2x128xf32>
    %cst_542 = arith.constant 1.000000e-03 : f32
    %1572 = vector.broadcast %cst_542 : f32 to vector<2x128xf32>
    %1573 = arith.maximumf %1571, %1572 : vector<2x128xf32>
    %1574 = tpu.reciprocal %1573 {approx = true} : vector<2x128xf32> -> vector<2x128xf32>
    %cst_543 = arith.constant 1.000000e+00 : f32
    %1575 = vector.broadcast %cst_543 : f32 to vector<2x128xf32>
    %1576 = arith.subf %1575, %1567 : vector<2x128xf32>
    %1577 = arith.mulf %1501, %1576 : vector<2x128xf32>
    %1578 = arith.addf %1577, %1567 : vector<2x128xf32>
    %cst_544 = arith.constant 1.000000e-03 : f32
    %1579 = vector.broadcast %cst_544 : f32 to vector<2x128xf32>
    %1580 = arith.maximumf %1578, %1579 : vector<2x128xf32>
    %1581 = tpu.reciprocal %1580 {approx = true} : vector<2x128xf32> -> vector<2x128xf32>
    %1582 = arith.mulf %1563, %1574 : vector<2x128xf32>
    %1583 = arith.mulf %1582, %1581 : vector<2x128xf32>
    %1584 = vector.broadcast %116 : f32 to vector<2x128xf32>
    %1585 = arith.mulf %1584, %1431 : vector<2x128xf32>
    %cst_545 = arith.constant 1.000000e+00 : f32
    %1586 = vector.broadcast %cst_545 : f32 to vector<2x128xf32>
    %1587 = arith.subf %1586, %423 : vector<2x128xf32>
    %1588 = arith.mulf %1587, %1463 : vector<2x128xf32>
    %1589 = arith.addf %423, %1588 : vector<2x128xf32>
    %cst_546 = arith.constant 1.000000e+00 : f32
    %1590 = vector.broadcast %cst_546 : f32 to vector<2x128xf32>
    %1591 = arith.subf %1590, %429 : vector<2x128xf32>
    %1592 = arith.mulf %1591, %1463 : vector<2x128xf32>
    %1593 = arith.addf %429, %1592 : vector<2x128xf32>
    %cst_547 = arith.constant 1.000000e+00 : f32
    %1594 = vector.broadcast %cst_547 : f32 to vector<2x128xf32>
    %1595 = arith.subf %1594, %423 : vector<2x128xf32>
    %cst_548 = arith.constant 0.318309873 : f32
    %1596 = vector.broadcast %cst_548 : f32 to vector<2x128xf32>
    %1597 = arith.mulf %1595, %1596 : vector<2x128xf32>
    %1598 = arith.mulf %411, %1597 : vector<2x128xf32>
    %cst_549 = arith.constant 2.500000e-01 : f32
    %1599 = vector.broadcast %cst_549 : f32 to vector<2x128xf32>
    %1600 = arith.mulf %1599, %1547 : vector<2x128xf32>
    %1601 = arith.mulf %1600, %1589 : vector<2x128xf32>
    %1602 = arith.addf %1598, %1601 : vector<2x128xf32>
    %cst_550 = arith.constant 1.000000e+00 : f32
    %1603 = vector.broadcast %cst_550 : f32 to vector<2x128xf32>
    %1604 = arith.subf %1603, %429 : vector<2x128xf32>
    %cst_551 = arith.constant 0.318309873 : f32
    %1605 = vector.broadcast %cst_551 : f32 to vector<2x128xf32>
    %1606 = arith.mulf %1604, %1605 : vector<2x128xf32>
    %1607 = arith.mulf %417, %1606 : vector<2x128xf32>
    %cst_552 = arith.constant 2.500000e-01 : f32
    %1608 = vector.broadcast %cst_552 : f32 to vector<2x128xf32>
    %1609 = arith.mulf %1608, %1583 : vector<2x128xf32>
    %1610 = arith.mulf %1609, %1593 : vector<2x128xf32>
    %1611 = arith.addf %1607, %1610 : vector<2x128xf32>
    %1612 = arith.mulf %1602, %1487 : vector<2x128xf32>
    %1613 = arith.mulf %1612, %1585 : vector<2x128xf32>
    %cst_553 = arith.constant 1.000000e-01 : f32
    %1614 = vector.broadcast %cst_553 : f32 to vector<2x128xf32>
    %1615 = arith.addf %1613, %1614 : vector<2x128xf32>
    %1616 = arith.mulf %1611, %1511 : vector<2x128xf32>
    %1617 = arith.mulf %1616, %1585 : vector<2x128xf32>
    %cst_554 = arith.constant 1.000000e-01 : f32
    %1618 = vector.broadcast %cst_554 : f32 to vector<2x128xf32>
    %1619 = arith.addf %1617, %1618 : vector<2x128xf32>
    %1620 = tpu.reciprocal %1619 {approx = true} : vector<2x128xf32> -> vector<2x128xf32>
    %1621 = arith.mulf %1615, %1620 : vector<2x128xf32>
    %1622 = math.log %1621 : vector<2x128xf32>
    %1623 = math.absf %1622 : vector<2x128xf32>
    %1624 = arith.addf %1388, %1623 : vector<2x128xf32>
    %1625 = vector.broadcast %119 : f32 to vector<2x128xf32>
    %1626 = arith.mulf %1625, %1431 : vector<2x128xf32>
    %cst_555 = arith.constant 1.000000e+00 : f32
    %1627 = vector.broadcast %cst_555 : f32 to vector<2x128xf32>
    %1628 = arith.subf %1627, %425 : vector<2x128xf32>
    %1629 = arith.mulf %1628, %1463 : vector<2x128xf32>
    %1630 = arith.addf %425, %1629 : vector<2x128xf32>
    %cst_556 = arith.constant 1.000000e+00 : f32
    %1631 = vector.broadcast %cst_556 : f32 to vector<2x128xf32>
    %1632 = arith.subf %1631, %431 : vector<2x128xf32>
    %1633 = arith.mulf %1632, %1463 : vector<2x128xf32>
    %1634 = arith.addf %431, %1633 : vector<2x128xf32>
    %cst_557 = arith.constant 1.000000e+00 : f32
    %1635 = vector.broadcast %cst_557 : f32 to vector<2x128xf32>
    %1636 = arith.subf %1635, %425 : vector<2x128xf32>
    %cst_558 = arith.constant 0.318309873 : f32
    %1637 = vector.broadcast %cst_558 : f32 to vector<2x128xf32>
    %1638 = arith.mulf %1636, %1637 : vector<2x128xf32>
    %1639 = arith.mulf %413, %1638 : vector<2x128xf32>
    %cst_559 = arith.constant 2.500000e-01 : f32
    %1640 = vector.broadcast %cst_559 : f32 to vector<2x128xf32>
    %1641 = arith.mulf %1640, %1547 : vector<2x128xf32>
    %1642 = arith.mulf %1641, %1630 : vector<2x128xf32>
    %1643 = arith.addf %1639, %1642 : vector<2x128xf32>
    %cst_560 = arith.constant 1.000000e+00 : f32
    %1644 = vector.broadcast %cst_560 : f32 to vector<2x128xf32>
    %1645 = arith.subf %1644, %431 : vector<2x128xf32>
    %cst_561 = arith.constant 0.318309873 : f32
    %1646 = vector.broadcast %cst_561 : f32 to vector<2x128xf32>
    %1647 = arith.mulf %1645, %1646 : vector<2x128xf32>
    %1648 = arith.mulf %419, %1647 : vector<2x128xf32>
    %cst_562 = arith.constant 2.500000e-01 : f32
    %1649 = vector.broadcast %cst_562 : f32 to vector<2x128xf32>
    %1650 = arith.mulf %1649, %1583 : vector<2x128xf32>
    %1651 = arith.mulf %1650, %1634 : vector<2x128xf32>
    %1652 = arith.addf %1648, %1651 : vector<2x128xf32>
    %1653 = arith.mulf %1643, %1487 : vector<2x128xf32>
    %1654 = arith.mulf %1653, %1626 : vector<2x128xf32>
    %cst_563 = arith.constant 1.000000e-01 : f32
    %1655 = vector.broadcast %cst_563 : f32 to vector<2x128xf32>
    %1656 = arith.addf %1654, %1655 : vector<2x128xf32>
    %1657 = arith.mulf %1652, %1511 : vector<2x128xf32>
    %1658 = arith.mulf %1657, %1626 : vector<2x128xf32>
    %cst_564 = arith.constant 1.000000e-01 : f32
    %1659 = vector.broadcast %cst_564 : f32 to vector<2x128xf32>
    %1660 = arith.addf %1658, %1659 : vector<2x128xf32>
    %1661 = tpu.reciprocal %1660 {approx = true} : vector<2x128xf32> -> vector<2x128xf32>
    %1662 = arith.mulf %1656, %1661 : vector<2x128xf32>
    %1663 = math.log %1662 : vector<2x128xf32>
    %1664 = math.absf %1663 : vector<2x128xf32>
    %1665 = arith.addf %1624, %1664 : vector<2x128xf32>
    %1666 = vector.broadcast %122 : f32 to vector<2x128xf32>
    %1667 = arith.mulf %1666, %1431 : vector<2x128xf32>
    %cst_565 = arith.constant 1.000000e+00 : f32
    %1668 = vector.broadcast %cst_565 : f32 to vector<2x128xf32>
    %1669 = arith.subf %1668, %427 : vector<2x128xf32>
    %1670 = arith.mulf %1669, %1463 : vector<2x128xf32>
    %1671 = arith.addf %427, %1670 : vector<2x128xf32>
    %cst_566 = arith.constant 1.000000e+00 : f32
    %1672 = vector.broadcast %cst_566 : f32 to vector<2x128xf32>
    %1673 = arith.subf %1672, %433 : vector<2x128xf32>
    %1674 = arith.mulf %1673, %1463 : vector<2x128xf32>
    %1675 = arith.addf %433, %1674 : vector<2x128xf32>
    %cst_567 = arith.constant 1.000000e+00 : f32
    %1676 = vector.broadcast %cst_567 : f32 to vector<2x128xf32>
    %1677 = arith.subf %1676, %427 : vector<2x128xf32>
    %cst_568 = arith.constant 0.318309873 : f32
    %1678 = vector.broadcast %cst_568 : f32 to vector<2x128xf32>
    %1679 = arith.mulf %1677, %1678 : vector<2x128xf32>
    %1680 = arith.mulf %415, %1679 : vector<2x128xf32>
    %cst_569 = arith.constant 2.500000e-01 : f32
    %1681 = vector.broadcast %cst_569 : f32 to vector<2x128xf32>
    %1682 = arith.mulf %1681, %1547 : vector<2x128xf32>
    %1683 = arith.mulf %1682, %1671 : vector<2x128xf32>
    %1684 = arith.addf %1680, %1683 : vector<2x128xf32>
    %cst_570 = arith.constant 1.000000e+00 : f32
    %1685 = vector.broadcast %cst_570 : f32 to vector<2x128xf32>
    %1686 = arith.subf %1685, %433 : vector<2x128xf32>
    %cst_571 = arith.constant 0.318309873 : f32
    %1687 = vector.broadcast %cst_571 : f32 to vector<2x128xf32>
    %1688 = arith.mulf %1686, %1687 : vector<2x128xf32>
    %1689 = arith.mulf %421, %1688 : vector<2x128xf32>
    %cst_572 = arith.constant 2.500000e-01 : f32
    %1690 = vector.broadcast %cst_572 : f32 to vector<2x128xf32>
    %1691 = arith.mulf %1690, %1583 : vector<2x128xf32>
    %1692 = arith.mulf %1691, %1675 : vector<2x128xf32>
    %1693 = arith.addf %1689, %1692 : vector<2x128xf32>
    %1694 = arith.mulf %1684, %1487 : vector<2x128xf32>
    %1695 = arith.mulf %1694, %1667 : vector<2x128xf32>
    %cst_573 = arith.constant 1.000000e-01 : f32
    %1696 = vector.broadcast %cst_573 : f32 to vector<2x128xf32>
    %1697 = arith.addf %1695, %1696 : vector<2x128xf32>
    %1698 = arith.mulf %1693, %1511 : vector<2x128xf32>
    %1699 = arith.mulf %1698, %1667 : vector<2x128xf32>
    %cst_574 = arith.constant 1.000000e-01 : f32
    %1700 = vector.broadcast %cst_574 : f32 to vector<2x128xf32>
    %1701 = arith.addf %1699, %1700 : vector<2x128xf32>
    %1702 = tpu.reciprocal %1701 {approx = true} : vector<2x128xf32> -> vector<2x128xf32>
    %1703 = arith.mulf %1697, %1702 : vector<2x128xf32>
    %1704 = math.log %1703 : vector<2x128xf32>
    %1705 = math.absf %1704 : vector<2x128xf32>
    %1706 = arith.addf %1665, %1705 : vector<2x128xf32>
    %1707 = vector.broadcast %128 : f32 to vector<2x128xf32>
    %1708 = arith.subf %1707, %274 : vector<2x128xf32>
    %1709 = vector.broadcast %131 : f32 to vector<2x128xf32>
    %1710 = arith.subf %1709, %276 : vector<2x128xf32>
    %1711 = arith.mulf %1708, %1708 : vector<2x128xf32>
    %1712 = arith.mulf %1710, %1710 : vector<2x128xf32>
    %1713 = arith.addf %1711, %1712 : vector<2x128xf32>
    %1714 = arith.mulf %134, %134 : f32
    %1715 = vector.broadcast %1714 : f32 to vector<2x128xf32>
    %1716 = arith.addf %1713, %1715 : vector<2x128xf32>
    %cst_575 = arith.constant 9.99999996E-13 : f32
    %1717 = vector.broadcast %cst_575 : f32 to vector<2x128xf32>
    %1718 = arith.addf %1716, %1717 : vector<2x128xf32>
    %1719 = math.rsqrt %1718 : vector<2x128xf32>
    %1720 = arith.mulf %1708, %1719 : vector<2x128xf32>
    %1721 = arith.mulf %1710, %1719 : vector<2x128xf32>
    %1722 = vector.broadcast %134 : f32 to vector<2x128xf32>
    %1723 = arith.mulf %1722, %1719 : vector<2x128xf32>
    %1724 = vector.broadcast %137 : f32 to vector<2x128xf32>
    %1725 = arith.subf %1724, %274 : vector<2x128xf32>
    %1726 = vector.broadcast %140 : f32 to vector<2x128xf32>
    %1727 = arith.subf %1726, %276 : vector<2x128xf32>
    %1728 = arith.mulf %1725, %1725 : vector<2x128xf32>
    %1729 = arith.mulf %1727, %1727 : vector<2x128xf32>
    %1730 = arith.addf %1728, %1729 : vector<2x128xf32>
    %1731 = arith.mulf %143, %143 : f32
    %1732 = vector.broadcast %1731 : f32 to vector<2x128xf32>
    %1733 = arith.addf %1730, %1732 : vector<2x128xf32>
    %cst_576 = arith.constant 9.99999996E-13 : f32
    %1734 = vector.broadcast %cst_576 : f32 to vector<2x128xf32>
    %1735 = arith.addf %1733, %1734 : vector<2x128xf32>
    %1736 = math.rsqrt %1735 : vector<2x128xf32>
    %1737 = arith.mulf %1725, %1736 : vector<2x128xf32>
    %1738 = arith.mulf %1727, %1736 : vector<2x128xf32>
    %1739 = vector.broadcast %143 : f32 to vector<2x128xf32>
    %1740 = arith.mulf %1739, %1736 : vector<2x128xf32>
    %1741 = arith.mulf %1725, %1725 : vector<2x128xf32>
    %1742 = arith.mulf %1727, %1727 : vector<2x128xf32>
    %1743 = arith.addf %1741, %1742 : vector<2x128xf32>
    %1744 = arith.mulf %143, %143 : f32
    %1745 = vector.broadcast %1744 : f32 to vector<2x128xf32>
    %1746 = arith.addf %1743, %1745 : vector<2x128xf32>
    %cst_577 = arith.constant 9.99999996E-13 : f32
    %1747 = vector.broadcast %cst_577 : f32 to vector<2x128xf32>
    %1748 = arith.maximumf %1746, %1747 : vector<2x128xf32>
    %1749 = tpu.reciprocal %1748 {approx = true} : vector<2x128xf32> -> vector<2x128xf32>
    %1750 = arith.addf %1737, %1720 : vector<2x128xf32>
    %cst_578 = arith.constant 5.000000e-01 : f32
    %1751 = vector.broadcast %cst_578 : f32 to vector<2x128xf32>
    %1752 = arith.mulf %1750, %1751 : vector<2x128xf32>
    %1753 = arith.addf %1738, %1721 : vector<2x128xf32>
    %cst_579 = arith.constant 5.000000e-01 : f32
    %1754 = vector.broadcast %cst_579 : f32 to vector<2x128xf32>
    %1755 = arith.mulf %1753, %1754 : vector<2x128xf32>
    %1756 = arith.addf %1740, %1723 : vector<2x128xf32>
    %cst_580 = arith.constant 5.000000e-01 : f32
    %1757 = vector.broadcast %cst_580 : f32 to vector<2x128xf32>
    %1758 = arith.mulf %1756, %1757 : vector<2x128xf32>
    %1759 = arith.mulf %1752, %1752 : vector<2x128xf32>
    %1760 = arith.mulf %1755, %1755 : vector<2x128xf32>
    %1761 = arith.addf %1759, %1760 : vector<2x128xf32>
    %1762 = arith.mulf %1758, %1758 : vector<2x128xf32>
    %1763 = arith.addf %1761, %1762 : vector<2x128xf32>
    %cst_581 = arith.constant 9.99999996E-13 : f32
    %1764 = vector.broadcast %cst_581 : f32 to vector<2x128xf32>
    %1765 = arith.addf %1763, %1764 : vector<2x128xf32>
    %1766 = math.rsqrt %1765 : vector<2x128xf32>
    %1767 = arith.mulf %1752, %1766 : vector<2x128xf32>
    %1768 = arith.mulf %1755, %1766 : vector<2x128xf32>
    %1769 = arith.mulf %1758, %1766 : vector<2x128xf32>
    %1770 = arith.mulf %1720, %1767 : vector<2x128xf32>
    %1771 = arith.mulf %1721, %1768 : vector<2x128xf32>
    %1772 = arith.addf %1770, %1771 : vector<2x128xf32>
    %1773 = arith.mulf %1723, %1769 : vector<2x128xf32>
    %1774 = arith.addf %1772, %1773 : vector<2x128xf32>
    %cst_582 = arith.constant 1.000000e-03 : f32
    %1775 = vector.broadcast %cst_582 : f32 to vector<2x128xf32>
    %1776 = arith.maximumf %1774, %1775 : vector<2x128xf32>
    %cst_583 = arith.constant 1.000000e+00 : f32
    %1777 = vector.broadcast %cst_583 : f32 to vector<2x128xf32>
    %1778 = arith.subf %1777, %1776 : vector<2x128xf32>
    %1779 = arith.mulf %1778, %1778 : vector<2x128xf32>
    %1780 = arith.mulf %1779, %1779 : vector<2x128xf32>
    %1781 = arith.mulf %1780, %1778 : vector<2x128xf32>
    %1782 = arith.mulf %399, %1767 : vector<2x128xf32>
    %1783 = arith.mulf %401, %1768 : vector<2x128xf32>
    %1784 = arith.addf %1782, %1783 : vector<2x128xf32>
    %1785 = arith.mulf %403, %1769 : vector<2x128xf32>
    %1786 = arith.addf %1784, %1785 : vector<2x128xf32>
    %cst_584 = arith.constant 1.000000e-03 : f32
    %1787 = vector.broadcast %cst_584 : f32 to vector<2x128xf32>
    %1788 = arith.maximumf %1786, %1787 : vector<2x128xf32>
    %1789 = arith.mulf %399, %1720 : vector<2x128xf32>
    %1790 = arith.mulf %401, %1721 : vector<2x128xf32>
    %1791 = arith.addf %1789, %1790 : vector<2x128xf32>
    %1792 = arith.mulf %403, %1723 : vector<2x128xf32>
    %1793 = arith.addf %1791, %1792 : vector<2x128xf32>
    %cst_585 = arith.constant 1.000000e-03 : f32
    %1794 = vector.broadcast %cst_585 : f32 to vector<2x128xf32>
    %1795 = arith.maximumf %1793, %1794 : vector<2x128xf32>
    %1796 = arith.mulf %399, %1737 : vector<2x128xf32>
    %1797 = arith.mulf %401, %1738 : vector<2x128xf32>
    %1798 = arith.addf %1796, %1797 : vector<2x128xf32>
    %1799 = arith.mulf %403, %1740 : vector<2x128xf32>
    %1800 = arith.addf %1798, %1799 : vector<2x128xf32>
    %1801 = arith.mulf %1788, %1788 : vector<2x128xf32>
    %cst_586 = arith.constant 1.000000e-03 : f32
    %1802 = vector.broadcast %cst_586 : f32 to vector<2x128xf32>
    %1803 = arith.maximumf %1800, %1802 : vector<2x128xf32>
    %cst_587 = arith.constant 0.000000e+00 : f32
    %1804 = vector.broadcast %cst_587 : f32 to vector<2x128xf32>
    %1805 = arith.maximumf %1800, %1804 : vector<2x128xf32>
    %1806 = arith.mulf %405, %1767 : vector<2x128xf32>
    %1807 = arith.mulf %407, %1768 : vector<2x128xf32>
    %1808 = arith.addf %1806, %1807 : vector<2x128xf32>
    %1809 = arith.mulf %409, %1769 : vector<2x128xf32>
    %1810 = arith.addf %1808, %1809 : vector<2x128xf32>
    %cst_588 = arith.constant 1.000000e-03 : f32
    %1811 = vector.broadcast %cst_588 : f32 to vector<2x128xf32>
    %1812 = arith.maximumf %1810, %1811 : vector<2x128xf32>
    %1813 = arith.mulf %405, %1720 : vector<2x128xf32>
    %1814 = arith.mulf %407, %1721 : vector<2x128xf32>
    %1815 = arith.addf %1813, %1814 : vector<2x128xf32>
    %1816 = arith.mulf %409, %1723 : vector<2x128xf32>
    %1817 = arith.addf %1815, %1816 : vector<2x128xf32>
    %cst_589 = arith.constant 1.000000e-03 : f32
    %1818 = vector.broadcast %cst_589 : f32 to vector<2x128xf32>
    %1819 = arith.maximumf %1817, %1818 : vector<2x128xf32>
    %1820 = arith.mulf %405, %1737 : vector<2x128xf32>
    %1821 = arith.mulf %407, %1738 : vector<2x128xf32>
    %1822 = arith.addf %1820, %1821 : vector<2x128xf32>
    %1823 = arith.mulf %409, %1740 : vector<2x128xf32>
    %1824 = arith.addf %1822, %1823 : vector<2x128xf32>
    %1825 = arith.mulf %1812, %1812 : vector<2x128xf32>
    %cst_590 = arith.constant 1.000000e-03 : f32
    %1826 = vector.broadcast %cst_590 : f32 to vector<2x128xf32>
    %1827 = arith.maximumf %1824, %1826 : vector<2x128xf32>
    %cst_591 = arith.constant 0.000000e+00 : f32
    %1828 = vector.broadcast %cst_591 : f32 to vector<2x128xf32>
    %1829 = arith.maximumf %1824, %1828 : vector<2x128xf32>
    %c0_592 = arith.constant 0 : index
    %c6_593 = arith.constant 6 : index
    %c0_594 = arith.constant 0 : index
    %c0_595 = arith.constant 0 : index
    %1830 = vector.load %arg5[%c0_592, %c6_593, %c0_594, %c0_595] : memref<1x12x2x128xf32, #tpu.memory_space<vmem>>, vector<1x1x2x128xf32>
    %1831 = vector.shape_cast %1830 : vector<1x1x2x128xf32> to vector<2x128xf32>
    %1832 = arith.mulf %1831, %1831 : vector<2x128xf32>
    %1833 = arith.mulf %1832, %1832 : vector<2x128xf32>
    %cst_596 = arith.constant 1.000000e+00 : f32
    %1834 = vector.broadcast %cst_596 : f32 to vector<2x128xf32>
    %1835 = arith.subf %1833, %1834 : vector<2x128xf32>
    %1836 = arith.mulf %1801, %1835 : vector<2x128xf32>
    %cst_597 = arith.constant 1.000000e+00 : f32
    %1837 = vector.broadcast %cst_597 : f32 to vector<2x128xf32>
    %1838 = arith.addf %1836, %1837 : vector<2x128xf32>
    %cst_598 = arith.constant 1.000000e-03 : f32
    %1839 = vector.broadcast %cst_598 : f32 to vector<2x128xf32>
    %1840 = arith.maximumf %1838, %1839 : vector<2x128xf32>
    %cst_599 = arith.constant 3.14159274 : f32
    %1841 = vector.broadcast %cst_599 : f32 to vector<2x128xf32>
    %1842 = arith.mulf %1841, %1840 : vector<2x128xf32>
    %1843 = arith.mulf %1842, %1840 : vector<2x128xf32>
    %1844 = tpu.reciprocal %1843 {approx = true} : vector<2x128xf32> -> vector<2x128xf32>
    %1845 = arith.mulf %1833, %1844 : vector<2x128xf32>
    %cst_600 = arith.constant 5.000000e-01 : f32
    %1846 = vector.broadcast %cst_600 : f32 to vector<2x128xf32>
    %1847 = arith.mulf %1832, %1846 : vector<2x128xf32>
    %cst_601 = arith.constant 9.99999974E-5 : f32
    %1848 = vector.broadcast %cst_601 : f32 to vector<2x128xf32>
    %1849 = arith.maximumf %1847, %1848 : vector<2x128xf32>
    %cst_602 = arith.constant 1.000000e+00 : f32
    %1850 = vector.broadcast %cst_602 : f32 to vector<2x128xf32>
    %1851 = arith.subf %1850, %1849 : vector<2x128xf32>
    %1852 = arith.mulf %1803, %1851 : vector<2x128xf32>
    %1853 = arith.addf %1852, %1849 : vector<2x128xf32>
    %cst_603 = arith.constant 1.000000e-03 : f32
    %1854 = vector.broadcast %cst_603 : f32 to vector<2x128xf32>
    %1855 = arith.maximumf %1853, %1854 : vector<2x128xf32>
    %1856 = tpu.reciprocal %1855 {approx = true} : vector<2x128xf32> -> vector<2x128xf32>
    %cst_604 = arith.constant 1.000000e+00 : f32
    %1857 = vector.broadcast %cst_604 : f32 to vector<2x128xf32>
    %1858 = arith.subf %1857, %1849 : vector<2x128xf32>
    %1859 = arith.mulf %1795, %1858 : vector<2x128xf32>
    %1860 = arith.addf %1859, %1849 : vector<2x128xf32>
    %cst_605 = arith.constant 1.000000e-03 : f32
    %1861 = vector.broadcast %cst_605 : f32 to vector<2x128xf32>
    %1862 = arith.maximumf %1860, %1861 : vector<2x128xf32>
    %1863 = tpu.reciprocal %1862 {approx = true} : vector<2x128xf32> -> vector<2x128xf32>
    %1864 = arith.mulf %1845, %1856 : vector<2x128xf32>
    %1865 = arith.mulf %1864, %1863 : vector<2x128xf32>
    %c0_606 = arith.constant 0 : index
    %c6_607 = arith.constant 6 : index
    %c0_608 = arith.constant 0 : index
    %c0_609 = arith.constant 0 : index
    %1866 = vector.load %arg6[%c0_606, %c6_607, %c0_608, %c0_609] : memref<1x12x2x128xf32, #tpu.memory_space<vmem>>, vector<1x1x2x128xf32>
    %1867 = vector.shape_cast %1866 : vector<1x1x2x128xf32> to vector<2x128xf32>
    %1868 = arith.mulf %1867, %1867 : vector<2x128xf32>
    %1869 = arith.mulf %1868, %1868 : vector<2x128xf32>
    %cst_610 = arith.constant 1.000000e+00 : f32
    %1870 = vector.broadcast %cst_610 : f32 to vector<2x128xf32>
    %1871 = arith.subf %1869, %1870 : vector<2x128xf32>
    %1872 = arith.mulf %1825, %1871 : vector<2x128xf32>
    %cst_611 = arith.constant 1.000000e+00 : f32
    %1873 = vector.broadcast %cst_611 : f32 to vector<2x128xf32>
    %1874 = arith.addf %1872, %1873 : vector<2x128xf32>
    %cst_612 = arith.constant 1.000000e-03 : f32
    %1875 = vector.broadcast %cst_612 : f32 to vector<2x128xf32>
    %1876 = arith.maximumf %1874, %1875 : vector<2x128xf32>
    %cst_613 = arith.constant 3.14159274 : f32
    %1877 = vector.broadcast %cst_613 : f32 to vector<2x128xf32>
    %1878 = arith.mulf %1877, %1876 : vector<2x128xf32>
    %1879 = arith.mulf %1878, %1876 : vector<2x128xf32>
    %1880 = tpu.reciprocal %1879 {approx = true} : vector<2x128xf32> -> vector<2x128xf32>
    %1881 = arith.mulf %1869, %1880 : vector<2x128xf32>
    %cst_614 = arith.constant 5.000000e-01 : f32
    %1882 = vector.broadcast %cst_614 : f32 to vector<2x128xf32>
    %1883 = arith.mulf %1868, %1882 : vector<2x128xf32>
    %cst_615 = arith.constant 9.99999974E-5 : f32
    %1884 = vector.broadcast %cst_615 : f32 to vector<2x128xf32>
    %1885 = arith.maximumf %1883, %1884 : vector<2x128xf32>
    %cst_616 = arith.constant 1.000000e+00 : f32
    %1886 = vector.broadcast %cst_616 : f32 to vector<2x128xf32>
    %1887 = arith.subf %1886, %1885 : vector<2x128xf32>
    %1888 = arith.mulf %1827, %1887 : vector<2x128xf32>
    %1889 = arith.addf %1888, %1885 : vector<2x128xf32>
    %cst_617 = arith.constant 1.000000e-03 : f32
    %1890 = vector.broadcast %cst_617 : f32 to vector<2x128xf32>
    %1891 = arith.maximumf %1889, %1890 : vector<2x128xf32>
    %1892 = tpu.reciprocal %1891 {approx = true} : vector<2x128xf32> -> vector<2x128xf32>
    %cst_618 = arith.constant 1.000000e+00 : f32
    %1893 = vector.broadcast %cst_618 : f32 to vector<2x128xf32>
    %1894 = arith.subf %1893, %1885 : vector<2x128xf32>
    %1895 = arith.mulf %1819, %1894 : vector<2x128xf32>
    %1896 = arith.addf %1895, %1885 : vector<2x128xf32>
    %cst_619 = arith.constant 1.000000e-03 : f32
    %1897 = vector.broadcast %cst_619 : f32 to vector<2x128xf32>
    %1898 = arith.maximumf %1896, %1897 : vector<2x128xf32>
    %1899 = tpu.reciprocal %1898 {approx = true} : vector<2x128xf32> -> vector<2x128xf32>
    %1900 = arith.mulf %1881, %1892 : vector<2x128xf32>
    %1901 = arith.mulf %1900, %1899 : vector<2x128xf32>
    %1902 = vector.broadcast %146 : f32 to vector<2x128xf32>
    %1903 = arith.mulf %1902, %1749 : vector<2x128xf32>
    %cst_620 = arith.constant 1.000000e+00 : f32
    %1904 = vector.broadcast %cst_620 : f32 to vector<2x128xf32>
    %1905 = arith.subf %1904, %423 : vector<2x128xf32>
    %1906 = arith.mulf %1905, %1781 : vector<2x128xf32>
    %1907 = arith.addf %423, %1906 : vector<2x128xf32>
    %cst_621 = arith.constant 1.000000e+00 : f32
    %1908 = vector.broadcast %cst_621 : f32 to vector<2x128xf32>
    %1909 = arith.subf %1908, %429 : vector<2x128xf32>
    %1910 = arith.mulf %1909, %1781 : vector<2x128xf32>
    %1911 = arith.addf %429, %1910 : vector<2x128xf32>
    %cst_622 = arith.constant 1.000000e+00 : f32
    %1912 = vector.broadcast %cst_622 : f32 to vector<2x128xf32>
    %1913 = arith.subf %1912, %423 : vector<2x128xf32>
    %cst_623 = arith.constant 0.318309873 : f32
    %1914 = vector.broadcast %cst_623 : f32 to vector<2x128xf32>
    %1915 = arith.mulf %1913, %1914 : vector<2x128xf32>
    %1916 = arith.mulf %411, %1915 : vector<2x128xf32>
    %cst_624 = arith.constant 2.500000e-01 : f32
    %1917 = vector.broadcast %cst_624 : f32 to vector<2x128xf32>
    %1918 = arith.mulf %1917, %1865 : vector<2x128xf32>
    %1919 = arith.mulf %1918, %1907 : vector<2x128xf32>
    %1920 = arith.addf %1916, %1919 : vector<2x128xf32>
    %cst_625 = arith.constant 1.000000e+00 : f32
    %1921 = vector.broadcast %cst_625 : f32 to vector<2x128xf32>
    %1922 = arith.subf %1921, %429 : vector<2x128xf32>
    %cst_626 = arith.constant 0.318309873 : f32
    %1923 = vector.broadcast %cst_626 : f32 to vector<2x128xf32>
    %1924 = arith.mulf %1922, %1923 : vector<2x128xf32>
    %1925 = arith.mulf %417, %1924 : vector<2x128xf32>
    %cst_627 = arith.constant 2.500000e-01 : f32
    %1926 = vector.broadcast %cst_627 : f32 to vector<2x128xf32>
    %1927 = arith.mulf %1926, %1901 : vector<2x128xf32>
    %1928 = arith.mulf %1927, %1911 : vector<2x128xf32>
    %1929 = arith.addf %1925, %1928 : vector<2x128xf32>
    %1930 = arith.mulf %1920, %1805 : vector<2x128xf32>
    %1931 = arith.mulf %1930, %1903 : vector<2x128xf32>
    %cst_628 = arith.constant 1.000000e-01 : f32
    %1932 = vector.broadcast %cst_628 : f32 to vector<2x128xf32>
    %1933 = arith.addf %1931, %1932 : vector<2x128xf32>
    %1934 = arith.mulf %1929, %1829 : vector<2x128xf32>
    %1935 = arith.mulf %1934, %1903 : vector<2x128xf32>
    %cst_629 = arith.constant 1.000000e-01 : f32
    %1936 = vector.broadcast %cst_629 : f32 to vector<2x128xf32>
    %1937 = arith.addf %1935, %1936 : vector<2x128xf32>
    %1938 = tpu.reciprocal %1937 {approx = true} : vector<2x128xf32> -> vector<2x128xf32>
    %1939 = arith.mulf %1933, %1938 : vector<2x128xf32>
    %1940 = math.log %1939 : vector<2x128xf32>
    %1941 = math.absf %1940 : vector<2x128xf32>
    %1942 = arith.addf %1706, %1941 : vector<2x128xf32>
    %1943 = vector.broadcast %149 : f32 to vector<2x128xf32>
    %1944 = arith.mulf %1943, %1749 : vector<2x128xf32>
    %cst_630 = arith.constant 1.000000e+00 : f32
    %1945 = vector.broadcast %cst_630 : f32 to vector<2x128xf32>
    %1946 = arith.subf %1945, %425 : vector<2x128xf32>
    %1947 = arith.mulf %1946, %1781 : vector<2x128xf32>
    %1948 = arith.addf %425, %1947 : vector<2x128xf32>
    %cst_631 = arith.constant 1.000000e+00 : f32
    %1949 = vector.broadcast %cst_631 : f32 to vector<2x128xf32>
    %1950 = arith.subf %1949, %431 : vector<2x128xf32>
    %1951 = arith.mulf %1950, %1781 : vector<2x128xf32>
    %1952 = arith.addf %431, %1951 : vector<2x128xf32>
    %cst_632 = arith.constant 1.000000e+00 : f32
    %1953 = vector.broadcast %cst_632 : f32 to vector<2x128xf32>
    %1954 = arith.subf %1953, %425 : vector<2x128xf32>
    %cst_633 = arith.constant 0.318309873 : f32
    %1955 = vector.broadcast %cst_633 : f32 to vector<2x128xf32>
    %1956 = arith.mulf %1954, %1955 : vector<2x128xf32>
    %1957 = arith.mulf %413, %1956 : vector<2x128xf32>
    %cst_634 = arith.constant 2.500000e-01 : f32
    %1958 = vector.broadcast %cst_634 : f32 to vector<2x128xf32>
    %1959 = arith.mulf %1958, %1865 : vector<2x128xf32>
    %1960 = arith.mulf %1959, %1948 : vector<2x128xf32>
    %1961 = arith.addf %1957, %1960 : vector<2x128xf32>
    %cst_635 = arith.constant 1.000000e+00 : f32
    %1962 = vector.broadcast %cst_635 : f32 to vector<2x128xf32>
    %1963 = arith.subf %1962, %431 : vector<2x128xf32>
    %cst_636 = arith.constant 0.318309873 : f32
    %1964 = vector.broadcast %cst_636 : f32 to vector<2x128xf32>
    %1965 = arith.mulf %1963, %1964 : vector<2x128xf32>
    %1966 = arith.mulf %419, %1965 : vector<2x128xf32>
    %cst_637 = arith.constant 2.500000e-01 : f32
    %1967 = vector.broadcast %cst_637 : f32 to vector<2x128xf32>
    %1968 = arith.mulf %1967, %1901 : vector<2x128xf32>
    %1969 = arith.mulf %1968, %1952 : vector<2x128xf32>
    %1970 = arith.addf %1966, %1969 : vector<2x128xf32>
    %1971 = arith.mulf %1961, %1805 : vector<2x128xf32>
    %1972 = arith.mulf %1971, %1944 : vector<2x128xf32>
    %cst_638 = arith.constant 1.000000e-01 : f32
    %1973 = vector.broadcast %cst_638 : f32 to vector<2x128xf32>
    %1974 = arith.addf %1972, %1973 : vector<2x128xf32>
    %1975 = arith.mulf %1970, %1829 : vector<2x128xf32>
    %1976 = arith.mulf %1975, %1944 : vector<2x128xf32>
    %cst_639 = arith.constant 1.000000e-01 : f32
    %1977 = vector.broadcast %cst_639 : f32 to vector<2x128xf32>
    %1978 = arith.addf %1976, %1977 : vector<2x128xf32>
    %1979 = tpu.reciprocal %1978 {approx = true} : vector<2x128xf32> -> vector<2x128xf32>
    %1980 = arith.mulf %1974, %1979 : vector<2x128xf32>
    %1981 = math.log %1980 : vector<2x128xf32>
    %1982 = math.absf %1981 : vector<2x128xf32>
    %1983 = arith.addf %1942, %1982 : vector<2x128xf32>
    %1984 = vector.broadcast %152 : f32 to vector<2x128xf32>
    %1985 = arith.mulf %1984, %1749 : vector<2x128xf32>
    %cst_640 = arith.constant 1.000000e+00 : f32
    %1986 = vector.broadcast %cst_640 : f32 to vector<2x128xf32>
    %1987 = arith.subf %1986, %427 : vector<2x128xf32>
    %1988 = arith.mulf %1987, %1781 : vector<2x128xf32>
    %1989 = arith.addf %427, %1988 : vector<2x128xf32>
    %cst_641 = arith.constant 1.000000e+00 : f32
    %1990 = vector.broadcast %cst_641 : f32 to vector<2x128xf32>
    %1991 = arith.subf %1990, %433 : vector<2x128xf32>
    %1992 = arith.mulf %1991, %1781 : vector<2x128xf32>
    %1993 = arith.addf %433, %1992 : vector<2x128xf32>
    %cst_642 = arith.constant 1.000000e+00 : f32
    %1994 = vector.broadcast %cst_642 : f32 to vector<2x128xf32>
    %1995 = arith.subf %1994, %427 : vector<2x128xf32>
    %cst_643 = arith.constant 0.318309873 : f32
    %1996 = vector.broadcast %cst_643 : f32 to vector<2x128xf32>
    %1997 = arith.mulf %1995, %1996 : vector<2x128xf32>
    %1998 = arith.mulf %415, %1997 : vector<2x128xf32>
    %cst_644 = arith.constant 2.500000e-01 : f32
    %1999 = vector.broadcast %cst_644 : f32 to vector<2x128xf32>
    %2000 = arith.mulf %1999, %1865 : vector<2x128xf32>
    %2001 = arith.mulf %2000, %1989 : vector<2x128xf32>
    %2002 = arith.addf %1998, %2001 : vector<2x128xf32>
    %cst_645 = arith.constant 1.000000e+00 : f32
    %2003 = vector.broadcast %cst_645 : f32 to vector<2x128xf32>
    %2004 = arith.subf %2003, %433 : vector<2x128xf32>
    %cst_646 = arith.constant 0.318309873 : f32
    %2005 = vector.broadcast %cst_646 : f32 to vector<2x128xf32>
    %2006 = arith.mulf %2004, %2005 : vector<2x128xf32>
    %2007 = arith.mulf %421, %2006 : vector<2x128xf32>
    %cst_647 = arith.constant 2.500000e-01 : f32
    %2008 = vector.broadcast %cst_647 : f32 to vector<2x128xf32>
    %2009 = arith.mulf %2008, %1901 : vector<2x128xf32>
    %2010 = arith.mulf %2009, %1993 : vector<2x128xf32>
    %2011 = arith.addf %2007, %2010 : vector<2x128xf32>
    %2012 = arith.mulf %2002, %1805 : vector<2x128xf32>
    %2013 = arith.mulf %2012, %1985 : vector<2x128xf32>
    %cst_648 = arith.constant 1.000000e-01 : f32
    %2014 = vector.broadcast %cst_648 : f32 to vector<2x128xf32>
    %2015 = arith.addf %2013, %2014 : vector<2x128xf32>
    %2016 = arith.mulf %2011, %1829 : vector<2x128xf32>
    %2017 = arith.mulf %2016, %1985 : vector<2x128xf32>
    %cst_649 = arith.constant 1.000000e-01 : f32
    %2018 = vector.broadcast %cst_649 : f32 to vector<2x128xf32>
    %2019 = arith.addf %2017, %2018 : vector<2x128xf32>
    %2020 = tpu.reciprocal %2019 {approx = true} : vector<2x128xf32> -> vector<2x128xf32>
    %2021 = arith.mulf %2015, %2020 : vector<2x128xf32>
    %2022 = math.log %2021 : vector<2x128xf32>
    %2023 = math.absf %2022 : vector<2x128xf32>
    %2024 = arith.addf %1983, %2023 : vector<2x128xf32>
    %2025 = vector.broadcast %158 : f32 to vector<2x128xf32>
    %2026 = arith.subf %2025, %274 : vector<2x128xf32>
    %2027 = vector.broadcast %161 : f32 to vector<2x128xf32>
    %2028 = arith.subf %2027, %276 : vector<2x128xf32>
    %2029 = arith.mulf %2026, %2026 : vector<2x128xf32>
    %2030 = arith.mulf %2028, %2028 : vector<2x128xf32>
    %2031 = arith.addf %2029, %2030 : vector<2x128xf32>
    %2032 = arith.mulf %164, %164 : f32
    %2033 = vector.broadcast %2032 : f32 to vector<2x128xf32>
    %2034 = arith.addf %2031, %2033 : vector<2x128xf32>
    %cst_650 = arith.constant 9.99999996E-13 : f32
    %2035 = vector.broadcast %cst_650 : f32 to vector<2x128xf32>
    %2036 = arith.addf %2034, %2035 : vector<2x128xf32>
    %2037 = math.rsqrt %2036 : vector<2x128xf32>
    %2038 = arith.mulf %2026, %2037 : vector<2x128xf32>
    %2039 = arith.mulf %2028, %2037 : vector<2x128xf32>
    %2040 = vector.broadcast %164 : f32 to vector<2x128xf32>
    %2041 = arith.mulf %2040, %2037 : vector<2x128xf32>
    %2042 = vector.broadcast %167 : f32 to vector<2x128xf32>
    %2043 = arith.subf %2042, %274 : vector<2x128xf32>
    %2044 = vector.broadcast %170 : f32 to vector<2x128xf32>
    %2045 = arith.subf %2044, %276 : vector<2x128xf32>
    %2046 = arith.mulf %2043, %2043 : vector<2x128xf32>
    %2047 = arith.mulf %2045, %2045 : vector<2x128xf32>
    %2048 = arith.addf %2046, %2047 : vector<2x128xf32>
    %2049 = arith.mulf %173, %173 : f32
    %2050 = vector.broadcast %2049 : f32 to vector<2x128xf32>
    %2051 = arith.addf %2048, %2050 : vector<2x128xf32>
    %cst_651 = arith.constant 9.99999996E-13 : f32
    %2052 = vector.broadcast %cst_651 : f32 to vector<2x128xf32>
    %2053 = arith.addf %2051, %2052 : vector<2x128xf32>
    %2054 = math.rsqrt %2053 : vector<2x128xf32>
    %2055 = arith.mulf %2043, %2054 : vector<2x128xf32>
    %2056 = arith.mulf %2045, %2054 : vector<2x128xf32>
    %2057 = vector.broadcast %173 : f32 to vector<2x128xf32>
    %2058 = arith.mulf %2057, %2054 : vector<2x128xf32>
    %2059 = arith.mulf %2043, %2043 : vector<2x128xf32>
    %2060 = arith.mulf %2045, %2045 : vector<2x128xf32>
    %2061 = arith.addf %2059, %2060 : vector<2x128xf32>
    %2062 = arith.mulf %173, %173 : f32
    %2063 = vector.broadcast %2062 : f32 to vector<2x128xf32>
    %2064 = arith.addf %2061, %2063 : vector<2x128xf32>
    %cst_652 = arith.constant 9.99999996E-13 : f32
    %2065 = vector.broadcast %cst_652 : f32 to vector<2x128xf32>
    %2066 = arith.maximumf %2064, %2065 : vector<2x128xf32>
    %2067 = tpu.reciprocal %2066 {approx = true} : vector<2x128xf32> -> vector<2x128xf32>
    %2068 = arith.addf %2055, %2038 : vector<2x128xf32>
    %cst_653 = arith.constant 5.000000e-01 : f32
    %2069 = vector.broadcast %cst_653 : f32 to vector<2x128xf32>
    %2070 = arith.mulf %2068, %2069 : vector<2x128xf32>
    %2071 = arith.addf %2056, %2039 : vector<2x128xf32>
    %cst_654 = arith.constant 5.000000e-01 : f32
    %2072 = vector.broadcast %cst_654 : f32 to vector<2x128xf32>
    %2073 = arith.mulf %2071, %2072 : vector<2x128xf32>
    %2074 = arith.addf %2058, %2041 : vector<2x128xf32>
    %cst_655 = arith.constant 5.000000e-01 : f32
    %2075 = vector.broadcast %cst_655 : f32 to vector<2x128xf32>
    %2076 = arith.mulf %2074, %2075 : vector<2x128xf32>
    %2077 = arith.mulf %2070, %2070 : vector<2x128xf32>
    %2078 = arith.mulf %2073, %2073 : vector<2x128xf32>
    %2079 = arith.addf %2077, %2078 : vector<2x128xf32>
    %2080 = arith.mulf %2076, %2076 : vector<2x128xf32>
    %2081 = arith.addf %2079, %2080 : vector<2x128xf32>
    %cst_656 = arith.constant 9.99999996E-13 : f32
    %2082 = vector.broadcast %cst_656 : f32 to vector<2x128xf32>
    %2083 = arith.addf %2081, %2082 : vector<2x128xf32>
    %2084 = math.rsqrt %2083 : vector<2x128xf32>
    %2085 = arith.mulf %2070, %2084 : vector<2x128xf32>
    %2086 = arith.mulf %2073, %2084 : vector<2x128xf32>
    %2087 = arith.mulf %2076, %2084 : vector<2x128xf32>
    %2088 = arith.mulf %2038, %2085 : vector<2x128xf32>
    %2089 = arith.mulf %2039, %2086 : vector<2x128xf32>
    %2090 = arith.addf %2088, %2089 : vector<2x128xf32>
    %2091 = arith.mulf %2041, %2087 : vector<2x128xf32>
    %2092 = arith.addf %2090, %2091 : vector<2x128xf32>
    %cst_657 = arith.constant 1.000000e-03 : f32
    %2093 = vector.broadcast %cst_657 : f32 to vector<2x128xf32>
    %2094 = arith.maximumf %2092, %2093 : vector<2x128xf32>
    %cst_658 = arith.constant 1.000000e+00 : f32
    %2095 = vector.broadcast %cst_658 : f32 to vector<2x128xf32>
    %2096 = arith.subf %2095, %2094 : vector<2x128xf32>
    %2097 = arith.mulf %2096, %2096 : vector<2x128xf32>
    %2098 = arith.mulf %2097, %2097 : vector<2x128xf32>
    %2099 = arith.mulf %2098, %2096 : vector<2x128xf32>
    %2100 = arith.mulf %399, %2085 : vector<2x128xf32>
    %2101 = arith.mulf %401, %2086 : vector<2x128xf32>
    %2102 = arith.addf %2100, %2101 : vector<2x128xf32>
    %2103 = arith.mulf %403, %2087 : vector<2x128xf32>
    %2104 = arith.addf %2102, %2103 : vector<2x128xf32>
    %cst_659 = arith.constant 1.000000e-03 : f32
    %2105 = vector.broadcast %cst_659 : f32 to vector<2x128xf32>
    %2106 = arith.maximumf %2104, %2105 : vector<2x128xf32>
    %2107 = arith.mulf %399, %2038 : vector<2x128xf32>
    %2108 = arith.mulf %401, %2039 : vector<2x128xf32>
    %2109 = arith.addf %2107, %2108 : vector<2x128xf32>
    %2110 = arith.mulf %403, %2041 : vector<2x128xf32>
    %2111 = arith.addf %2109, %2110 : vector<2x128xf32>
    %cst_660 = arith.constant 1.000000e-03 : f32
    %2112 = vector.broadcast %cst_660 : f32 to vector<2x128xf32>
    %2113 = arith.maximumf %2111, %2112 : vector<2x128xf32>
    %2114 = arith.mulf %399, %2055 : vector<2x128xf32>
    %2115 = arith.mulf %401, %2056 : vector<2x128xf32>
    %2116 = arith.addf %2114, %2115 : vector<2x128xf32>
    %2117 = arith.mulf %403, %2058 : vector<2x128xf32>
    %2118 = arith.addf %2116, %2117 : vector<2x128xf32>
    %2119 = arith.mulf %2106, %2106 : vector<2x128xf32>
    %cst_661 = arith.constant 1.000000e-03 : f32
    %2120 = vector.broadcast %cst_661 : f32 to vector<2x128xf32>
    %2121 = arith.maximumf %2118, %2120 : vector<2x128xf32>
    %cst_662 = arith.constant 0.000000e+00 : f32
    %2122 = vector.broadcast %cst_662 : f32 to vector<2x128xf32>
    %2123 = arith.maximumf %2118, %2122 : vector<2x128xf32>
    %2124 = arith.mulf %405, %2085 : vector<2x128xf32>
    %2125 = arith.mulf %407, %2086 : vector<2x128xf32>
    %2126 = arith.addf %2124, %2125 : vector<2x128xf32>
    %2127 = arith.mulf %409, %2087 : vector<2x128xf32>
    %2128 = arith.addf %2126, %2127 : vector<2x128xf32>
    %cst_663 = arith.constant 1.000000e-03 : f32
    %2129 = vector.broadcast %cst_663 : f32 to vector<2x128xf32>
    %2130 = arith.maximumf %2128, %2129 : vector<2x128xf32>
    %2131 = arith.mulf %405, %2038 : vector<2x128xf32>
    %2132 = arith.mulf %407, %2039 : vector<2x128xf32>
    %2133 = arith.addf %2131, %2132 : vector<2x128xf32>
    %2134 = arith.mulf %409, %2041 : vector<2x128xf32>
    %2135 = arith.addf %2133, %2134 : vector<2x128xf32>
    %cst_664 = arith.constant 1.000000e-03 : f32
    %2136 = vector.broadcast %cst_664 : f32 to vector<2x128xf32>
    %2137 = arith.maximumf %2135, %2136 : vector<2x128xf32>
    %2138 = arith.mulf %405, %2055 : vector<2x128xf32>
    %2139 = arith.mulf %407, %2056 : vector<2x128xf32>
    %2140 = arith.addf %2138, %2139 : vector<2x128xf32>
    %2141 = arith.mulf %409, %2058 : vector<2x128xf32>
    %2142 = arith.addf %2140, %2141 : vector<2x128xf32>
    %2143 = arith.mulf %2130, %2130 : vector<2x128xf32>
    %cst_665 = arith.constant 1.000000e-03 : f32
    %2144 = vector.broadcast %cst_665 : f32 to vector<2x128xf32>
    %2145 = arith.maximumf %2142, %2144 : vector<2x128xf32>
    %cst_666 = arith.constant 0.000000e+00 : f32
    %2146 = vector.broadcast %cst_666 : f32 to vector<2x128xf32>
    %2147 = arith.maximumf %2142, %2146 : vector<2x128xf32>
    %c0_667 = arith.constant 0 : index
    %c6_668 = arith.constant 6 : index
    %c0_669 = arith.constant 0 : index
    %c0_670 = arith.constant 0 : index
    %2148 = vector.load %arg5[%c0_667, %c6_668, %c0_669, %c0_670] : memref<1x12x2x128xf32, #tpu.memory_space<vmem>>, vector<1x1x2x128xf32>
    %2149 = vector.shape_cast %2148 : vector<1x1x2x128xf32> to vector<2x128xf32>
    %2150 = arith.mulf %2149, %2149 : vector<2x128xf32>
    %2151 = arith.mulf %2150, %2150 : vector<2x128xf32>
    %cst_671 = arith.constant 1.000000e+00 : f32
    %2152 = vector.broadcast %cst_671 : f32 to vector<2x128xf32>
    %2153 = arith.subf %2151, %2152 : vector<2x128xf32>
    %2154 = arith.mulf %2119, %2153 : vector<2x128xf32>
    %cst_672 = arith.constant 1.000000e+00 : f32
    %2155 = vector.broadcast %cst_672 : f32 to vector<2x128xf32>
    %2156 = arith.addf %2154, %2155 : vector<2x128xf32>
    %cst_673 = arith.constant 1.000000e-03 : f32
    %2157 = vector.broadcast %cst_673 : f32 to vector<2x128xf32>
    %2158 = arith.maximumf %2156, %2157 : vector<2x128xf32>
    %cst_674 = arith.constant 3.14159274 : f32
    %2159 = vector.broadcast %cst_674 : f32 to vector<2x128xf32>
    %2160 = arith.mulf %2159, %2158 : vector<2x128xf32>
    %2161 = arith.mulf %2160, %2158 : vector<2x128xf32>
    %2162 = tpu.reciprocal %2161 {approx = true} : vector<2x128xf32> -> vector<2x128xf32>
    %2163 = arith.mulf %2151, %2162 : vector<2x128xf32>
    %cst_675 = arith.constant 5.000000e-01 : f32
    %2164 = vector.broadcast %cst_675 : f32 to vector<2x128xf32>
    %2165 = arith.mulf %2150, %2164 : vector<2x128xf32>
    %cst_676 = arith.constant 9.99999974E-5 : f32
    %2166 = vector.broadcast %cst_676 : f32 to vector<2x128xf32>
    %2167 = arith.maximumf %2165, %2166 : vector<2x128xf32>
    %cst_677 = arith.constant 1.000000e+00 : f32
    %2168 = vector.broadcast %cst_677 : f32 to vector<2x128xf32>
    %2169 = arith.subf %2168, %2167 : vector<2x128xf32>
    %2170 = arith.mulf %2121, %2169 : vector<2x128xf32>
    %2171 = arith.addf %2170, %2167 : vector<2x128xf32>
    %cst_678 = arith.constant 1.000000e-03 : f32
    %2172 = vector.broadcast %cst_678 : f32 to vector<2x128xf32>
    %2173 = arith.maximumf %2171, %2172 : vector<2x128xf32>
    %2174 = tpu.reciprocal %2173 {approx = true} : vector<2x128xf32> -> vector<2x128xf32>
    %cst_679 = arith.constant 1.000000e+00 : f32
    %2175 = vector.broadcast %cst_679 : f32 to vector<2x128xf32>
    %2176 = arith.subf %2175, %2167 : vector<2x128xf32>
    %2177 = arith.mulf %2113, %2176 : vector<2x128xf32>
    %2178 = arith.addf %2177, %2167 : vector<2x128xf32>
    %cst_680 = arith.constant 1.000000e-03 : f32
    %2179 = vector.broadcast %cst_680 : f32 to vector<2x128xf32>
    %2180 = arith.maximumf %2178, %2179 : vector<2x128xf32>
    %2181 = tpu.reciprocal %2180 {approx = true} : vector<2x128xf32> -> vector<2x128xf32>
    %2182 = arith.mulf %2163, %2174 : vector<2x128xf32>
    %2183 = arith.mulf %2182, %2181 : vector<2x128xf32>
    %c0_681 = arith.constant 0 : index
    %c6_682 = arith.constant 6 : index
    %c0_683 = arith.constant 0 : index
    %c0_684 = arith.constant 0 : index
    %2184 = vector.load %arg6[%c0_681, %c6_682, %c0_683, %c0_684] : memref<1x12x2x128xf32, #tpu.memory_space<vmem>>, vector<1x1x2x128xf32>
    %2185 = vector.shape_cast %2184 : vector<1x1x2x128xf32> to vector<2x128xf32>
    %2186 = arith.mulf %2185, %2185 : vector<2x128xf32>
    %2187 = arith.mulf %2186, %2186 : vector<2x128xf32>
    %cst_685 = arith.constant 1.000000e+00 : f32
    %2188 = vector.broadcast %cst_685 : f32 to vector<2x128xf32>
    %2189 = arith.subf %2187, %2188 : vector<2x128xf32>
    %2190 = arith.mulf %2143, %2189 : vector<2x128xf32>
    %cst_686 = arith.constant 1.000000e+00 : f32
    %2191 = vector.broadcast %cst_686 : f32 to vector<2x128xf32>
    %2192 = arith.addf %2190, %2191 : vector<2x128xf32>
    %cst_687 = arith.constant 1.000000e-03 : f32
    %2193 = vector.broadcast %cst_687 : f32 to vector<2x128xf32>
    %2194 = arith.maximumf %2192, %2193 : vector<2x128xf32>
    %cst_688 = arith.constant 3.14159274 : f32
    %2195 = vector.broadcast %cst_688 : f32 to vector<2x128xf32>
    %2196 = arith.mulf %2195, %2194 : vector<2x128xf32>
    %2197 = arith.mulf %2196, %2194 : vector<2x128xf32>
    %2198 = tpu.reciprocal %2197 {approx = true} : vector<2x128xf32> -> vector<2x128xf32>
    %2199 = arith.mulf %2187, %2198 : vector<2x128xf32>
    %cst_689 = arith.constant 5.000000e-01 : f32
    %2200 = vector.broadcast %cst_689 : f32 to vector<2x128xf32>
    %2201 = arith.mulf %2186, %2200 : vector<2x128xf32>
    %cst_690 = arith.constant 9.99999974E-5 : f32
    %2202 = vector.broadcast %cst_690 : f32 to vector<2x128xf32>
    %2203 = arith.maximumf %2201, %2202 : vector<2x128xf32>
    %cst_691 = arith.constant 1.000000e+00 : f32
    %2204 = vector.broadcast %cst_691 : f32 to vector<2x128xf32>
    %2205 = arith.subf %2204, %2203 : vector<2x128xf32>
    %2206 = arith.mulf %2145, %2205 : vector<2x128xf32>
    %2207 = arith.addf %2206, %2203 : vector<2x128xf32>
    %cst_692 = arith.constant 1.000000e-03 : f32
    %2208 = vector.broadcast %cst_692 : f32 to vector<2x128xf32>
    %2209 = arith.maximumf %2207, %2208 : vector<2x128xf32>
    %2210 = tpu.reciprocal %2209 {approx = true} : vector<2x128xf32> -> vector<2x128xf32>
    %cst_693 = arith.constant 1.000000e+00 : f32
    %2211 = vector.broadcast %cst_693 : f32 to vector<2x128xf32>
    %2212 = arith.subf %2211, %2203 : vector<2x128xf32>
    %2213 = arith.mulf %2137, %2212 : vector<2x128xf32>
    %2214 = arith.addf %2213, %2203 : vector<2x128xf32>
    %cst_694 = arith.constant 1.000000e-03 : f32
    %2215 = vector.broadcast %cst_694 : f32 to vector<2x128xf32>
    %2216 = arith.maximumf %2214, %2215 : vector<2x128xf32>
    %2217 = tpu.reciprocal %2216 {approx = true} : vector<2x128xf32> -> vector<2x128xf32>
    %2218 = arith.mulf %2199, %2210 : vector<2x128xf32>
    %2219 = arith.mulf %2218, %2217 : vector<2x128xf32>
    %2220 = vector.broadcast %176 : f32 to vector<2x128xf32>
    %2221 = arith.mulf %2220, %2067 : vector<2x128xf32>
    %cst_695 = arith.constant 1.000000e+00 : f32
    %2222 = vector.broadcast %cst_695 : f32 to vector<2x128xf32>
    %2223 = arith.subf %2222, %423 : vector<2x128xf32>
    %2224 = arith.mulf %2223, %2099 : vector<2x128xf32>
    %2225 = arith.addf %423, %2224 : vector<2x128xf32>
    %cst_696 = arith.constant 1.000000e+00 : f32
    %2226 = vector.broadcast %cst_696 : f32 to vector<2x128xf32>
    %2227 = arith.subf %2226, %429 : vector<2x128xf32>
    %2228 = arith.mulf %2227, %2099 : vector<2x128xf32>
    %2229 = arith.addf %429, %2228 : vector<2x128xf32>
    %cst_697 = arith.constant 1.000000e+00 : f32
    %2230 = vector.broadcast %cst_697 : f32 to vector<2x128xf32>
    %2231 = arith.subf %2230, %423 : vector<2x128xf32>
    %cst_698 = arith.constant 0.318309873 : f32
    %2232 = vector.broadcast %cst_698 : f32 to vector<2x128xf32>
    %2233 = arith.mulf %2231, %2232 : vector<2x128xf32>
    %2234 = arith.mulf %411, %2233 : vector<2x128xf32>
    %cst_699 = arith.constant 2.500000e-01 : f32
    %2235 = vector.broadcast %cst_699 : f32 to vector<2x128xf32>
    %2236 = arith.mulf %2235, %2183 : vector<2x128xf32>
    %2237 = arith.mulf %2236, %2225 : vector<2x128xf32>
    %2238 = arith.addf %2234, %2237 : vector<2x128xf32>
    %cst_700 = arith.constant 1.000000e+00 : f32
    %2239 = vector.broadcast %cst_700 : f32 to vector<2x128xf32>
    %2240 = arith.subf %2239, %429 : vector<2x128xf32>
    %cst_701 = arith.constant 0.318309873 : f32
    %2241 = vector.broadcast %cst_701 : f32 to vector<2x128xf32>
    %2242 = arith.mulf %2240, %2241 : vector<2x128xf32>
    %2243 = arith.mulf %417, %2242 : vector<2x128xf32>
    %cst_702 = arith.constant 2.500000e-01 : f32
    %2244 = vector.broadcast %cst_702 : f32 to vector<2x128xf32>
    %2245 = arith.mulf %2244, %2219 : vector<2x128xf32>
    %2246 = arith.mulf %2245, %2229 : vector<2x128xf32>
    %2247 = arith.addf %2243, %2246 : vector<2x128xf32>
    %2248 = arith.mulf %2238, %2123 : vector<2x128xf32>
    %2249 = arith.mulf %2248, %2221 : vector<2x128xf32>
    %cst_703 = arith.constant 1.000000e-01 : f32
    %2250 = vector.broadcast %cst_703 : f32 to vector<2x128xf32>
    %2251 = arith.addf %2249, %2250 : vector<2x128xf32>
    %2252 = arith.mulf %2247, %2147 : vector<2x128xf32>
    %2253 = arith.mulf %2252, %2221 : vector<2x128xf32>
    %cst_704 = arith.constant 1.000000e-01 : f32
    %2254 = vector.broadcast %cst_704 : f32 to vector<2x128xf32>
    %2255 = arith.addf %2253, %2254 : vector<2x128xf32>
    %2256 = tpu.reciprocal %2255 {approx = true} : vector<2x128xf32> -> vector<2x128xf32>
    %2257 = arith.mulf %2251, %2256 : vector<2x128xf32>
    %2258 = math.log %2257 : vector<2x128xf32>
    %2259 = math.absf %2258 : vector<2x128xf32>
    %2260 = arith.addf %2024, %2259 : vector<2x128xf32>
    %2261 = vector.broadcast %179 : f32 to vector<2x128xf32>
    %2262 = arith.mulf %2261, %2067 : vector<2x128xf32>
    %cst_705 = arith.constant 1.000000e+00 : f32
    %2263 = vector.broadcast %cst_705 : f32 to vector<2x128xf32>
    %2264 = arith.subf %2263, %425 : vector<2x128xf32>
    %2265 = arith.mulf %2264, %2099 : vector<2x128xf32>
    %2266 = arith.addf %425, %2265 : vector<2x128xf32>
    %cst_706 = arith.constant 1.000000e+00 : f32
    %2267 = vector.broadcast %cst_706 : f32 to vector<2x128xf32>
    %2268 = arith.subf %2267, %431 : vector<2x128xf32>
    %2269 = arith.mulf %2268, %2099 : vector<2x128xf32>
    %2270 = arith.addf %431, %2269 : vector<2x128xf32>
    %cst_707 = arith.constant 1.000000e+00 : f32
    %2271 = vector.broadcast %cst_707 : f32 to vector<2x128xf32>
    %2272 = arith.subf %2271, %425 : vector<2x128xf32>
    %cst_708 = arith.constant 0.318309873 : f32
    %2273 = vector.broadcast %cst_708 : f32 to vector<2x128xf32>
    %2274 = arith.mulf %2272, %2273 : vector<2x128xf32>
    %2275 = arith.mulf %413, %2274 : vector<2x128xf32>
    %cst_709 = arith.constant 2.500000e-01 : f32
    %2276 = vector.broadcast %cst_709 : f32 to vector<2x128xf32>
    %2277 = arith.mulf %2276, %2183 : vector<2x128xf32>
    %2278 = arith.mulf %2277, %2266 : vector<2x128xf32>
    %2279 = arith.addf %2275, %2278 : vector<2x128xf32>
    %cst_710 = arith.constant 1.000000e+00 : f32
    %2280 = vector.broadcast %cst_710 : f32 to vector<2x128xf32>
    %2281 = arith.subf %2280, %431 : vector<2x128xf32>
    %cst_711 = arith.constant 0.318309873 : f32
    %2282 = vector.broadcast %cst_711 : f32 to vector<2x128xf32>
    %2283 = arith.mulf %2281, %2282 : vector<2x128xf32>
    %2284 = arith.mulf %419, %2283 : vector<2x128xf32>
    %cst_712 = arith.constant 2.500000e-01 : f32
    %2285 = vector.broadcast %cst_712 : f32 to vector<2x128xf32>
    %2286 = arith.mulf %2285, %2219 : vector<2x128xf32>
    %2287 = arith.mulf %2286, %2270 : vector<2x128xf32>
    %2288 = arith.addf %2284, %2287 : vector<2x128xf32>
    %2289 = arith.mulf %2279, %2123 : vector<2x128xf32>
    %2290 = arith.mulf %2289, %2262 : vector<2x128xf32>
    %cst_713 = arith.constant 1.000000e-01 : f32
    %2291 = vector.broadcast %cst_713 : f32 to vector<2x128xf32>
    %2292 = arith.addf %2290, %2291 : vector<2x128xf32>
    %2293 = arith.mulf %2288, %2147 : vector<2x128xf32>
    %2294 = arith.mulf %2293, %2262 : vector<2x128xf32>
    %cst_714 = arith.constant 1.000000e-01 : f32
    %2295 = vector.broadcast %cst_714 : f32 to vector<2x128xf32>
    %2296 = arith.addf %2294, %2295 : vector<2x128xf32>
    %2297 = tpu.reciprocal %2296 {approx = true} : vector<2x128xf32> -> vector<2x128xf32>
    %2298 = arith.mulf %2292, %2297 : vector<2x128xf32>
    %2299 = math.log %2298 : vector<2x128xf32>
    %2300 = math.absf %2299 : vector<2x128xf32>
    %2301 = arith.addf %2260, %2300 : vector<2x128xf32>
    %2302 = vector.broadcast %182 : f32 to vector<2x128xf32>
    %2303 = arith.mulf %2302, %2067 : vector<2x128xf32>
    %cst_715 = arith.constant 1.000000e+00 : f32
    %2304 = vector.broadcast %cst_715 : f32 to vector<2x128xf32>
    %2305 = arith.subf %2304, %427 : vector<2x128xf32>
    %2306 = arith.mulf %2305, %2099 : vector<2x128xf32>
    %2307 = arith.addf %427, %2306 : vector<2x128xf32>
    %cst_716 = arith.constant 1.000000e+00 : f32
    %2308 = vector.broadcast %cst_716 : f32 to vector<2x128xf32>
    %2309 = arith.subf %2308, %433 : vector<2x128xf32>
    %2310 = arith.mulf %2309, %2099 : vector<2x128xf32>
    %2311 = arith.addf %433, %2310 : vector<2x128xf32>
    %cst_717 = arith.constant 1.000000e+00 : f32
    %2312 = vector.broadcast %cst_717 : f32 to vector<2x128xf32>
    %2313 = arith.subf %2312, %427 : vector<2x128xf32>
    %cst_718 = arith.constant 0.318309873 : f32
    %2314 = vector.broadcast %cst_718 : f32 to vector<2x128xf32>
    %2315 = arith.mulf %2313, %2314 : vector<2x128xf32>
    %2316 = arith.mulf %415, %2315 : vector<2x128xf32>
    %cst_719 = arith.constant 2.500000e-01 : f32
    %2317 = vector.broadcast %cst_719 : f32 to vector<2x128xf32>
    %2318 = arith.mulf %2317, %2183 : vector<2x128xf32>
    %2319 = arith.mulf %2318, %2307 : vector<2x128xf32>
    %2320 = arith.addf %2316, %2319 : vector<2x128xf32>
    %cst_720 = arith.constant 1.000000e+00 : f32
    %2321 = vector.broadcast %cst_720 : f32 to vector<2x128xf32>
    %2322 = arith.subf %2321, %433 : vector<2x128xf32>
    %cst_721 = arith.constant 0.318309873 : f32
    %2323 = vector.broadcast %cst_721 : f32 to vector<2x128xf32>
    %2324 = arith.mulf %2322, %2323 : vector<2x128xf32>
    %2325 = arith.mulf %421, %2324 : vector<2x128xf32>
    %cst_722 = arith.constant 2.500000e-01 : f32
    %2326 = vector.broadcast %cst_722 : f32 to vector<2x128xf32>
    %2327 = arith.mulf %2326, %2219 : vector<2x128xf32>
    %2328 = arith.mulf %2327, %2311 : vector<2x128xf32>
    %2329 = arith.addf %2325, %2328 : vector<2x128xf32>
    %2330 = arith.mulf %2320, %2123 : vector<2x128xf32>
    %2331 = arith.mulf %2330, %2303 : vector<2x128xf32>
    %cst_723 = arith.constant 1.000000e-01 : f32
    %2332 = vector.broadcast %cst_723 : f32 to vector<2x128xf32>
    %2333 = arith.addf %2331, %2332 : vector<2x128xf32>
    %2334 = arith.mulf %2329, %2147 : vector<2x128xf32>
    %2335 = arith.mulf %2334, %2303 : vector<2x128xf32>
    %cst_724 = arith.constant 1.000000e-01 : f32
    %2336 = vector.broadcast %cst_724 : f32 to vector<2x128xf32>
    %2337 = arith.addf %2335, %2336 : vector<2x128xf32>
    %2338 = tpu.reciprocal %2337 {approx = true} : vector<2x128xf32> -> vector<2x128xf32>
    %2339 = arith.mulf %2333, %2338 : vector<2x128xf32>
    %2340 = math.log %2339 : vector<2x128xf32>
    %2341 = math.absf %2340 : vector<2x128xf32>
    %2342 = arith.addf %2301, %2341 : vector<2x128xf32>
    %2343 = vector.broadcast %188 : f32 to vector<2x128xf32>
    %2344 = arith.subf %2343, %274 : vector<2x128xf32>
    %2345 = vector.broadcast %191 : f32 to vector<2x128xf32>
    %2346 = arith.subf %2345, %276 : vector<2x128xf32>
    %2347 = arith.mulf %2344, %2344 : vector<2x128xf32>
    %2348 = arith.mulf %2346, %2346 : vector<2x128xf32>
    %2349 = arith.addf %2347, %2348 : vector<2x128xf32>
    %2350 = arith.mulf %194, %194 : f32
    %2351 = vector.broadcast %2350 : f32 to vector<2x128xf32>
    %2352 = arith.addf %2349, %2351 : vector<2x128xf32>
    %cst_725 = arith.constant 9.99999996E-13 : f32
    %2353 = vector.broadcast %cst_725 : f32 to vector<2x128xf32>
    %2354 = arith.addf %2352, %2353 : vector<2x128xf32>
    %2355 = math.rsqrt %2354 : vector<2x128xf32>
    %2356 = arith.mulf %2344, %2355 : vector<2x128xf32>
    %2357 = arith.mulf %2346, %2355 : vector<2x128xf32>
    %2358 = vector.broadcast %194 : f32 to vector<2x128xf32>
    %2359 = arith.mulf %2358, %2355 : vector<2x128xf32>
    %2360 = vector.broadcast %197 : f32 to vector<2x128xf32>
    %2361 = arith.subf %2360, %274 : vector<2x128xf32>
    %2362 = vector.broadcast %200 : f32 to vector<2x128xf32>
    %2363 = arith.subf %2362, %276 : vector<2x128xf32>
    %2364 = arith.mulf %2361, %2361 : vector<2x128xf32>
    %2365 = arith.mulf %2363, %2363 : vector<2x128xf32>
    %2366 = arith.addf %2364, %2365 : vector<2x128xf32>
    %2367 = arith.mulf %203, %203 : f32
    %2368 = vector.broadcast %2367 : f32 to vector<2x128xf32>
    %2369 = arith.addf %2366, %2368 : vector<2x128xf32>
    %cst_726 = arith.constant 9.99999996E-13 : f32
    %2370 = vector.broadcast %cst_726 : f32 to vector<2x128xf32>
    %2371 = arith.addf %2369, %2370 : vector<2x128xf32>
    %2372 = math.rsqrt %2371 : vector<2x128xf32>
    %2373 = arith.mulf %2361, %2372 : vector<2x128xf32>
    %2374 = arith.mulf %2363, %2372 : vector<2x128xf32>
    %2375 = vector.broadcast %203 : f32 to vector<2x128xf32>
    %2376 = arith.mulf %2375, %2372 : vector<2x128xf32>
    %2377 = arith.mulf %2361, %2361 : vector<2x128xf32>
    %2378 = arith.mulf %2363, %2363 : vector<2x128xf32>
    %2379 = arith.addf %2377, %2378 : vector<2x128xf32>
    %2380 = arith.mulf %203, %203 : f32
    %2381 = vector.broadcast %2380 : f32 to vector<2x128xf32>
    %2382 = arith.addf %2379, %2381 : vector<2x128xf32>
    %cst_727 = arith.constant 9.99999996E-13 : f32
    %2383 = vector.broadcast %cst_727 : f32 to vector<2x128xf32>
    %2384 = arith.maximumf %2382, %2383 : vector<2x128xf32>
    %2385 = tpu.reciprocal %2384 {approx = true} : vector<2x128xf32> -> vector<2x128xf32>
    %2386 = arith.addf %2373, %2356 : vector<2x128xf32>
    %cst_728 = arith.constant 5.000000e-01 : f32
    %2387 = vector.broadcast %cst_728 : f32 to vector<2x128xf32>
    %2388 = arith.mulf %2386, %2387 : vector<2x128xf32>
    %2389 = arith.addf %2374, %2357 : vector<2x128xf32>
    %cst_729 = arith.constant 5.000000e-01 : f32
    %2390 = vector.broadcast %cst_729 : f32 to vector<2x128xf32>
    %2391 = arith.mulf %2389, %2390 : vector<2x128xf32>
    %2392 = arith.addf %2376, %2359 : vector<2x128xf32>
    %cst_730 = arith.constant 5.000000e-01 : f32
    %2393 = vector.broadcast %cst_730 : f32 to vector<2x128xf32>
    %2394 = arith.mulf %2392, %2393 : vector<2x128xf32>
    %2395 = arith.mulf %2388, %2388 : vector<2x128xf32>
    %2396 = arith.mulf %2391, %2391 : vector<2x128xf32>
    %2397 = arith.addf %2395, %2396 : vector<2x128xf32>
    %2398 = arith.mulf %2394, %2394 : vector<2x128xf32>
    %2399 = arith.addf %2397, %2398 : vector<2x128xf32>
    %cst_731 = arith.constant 9.99999996E-13 : f32
    %2400 = vector.broadcast %cst_731 : f32 to vector<2x128xf32>
    %2401 = arith.addf %2399, %2400 : vector<2x128xf32>
    %2402 = math.rsqrt %2401 : vector<2x128xf32>
    %2403 = arith.mulf %2388, %2402 : vector<2x128xf32>
    %2404 = arith.mulf %2391, %2402 : vector<2x128xf32>
    %2405 = arith.mulf %2394, %2402 : vector<2x128xf32>
    %2406 = arith.mulf %2356, %2403 : vector<2x128xf32>
    %2407 = arith.mulf %2357, %2404 : vector<2x128xf32>
    %2408 = arith.addf %2406, %2407 : vector<2x128xf32>
    %2409 = arith.mulf %2359, %2405 : vector<2x128xf32>
    %2410 = arith.addf %2408, %2409 : vector<2x128xf32>
    %cst_732 = arith.constant 1.000000e-03 : f32
    %2411 = vector.broadcast %cst_732 : f32 to vector<2x128xf32>
    %2412 = arith.maximumf %2410, %2411 : vector<2x128xf32>
    %cst_733 = arith.constant 1.000000e+00 : f32
    %2413 = vector.broadcast %cst_733 : f32 to vector<2x128xf32>
    %2414 = arith.subf %2413, %2412 : vector<2x128xf32>
    %2415 = arith.mulf %2414, %2414 : vector<2x128xf32>
    %2416 = arith.mulf %2415, %2415 : vector<2x128xf32>
    %2417 = arith.mulf %2416, %2414 : vector<2x128xf32>
    %2418 = arith.mulf %399, %2403 : vector<2x128xf32>
    %2419 = arith.mulf %401, %2404 : vector<2x128xf32>
    %2420 = arith.addf %2418, %2419 : vector<2x128xf32>
    %2421 = arith.mulf %403, %2405 : vector<2x128xf32>
    %2422 = arith.addf %2420, %2421 : vector<2x128xf32>
    %cst_734 = arith.constant 1.000000e-03 : f32
    %2423 = vector.broadcast %cst_734 : f32 to vector<2x128xf32>
    %2424 = arith.maximumf %2422, %2423 : vector<2x128xf32>
    %2425 = arith.mulf %399, %2356 : vector<2x128xf32>
    %2426 = arith.mulf %401, %2357 : vector<2x128xf32>
    %2427 = arith.addf %2425, %2426 : vector<2x128xf32>
    %2428 = arith.mulf %403, %2359 : vector<2x128xf32>
    %2429 = arith.addf %2427, %2428 : vector<2x128xf32>
    %cst_735 = arith.constant 1.000000e-03 : f32
    %2430 = vector.broadcast %cst_735 : f32 to vector<2x128xf32>
    %2431 = arith.maximumf %2429, %2430 : vector<2x128xf32>
    %2432 = arith.mulf %399, %2373 : vector<2x128xf32>
    %2433 = arith.mulf %401, %2374 : vector<2x128xf32>
    %2434 = arith.addf %2432, %2433 : vector<2x128xf32>
    %2435 = arith.mulf %403, %2376 : vector<2x128xf32>
    %2436 = arith.addf %2434, %2435 : vector<2x128xf32>
    %2437 = arith.mulf %2424, %2424 : vector<2x128xf32>
    %cst_736 = arith.constant 1.000000e-03 : f32
    %2438 = vector.broadcast %cst_736 : f32 to vector<2x128xf32>
    %2439 = arith.maximumf %2436, %2438 : vector<2x128xf32>
    %cst_737 = arith.constant 0.000000e+00 : f32
    %2440 = vector.broadcast %cst_737 : f32 to vector<2x128xf32>
    %2441 = arith.maximumf %2436, %2440 : vector<2x128xf32>
    %2442 = arith.mulf %405, %2403 : vector<2x128xf32>
    %2443 = arith.mulf %407, %2404 : vector<2x128xf32>
    %2444 = arith.addf %2442, %2443 : vector<2x128xf32>
    %2445 = arith.mulf %409, %2405 : vector<2x128xf32>
    %2446 = arith.addf %2444, %2445 : vector<2x128xf32>
    %cst_738 = arith.constant 1.000000e-03 : f32
    %2447 = vector.broadcast %cst_738 : f32 to vector<2x128xf32>
    %2448 = arith.maximumf %2446, %2447 : vector<2x128xf32>
    %2449 = arith.mulf %405, %2356 : vector<2x128xf32>
    %2450 = arith.mulf %407, %2357 : vector<2x128xf32>
    %2451 = arith.addf %2449, %2450 : vector<2x128xf32>
    %2452 = arith.mulf %409, %2359 : vector<2x128xf32>
    %2453 = arith.addf %2451, %2452 : vector<2x128xf32>
    %cst_739 = arith.constant 1.000000e-03 : f32
    %2454 = vector.broadcast %cst_739 : f32 to vector<2x128xf32>
    %2455 = arith.maximumf %2453, %2454 : vector<2x128xf32>
    %2456 = arith.mulf %405, %2373 : vector<2x128xf32>
    %2457 = arith.mulf %407, %2374 : vector<2x128xf32>
    %2458 = arith.addf %2456, %2457 : vector<2x128xf32>
    %2459 = arith.mulf %409, %2376 : vector<2x128xf32>
    %2460 = arith.addf %2458, %2459 : vector<2x128xf32>
    %2461 = arith.mulf %2448, %2448 : vector<2x128xf32>
    %cst_740 = arith.constant 1.000000e-03 : f32
    %2462 = vector.broadcast %cst_740 : f32 to vector<2x128xf32>
    %2463 = arith.maximumf %2460, %2462 : vector<2x128xf32>
    %cst_741 = arith.constant 0.000000e+00 : f32
    %2464 = vector.broadcast %cst_741 : f32 to vector<2x128xf32>
    %2465 = arith.maximumf %2460, %2464 : vector<2x128xf32>
    %c0_742 = arith.constant 0 : index
    %c6_743 = arith.constant 6 : index
    %c0_744 = arith.constant 0 : index
    %c0_745 = arith.constant 0 : index
    %2466 = vector.load %arg5[%c0_742, %c6_743, %c0_744, %c0_745] : memref<1x12x2x128xf32, #tpu.memory_space<vmem>>, vector<1x1x2x128xf32>
    %2467 = vector.shape_cast %2466 : vector<1x1x2x128xf32> to vector<2x128xf32>
    %2468 = arith.mulf %2467, %2467 : vector<2x128xf32>
    %2469 = arith.mulf %2468, %2468 : vector<2x128xf32>
    %cst_746 = arith.constant 1.000000e+00 : f32
    %2470 = vector.broadcast %cst_746 : f32 to vector<2x128xf32>
    %2471 = arith.subf %2469, %2470 : vector<2x128xf32>
    %2472 = arith.mulf %2437, %2471 : vector<2x128xf32>
    %cst_747 = arith.constant 1.000000e+00 : f32
    %2473 = vector.broadcast %cst_747 : f32 to vector<2x128xf32>
    %2474 = arith.addf %2472, %2473 : vector<2x128xf32>
    %cst_748 = arith.constant 1.000000e-03 : f32
    %2475 = vector.broadcast %cst_748 : f32 to vector<2x128xf32>
    %2476 = arith.maximumf %2474, %2475 : vector<2x128xf32>
    %cst_749 = arith.constant 3.14159274 : f32
    %2477 = vector.broadcast %cst_749 : f32 to vector<2x128xf32>
    %2478 = arith.mulf %2477, %2476 : vector<2x128xf32>
    %2479 = arith.mulf %2478, %2476 : vector<2x128xf32>
    %2480 = tpu.reciprocal %2479 {approx = true} : vector<2x128xf32> -> vector<2x128xf32>
    %2481 = arith.mulf %2469, %2480 : vector<2x128xf32>
    %cst_750 = arith.constant 5.000000e-01 : f32
    %2482 = vector.broadcast %cst_750 : f32 to vector<2x128xf32>
    %2483 = arith.mulf %2468, %2482 : vector<2x128xf32>
    %cst_751 = arith.constant 9.99999974E-5 : f32
    %2484 = vector.broadcast %cst_751 : f32 to vector<2x128xf32>
    %2485 = arith.maximumf %2483, %2484 : vector<2x128xf32>
    %cst_752 = arith.constant 1.000000e+00 : f32
    %2486 = vector.broadcast %cst_752 : f32 to vector<2x128xf32>
    %2487 = arith.subf %2486, %2485 : vector<2x128xf32>
    %2488 = arith.mulf %2439, %2487 : vector<2x128xf32>
    %2489 = arith.addf %2488, %2485 : vector<2x128xf32>
    %cst_753 = arith.constant 1.000000e-03 : f32
    %2490 = vector.broadcast %cst_753 : f32 to vector<2x128xf32>
    %2491 = arith.maximumf %2489, %2490 : vector<2x128xf32>
    %2492 = tpu.reciprocal %2491 {approx = true} : vector<2x128xf32> -> vector<2x128xf32>
    %cst_754 = arith.constant 1.000000e+00 : f32
    %2493 = vector.broadcast %cst_754 : f32 to vector<2x128xf32>
    %2494 = arith.subf %2493, %2485 : vector<2x128xf32>
    %2495 = arith.mulf %2431, %2494 : vector<2x128xf32>
    %2496 = arith.addf %2495, %2485 : vector<2x128xf32>
    %cst_755 = arith.constant 1.000000e-03 : f32
    %2497 = vector.broadcast %cst_755 : f32 to vector<2x128xf32>
    %2498 = arith.maximumf %2496, %2497 : vector<2x128xf32>
    %2499 = tpu.reciprocal %2498 {approx = true} : vector<2x128xf32> -> vector<2x128xf32>
    %2500 = arith.mulf %2481, %2492 : vector<2x128xf32>
    %2501 = arith.mulf %2500, %2499 : vector<2x128xf32>
    %c0_756 = arith.constant 0 : index
    %c6_757 = arith.constant 6 : index
    %c0_758 = arith.constant 0 : index
    %c0_759 = arith.constant 0 : index
    %2502 = vector.load %arg6[%c0_756, %c6_757, %c0_758, %c0_759] : memref<1x12x2x128xf32, #tpu.memory_space<vmem>>, vector<1x1x2x128xf32>
    %2503 = vector.shape_cast %2502 : vector<1x1x2x128xf32> to vector<2x128xf32>
    %2504 = arith.mulf %2503, %2503 : vector<2x128xf32>
    %2505 = arith.mulf %2504, %2504 : vector<2x128xf32>
    %cst_760 = arith.constant 1.000000e+00 : f32
    %2506 = vector.broadcast %cst_760 : f32 to vector<2x128xf32>
    %2507 = arith.subf %2505, %2506 : vector<2x128xf32>
    %2508 = arith.mulf %2461, %2507 : vector<2x128xf32>
    %cst_761 = arith.constant 1.000000e+00 : f32
    %2509 = vector.broadcast %cst_761 : f32 to vector<2x128xf32>
    %2510 = arith.addf %2508, %2509 : vector<2x128xf32>
    %cst_762 = arith.constant 1.000000e-03 : f32
    %2511 = vector.broadcast %cst_762 : f32 to vector<2x128xf32>
    %2512 = arith.maximumf %2510, %2511 : vector<2x128xf32>
    %cst_763 = arith.constant 3.14159274 : f32
    %2513 = vector.broadcast %cst_763 : f32 to vector<2x128xf32>
    %2514 = arith.mulf %2513, %2512 : vector<2x128xf32>
    %2515 = arith.mulf %2514, %2512 : vector<2x128xf32>
    %2516 = tpu.reciprocal %2515 {approx = true} : vector<2x128xf32> -> vector<2x128xf32>
    %2517 = arith.mulf %2505, %2516 : vector<2x128xf32>
    %cst_764 = arith.constant 5.000000e-01 : f32
    %2518 = vector.broadcast %cst_764 : f32 to vector<2x128xf32>
    %2519 = arith.mulf %2504, %2518 : vector<2x128xf32>
    %cst_765 = arith.constant 9.99999974E-5 : f32
    %2520 = vector.broadcast %cst_765 : f32 to vector<2x128xf32>
    %2521 = arith.maximumf %2519, %2520 : vector<2x128xf32>
    %cst_766 = arith.constant 1.000000e+00 : f32
    %2522 = vector.broadcast %cst_766 : f32 to vector<2x128xf32>
    %2523 = arith.subf %2522, %2521 : vector<2x128xf32>
    %2524 = arith.mulf %2463, %2523 : vector<2x128xf32>
    %2525 = arith.addf %2524, %2521 : vector<2x128xf32>
    %cst_767 = arith.constant 1.000000e-03 : f32
    %2526 = vector.broadcast %cst_767 : f32 to vector<2x128xf32>
    %2527 = arith.maximumf %2525, %2526 : vector<2x128xf32>
    %2528 = tpu.reciprocal %2527 {approx = true} : vector<2x128xf32> -> vector<2x128xf32>
    %cst_768 = arith.constant 1.000000e+00 : f32
    %2529 = vector.broadcast %cst_768 : f32 to vector<2x128xf32>
    %2530 = arith.subf %2529, %2521 : vector<2x128xf32>
    %2531 = arith.mulf %2455, %2530 : vector<2x128xf32>
    %2532 = arith.addf %2531, %2521 : vector<2x128xf32>
    %cst_769 = arith.constant 1.000000e-03 : f32
    %2533 = vector.broadcast %cst_769 : f32 to vector<2x128xf32>
    %2534 = arith.maximumf %2532, %2533 : vector<2x128xf32>
    %2535 = tpu.reciprocal %2534 {approx = true} : vector<2x128xf32> -> vector<2x128xf32>
    %2536 = arith.mulf %2517, %2528 : vector<2x128xf32>
    %2537 = arith.mulf %2536, %2535 : vector<2x128xf32>
    %2538 = vector.broadcast %206 : f32 to vector<2x128xf32>
    %2539 = arith.mulf %2538, %2385 : vector<2x128xf32>
    %cst_770 = arith.constant 1.000000e+00 : f32
    %2540 = vector.broadcast %cst_770 : f32 to vector<2x128xf32>
    %2541 = arith.subf %2540, %423 : vector<2x128xf32>
    %2542 = arith.mulf %2541, %2417 : vector<2x128xf32>
    %2543 = arith.addf %423, %2542 : vector<2x128xf32>
    %cst_771 = arith.constant 1.000000e+00 : f32
    %2544 = vector.broadcast %cst_771 : f32 to vector<2x128xf32>
    %2545 = arith.subf %2544, %429 : vector<2x128xf32>
    %2546 = arith.mulf %2545, %2417 : vector<2x128xf32>
    %2547 = arith.addf %429, %2546 : vector<2x128xf32>
    %cst_772 = arith.constant 1.000000e+00 : f32
    %2548 = vector.broadcast %cst_772 : f32 to vector<2x128xf32>
    %2549 = arith.subf %2548, %423 : vector<2x128xf32>
    %cst_773 = arith.constant 0.318309873 : f32
    %2550 = vector.broadcast %cst_773 : f32 to vector<2x128xf32>
    %2551 = arith.mulf %2549, %2550 : vector<2x128xf32>
    %2552 = arith.mulf %411, %2551 : vector<2x128xf32>
    %cst_774 = arith.constant 2.500000e-01 : f32
    %2553 = vector.broadcast %cst_774 : f32 to vector<2x128xf32>
    %2554 = arith.mulf %2553, %2501 : vector<2x128xf32>
    %2555 = arith.mulf %2554, %2543 : vector<2x128xf32>
    %2556 = arith.addf %2552, %2555 : vector<2x128xf32>
    %cst_775 = arith.constant 1.000000e+00 : f32
    %2557 = vector.broadcast %cst_775 : f32 to vector<2x128xf32>
    %2558 = arith.subf %2557, %429 : vector<2x128xf32>
    %cst_776 = arith.constant 0.318309873 : f32
    %2559 = vector.broadcast %cst_776 : f32 to vector<2x128xf32>
    %2560 = arith.mulf %2558, %2559 : vector<2x128xf32>
    %2561 = arith.mulf %417, %2560 : vector<2x128xf32>
    %cst_777 = arith.constant 2.500000e-01 : f32
    %2562 = vector.broadcast %cst_777 : f32 to vector<2x128xf32>
    %2563 = arith.mulf %2562, %2537 : vector<2x128xf32>
    %2564 = arith.mulf %2563, %2547 : vector<2x128xf32>
    %2565 = arith.addf %2561, %2564 : vector<2x128xf32>
    %2566 = arith.mulf %2556, %2441 : vector<2x128xf32>
    %2567 = arith.mulf %2566, %2539 : vector<2x128xf32>
    %cst_778 = arith.constant 1.000000e-01 : f32
    %2568 = vector.broadcast %cst_778 : f32 to vector<2x128xf32>
    %2569 = arith.addf %2567, %2568 : vector<2x128xf32>
    %2570 = arith.mulf %2565, %2465 : vector<2x128xf32>
    %2571 = arith.mulf %2570, %2539 : vector<2x128xf32>
    %cst_779 = arith.constant 1.000000e-01 : f32
    %2572 = vector.broadcast %cst_779 : f32 to vector<2x128xf32>
    %2573 = arith.addf %2571, %2572 : vector<2x128xf32>
    %2574 = tpu.reciprocal %2573 {approx = true} : vector<2x128xf32> -> vector<2x128xf32>
    %2575 = arith.mulf %2569, %2574 : vector<2x128xf32>
    %2576 = math.log %2575 : vector<2x128xf32>
    %2577 = math.absf %2576 : vector<2x128xf32>
    %2578 = arith.addf %2342, %2577 : vector<2x128xf32>
    %2579 = vector.broadcast %209 : f32 to vector<2x128xf32>
    %2580 = arith.mulf %2579, %2385 : vector<2x128xf32>
    %cst_780 = arith.constant 1.000000e+00 : f32
    %2581 = vector.broadcast %cst_780 : f32 to vector<2x128xf32>
    %2582 = arith.subf %2581, %425 : vector<2x128xf32>
    %2583 = arith.mulf %2582, %2417 : vector<2x128xf32>
    %2584 = arith.addf %425, %2583 : vector<2x128xf32>
    %cst_781 = arith.constant 1.000000e+00 : f32
    %2585 = vector.broadcast %cst_781 : f32 to vector<2x128xf32>
    %2586 = arith.subf %2585, %431 : vector<2x128xf32>
    %2587 = arith.mulf %2586, %2417 : vector<2x128xf32>
    %2588 = arith.addf %431, %2587 : vector<2x128xf32>
    %cst_782 = arith.constant 1.000000e+00 : f32
    %2589 = vector.broadcast %cst_782 : f32 to vector<2x128xf32>
    %2590 = arith.subf %2589, %425 : vector<2x128xf32>
    %cst_783 = arith.constant 0.318309873 : f32
    %2591 = vector.broadcast %cst_783 : f32 to vector<2x128xf32>
    %2592 = arith.mulf %2590, %2591 : vector<2x128xf32>
    %2593 = arith.mulf %413, %2592 : vector<2x128xf32>
    %cst_784 = arith.constant 2.500000e-01 : f32
    %2594 = vector.broadcast %cst_784 : f32 to vector<2x128xf32>
    %2595 = arith.mulf %2594, %2501 : vector<2x128xf32>
    %2596 = arith.mulf %2595, %2584 : vector<2x128xf32>
    %2597 = arith.addf %2593, %2596 : vector<2x128xf32>
    %cst_785 = arith.constant 1.000000e+00 : f32
    %2598 = vector.broadcast %cst_785 : f32 to vector<2x128xf32>
    %2599 = arith.subf %2598, %431 : vector<2x128xf32>
    %cst_786 = arith.constant 0.318309873 : f32
    %2600 = vector.broadcast %cst_786 : f32 to vector<2x128xf32>
    %2601 = arith.mulf %2599, %2600 : vector<2x128xf32>
    %2602 = arith.mulf %419, %2601 : vector<2x128xf32>
    %cst_787 = arith.constant 2.500000e-01 : f32
    %2603 = vector.broadcast %cst_787 : f32 to vector<2x128xf32>
    %2604 = arith.mulf %2603, %2537 : vector<2x128xf32>
    %2605 = arith.mulf %2604, %2588 : vector<2x128xf32>
    %2606 = arith.addf %2602, %2605 : vector<2x128xf32>
    %2607 = arith.mulf %2597, %2441 : vector<2x128xf32>
    %2608 = arith.mulf %2607, %2580 : vector<2x128xf32>
    %cst_788 = arith.constant 1.000000e-01 : f32
    %2609 = vector.broadcast %cst_788 : f32 to vector<2x128xf32>
    %2610 = arith.addf %2608, %2609 : vector<2x128xf32>
    %2611 = arith.mulf %2606, %2465 : vector<2x128xf32>
    %2612 = arith.mulf %2611, %2580 : vector<2x128xf32>
    %cst_789 = arith.constant 1.000000e-01 : f32
    %2613 = vector.broadcast %cst_789 : f32 to vector<2x128xf32>
    %2614 = arith.addf %2612, %2613 : vector<2x128xf32>
    %2615 = tpu.reciprocal %2614 {approx = true} : vector<2x128xf32> -> vector<2x128xf32>
    %2616 = arith.mulf %2610, %2615 : vector<2x128xf32>
    %2617 = math.log %2616 : vector<2x128xf32>
    %2618 = math.absf %2617 : vector<2x128xf32>
    %2619 = arith.addf %2578, %2618 : vector<2x128xf32>
    %2620 = vector.broadcast %212 : f32 to vector<2x128xf32>
    %2621 = arith.mulf %2620, %2385 : vector<2x128xf32>
    %cst_790 = arith.constant 1.000000e+00 : f32
    %2622 = vector.broadcast %cst_790 : f32 to vector<2x128xf32>
    %2623 = arith.subf %2622, %427 : vector<2x128xf32>
    %2624 = arith.mulf %2623, %2417 : vector<2x128xf32>
    %2625 = arith.addf %427, %2624 : vector<2x128xf32>
    %cst_791 = arith.constant 1.000000e+00 : f32
    %2626 = vector.broadcast %cst_791 : f32 to vector<2x128xf32>
    %2627 = arith.subf %2626, %433 : vector<2x128xf32>
    %2628 = arith.mulf %2627, %2417 : vector<2x128xf32>
    %2629 = arith.addf %433, %2628 : vector<2x128xf32>
    %cst_792 = arith.constant 1.000000e+00 : f32
    %2630 = vector.broadcast %cst_792 : f32 to vector<2x128xf32>
    %2631 = arith.subf %2630, %427 : vector<2x128xf32>
    %cst_793 = arith.constant 0.318309873 : f32
    %2632 = vector.broadcast %cst_793 : f32 to vector<2x128xf32>
    %2633 = arith.mulf %2631, %2632 : vector<2x128xf32>
    %2634 = arith.mulf %415, %2633 : vector<2x128xf32>
    %cst_794 = arith.constant 2.500000e-01 : f32
    %2635 = vector.broadcast %cst_794 : f32 to vector<2x128xf32>
    %2636 = arith.mulf %2635, %2501 : vector<2x128xf32>
    %2637 = arith.mulf %2636, %2625 : vector<2x128xf32>
    %2638 = arith.addf %2634, %2637 : vector<2x128xf32>
    %cst_795 = arith.constant 1.000000e+00 : f32
    %2639 = vector.broadcast %cst_795 : f32 to vector<2x128xf32>
    %2640 = arith.subf %2639, %433 : vector<2x128xf32>
    %cst_796 = arith.constant 0.318309873 : f32
    %2641 = vector.broadcast %cst_796 : f32 to vector<2x128xf32>
    %2642 = arith.mulf %2640, %2641 : vector<2x128xf32>
    %2643 = arith.mulf %421, %2642 : vector<2x128xf32>
    %cst_797 = arith.constant 2.500000e-01 : f32
    %2644 = vector.broadcast %cst_797 : f32 to vector<2x128xf32>
    %2645 = arith.mulf %2644, %2537 : vector<2x128xf32>
    %2646 = arith.mulf %2645, %2629 : vector<2x128xf32>
    %2647 = arith.addf %2643, %2646 : vector<2x128xf32>
    %2648 = arith.mulf %2638, %2441 : vector<2x128xf32>
    %2649 = arith.mulf %2648, %2621 : vector<2x128xf32>
    %cst_798 = arith.constant 1.000000e-01 : f32
    %2650 = vector.broadcast %cst_798 : f32 to vector<2x128xf32>
    %2651 = arith.addf %2649, %2650 : vector<2x128xf32>
    %2652 = arith.mulf %2647, %2465 : vector<2x128xf32>
    %2653 = arith.mulf %2652, %2621 : vector<2x128xf32>
    %cst_799 = arith.constant 1.000000e-01 : f32
    %2654 = vector.broadcast %cst_799 : f32 to vector<2x128xf32>
    %2655 = arith.addf %2653, %2654 : vector<2x128xf32>
    %2656 = tpu.reciprocal %2655 {approx = true} : vector<2x128xf32> -> vector<2x128xf32>
    %2657 = arith.mulf %2651, %2656 : vector<2x128xf32>
    %2658 = math.log %2657 : vector<2x128xf32>
    %2659 = math.absf %2658 : vector<2x128xf32>
    %2660 = arith.addf %2619, %2659 : vector<2x128xf32>
    %2661 = vector.broadcast %218 : f32 to vector<2x128xf32>
    %2662 = arith.subf %2661, %274 : vector<2x128xf32>
    %2663 = vector.broadcast %221 : f32 to vector<2x128xf32>
    %2664 = arith.subf %2663, %276 : vector<2x128xf32>
    %2665 = arith.mulf %2662, %2662 : vector<2x128xf32>
    %2666 = arith.mulf %2664, %2664 : vector<2x128xf32>
    %2667 = arith.addf %2665, %2666 : vector<2x128xf32>
    %2668 = arith.mulf %224, %224 : f32
    %2669 = vector.broadcast %2668 : f32 to vector<2x128xf32>
    %2670 = arith.addf %2667, %2669 : vector<2x128xf32>
    %cst_800 = arith.constant 9.99999996E-13 : f32
    %2671 = vector.broadcast %cst_800 : f32 to vector<2x128xf32>
    %2672 = arith.addf %2670, %2671 : vector<2x128xf32>
    %2673 = math.rsqrt %2672 : vector<2x128xf32>
    %2674 = arith.mulf %2662, %2673 : vector<2x128xf32>
    %2675 = arith.mulf %2664, %2673 : vector<2x128xf32>
    %2676 = vector.broadcast %224 : f32 to vector<2x128xf32>
    %2677 = arith.mulf %2676, %2673 : vector<2x128xf32>
    %2678 = vector.broadcast %227 : f32 to vector<2x128xf32>
    %2679 = arith.subf %2678, %274 : vector<2x128xf32>
    %2680 = vector.broadcast %230 : f32 to vector<2x128xf32>
    %2681 = arith.subf %2680, %276 : vector<2x128xf32>
    %2682 = arith.mulf %2679, %2679 : vector<2x128xf32>
    %2683 = arith.mulf %2681, %2681 : vector<2x128xf32>
    %2684 = arith.addf %2682, %2683 : vector<2x128xf32>
    %2685 = arith.mulf %233, %233 : f32
    %2686 = vector.broadcast %2685 : f32 to vector<2x128xf32>
    %2687 = arith.addf %2684, %2686 : vector<2x128xf32>
    %cst_801 = arith.constant 9.99999996E-13 : f32
    %2688 = vector.broadcast %cst_801 : f32 to vector<2x128xf32>
    %2689 = arith.addf %2687, %2688 : vector<2x128xf32>
    %2690 = math.rsqrt %2689 : vector<2x128xf32>
    %2691 = arith.mulf %2679, %2690 : vector<2x128xf32>
    %2692 = arith.mulf %2681, %2690 : vector<2x128xf32>
    %2693 = vector.broadcast %233 : f32 to vector<2x128xf32>
    %2694 = arith.mulf %2693, %2690 : vector<2x128xf32>
    %2695 = arith.mulf %2679, %2679 : vector<2x128xf32>
    %2696 = arith.mulf %2681, %2681 : vector<2x128xf32>
    %2697 = arith.addf %2695, %2696 : vector<2x128xf32>
    %2698 = arith.mulf %233, %233 : f32
    %2699 = vector.broadcast %2698 : f32 to vector<2x128xf32>
    %2700 = arith.addf %2697, %2699 : vector<2x128xf32>
    %cst_802 = arith.constant 9.99999996E-13 : f32
    %2701 = vector.broadcast %cst_802 : f32 to vector<2x128xf32>
    %2702 = arith.maximumf %2700, %2701 : vector<2x128xf32>
    %2703 = tpu.reciprocal %2702 {approx = true} : vector<2x128xf32> -> vector<2x128xf32>
    %2704 = arith.addf %2691, %2674 : vector<2x128xf32>
    %cst_803 = arith.constant 5.000000e-01 : f32
    %2705 = vector.broadcast %cst_803 : f32 to vector<2x128xf32>
    %2706 = arith.mulf %2704, %2705 : vector<2x128xf32>
    %2707 = arith.addf %2692, %2675 : vector<2x128xf32>
    %cst_804 = arith.constant 5.000000e-01 : f32
    %2708 = vector.broadcast %cst_804 : f32 to vector<2x128xf32>
    %2709 = arith.mulf %2707, %2708 : vector<2x128xf32>
    %2710 = arith.addf %2694, %2677 : vector<2x128xf32>
    %cst_805 = arith.constant 5.000000e-01 : f32
    %2711 = vector.broadcast %cst_805 : f32 to vector<2x128xf32>
    %2712 = arith.mulf %2710, %2711 : vector<2x128xf32>
    %2713 = arith.mulf %2706, %2706 : vector<2x128xf32>
    %2714 = arith.mulf %2709, %2709 : vector<2x128xf32>
    %2715 = arith.addf %2713, %2714 : vector<2x128xf32>
    %2716 = arith.mulf %2712, %2712 : vector<2x128xf32>
    %2717 = arith.addf %2715, %2716 : vector<2x128xf32>
    %cst_806 = arith.constant 9.99999996E-13 : f32
    %2718 = vector.broadcast %cst_806 : f32 to vector<2x128xf32>
    %2719 = arith.addf %2717, %2718 : vector<2x128xf32>
    %2720 = math.rsqrt %2719 : vector<2x128xf32>
    %2721 = arith.mulf %2706, %2720 : vector<2x128xf32>
    %2722 = arith.mulf %2709, %2720 : vector<2x128xf32>
    %2723 = arith.mulf %2712, %2720 : vector<2x128xf32>
    %2724 = arith.mulf %2674, %2721 : vector<2x128xf32>
    %2725 = arith.mulf %2675, %2722 : vector<2x128xf32>
    %2726 = arith.addf %2724, %2725 : vector<2x128xf32>
    %2727 = arith.mulf %2677, %2723 : vector<2x128xf32>
    %2728 = arith.addf %2726, %2727 : vector<2x128xf32>
    %cst_807 = arith.constant 1.000000e-03 : f32
    %2729 = vector.broadcast %cst_807 : f32 to vector<2x128xf32>
    %2730 = arith.maximumf %2728, %2729 : vector<2x128xf32>
    %cst_808 = arith.constant 1.000000e+00 : f32
    %2731 = vector.broadcast %cst_808 : f32 to vector<2x128xf32>
    %2732 = arith.subf %2731, %2730 : vector<2x128xf32>
    %2733 = arith.mulf %2732, %2732 : vector<2x128xf32>
    %2734 = arith.mulf %2733, %2733 : vector<2x128xf32>
    %2735 = arith.mulf %2734, %2732 : vector<2x128xf32>
    %2736 = arith.mulf %399, %2721 : vector<2x128xf32>
    %2737 = arith.mulf %401, %2722 : vector<2x128xf32>
    %2738 = arith.addf %2736, %2737 : vector<2x128xf32>
    %2739 = arith.mulf %403, %2723 : vector<2x128xf32>
    %2740 = arith.addf %2738, %2739 : vector<2x128xf32>
    %cst_809 = arith.constant 1.000000e-03 : f32
    %2741 = vector.broadcast %cst_809 : f32 to vector<2x128xf32>
    %2742 = arith.maximumf %2740, %2741 : vector<2x128xf32>
    %2743 = arith.mulf %399, %2674 : vector<2x128xf32>
    %2744 = arith.mulf %401, %2675 : vector<2x128xf32>
    %2745 = arith.addf %2743, %2744 : vector<2x128xf32>
    %2746 = arith.mulf %403, %2677 : vector<2x128xf32>
    %2747 = arith.addf %2745, %2746 : vector<2x128xf32>
    %cst_810 = arith.constant 1.000000e-03 : f32
    %2748 = vector.broadcast %cst_810 : f32 to vector<2x128xf32>
    %2749 = arith.maximumf %2747, %2748 : vector<2x128xf32>
    %2750 = arith.mulf %399, %2691 : vector<2x128xf32>
    %2751 = arith.mulf %401, %2692 : vector<2x128xf32>
    %2752 = arith.addf %2750, %2751 : vector<2x128xf32>
    %2753 = arith.mulf %403, %2694 : vector<2x128xf32>
    %2754 = arith.addf %2752, %2753 : vector<2x128xf32>
    %2755 = arith.mulf %2742, %2742 : vector<2x128xf32>
    %cst_811 = arith.constant 1.000000e-03 : f32
    %2756 = vector.broadcast %cst_811 : f32 to vector<2x128xf32>
    %2757 = arith.maximumf %2754, %2756 : vector<2x128xf32>
    %cst_812 = arith.constant 0.000000e+00 : f32
    %2758 = vector.broadcast %cst_812 : f32 to vector<2x128xf32>
    %2759 = arith.maximumf %2754, %2758 : vector<2x128xf32>
    %2760 = arith.mulf %405, %2721 : vector<2x128xf32>
    %2761 = arith.mulf %407, %2722 : vector<2x128xf32>
    %2762 = arith.addf %2760, %2761 : vector<2x128xf32>
    %2763 = arith.mulf %409, %2723 : vector<2x128xf32>
    %2764 = arith.addf %2762, %2763 : vector<2x128xf32>
    %cst_813 = arith.constant 1.000000e-03 : f32
    %2765 = vector.broadcast %cst_813 : f32 to vector<2x128xf32>
    %2766 = arith.maximumf %2764, %2765 : vector<2x128xf32>
    %2767 = arith.mulf %405, %2674 : vector<2x128xf32>
    %2768 = arith.mulf %407, %2675 : vector<2x128xf32>
    %2769 = arith.addf %2767, %2768 : vector<2x128xf32>
    %2770 = arith.mulf %409, %2677 : vector<2x128xf32>
    %2771 = arith.addf %2769, %2770 : vector<2x128xf32>
    %cst_814 = arith.constant 1.000000e-03 : f32
    %2772 = vector.broadcast %cst_814 : f32 to vector<2x128xf32>
    %2773 = arith.maximumf %2771, %2772 : vector<2x128xf32>
    %2774 = arith.mulf %405, %2691 : vector<2x128xf32>
    %2775 = arith.mulf %407, %2692 : vector<2x128xf32>
    %2776 = arith.addf %2774, %2775 : vector<2x128xf32>
    %2777 = arith.mulf %409, %2694 : vector<2x128xf32>
    %2778 = arith.addf %2776, %2777 : vector<2x128xf32>
    %2779 = arith.mulf %2766, %2766 : vector<2x128xf32>
    %cst_815 = arith.constant 1.000000e-03 : f32
    %2780 = vector.broadcast %cst_815 : f32 to vector<2x128xf32>
    %2781 = arith.maximumf %2778, %2780 : vector<2x128xf32>
    %cst_816 = arith.constant 0.000000e+00 : f32
    %2782 = vector.broadcast %cst_816 : f32 to vector<2x128xf32>
    %2783 = arith.maximumf %2778, %2782 : vector<2x128xf32>
    %c0_817 = arith.constant 0 : index
    %c6_818 = arith.constant 6 : index
    %c0_819 = arith.constant 0 : index
    %c0_820 = arith.constant 0 : index
    %2784 = vector.load %arg5[%c0_817, %c6_818, %c0_819, %c0_820] : memref<1x12x2x128xf32, #tpu.memory_space<vmem>>, vector<1x1x2x128xf32>
    %2785 = vector.shape_cast %2784 : vector<1x1x2x128xf32> to vector<2x128xf32>
    %2786 = arith.mulf %2785, %2785 : vector<2x128xf32>
    %2787 = arith.mulf %2786, %2786 : vector<2x128xf32>
    %cst_821 = arith.constant 1.000000e+00 : f32
    %2788 = vector.broadcast %cst_821 : f32 to vector<2x128xf32>
    %2789 = arith.subf %2787, %2788 : vector<2x128xf32>
    %2790 = arith.mulf %2755, %2789 : vector<2x128xf32>
    %cst_822 = arith.constant 1.000000e+00 : f32
    %2791 = vector.broadcast %cst_822 : f32 to vector<2x128xf32>
    %2792 = arith.addf %2790, %2791 : vector<2x128xf32>
    %cst_823 = arith.constant 1.000000e-03 : f32
    %2793 = vector.broadcast %cst_823 : f32 to vector<2x128xf32>
    %2794 = arith.maximumf %2792, %2793 : vector<2x128xf32>
    %cst_824 = arith.constant 3.14159274 : f32
    %2795 = vector.broadcast %cst_824 : f32 to vector<2x128xf32>
    %2796 = arith.mulf %2795, %2794 : vector<2x128xf32>
    %2797 = arith.mulf %2796, %2794 : vector<2x128xf32>
    %2798 = tpu.reciprocal %2797 {approx = true} : vector<2x128xf32> -> vector<2x128xf32>
    %2799 = arith.mulf %2787, %2798 : vector<2x128xf32>
    %cst_825 = arith.constant 5.000000e-01 : f32
    %2800 = vector.broadcast %cst_825 : f32 to vector<2x128xf32>
    %2801 = arith.mulf %2786, %2800 : vector<2x128xf32>
    %cst_826 = arith.constant 9.99999974E-5 : f32
    %2802 = vector.broadcast %cst_826 : f32 to vector<2x128xf32>
    %2803 = arith.maximumf %2801, %2802 : vector<2x128xf32>
    %cst_827 = arith.constant 1.000000e+00 : f32
    %2804 = vector.broadcast %cst_827 : f32 to vector<2x128xf32>
    %2805 = arith.subf %2804, %2803 : vector<2x128xf32>
    %2806 = arith.mulf %2757, %2805 : vector<2x128xf32>
    %2807 = arith.addf %2806, %2803 : vector<2x128xf32>
    %cst_828 = arith.constant 1.000000e-03 : f32
    %2808 = vector.broadcast %cst_828 : f32 to vector<2x128xf32>
    %2809 = arith.maximumf %2807, %2808 : vector<2x128xf32>
    %2810 = tpu.reciprocal %2809 {approx = true} : vector<2x128xf32> -> vector<2x128xf32>
    %cst_829 = arith.constant 1.000000e+00 : f32
    %2811 = vector.broadcast %cst_829 : f32 to vector<2x128xf32>
    %2812 = arith.subf %2811, %2803 : vector<2x128xf32>
    %2813 = arith.mulf %2749, %2812 : vector<2x128xf32>
    %2814 = arith.addf %2813, %2803 : vector<2x128xf32>
    %cst_830 = arith.constant 1.000000e-03 : f32
    %2815 = vector.broadcast %cst_830 : f32 to vector<2x128xf32>
    %2816 = arith.maximumf %2814, %2815 : vector<2x128xf32>
    %2817 = tpu.reciprocal %2816 {approx = true} : vector<2x128xf32> -> vector<2x128xf32>
    %2818 = arith.mulf %2799, %2810 : vector<2x128xf32>
    %2819 = arith.mulf %2818, %2817 : vector<2x128xf32>
    %c0_831 = arith.constant 0 : index
    %c6_832 = arith.constant 6 : index
    %c0_833 = arith.constant 0 : index
    %c0_834 = arith.constant 0 : index
    %2820 = vector.load %arg6[%c0_831, %c6_832, %c0_833, %c0_834] : memref<1x12x2x128xf32, #tpu.memory_space<vmem>>, vector<1x1x2x128xf32>
    %2821 = vector.shape_cast %2820 : vector<1x1x2x128xf32> to vector<2x128xf32>
    %2822 = arith.mulf %2821, %2821 : vector<2x128xf32>
    %2823 = arith.mulf %2822, %2822 : vector<2x128xf32>
    %cst_835 = arith.constant 1.000000e+00 : f32
    %2824 = vector.broadcast %cst_835 : f32 to vector<2x128xf32>
    %2825 = arith.subf %2823, %2824 : vector<2x128xf32>
    %2826 = arith.mulf %2779, %2825 : vector<2x128xf32>
    %cst_836 = arith.constant 1.000000e+00 : f32
    %2827 = vector.broadcast %cst_836 : f32 to vector<2x128xf32>
    %2828 = arith.addf %2826, %2827 : vector<2x128xf32>
    %cst_837 = arith.constant 1.000000e-03 : f32
    %2829 = vector.broadcast %cst_837 : f32 to vector<2x128xf32>
    %2830 = arith.maximumf %2828, %2829 : vector<2x128xf32>
    %cst_838 = arith.constant 3.14159274 : f32
    %2831 = vector.broadcast %cst_838 : f32 to vector<2x128xf32>
    %2832 = arith.mulf %2831, %2830 : vector<2x128xf32>
    %2833 = arith.mulf %2832, %2830 : vector<2x128xf32>
    %2834 = tpu.reciprocal %2833 {approx = true} : vector<2x128xf32> -> vector<2x128xf32>
    %2835 = arith.mulf %2823, %2834 : vector<2x128xf32>
    %cst_839 = arith.constant 5.000000e-01 : f32
    %2836 = vector.broadcast %cst_839 : f32 to vector<2x128xf32>
    %2837 = arith.mulf %2822, %2836 : vector<2x128xf32>
    %cst_840 = arith.constant 9.99999974E-5 : f32
    %2838 = vector.broadcast %cst_840 : f32 to vector<2x128xf32>
    %2839 = arith.maximumf %2837, %2838 : vector<2x128xf32>
    %cst_841 = arith.constant 1.000000e+00 : f32
    %2840 = vector.broadcast %cst_841 : f32 to vector<2x128xf32>
    %2841 = arith.subf %2840, %2839 : vector<2x128xf32>
    %2842 = arith.mulf %2781, %2841 : vector<2x128xf32>
    %2843 = arith.addf %2842, %2839 : vector<2x128xf32>
    %cst_842 = arith.constant 1.000000e-03 : f32
    %2844 = vector.broadcast %cst_842 : f32 to vector<2x128xf32>
    %2845 = arith.maximumf %2843, %2844 : vector<2x128xf32>
    %2846 = tpu.reciprocal %2845 {approx = true} : vector<2x128xf32> -> vector<2x128xf32>
    %cst_843 = arith.constant 1.000000e+00 : f32
    %2847 = vector.broadcast %cst_843 : f32 to vector<2x128xf32>
    %2848 = arith.subf %2847, %2839 : vector<2x128xf32>
    %2849 = arith.mulf %2773, %2848 : vector<2x128xf32>
    %2850 = arith.addf %2849, %2839 : vector<2x128xf32>
    %cst_844 = arith.constant 1.000000e-03 : f32
    %2851 = vector.broadcast %cst_844 : f32 to vector<2x128xf32>
    %2852 = arith.maximumf %2850, %2851 : vector<2x128xf32>
    %2853 = tpu.reciprocal %2852 {approx = true} : vector<2x128xf32> -> vector<2x128xf32>
    %2854 = arith.mulf %2835, %2846 : vector<2x128xf32>
    %2855 = arith.mulf %2854, %2853 : vector<2x128xf32>
    %2856 = vector.broadcast %236 : f32 to vector<2x128xf32>
    %2857 = arith.mulf %2856, %2703 : vector<2x128xf32>
    %cst_845 = arith.constant 1.000000e+00 : f32
    %2858 = vector.broadcast %cst_845 : f32 to vector<2x128xf32>
    %2859 = arith.subf %2858, %423 : vector<2x128xf32>
    %2860 = arith.mulf %2859, %2735 : vector<2x128xf32>
    %2861 = arith.addf %423, %2860 : vector<2x128xf32>
    %cst_846 = arith.constant 1.000000e+00 : f32
    %2862 = vector.broadcast %cst_846 : f32 to vector<2x128xf32>
    %2863 = arith.subf %2862, %429 : vector<2x128xf32>
    %2864 = arith.mulf %2863, %2735 : vector<2x128xf32>
    %2865 = arith.addf %429, %2864 : vector<2x128xf32>
    %cst_847 = arith.constant 1.000000e+00 : f32
    %2866 = vector.broadcast %cst_847 : f32 to vector<2x128xf32>
    %2867 = arith.subf %2866, %423 : vector<2x128xf32>
    %cst_848 = arith.constant 0.318309873 : f32
    %2868 = vector.broadcast %cst_848 : f32 to vector<2x128xf32>
    %2869 = arith.mulf %2867, %2868 : vector<2x128xf32>
    %2870 = arith.mulf %411, %2869 : vector<2x128xf32>
    %cst_849 = arith.constant 2.500000e-01 : f32
    %2871 = vector.broadcast %cst_849 : f32 to vector<2x128xf32>
    %2872 = arith.mulf %2871, %2819 : vector<2x128xf32>
    %2873 = arith.mulf %2872, %2861 : vector<2x128xf32>
    %2874 = arith.addf %2870, %2873 : vector<2x128xf32>
    %cst_850 = arith.constant 1.000000e+00 : f32
    %2875 = vector.broadcast %cst_850 : f32 to vector<2x128xf32>
    %2876 = arith.subf %2875, %429 : vector<2x128xf32>
    %cst_851 = arith.constant 0.318309873 : f32
    %2877 = vector.broadcast %cst_851 : f32 to vector<2x128xf32>
    %2878 = arith.mulf %2876, %2877 : vector<2x128xf32>
    %2879 = arith.mulf %417, %2878 : vector<2x128xf32>
    %cst_852 = arith.constant 2.500000e-01 : f32
    %2880 = vector.broadcast %cst_852 : f32 to vector<2x128xf32>
    %2881 = arith.mulf %2880, %2855 : vector<2x128xf32>
    %2882 = arith.mulf %2881, %2865 : vector<2x128xf32>
    %2883 = arith.addf %2879, %2882 : vector<2x128xf32>
    %2884 = arith.mulf %2874, %2759 : vector<2x128xf32>
    %2885 = arith.mulf %2884, %2857 : vector<2x128xf32>
    %cst_853 = arith.constant 1.000000e-01 : f32
    %2886 = vector.broadcast %cst_853 : f32 to vector<2x128xf32>
    %2887 = arith.addf %2885, %2886 : vector<2x128xf32>
    %2888 = arith.mulf %2883, %2783 : vector<2x128xf32>
    %2889 = arith.mulf %2888, %2857 : vector<2x128xf32>
    %cst_854 = arith.constant 1.000000e-01 : f32
    %2890 = vector.broadcast %cst_854 : f32 to vector<2x128xf32>
    %2891 = arith.addf %2889, %2890 : vector<2x128xf32>
    %2892 = tpu.reciprocal %2891 {approx = true} : vector<2x128xf32> -> vector<2x128xf32>
    %2893 = arith.mulf %2887, %2892 : vector<2x128xf32>
    %2894 = math.log %2893 : vector<2x128xf32>
    %2895 = math.absf %2894 : vector<2x128xf32>
    %2896 = arith.addf %2660, %2895 : vector<2x128xf32>
    %2897 = vector.broadcast %239 : f32 to vector<2x128xf32>
    %2898 = arith.mulf %2897, %2703 : vector<2x128xf32>
    %cst_855 = arith.constant 1.000000e+00 : f32
    %2899 = vector.broadcast %cst_855 : f32 to vector<2x128xf32>
    %2900 = arith.subf %2899, %425 : vector<2x128xf32>
    %2901 = arith.mulf %2900, %2735 : vector<2x128xf32>
    %2902 = arith.addf %425, %2901 : vector<2x128xf32>
    %cst_856 = arith.constant 1.000000e+00 : f32
    %2903 = vector.broadcast %cst_856 : f32 to vector<2x128xf32>
    %2904 = arith.subf %2903, %431 : vector<2x128xf32>
    %2905 = arith.mulf %2904, %2735 : vector<2x128xf32>
    %2906 = arith.addf %431, %2905 : vector<2x128xf32>
    %cst_857 = arith.constant 1.000000e+00 : f32
    %2907 = vector.broadcast %cst_857 : f32 to vector<2x128xf32>
    %2908 = arith.subf %2907, %425 : vector<2x128xf32>
    %cst_858 = arith.constant 0.318309873 : f32
    %2909 = vector.broadcast %cst_858 : f32 to vector<2x128xf32>
    %2910 = arith.mulf %2908, %2909 : vector<2x128xf32>
    %2911 = arith.mulf %413, %2910 : vector<2x128xf32>
    %cst_859 = arith.constant 2.500000e-01 : f32
    %2912 = vector.broadcast %cst_859 : f32 to vector<2x128xf32>
    %2913 = arith.mulf %2912, %2819 : vector<2x128xf32>
    %2914 = arith.mulf %2913, %2902 : vector<2x128xf32>
    %2915 = arith.addf %2911, %2914 : vector<2x128xf32>
    %cst_860 = arith.constant 1.000000e+00 : f32
    %2916 = vector.broadcast %cst_860 : f32 to vector<2x128xf32>
    %2917 = arith.subf %2916, %431 : vector<2x128xf32>
    %cst_861 = arith.constant 0.318309873 : f32
    %2918 = vector.broadcast %cst_861 : f32 to vector<2x128xf32>
    %2919 = arith.mulf %2917, %2918 : vector<2x128xf32>
    %2920 = arith.mulf %419, %2919 : vector<2x128xf32>
    %cst_862 = arith.constant 2.500000e-01 : f32
    %2921 = vector.broadcast %cst_862 : f32 to vector<2x128xf32>
    %2922 = arith.mulf %2921, %2855 : vector<2x128xf32>
    %2923 = arith.mulf %2922, %2906 : vector<2x128xf32>
    %2924 = arith.addf %2920, %2923 : vector<2x128xf32>
    %2925 = arith.mulf %2915, %2759 : vector<2x128xf32>
    %2926 = arith.mulf %2925, %2898 : vector<2x128xf32>
    %cst_863 = arith.constant 1.000000e-01 : f32
    %2927 = vector.broadcast %cst_863 : f32 to vector<2x128xf32>
    %2928 = arith.addf %2926, %2927 : vector<2x128xf32>
    %2929 = arith.mulf %2924, %2783 : vector<2x128xf32>
    %2930 = arith.mulf %2929, %2898 : vector<2x128xf32>
    %cst_864 = arith.constant 1.000000e-01 : f32
    %2931 = vector.broadcast %cst_864 : f32 to vector<2x128xf32>
    %2932 = arith.addf %2930, %2931 : vector<2x128xf32>
    %2933 = tpu.reciprocal %2932 {approx = true} : vector<2x128xf32> -> vector<2x128xf32>
    %2934 = arith.mulf %2928, %2933 : vector<2x128xf32>
    %2935 = math.log %2934 : vector<2x128xf32>
    %2936 = math.absf %2935 : vector<2x128xf32>
    %2937 = arith.addf %2896, %2936 : vector<2x128xf32>
    %2938 = vector.broadcast %242 : f32 to vector<2x128xf32>
    %2939 = arith.mulf %2938, %2703 : vector<2x128xf32>
    %cst_865 = arith.constant 1.000000e+00 : f32
    %2940 = vector.broadcast %cst_865 : f32 to vector<2x128xf32>
    %2941 = arith.subf %2940, %427 : vector<2x128xf32>
    %2942 = arith.mulf %2941, %2735 : vector<2x128xf32>
    %2943 = arith.addf %427, %2942 : vector<2x128xf32>
    %cst_866 = arith.constant 1.000000e+00 : f32
    %2944 = vector.broadcast %cst_866 : f32 to vector<2x128xf32>
    %2945 = arith.subf %2944, %433 : vector<2x128xf32>
    %2946 = arith.mulf %2945, %2735 : vector<2x128xf32>
    %2947 = arith.addf %433, %2946 : vector<2x128xf32>
    %cst_867 = arith.constant 1.000000e+00 : f32
    %2948 = vector.broadcast %cst_867 : f32 to vector<2x128xf32>
    %2949 = arith.subf %2948, %427 : vector<2x128xf32>
    %cst_868 = arith.constant 0.318309873 : f32
    %2950 = vector.broadcast %cst_868 : f32 to vector<2x128xf32>
    %2951 = arith.mulf %2949, %2950 : vector<2x128xf32>
    %2952 = arith.mulf %415, %2951 : vector<2x128xf32>
    %cst_869 = arith.constant 2.500000e-01 : f32
    %2953 = vector.broadcast %cst_869 : f32 to vector<2x128xf32>
    %2954 = arith.mulf %2953, %2819 : vector<2x128xf32>
    %2955 = arith.mulf %2954, %2943 : vector<2x128xf32>
    %2956 = arith.addf %2952, %2955 : vector<2x128xf32>
    %cst_870 = arith.constant 1.000000e+00 : f32
    %2957 = vector.broadcast %cst_870 : f32 to vector<2x128xf32>
    %2958 = arith.subf %2957, %433 : vector<2x128xf32>
    %cst_871 = arith.constant 0.318309873 : f32
    %2959 = vector.broadcast %cst_871 : f32 to vector<2x128xf32>
    %2960 = arith.mulf %2958, %2959 : vector<2x128xf32>
    %2961 = arith.mulf %421, %2960 : vector<2x128xf32>
    %cst_872 = arith.constant 2.500000e-01 : f32
    %2962 = vector.broadcast %cst_872 : f32 to vector<2x128xf32>
    %2963 = arith.mulf %2962, %2855 : vector<2x128xf32>
    %2964 = arith.mulf %2963, %2947 : vector<2x128xf32>
    %2965 = arith.addf %2961, %2964 : vector<2x128xf32>
    %2966 = arith.mulf %2956, %2759 : vector<2x128xf32>
    %2967 = arith.mulf %2966, %2939 : vector<2x128xf32>
    %cst_873 = arith.constant 1.000000e-01 : f32
    %2968 = vector.broadcast %cst_873 : f32 to vector<2x128xf32>
    %2969 = arith.addf %2967, %2968 : vector<2x128xf32>
    %2970 = arith.mulf %2965, %2783 : vector<2x128xf32>
    %2971 = arith.mulf %2970, %2939 : vector<2x128xf32>
    %cst_874 = arith.constant 1.000000e-01 : f32
    %2972 = vector.broadcast %cst_874 : f32 to vector<2x128xf32>
    %2973 = arith.addf %2971, %2972 : vector<2x128xf32>
    %2974 = tpu.reciprocal %2973 {approx = true} : vector<2x128xf32> -> vector<2x128xf32>
    %2975 = arith.mulf %2969, %2974 : vector<2x128xf32>
    %2976 = math.log %2975 : vector<2x128xf32>
    %2977 = math.absf %2976 : vector<2x128xf32>
    %2978 = arith.addf %2937, %2977 : vector<2x128xf32>
    %2979 = vector.broadcast %248 : f32 to vector<2x128xf32>
    %2980 = arith.subf %2979, %274 : vector<2x128xf32>
    %2981 = vector.broadcast %251 : f32 to vector<2x128xf32>
    %2982 = arith.subf %2981, %276 : vector<2x128xf32>
    %2983 = arith.mulf %2980, %2980 : vector<2x128xf32>
    %2984 = arith.mulf %2982, %2982 : vector<2x128xf32>
    %2985 = arith.addf %2983, %2984 : vector<2x128xf32>
    %2986 = arith.mulf %254, %254 : f32
    %2987 = vector.broadcast %2986 : f32 to vector<2x128xf32>
    %2988 = arith.addf %2985, %2987 : vector<2x128xf32>
    %cst_875 = arith.constant 9.99999996E-13 : f32
    %2989 = vector.broadcast %cst_875 : f32 to vector<2x128xf32>
    %2990 = arith.addf %2988, %2989 : vector<2x128xf32>
    %2991 = math.rsqrt %2990 : vector<2x128xf32>
    %2992 = arith.mulf %2980, %2991 : vector<2x128xf32>
    %2993 = arith.mulf %2982, %2991 : vector<2x128xf32>
    %2994 = vector.broadcast %254 : f32 to vector<2x128xf32>
    %2995 = arith.mulf %2994, %2991 : vector<2x128xf32>
    %2996 = vector.broadcast %257 : f32 to vector<2x128xf32>
    %2997 = arith.subf %2996, %274 : vector<2x128xf32>
    %2998 = vector.broadcast %260 : f32 to vector<2x128xf32>
    %2999 = arith.subf %2998, %276 : vector<2x128xf32>
    %3000 = arith.mulf %2997, %2997 : vector<2x128xf32>
    %3001 = arith.mulf %2999, %2999 : vector<2x128xf32>
    %3002 = arith.addf %3000, %3001 : vector<2x128xf32>
    %3003 = arith.mulf %263, %263 : f32
    %3004 = vector.broadcast %3003 : f32 to vector<2x128xf32>
    %3005 = arith.addf %3002, %3004 : vector<2x128xf32>
    %cst_876 = arith.constant 9.99999996E-13 : f32
    %3006 = vector.broadcast %cst_876 : f32 to vector<2x128xf32>
    %3007 = arith.addf %3005, %3006 : vector<2x128xf32>
    %3008 = math.rsqrt %3007 : vector<2x128xf32>
    %3009 = arith.mulf %2997, %3008 : vector<2x128xf32>
    %3010 = arith.mulf %2999, %3008 : vector<2x128xf32>
    %3011 = vector.broadcast %263 : f32 to vector<2x128xf32>
    %3012 = arith.mulf %3011, %3008 : vector<2x128xf32>
    %3013 = arith.mulf %2997, %2997 : vector<2x128xf32>
    %3014 = arith.mulf %2999, %2999 : vector<2x128xf32>
    %3015 = arith.addf %3013, %3014 : vector<2x128xf32>
    %3016 = arith.mulf %263, %263 : f32
    %3017 = vector.broadcast %3016 : f32 to vector<2x128xf32>
    %3018 = arith.addf %3015, %3017 : vector<2x128xf32>
    %cst_877 = arith.constant 9.99999996E-13 : f32
    %3019 = vector.broadcast %cst_877 : f32 to vector<2x128xf32>
    %3020 = arith.maximumf %3018, %3019 : vector<2x128xf32>
    %3021 = tpu.reciprocal %3020 {approx = true} : vector<2x128xf32> -> vector<2x128xf32>
    %3022 = arith.addf %3009, %2992 : vector<2x128xf32>
    %cst_878 = arith.constant 5.000000e-01 : f32
    %3023 = vector.broadcast %cst_878 : f32 to vector<2x128xf32>
    %3024 = arith.mulf %3022, %3023 : vector<2x128xf32>
    %3025 = arith.addf %3010, %2993 : vector<2x128xf32>
    %cst_879 = arith.constant 5.000000e-01 : f32
    %3026 = vector.broadcast %cst_879 : f32 to vector<2x128xf32>
    %3027 = arith.mulf %3025, %3026 : vector<2x128xf32>
    %3028 = arith.addf %3012, %2995 : vector<2x128xf32>
    %cst_880 = arith.constant 5.000000e-01 : f32
    %3029 = vector.broadcast %cst_880 : f32 to vector<2x128xf32>
    %3030 = arith.mulf %3028, %3029 : vector<2x128xf32>
    %3031 = arith.mulf %3024, %3024 : vector<2x128xf32>
    %3032 = arith.mulf %3027, %3027 : vector<2x128xf32>
    %3033 = arith.addf %3031, %3032 : vector<2x128xf32>
    %3034 = arith.mulf %3030, %3030 : vector<2x128xf32>
    %3035 = arith.addf %3033, %3034 : vector<2x128xf32>
    %cst_881 = arith.constant 9.99999996E-13 : f32
    %3036 = vector.broadcast %cst_881 : f32 to vector<2x128xf32>
    %3037 = arith.addf %3035, %3036 : vector<2x128xf32>
    %3038 = math.rsqrt %3037 : vector<2x128xf32>
    %3039 = arith.mulf %3024, %3038 : vector<2x128xf32>
    %3040 = arith.mulf %3027, %3038 : vector<2x128xf32>
    %3041 = arith.mulf %3030, %3038 : vector<2x128xf32>
    %3042 = arith.mulf %2992, %3039 : vector<2x128xf32>
    %3043 = arith.mulf %2993, %3040 : vector<2x128xf32>
    %3044 = arith.addf %3042, %3043 : vector<2x128xf32>
    %3045 = arith.mulf %2995, %3041 : vector<2x128xf32>
    %3046 = arith.addf %3044, %3045 : vector<2x128xf32>
    %cst_882 = arith.constant 1.000000e-03 : f32
    %3047 = vector.broadcast %cst_882 : f32 to vector<2x128xf32>
    %3048 = arith.maximumf %3046, %3047 : vector<2x128xf32>
    %cst_883 = arith.constant 1.000000e+00 : f32
    %3049 = vector.broadcast %cst_883 : f32 to vector<2x128xf32>
    %3050 = arith.subf %3049, %3048 : vector<2x128xf32>
    %3051 = arith.mulf %3050, %3050 : vector<2x128xf32>
    %3052 = arith.mulf %3051, %3051 : vector<2x128xf32>
    %3053 = arith.mulf %3052, %3050 : vector<2x128xf32>
    %3054 = arith.mulf %399, %3039 : vector<2x128xf32>
    %3055 = arith.mulf %401, %3040 : vector<2x128xf32>
    %3056 = arith.addf %3054, %3055 : vector<2x128xf32>
    %3057 = arith.mulf %403, %3041 : vector<2x128xf32>
    %3058 = arith.addf %3056, %3057 : vector<2x128xf32>
    %cst_884 = arith.constant 1.000000e-03 : f32
    %3059 = vector.broadcast %cst_884 : f32 to vector<2x128xf32>
    %3060 = arith.maximumf %3058, %3059 : vector<2x128xf32>
    %3061 = arith.mulf %399, %2992 : vector<2x128xf32>
    %3062 = arith.mulf %401, %2993 : vector<2x128xf32>
    %3063 = arith.addf %3061, %3062 : vector<2x128xf32>
    %3064 = arith.mulf %403, %2995 : vector<2x128xf32>
    %3065 = arith.addf %3063, %3064 : vector<2x128xf32>
    %cst_885 = arith.constant 1.000000e-03 : f32
    %3066 = vector.broadcast %cst_885 : f32 to vector<2x128xf32>
    %3067 = arith.maximumf %3065, %3066 : vector<2x128xf32>
    %3068 = arith.mulf %399, %3009 : vector<2x128xf32>
    %3069 = arith.mulf %401, %3010 : vector<2x128xf32>
    %3070 = arith.addf %3068, %3069 : vector<2x128xf32>
    %3071 = arith.mulf %403, %3012 : vector<2x128xf32>
    %3072 = arith.addf %3070, %3071 : vector<2x128xf32>
    %3073 = arith.mulf %3060, %3060 : vector<2x128xf32>
    %cst_886 = arith.constant 1.000000e-03 : f32
    %3074 = vector.broadcast %cst_886 : f32 to vector<2x128xf32>
    %3075 = arith.maximumf %3072, %3074 : vector<2x128xf32>
    %cst_887 = arith.constant 0.000000e+00 : f32
    %3076 = vector.broadcast %cst_887 : f32 to vector<2x128xf32>
    %3077 = arith.maximumf %3072, %3076 : vector<2x128xf32>
    %3078 = arith.mulf %405, %3039 : vector<2x128xf32>
    %3079 = arith.mulf %407, %3040 : vector<2x128xf32>
    %3080 = arith.addf %3078, %3079 : vector<2x128xf32>
    %3081 = arith.mulf %409, %3041 : vector<2x128xf32>
    %3082 = arith.addf %3080, %3081 : vector<2x128xf32>
    %cst_888 = arith.constant 1.000000e-03 : f32
    %3083 = vector.broadcast %cst_888 : f32 to vector<2x128xf32>
    %3084 = arith.maximumf %3082, %3083 : vector<2x128xf32>
    %3085 = arith.mulf %405, %2992 : vector<2x128xf32>
    %3086 = arith.mulf %407, %2993 : vector<2x128xf32>
    %3087 = arith.addf %3085, %3086 : vector<2x128xf32>
    %3088 = arith.mulf %409, %2995 : vector<2x128xf32>
    %3089 = arith.addf %3087, %3088 : vector<2x128xf32>
    %cst_889 = arith.constant 1.000000e-03 : f32
    %3090 = vector.broadcast %cst_889 : f32 to vector<2x128xf32>
    %3091 = arith.maximumf %3089, %3090 : vector<2x128xf32>
    %3092 = arith.mulf %405, %3009 : vector<2x128xf32>
    %3093 = arith.mulf %407, %3010 : vector<2x128xf32>
    %3094 = arith.addf %3092, %3093 : vector<2x128xf32>
    %3095 = arith.mulf %409, %3012 : vector<2x128xf32>
    %3096 = arith.addf %3094, %3095 : vector<2x128xf32>
    %3097 = arith.mulf %3084, %3084 : vector<2x128xf32>
    %cst_890 = arith.constant 1.000000e-03 : f32
    %3098 = vector.broadcast %cst_890 : f32 to vector<2x128xf32>
    %3099 = arith.maximumf %3096, %3098 : vector<2x128xf32>
    %cst_891 = arith.constant 0.000000e+00 : f32
    %3100 = vector.broadcast %cst_891 : f32 to vector<2x128xf32>
    %3101 = arith.maximumf %3096, %3100 : vector<2x128xf32>
    %c0_892 = arith.constant 0 : index
    %c6_893 = arith.constant 6 : index
    %c0_894 = arith.constant 0 : index
    %c0_895 = arith.constant 0 : index
    %3102 = vector.load %arg5[%c0_892, %c6_893, %c0_894, %c0_895] : memref<1x12x2x128xf32, #tpu.memory_space<vmem>>, vector<1x1x2x128xf32>
    %3103 = vector.shape_cast %3102 : vector<1x1x2x128xf32> to vector<2x128xf32>
    %3104 = arith.mulf %3103, %3103 : vector<2x128xf32>
    %3105 = arith.mulf %3104, %3104 : vector<2x128xf32>
    %cst_896 = arith.constant 1.000000e+00 : f32
    %3106 = vector.broadcast %cst_896 : f32 to vector<2x128xf32>
    %3107 = arith.subf %3105, %3106 : vector<2x128xf32>
    %3108 = arith.mulf %3073, %3107 : vector<2x128xf32>
    %cst_897 = arith.constant 1.000000e+00 : f32
    %3109 = vector.broadcast %cst_897 : f32 to vector<2x128xf32>
    %3110 = arith.addf %3108, %3109 : vector<2x128xf32>
    %cst_898 = arith.constant 1.000000e-03 : f32
    %3111 = vector.broadcast %cst_898 : f32 to vector<2x128xf32>
    %3112 = arith.maximumf %3110, %3111 : vector<2x128xf32>
    %cst_899 = arith.constant 3.14159274 : f32
    %3113 = vector.broadcast %cst_899 : f32 to vector<2x128xf32>
    %3114 = arith.mulf %3113, %3112 : vector<2x128xf32>
    %3115 = arith.mulf %3114, %3112 : vector<2x128xf32>
    %3116 = tpu.reciprocal %3115 {approx = true} : vector<2x128xf32> -> vector<2x128xf32>
    %3117 = arith.mulf %3105, %3116 : vector<2x128xf32>
    %cst_900 = arith.constant 5.000000e-01 : f32
    %3118 = vector.broadcast %cst_900 : f32 to vector<2x128xf32>
    %3119 = arith.mulf %3104, %3118 : vector<2x128xf32>
    %cst_901 = arith.constant 9.99999974E-5 : f32
    %3120 = vector.broadcast %cst_901 : f32 to vector<2x128xf32>
    %3121 = arith.maximumf %3119, %3120 : vector<2x128xf32>
    %cst_902 = arith.constant 1.000000e+00 : f32
    %3122 = vector.broadcast %cst_902 : f32 to vector<2x128xf32>
    %3123 = arith.subf %3122, %3121 : vector<2x128xf32>
    %3124 = arith.mulf %3075, %3123 : vector<2x128xf32>
    %3125 = arith.addf %3124, %3121 : vector<2x128xf32>
    %cst_903 = arith.constant 1.000000e-03 : f32
    %3126 = vector.broadcast %cst_903 : f32 to vector<2x128xf32>
    %3127 = arith.maximumf %3125, %3126 : vector<2x128xf32>
    %3128 = tpu.reciprocal %3127 {approx = true} : vector<2x128xf32> -> vector<2x128xf32>
    %cst_904 = arith.constant 1.000000e+00 : f32
    %3129 = vector.broadcast %cst_904 : f32 to vector<2x128xf32>
    %3130 = arith.subf %3129, %3121 : vector<2x128xf32>
    %3131 = arith.mulf %3067, %3130 : vector<2x128xf32>
    %3132 = arith.addf %3131, %3121 : vector<2x128xf32>
    %cst_905 = arith.constant 1.000000e-03 : f32
    %3133 = vector.broadcast %cst_905 : f32 to vector<2x128xf32>
    %3134 = arith.maximumf %3132, %3133 : vector<2x128xf32>
    %3135 = tpu.reciprocal %3134 {approx = true} : vector<2x128xf32> -> vector<2x128xf32>
    %3136 = arith.mulf %3117, %3128 : vector<2x128xf32>
    %3137 = arith.mulf %3136, %3135 : vector<2x128xf32>
    %c0_906 = arith.constant 0 : index
    %c6_907 = arith.constant 6 : index
    %c0_908 = arith.constant 0 : index
    %c0_909 = arith.constant 0 : index
    %3138 = vector.load %arg6[%c0_906, %c6_907, %c0_908, %c0_909] : memref<1x12x2x128xf32, #tpu.memory_space<vmem>>, vector<1x1x2x128xf32>
    %3139 = vector.shape_cast %3138 : vector<1x1x2x128xf32> to vector<2x128xf32>
    %3140 = arith.mulf %3139, %3139 : vector<2x128xf32>
    %3141 = arith.mulf %3140, %3140 : vector<2x128xf32>
    %cst_910 = arith.constant 1.000000e+00 : f32
    %3142 = vector.broadcast %cst_910 : f32 to vector<2x128xf32>
    %3143 = arith.subf %3141, %3142 : vector<2x128xf32>
    %3144 = arith.mulf %3097, %3143 : vector<2x128xf32>
    %cst_911 = arith.constant 1.000000e+00 : f32
    %3145 = vector.broadcast %cst_911 : f32 to vector<2x128xf32>
    %3146 = arith.addf %3144, %3145 : vector<2x128xf32>
    %cst_912 = arith.constant 1.000000e-03 : f32
    %3147 = vector.broadcast %cst_912 : f32 to vector<2x128xf32>
    %3148 = arith.maximumf %3146, %3147 : vector<2x128xf32>
    %cst_913 = arith.constant 3.14159274 : f32
    %3149 = vector.broadcast %cst_913 : f32 to vector<2x128xf32>
    %3150 = arith.mulf %3149, %3148 : vector<2x128xf32>
    %3151 = arith.mulf %3150, %3148 : vector<2x128xf32>
    %3152 = tpu.reciprocal %3151 {approx = true} : vector<2x128xf32> -> vector<2x128xf32>
    %3153 = arith.mulf %3141, %3152 : vector<2x128xf32>
    %cst_914 = arith.constant 5.000000e-01 : f32
    %3154 = vector.broadcast %cst_914 : f32 to vector<2x128xf32>
    %3155 = arith.mulf %3140, %3154 : vector<2x128xf32>
    %cst_915 = arith.constant 9.99999974E-5 : f32
    %3156 = vector.broadcast %cst_915 : f32 to vector<2x128xf32>
    %3157 = arith.maximumf %3155, %3156 : vector<2x128xf32>
    %cst_916 = arith.constant 1.000000e+00 : f32
    %3158 = vector.broadcast %cst_916 : f32 to vector<2x128xf32>
    %3159 = arith.subf %3158, %3157 : vector<2x128xf32>
    %3160 = arith.mulf %3099, %3159 : vector<2x128xf32>
    %3161 = arith.addf %3160, %3157 : vector<2x128xf32>
    %cst_917 = arith.constant 1.000000e-03 : f32
    %3162 = vector.broadcast %cst_917 : f32 to vector<2x128xf32>
    %3163 = arith.maximumf %3161, %3162 : vector<2x128xf32>
    %3164 = tpu.reciprocal %3163 {approx = true} : vector<2x128xf32> -> vector<2x128xf32>
    %cst_918 = arith.constant 1.000000e+00 : f32
    %3165 = vector.broadcast %cst_918 : f32 to vector<2x128xf32>
    %3166 = arith.subf %3165, %3157 : vector<2x128xf32>
    %3167 = arith.mulf %3091, %3166 : vector<2x128xf32>
    %3168 = arith.addf %3167, %3157 : vector<2x128xf32>
    %cst_919 = arith.constant 1.000000e-03 : f32
    %3169 = vector.broadcast %cst_919 : f32 to vector<2x128xf32>
    %3170 = arith.maximumf %3168, %3169 : vector<2x128xf32>
    %3171 = tpu.reciprocal %3170 {approx = true} : vector<2x128xf32> -> vector<2x128xf32>
    %3172 = arith.mulf %3153, %3164 : vector<2x128xf32>
    %3173 = arith.mulf %3172, %3171 : vector<2x128xf32>
    %3174 = vector.broadcast %266 : f32 to vector<2x128xf32>
    %3175 = arith.mulf %3174, %3021 : vector<2x128xf32>
    %cst_920 = arith.constant 1.000000e+00 : f32
    %3176 = vector.broadcast %cst_920 : f32 to vector<2x128xf32>
    %3177 = arith.subf %3176, %423 : vector<2x128xf32>
    %3178 = arith.mulf %3177, %3053 : vector<2x128xf32>
    %3179 = arith.addf %423, %3178 : vector<2x128xf32>
    %cst_921 = arith.constant 1.000000e+00 : f32
    %3180 = vector.broadcast %cst_921 : f32 to vector<2x128xf32>
    %3181 = arith.subf %3180, %429 : vector<2x128xf32>
    %3182 = arith.mulf %3181, %3053 : vector<2x128xf32>
    %3183 = arith.addf %429, %3182 : vector<2x128xf32>
    %cst_922 = arith.constant 1.000000e+00 : f32
    %3184 = vector.broadcast %cst_922 : f32 to vector<2x128xf32>
    %3185 = arith.subf %3184, %423 : vector<2x128xf32>
    %cst_923 = arith.constant 0.318309873 : f32
    %3186 = vector.broadcast %cst_923 : f32 to vector<2x128xf32>
    %3187 = arith.mulf %3185, %3186 : vector<2x128xf32>
    %3188 = arith.mulf %411, %3187 : vector<2x128xf32>
    %cst_924 = arith.constant 2.500000e-01 : f32
    %3189 = vector.broadcast %cst_924 : f32 to vector<2x128xf32>
    %3190 = arith.mulf %3189, %3137 : vector<2x128xf32>
    %3191 = arith.mulf %3190, %3179 : vector<2x128xf32>
    %3192 = arith.addf %3188, %3191 : vector<2x128xf32>
    %cst_925 = arith.constant 1.000000e+00 : f32
    %3193 = vector.broadcast %cst_925 : f32 to vector<2x128xf32>
    %3194 = arith.subf %3193, %429 : vector<2x128xf32>
    %cst_926 = arith.constant 0.318309873 : f32
    %3195 = vector.broadcast %cst_926 : f32 to vector<2x128xf32>
    %3196 = arith.mulf %3194, %3195 : vector<2x128xf32>
    %3197 = arith.mulf %417, %3196 : vector<2x128xf32>
    %cst_927 = arith.constant 2.500000e-01 : f32
    %3198 = vector.broadcast %cst_927 : f32 to vector<2x128xf32>
    %3199 = arith.mulf %3198, %3173 : vector<2x128xf32>
    %3200 = arith.mulf %3199, %3183 : vector<2x128xf32>
    %3201 = arith.addf %3197, %3200 : vector<2x128xf32>
    %3202 = arith.mulf %3192, %3077 : vector<2x128xf32>
    %3203 = arith.mulf %3202, %3175 : vector<2x128xf32>
    %cst_928 = arith.constant 1.000000e-01 : f32
    %3204 = vector.broadcast %cst_928 : f32 to vector<2x128xf32>
    %3205 = arith.addf %3203, %3204 : vector<2x128xf32>
    %3206 = arith.mulf %3201, %3101 : vector<2x128xf32>
    %3207 = arith.mulf %3206, %3175 : vector<2x128xf32>
    %cst_929 = arith.constant 1.000000e-01 : f32
    %3208 = vector.broadcast %cst_929 : f32 to vector<2x128xf32>
    %3209 = arith.addf %3207, %3208 : vector<2x128xf32>
    %3210 = tpu.reciprocal %3209 {approx = true} : vector<2x128xf32> -> vector<2x128xf32>
    %3211 = arith.mulf %3205, %3210 : vector<2x128xf32>
    %3212 = math.log %3211 : vector<2x128xf32>
    %3213 = math.absf %3212 : vector<2x128xf32>
    %3214 = arith.addf %2978, %3213 : vector<2x128xf32>
    %3215 = vector.broadcast %269 : f32 to vector<2x128xf32>
    %3216 = arith.mulf %3215, %3021 : vector<2x128xf32>
    %cst_930 = arith.constant 1.000000e+00 : f32
    %3217 = vector.broadcast %cst_930 : f32 to vector<2x128xf32>
    %3218 = arith.subf %3217, %425 : vector<2x128xf32>
    %3219 = arith.mulf %3218, %3053 : vector<2x128xf32>
    %3220 = arith.addf %425, %3219 : vector<2x128xf32>
    %cst_931 = arith.constant 1.000000e+00 : f32
    %3221 = vector.broadcast %cst_931 : f32 to vector<2x128xf32>
    %3222 = arith.subf %3221, %431 : vector<2x128xf32>
    %3223 = arith.mulf %3222, %3053 : vector<2x128xf32>
    %3224 = arith.addf %431, %3223 : vector<2x128xf32>
    %cst_932 = arith.constant 1.000000e+00 : f32
    %3225 = vector.broadcast %cst_932 : f32 to vector<2x128xf32>
    %3226 = arith.subf %3225, %425 : vector<2x128xf32>
    %cst_933 = arith.constant 0.318309873 : f32
    %3227 = vector.broadcast %cst_933 : f32 to vector<2x128xf32>
    %3228 = arith.mulf %3226, %3227 : vector<2x128xf32>
    %3229 = arith.mulf %413, %3228 : vector<2x128xf32>
    %cst_934 = arith.constant 2.500000e-01 : f32
    %3230 = vector.broadcast %cst_934 : f32 to vector<2x128xf32>
    %3231 = arith.mulf %3230, %3137 : vector<2x128xf32>
    %3232 = arith.mulf %3231, %3220 : vector<2x128xf32>
    %3233 = arith.addf %3229, %3232 : vector<2x128xf32>
    %cst_935 = arith.constant 1.000000e+00 : f32
    %3234 = vector.broadcast %cst_935 : f32 to vector<2x128xf32>
    %3235 = arith.subf %3234, %431 : vector<2x128xf32>
    %cst_936 = arith.constant 0.318309873 : f32
    %3236 = vector.broadcast %cst_936 : f32 to vector<2x128xf32>
    %3237 = arith.mulf %3235, %3236 : vector<2x128xf32>
    %3238 = arith.mulf %419, %3237 : vector<2x128xf32>
    %cst_937 = arith.constant 2.500000e-01 : f32
    %3239 = vector.broadcast %cst_937 : f32 to vector<2x128xf32>
    %3240 = arith.mulf %3239, %3173 : vector<2x128xf32>
    %3241 = arith.mulf %3240, %3224 : vector<2x128xf32>
    %3242 = arith.addf %3238, %3241 : vector<2x128xf32>
    %3243 = arith.mulf %3233, %3077 : vector<2x128xf32>
    %3244 = arith.mulf %3243, %3216 : vector<2x128xf32>
    %cst_938 = arith.constant 1.000000e-01 : f32
    %3245 = vector.broadcast %cst_938 : f32 to vector<2x128xf32>
    %3246 = arith.addf %3244, %3245 : vector<2x128xf32>
    %3247 = arith.mulf %3242, %3101 : vector<2x128xf32>
    %3248 = arith.mulf %3247, %3216 : vector<2x128xf32>
    %cst_939 = arith.constant 1.000000e-01 : f32
    %3249 = vector.broadcast %cst_939 : f32 to vector<2x128xf32>
    %3250 = arith.addf %3248, %3249 : vector<2x128xf32>
    %3251 = tpu.reciprocal %3250 {approx = true} : vector<2x128xf32> -> vector<2x128xf32>
    %3252 = arith.mulf %3246, %3251 : vector<2x128xf32>
    %3253 = math.log %3252 : vector<2x128xf32>
    %3254 = math.absf %3253 : vector<2x128xf32>
    %3255 = arith.addf %3214, %3254 : vector<2x128xf32>
    %3256 = vector.broadcast %272 : f32 to vector<2x128xf32>
    %3257 = arith.mulf %3256, %3021 : vector<2x128xf32>
    %cst_940 = arith.constant 1.000000e+00 : f32
    %3258 = vector.broadcast %cst_940 : f32 to vector<2x128xf32>
    %3259 = arith.subf %3258, %427 : vector<2x128xf32>
    %3260 = arith.mulf %3259, %3053 : vector<2x128xf32>
    %3261 = arith.addf %427, %3260 : vector<2x128xf32>
    %cst_941 = arith.constant 1.000000e+00 : f32
    %3262 = vector.broadcast %cst_941 : f32 to vector<2x128xf32>
    %3263 = arith.subf %3262, %433 : vector<2x128xf32>
    %3264 = arith.mulf %3263, %3053 : vector<2x128xf32>
    %3265 = arith.addf %433, %3264 : vector<2x128xf32>
    %cst_942 = arith.constant 1.000000e+00 : f32
    %3266 = vector.broadcast %cst_942 : f32 to vector<2x128xf32>
    %3267 = arith.subf %3266, %427 : vector<2x128xf32>
    %cst_943 = arith.constant 0.318309873 : f32
    %3268 = vector.broadcast %cst_943 : f32 to vector<2x128xf32>
    %3269 = arith.mulf %3267, %3268 : vector<2x128xf32>
    %3270 = arith.mulf %415, %3269 : vector<2x128xf32>
    %cst_944 = arith.constant 2.500000e-01 : f32
    %3271 = vector.broadcast %cst_944 : f32 to vector<2x128xf32>
    %3272 = arith.mulf %3271, %3137 : vector<2x128xf32>
    %3273 = arith.mulf %3272, %3261 : vector<2x128xf32>
    %3274 = arith.addf %3270, %3273 : vector<2x128xf32>
    %cst_945 = arith.constant 1.000000e+00 : f32
    %3275 = vector.broadcast %cst_945 : f32 to vector<2x128xf32>
    %3276 = arith.subf %3275, %433 : vector<2x128xf32>
    %cst_946 = arith.constant 0.318309873 : f32
    %3277 = vector.broadcast %cst_946 : f32 to vector<2x128xf32>
    %3278 = arith.mulf %3276, %3277 : vector<2x128xf32>
    %3279 = arith.mulf %421, %3278 : vector<2x128xf32>
    %cst_947 = arith.constant 2.500000e-01 : f32
    %3280 = vector.broadcast %cst_947 : f32 to vector<2x128xf32>
    %3281 = arith.mulf %3280, %3173 : vector<2x128xf32>
    %3282 = arith.mulf %3281, %3265 : vector<2x128xf32>
    %3283 = arith.addf %3279, %3282 : vector<2x128xf32>
    %3284 = arith.mulf %3274, %3077 : vector<2x128xf32>
    %3285 = arith.mulf %3284, %3257 : vector<2x128xf32>
    %cst_948 = arith.constant 1.000000e-01 : f32
    %3286 = vector.broadcast %cst_948 : f32 to vector<2x128xf32>
    %3287 = arith.addf %3285, %3286 : vector<2x128xf32>
    %3288 = arith.mulf %3283, %3101 : vector<2x128xf32>
    %3289 = arith.mulf %3288, %3257 : vector<2x128xf32>
    %cst_949 = arith.constant 1.000000e-01 : f32
    %3290 = vector.broadcast %cst_949 : f32 to vector<2x128xf32>
    %3291 = arith.addf %3289, %3290 : vector<2x128xf32>
    %3292 = tpu.reciprocal %3291 {approx = true} : vector<2x128xf32> -> vector<2x128xf32>
    %3293 = arith.mulf %3287, %3292 : vector<2x128xf32>
    %3294 = math.log %3293 : vector<2x128xf32>
    %3295 = math.absf %3294 : vector<2x128xf32>
    %3296 = arith.addf %3255, %3295 : vector<2x128xf32>
    %c0_950 = arith.constant 0 : index
    %c0_951 = arith.constant 0 : index
    %3297 = vector.load %arg9[%c0_950, %c0_951] : memref<2x128xf32, #tpu.memory_space<vmem>>, vector<2x128xf32>
    %3298 = arith.addf %3297, %3296 : vector<2x128xf32>
    %c0_952 = arith.constant 0 : index
    %c0_953 = arith.constant 0 : index
    %3299 = vector.load %arg9[%c0_952, %c0_953] : memref<2x128xf32, #tpu.memory_space<vmem>>, vector<2x128xf32>
    tpu.vector_store %arg9[%c0_952, %c0_953], %3298 {strides = array<i32>} : memref<2x128xf32, #tpu.memory_space<vmem>>, vector<2x128xf32>,
    %c0_954 = arith.constant 0 : index
    %c0_955 = arith.constant 0 : index
    %3300 = vector.load %arg10[%c0_954, %c0_955] : memref<2x128xf32, #tpu.memory_space<vmem>>, vector<2x128xf32>
    %3301 = arith.addf %3300, %397 : vector<2x128xf32>
    %c0_956 = arith.constant 0 : index
    %c0_957 = arith.constant 0 : index
    %3302 = vector.load %arg10[%c0_956, %c0_957] : memref<2x128xf32, #tpu.memory_space<vmem>>, vector<2x128xf32>
    tpu.vector_store %arg10[%c0_956, %c0_957], %3301 {strides = array<i32>} : memref<2x128xf32, #tpu.memory_space<vmem>>, vector<2x128xf32>,
    %c0_i32_958 = arith.constant 0 : i32
    %3303 = arith.cmpi eq, %arg2, %c0_i32_958 : i32
    %3304 = arith.extui %3303 : i1 to i32
    %c0_i32_959 = arith.constant 0 : i32
    %3305 = arith.cmpi ne, %3304, %c0_i32_959 : i32
    scf.if %3305 {
      %c0_960 = arith.constant 0 : index
      %c0_961 = arith.constant 0 : index
      %3306 = vector.load %arg9[%c0_960, %c0_961] : memref<2x128xf32, #tpu.memory_space<vmem>>, vector<2x128xf32>
      %3307 = vector.shape_cast %3306 : vector<2x128xf32> to vector<1x2x128xf32>
      %cst_962 = arith.constant dense<0.000000e+00> : vector<1xf32>
      %3308 = vector.multi_reduction <add>, %3307, %cst_962 [1, 2] : vector<1x2x128xf32> to vector<1xf32>
      %3309 = vector.shape_cast %3308 : vector<1xf32> to vector<1x1x1xf32>
      %3310 = vector.extract %3309[0, 0, 0] : f32 from vector<1x1x1xf32>
      %3311 = vector.broadcast %3310 : f32 to vector<1x1x1xf32>
      %c0_963 = arith.constant 0 : index
      %c0_964 = arith.constant 0 : index
      %c0_965 = arith.constant 0 : index
      %3312 = vector.load %arg7[%c0_963, %c0_964, %c0_965] : memref<1x1x1xf32, #tpu.memory_space<vmem>>, vector<1x1x1xf32>
      tpu.vector_store %arg7[%c0_963, %c0_964, %c0_965], %3311 {strides = array<i32>} : memref<1x1x1xf32, #tpu.memory_space<vmem>>, vector<1x1x1xf32>,
      %c0_966 = arith.constant 0 : index
      %c0_967 = arith.constant 0 : index
      %3313 = vector.load %arg10[%c0_966, %c0_967] : memref<2x128xf32, #tpu.memory_space<vmem>>, vector<2x128xf32>
      %3314 = vector.shape_cast %3313 : vector<2x128xf32> to vector<1x2x128xf32>
      %cst_968 = arith.constant dense<0.000000e+00> : vector<1xf32>
      %3315 = vector.multi_reduction <add>, %3314, %cst_968 [1, 2] : vector<1x2x128xf32> to vector<1xf32>
      %3316 = vector.shape_cast %3315 : vector<1xf32> to vector<1x1x1xf32>
      %3317 = vector.extract %3316[0, 0, 0] : f32 from vector<1x1x1xf32>
      %3318 = vector.broadcast %3317 : f32 to vector<1x1x1xf32>
      %c0_969 = arith.constant 0 : index
      %c0_970 = arith.constant 0 : index
      %c0_971 = arith.constant 0 : index
      %3319 = vector.load %arg8[%c0_969, %c0_970, %c0_971] : memref<1x1x1xf32, #tpu.memory_space<vmem>>, vector<1x1x1xf32>
      tpu.vector_store %arg8[%c0_969, %c0_970, %c0_971], %3318 {strides = array<i32>} : memref<1x1x1xf32, #tpu.memory_space<vmem>>, vector<1x1x1xf32>,
    } else {
    }
    return
  }
  func.func @transform_0(%arg0: i32, %arg1: i32, %arg2: i32) -> i32 {
    %c0_i32 = arith.constant 0 : i32
    %c0_i32_0 = arith.constant 0 : i32
    return %c0_i32 : i32
  }
  func.func @transform_1(%arg0: i32, %arg1: i32, %arg2: i32) -> (i32, i32, i32) {
    %c1_i32 = arith.constant 1 : i32
    %0 = arith.muli %arg1, %c1_i32 : i32
    %1 = arith.addi %0, %arg2 : i32
    %c0_i32 = arith.constant 0 : i32
    %c0_i32_0 = arith.constant 0 : i32
    %c0_i32_1 = arith.constant 0 : i32
    return %c0_i32, %1, %c0_i32_0 : i32, i32, i32
  }
  func.func @transform_2(%arg0: i32, %arg1: i32, %arg2: i32) -> (i32, i32, i32, i32) {
    %c1_i32 = arith.constant 1 : i32
    %0 = arith.muli %arg1, %c1_i32 : i32
    %1 = arith.addi %0, %arg2 : i32
    %c0_i32 = arith.constant 0 : i32
    %c0_i32_0 = arith.constant 0 : i32
    %c0_i32_1 = arith.constant 0 : i32
    return %arg0, %c0_i32, %1, %c0_i32_0 : i32, i32, i32, i32
  }
  func.func @transform_3(%arg0: i32, %arg1: i32, %arg2: i32) -> (i32, i32, i32, i32) {
    %c1_i32 = arith.constant 1 : i32
    %0 = arith.muli %arg1, %c1_i32 : i32
    %1 = arith.addi %0, %arg2 : i32
    %c0_i32 = arith.constant 0 : i32
    %c0_i32_0 = arith.constant 0 : i32
    %c0_i32_1 = arith.constant 0 : i32
    return %arg0, %c0_i32, %1, %c0_i32_0 : i32, i32, i32, i32
  }
  func.func @transform_4(%arg0: i32, %arg1: i32, %arg2: i32) -> (i32, i32, i32) {
    %c1_i32 = arith.constant 1 : i32
    %0 = arith.muli %arg0, %c1_i32 : i32
    %1 = arith.addi %0, %arg1 : i32
    %c0_i32 = arith.constant 0 : i32
    %c0_i32_0 = arith.constant 0 : i32
    %c0_i32_1 = arith.constant 0 : i32
    return %1, %c0_i32, %c0_i32_0 : i32, i32, i32
  }
  func.func @transform_5(%arg0: i32, %arg1: i32, %arg2: i32) -> (i32, i32, i32) {
    %c1_i32 = arith.constant 1 : i32
    %0 = arith.muli %arg0, %c1_i32 : i32
    %1 = arith.addi %0, %arg1 : i32
    %c0_i32 = arith.constant 0 : i32
    %c0_i32_0 = arith.constant 0 : i32
    %c0_i32_1 = arith.constant 0 : i32
    return %1, %c0_i32, %c0_i32_0 : i32, i32, i32
  }
}

</mosaic_0001>

<bundles_post_ra>
// kernel: tpu_custom_call.1
= control target key start
LH: loop header
LB: loop body
LE: loop exit
PB: predicated region body
PF: predicated region fallthrough
CT: control target
= control target key end

     0   :  { %s6141_s0 = inlined_call_operand.hbm [shape: f32[162], index: 0, kind: input, shape index: {}]   ;;  %s6142_s1 = inlined_call_operand.hbm [shape: f32[2,2,128], index: 1, kind: input, shape index: {}]   ;;  %s6143_s2 = inlined_call_operand.hbm [shape: f32[2,12,2,128], index: 2, kind: input, shape index: {}]   ;;  %s6144_s3 = inlined_call_operand.hbm [shape: f32[2,12,2,128], index: 3, kind: input, shape index: {}]   ;;  %s6145_s4 = inlined_call_operand.vmem [shape: f32[2,1,1], index: 4, kind: output, shape index: {0}]   ;;  %s6146_s5 = inlined_call_operand.vmem [shape: f32[2,1,1], index: 5, kind: output, shape index: {1}]  }
   0x1   :  { %6256 = sst [smem:[#allocation48_spill]] %s6141_s0 }
   0x2   :  { %6257 = sst [smem:[#allocation49_spill]] %s6142_s1 }
   0x3   :  { %6258 = sst [smem:[#allocation50_spill]] %s6143_s2 }
   0x4   :  { %11 = vsyncpa [#allocation6], 0 }
   0x5   :  { %12 = vsyncpa [#allocation5], 0 }
   0x6   :  { %13 = vsyncpa [#allocation9], 0 }
   0x7   :  { %15 = vsyncpa [#allocation9 + $0x1], 0  ;;  %s3642_s18 = smov 0   ;;  %s3644_s19 = smov 0  }
   0x8   :  { %s3646_s20 = smov 0   ;;  %s3648_s21 = smov 0  }
   0x9   :  { %s3650_s22 = smov 0   ;;  %s3652_s23 = smov 0  }
   0xa LB: > { %s40_s24 = sadd.s32 1, %s3601_s22  ;;  %s100_s25 = sadd.s32 1, %s3593_s20  ;;  %s3605_s23 = sphi %s3652_s23, %s21_s23   ;;  %s3601_s22 = sphi %s3650_s22, %s6445_s22   ;;  %s3597_s21 = sphi %s3648_s21, %s6444_s21   ;;  %s3593_s20 = sphi %s3646_s20, %s6443_s20   ;;  %s3589_s19 = sphi %s3644_s19, %s6442_s19   ;;  %s3585_s18 = sphi %s3642_s18, %s6441_s18  }
   0xb   : > { %p42_p0 = scmp.ge.s32.totalorder %s40_s24, 2  ;;  %p107_p1 = scmp.ne.s32.totalorder %s3593_s20, %s3589_s19 }
   0xc   : > { %p108_p2 = scmp.eq.s32.totalorder %s3605_s23, 0  ;;  %p3024_p5 = scmp.lt.s32.totalorder %s3605_s23, 2 }
   0xd   : > { %s6447_s24 = smov (%p42_p0, %s40_s24), 0  ;;  %s250_s27 = sand.u32 1, %s3605_s23  }
   0xe   : > { %p109_p3 = por %p108_p2, %p107_p1  ;;  %s95_s26 = ssub.s32 %s3601_s22, %s6447_s24 }
   0xf   : > { %p98_p4 = scmp.eq.s32.totalorder %s95_s26, 0  ;;  %s252_s28 = sand.u32 1, %s3593_s20  }
  0x10   : > { %s3687_s30 = smul.u32 24, %s252_s28  ;;  %p3690_p6 = pnand %p3024_p5, %p109_p3 }
  0x11   : > { %s3685_s29 = scalar_select %p98_p4, %s3593_s20, %s100_s25  }
  0x12   : > { %s2988_s6 = smul.u32 24, %s3601_s22  ;;  %s6260_s2 = sld [smem:[#allocation50_spill]] }
  0x13   : > { %s254_s11 = scalar_lea.vmem [#allocation8], %s3687_s30  ;;  %s3698_s14 = scalar_lea.sflag [#allocation9], %s250_s27 }
  0x14   : > { %s264_s12 = sshll.u32 %s254_s11, 4  ;;  %s6148_s15 = smov 32   ;;  %s265_s12 = int_to_ptr.vmem [resolvable:$true] %s264_s12 }
  0x15   : > { %s3608_s16 = smov 2   ;;  %s6147_s17 = sadd.s32 4294967295, %s3605_s23  }
  0x16   : > { %p113_p7 = scmp.ne.s32.totalorder %s3589_s19, %s3585_s18  ;;  %p3711_p8 = scmp.eq.s32.totalorder %s6147_s17, 0 }
  0x17   : > { %p2952_p9 = scmp.ge.s32.totalorder %s3605_s23, 1  ;;  %p210_p10 = scmp.lt.s32.totalorder %s3605_s23, 3 }
  0x18   : > { %s261_s10 = scalar_lea.hbm %s6260_s2, %s2988_s6  ;;  %p3719_p11 = por %p3711_p8, %p113_p7 }
  0x19   : > { %s262_s13 = sshll.u32 %s261_s10, 4  ;;  %p3723_p12 = pnand %p2952_p9, %p210_p10  ;;  %s263_s13 = int_to_ptr.hbm [resolvable:$true] %s262_s13 }
  0x1a   : > { %3018 = dma.hbm_to_vmem [thread:$0]  (!%p3690_p6), %s263_s13, 384, %s265_s12, %s3698_s14, %s6148_s15, %s6148_s15, %s3608_s16  }
  0x1b   : > { %s6264_s0 = sld [smem:[#allocation48_spill]]  ;;  %p3008_p13 = pneg %p3723_p12 }
  0x1c   : > { %s6265_s1 = sld [smem:[#allocation49_spill]]  ;;  %s3609_s12 = smov [#allocation7]  }
  0x1d   : > { %p3009_p0 = pnand %p3008_p13, %p3711_p8  ;;  %s236_s13 = sshll.u32 %s3609_s12, 4  ;;  %s237_s13 = int_to_ptr.vmem [resolvable:$true] %s236_s13 }
  0x1e   : > { %s285_s18 = scalar_lea.hbm %s6144_s3, %s2988_s6  ;;  %s3610_s28 = smov [#allocation4]  }
  0x1f   : > { %s286_s9 = sshll.u32 %s285_s18, 4  ;;  %s278_s10 = scalar_lea.vmem [#allocation10], %s3687_s30  ;;  %s287_s9 = int_to_ptr.hbm [resolvable:$true] %s286_s9 }
  0x20   : > { %s288_s2 = sshll.u32 %s278_s10, 4  ;;  %s289_s2 = int_to_ptr.vmem [resolvable:$true] %s288_s2 }
  0x21   : > { %s222_s8 = sshll.u32 %s6264_s0, 4  ;;  %s6266_s0 = smov 32   ;;  %s223_s8 = int_to_ptr.hbm [resolvable:$true] %s222_s8 }
  0x22   : > { %s234_s11 = sshll.u32 %s6265_s1, 4  ;;  %300 = sbr.rel (%p3723_p12) target bundleno = 842 (0x34a), region = 36  ;;  %s235_s11 = int_to_ptr.hbm [resolvable:$true] %s234_s11 }
  0x23   : > { %3011 = dma.hbm_to_smem (!%p3009_p0), %s223_s8, 32, %s3610_s28, [#allocation6]  }
  0x24   : > { %3014 = dma.hbm_to_vmem [thread:$0]  (!%p3009_p0), %s235_s11, 64, %s237_s13, [#allocation5], %s6266_s0, %s6266_s0, %s3608_s16  }
  0x25   : > { %3021 = dma.hbm_to_vmem [thread:$0]  (!%p3690_p6), %s287_s9, 384, %s289_s2, %s3698_s14, %s6266_s0, %s6266_s0, %s3608_s16  }
  0x27   : > { %3572 = dma.done.wait (%p3711_p8), [#allocation6], 32  }
  0x28   : > { %3574 = vsyncadd (%p3711_p8), [#allocation6], 4294967264 }
  0x29   : > { %3576 = dma.done.wait (%p3711_p8), [#allocation5], 64  }
  0x2a   : > { %3578 = vsyncadd (%p3711_p8), [#allocation5], 4294967232  ;;  %s6267_s30 = sadd.s32 4294967295, %s3605_s23   ;;  %s314_s2 = sand.u32 1, %s3589_s19  }
  0x2b   : > { %s312_s0 = sand.u32 1, %s6267_s30   ;;  %s2991_s6 = smul.u32 24, %s314_s2 }
  0x2c   : > { %s313_s7 = scalar_lea.sflag [#allocation9], %s312_s0 }
  0x2d   : > { %s3763_s14 = scalar_lea.vmem [#allocation8], %s2991_s6 }
  0x2e   : > { %3580 = dma.done.wait (%p3719_p11), %s313_s7, 768  }
  0x2f   : > { %3582 = vsyncadd (%p3719_p11), %s313_s7, 4294966528  ;;  %s3769_s15 = scalar_lea.vmem [#allocation10], %s2991_s6 }
  0x30   : > { %332 = sfence }
  0x31   : > { %v3611_v0 = vmov 0.0   ;;  %s3772_s16 = smul.u32 81, %s3597_s21  ;;  %v3789_v1 = vld [vmem:[#allocation7] sm:$0x3]  ;;  %v3791_v2 = vld [vmem:[#allocation7 + $0x2] sm:$0x3] }
  0x32   : > { %380 = vst [vmem:[#allocation2] sm:$0x3] %v3611_v0  ;;  %s3775_s17 = smul.u32 9, %s3597_s21  ;;  %p367_p1 = scmp.lt.s32.totalorder %s3597_s21, 1 }
  0x33   : > { %381 = vst [vmem:[#allocation3] sm:$0x3] %v3611_v0  ;;  %s384_s25 = sadd.s32 1, %s3772_s16  ;;  %s383_s26 = sld [smem:[#allocation4 + %s3772_s16]] }
  0x34   : > { %s385_s27 = sld [smem:[#allocation4 + %s384_s25]]  ;;  %s401_s8 = sadd.s32 1, %s3775_s17 }
  0x35   : > { %s386_s11 = sadd.s32 2, %s3772_s16  ;;  %s3781_s12 = smul.u32 9, %s401_s8 }
  0x36   : > { %s388_s13 = sadd.s32 3, %s3772_s16  ;;  %s390_s18 = sadd.s32 4, %s3772_s16 }
  0x37   : > { %s3785_s28 = sld [smem:[#allocation4 + %s386_s11]]  ;;  %s404_s10 = sadd.s32 1, %s3781_s12 }
  0x38   : > { %s389_s9 = sld [smem:[#allocation4 + %s388_s13]]  ;;  %s408_s0 = sadd.s32 3, %s3781_s12 }
  0x39   : > { %s391_s30 = sld [smem:[#allocation4 + %s390_s18]]  ;;  %v668_v3 = vstv %s383_s26  ;;  %s410_s6 = sadd.s32 4, %s3781_s12 }
  0x3a   : > { %v670_v4 = vstv %s385_s27  ;;  %s403_s2 = sld [smem:[#allocation4 + %s3781_s12]]  ;;  %v3796_v5 = vsub.f32 %v668_v3, %v3789_v1  ;;  %s420_s11 = sadd.s32 2, %s3775_s17 }
  0x3b   : > { %s405_s7 = sld [smem:[#allocation4 + %s404_s10]]  ;;  %v3799_v6 = vsub.f32 %v670_v4, %v3791_v2  ;;  %s392_s26 = sadd.s32 5, %s3772_s16 }
  0x3c   : > { %s409_s25 = sld [smem:[#allocation4 + %s408_s0]]  ;;  %v672_v7 = vmul.f32 %v3796_v5, %v3796_v5  ;;  %s3807_s27 = smul.u32 9, %s420_s11 }
  0x3d   : > { %s411_s8 = sld [smem:[#allocation4 + %s410_s6]]  ;;  %v673_v8 = vmul.f32 %v3799_v6, %v3799_v6  ;;  %s406_s13 = sadd.s32 2, %s3781_s12 }
  0x3e   : > { %v693_v9 = vstv %s389_s9  ;;  %s412_s18 = sadd.s32 5, %s3781_s12  ;;  %s675_s10 = smul.f32 %s3785_s28, %s3785_s28 }
  0x3f   : > { %v695_v10 = vstv %s391_s30  ;;  %v674_v13 = vadd.f32 %v673_v8, %v672_v7  ;;  %v3814_v14 = vsub.f32 %v693_v9, %v3789_v1  ;;  %s3819_s9 = sld [smem:[#allocation4 + %s392_s26]]  ;;  %s423_s0 = sadd.s32 1, %s3807_s27 }
  0x40   : > { %v927_v11 = vstv %s403_s2  ;;  %v3817_v15 = vsub.f32 %v695_v10, %v3791_v2  ;;  %s3827_s30 = sld [smem:[#allocation4 + %s406_s13]]  ;;  %v676_v20 = vstv %s675_s10  ;;  %s429_s13 = sadd.s32 4, %s3807_s27 }
  0x41   : > { %v929_v12 = vstv %s405_s7  ;;  %v3822_v18 = vsub.f32 %v927_v11, %v3789_v1  ;;  %s3830_s2 = sld [smem:[#allocation4 + %s412_s18]]  ;;  %v677_v21 = vadd.f32 %v676_v20, %v674_v13  ;;  %s425_s7 = sadd.s32 2, %s3807_s27  ;;  %v697_v24 = vmul.f32 %v3814_v14, %v3814_v14 }
  0x42   : > { %v952_v16 = vstv %s409_s25  ;;  %v3825_v19 = vsub.f32 %v929_v12, %v3791_v2  ;;  %s3839_s6 = sld [smem:[#allocation4 + %s3807_s27]]  ;;  %v698_v25 = vmul.f32 %v3817_v15, %v3817_v15  ;;  %v691_v20 = vstv %s3785_s28  ;;  %s394_s28 = sadd.s32 6, %s3772_s16 }
  0x43   : > { %v954_v17 = vstv %s411_s8  ;;  %v3833_v22 = vsub.f32 %v952_v16, %v3789_v1  ;;  %s3846_s25 = sld [smem:[#allocation4 + %s423_s0]]  ;;  %s427_s8 = sadd.s32 3, %s3807_s27  ;;  %v678_v26 = vadd.f32 1e-12, %v677_v21  ;;  %v931_v27 = vmul.f32 %v3822_v18, %v3822_v18 }
  0x44   : > { %v3836_v23 = vsub.f32 %v954_v17, %v3791_v2  ;;  %v932_v28 = vmul.f32 %v3825_v19, %v3825_v19  ;;  %s3853_s11 = sld [smem:[#allocation4 + %s425_s7]]  ;;  %v699_v31 = vadd.f32 %v698_v25, %v697_v24  ;;  %s477_s1 = sadd.s32 5, %s3775_s17 }
  0x45   : > { %3080 = vrsqrt.f32 %v678_v26  ;;  %v956_v29 = vmul.f32 %v3833_v22, %v3833_v22  ;;  %s3859_s26 = sld [smem:[#allocation4 + %s427_s8]]  ;;  %s700_s18 = smul.f32 %s3819_s9, %s3819_s9  ;;  %vm685_vm0 = vweird.f32 %v678_v26  ;;  %v716_v24 = vstv %s3819_s9 }
  0x46   : > { %v957_v30 = vmul.f32 %v3836_v23, %v3836_v23  ;;  %v933_v32 = vadd.f32 %v932_v28, %v931_v27  ;;  %s934_s10 = smul.f32 %s3827_s30, %s3827_s30  ;;  %s3866_s0 = sld [smem:[#allocation4 + %s429_s13]] }
  0x47   : > { %v701_v33 = vstv %s700_s18  ;;  %s959_s7 = smul.f32 %s3830_s2, %s3830_s2  ;;  %s431_s8 = sadd.s32 5, %s3807_s27 }
  0x48   : > { %v958_v34 = vadd.f32 %v957_v30, %v956_v29  ;;  %v3870_v35 = vadd.f32 %v701_v33, %v699_v31  ;;  %v935_v36 = vstv %s934_s10  ;;  %v1156_v40 = vstv %s3839_s6  ;;  %s3888_s18 = sld [smem:[#allocation4 + %s431_s8]]  ;;  %s416_s10 = sadd.s32 7, %s3781_s12 }
  0x49   : > { %v936_v38 = vadd.f32 %v935_v36, %v933_v32  ;;  %v960_v39 = vstv %s959_s7  ;;  %v1158_v41 = vstv %s3846_s25  ;;  %v3881_v46 = vsub.f32 %v1156_v40, %v3789_v1  ;;  %s4087_s9 = sld [smem:[#allocation4 + %s394_s28]]  ;;  %s398_s25 = sadd.s32 8, %s3772_s16 }
  0x4a   : > { %v703_v43 = vadd.f32 1e-12, %v3870_v35  ;;  %v3878_v45 = vadd.f32 %v960_v39, %v958_v34  ;;  %v3884_v47 = vsub.f32 %v1158_v41, %v3791_v2  ;;  %s1163_s13 = smul.f32 %s3853_s11, %s3853_s11  ;;  %v975_v41 = vstv %s3830_s2  ;;  %s4330_s7 = sld [smem:[#allocation4 + %s416_s10]] }
  0x4b   : > { %v3081_v37 = vpop.eup %3080  ;;  %v3876_v44 = vadd.f32 1e-12, %v936_v38  ;;  %v1181_v49 = vstv %s3859_s26  ;;  %v1160_v51 = vmul.f32 %v3881_v46, %v3881_v46  ;;  %s439_s8 = sadd.s32 3, %s3775_s17  ;;  %s458_s10 = sadd.s32 4, %s3775_s17 }
  0x4c   : > { %v680_v42 = vmul.f32 %v3081_v37, %v678_v26  ;;  %3082 = vrsqrt.f32 %v703_v43  ;;  %v962_v50 = vadd.f32 1e-12, %v3878_v45  ;;  %v1161_v53 = vmul.f32 %v3884_v47, %v3884_v47  ;;  %s6449_s21 = smov (!%p367_p1, %s3597_s21), 1 }
  0x4d   : > { %3084 = vrsqrt.f32 %v3876_v44  ;;  %v1164_v54 = vstv %s1163_s13  ;;  %v3898_v55 = vsub.f32 %v1181_v49, %v3789_v1  ;;  %v1183_v56 = vstv %s3866_s0  ;;  %s418_s0 = sadd.s32 8, %s3781_s12  ;;  %s4369_s13 = smul.u32 9, %s439_s8 }
  0x4e   : > { %v681_v48 = vmul.f32 %v3081_v37, %v680_v42  ;;  %3086 = vrsqrt.f32 %v962_v50  ;;  %v1162_v58 = vadd.f32 %v1161_v53, %v1160_v51  ;;  %v3902_v59 = vsub.f32 %v1183_v56, %v3791_v2  ;;  %s1188_s6 = smul.f32 %s3888_s18, %s3888_s18  ;;  %s435_s8 = sadd.s32 7, %s3807_s27 }
  0x4f   : > { %6268 = vst [vmem:[#allocation14_spill] sm:$0xff] %v3898_v55  ;;  %vm686_vm1 = vweird.f32 %v3081_v37  ;;  %v1185_v63 = vmul.f32 %v3898_v55, %v3898_v55  ;;  %vm710_vm3 = vweird.f32 %v703_v43  ;;  %vm944_vm5 = vweird.f32 %v3876_v44  ;;  %s442_s28 = sadd.s32 1, %s4369_s13 }
  0x50   : > { %v682_v52 = vmul.f32 0.5, %v681_v48  ;;  %6269 = vst [vmem:[#allocation15_spill] sm:$0xff] %v3902_v59  ;;  %v1165_v61 = vadd.f32 %v1164_v54, %v1162_v58  ;;  %v1186_v0 = vmul.f32 %v3902_v59, %v3902_v59  ;;  %vm687_vm2 = vmor %vm685_vm0, %vm686_vm1  ;;  %v1189_v17 = vstv %s1188_s6  ;;  %s4385_s6 = sld [smem:[#allocation4 + %s4369_s13]] }
  0x51   : > { %vm969_vm8 = vweird.f32 %v962_v50 }
  0x52   : > { %v683_v57 = vsub.f32 1.5, %v682_v52  ;;  %v3083_v60 = vpop.eup %3082  ;;  %v3908_v4 = vadd.f32 1e-12, %v1165_v61  ;;  %v1187_v11 = vadd.f32 %v1186_v0, %v1185_v63 }
  0x53   : > { %v705_v62 = vmul.f32 %v3083_v60, %v703_v43  ;;  %v3085_v3 = vpop.eup %3084  ;;  %vm711_vm4 = vweird.f32 %v3083_v60 }
  0x54   : > { %v684_v1 = vmul.f32 %v3081_v37, %v683_v57  ;;  %v3087_v2 = vpop.eup %3086  ;;  %v939_v8 = vmul.f32 %v3085_v3, %v3876_v44  ;;  %3088 = vrsqrt.f32 %v3908_v4  ;;  %vm712_vm6 = vmor %vm710_vm3, %vm711_vm4  ;;  %vm945_vm7 = vweird.f32 %v3085_v3 }
  0x55   : > { %v706_v7 = vmul.f32 %v3083_v60, %v705_v62  ;;  %v964_v9 = vmul.f32 %v3087_v2, %v962_v50  ;;  %vm970_vm9 = vweird.f32 %v3087_v2  ;;  %v3921_v29 = vadd.f32 %v1189_v17, %v1187_v11  ;;  %vm946_vm10 = vmor %vm944_vm5, %vm945_vm7 }
  0x56   : > { %v688_v12 = vsel %vm687_vm2, %v3081_v37, %v684_v1  ;;  %v940_v13 = vmul.f32 %v3085_v3, %v939_v8  ;;  %vm971_vm11 = vmor %vm969_vm8, %vm970_vm9  ;;  %v2964_v1 = vld [vmem:[%s3769_s15 + $0xc] sm:$0x3]  ;;  %v3999_v8 = vld [vmem:[%s3769_s15 + $0x2] sm:$0x3]  ;;  %vm1173_vm12 = vweird.f32 %v3908_v4 }
  0x57   : > { %v707_v10 = vmul.f32 0.5, %v706_v7  ;;  %v965_v16 = vmul.f32 %v3087_v2, %v964_v9  ;;  %v3919_v27 = vmul.f32 %v688_v12, %v3796_v5  ;;  %6270 = vst [vmem:[#allocation16_spill] sm:$0xff] %v3921_v29  ;;  %v3924_v30 = vmul.f32 %v688_v12, %v3799_v6  ;;  %v3996_v7 = vld [vmem:[%s3769_s15] sm:$0x3] }
  0x58   : > { %v941_v25 = vmul.f32 0.5, %v940_v13  ;;  %v3926_v31 = vmul.f32 %v691_v20, %v688_v12  ;;  %v950_v5 = vstv %s3827_s30  ;;  %v3946_v43 = vadd.f32 1e-12, %v3921_v29  ;;  %v4014_v20 = vld [vmem:[%s3769_s15 + $0x4] sm:$0x3]  ;;  %s396_s30 = sadd.s32 7, %s3772_s16 }
  0x59   : > { %v708_v21 = vsub.f32 1.5, %v707_v10  ;;  %v966_v26 = vmul.f32 0.5, %v965_v16  ;;  %s4129_s2 = sld [smem:[#allocation4 + %s396_s30]] }
  0x5a   : > { %v942_v32 = vsub.f32 1.5, %v941_v25  ;;  %v3928_v34 = vpop.eup %3088  ;;  %3090 = vrsqrt.f32 %v3946_v43  ;;  %s4152_s16 = sld [smem:[#allocation4 + %s398_s25]]  ;;  %vm1198_vm5 = vweird.f32 %v3946_v43  ;;  %s446_s25 = sadd.s32 3, %s4369_s13 }
  0x5b   : > { %v709_v28 = vmul.f32 %v3083_v60, %v708_v21  ;;  %v967_v33 = vsub.f32 1.5, %v966_v26  ;;  %v1168_v42 = vmul.f32 %v3928_v34, %v3908_v4  ;;  %v781_v26 = vmul.f32 %v3919_v27, %v3996_v7 }
  0x5c   : > { %v943_v6 = vmul.f32 %v3085_v3, %v942_v32  ;;  %vm1174_vm13 = vweird.f32 %v3928_v34 }
  0x5d   : > { %v713_v36 = vsel %vm712_vm6, %v3083_v60, %v709_v28  ;;  %v968_v40 = vmul.f32 %v3087_v2, %v967_v33  ;;  %v782_v28 = vmul.f32 %v3999_v8, %v3924_v30  ;;  %vm1175_vm15 = vmor %vm1173_vm12, %vm1174_vm13 }
  0x5e   : > { %v3934_v37 = vmul.f32 %v713_v36, %v3814_v14  ;;  %v3937_v38 = vmul.f32 %v713_v36, %v3817_v15  ;;  %v3939_v39 = vmul.f32 %v716_v24, %v713_v36  ;;  %v947_v48 = vsel %vm946_vm10, %v3085_v3, %v943_v6 }
  0x5f   : > { %v3955_v49 = vmul.f32 %v947_v48, %v3822_v18  ;;  %v3958_v50 = vmul.f32 %v947_v48, %v3825_v19  ;;  %v3960_v51 = vmul.f32 %v950_v5, %v947_v48  ;;  %v972_v52 = vsel %vm971_vm11, %v3087_v2, %v968_v40  ;;  %v4030_v40 = vld [vmem:[%s3763_s14] sm:$0x3] }
  0x60   : > { %v720_v14 = vadd.f32 %v3934_v37, %v3919_v27  ;;  %v722_v15 = vadd.f32 %v3937_v38, %v3924_v30  ;;  %v724_v44 = vadd.f32 %v3939_v39, %v3926_v31  ;;  %v3969_v57 = vmul.f32 %v972_v52, %v3833_v22  ;;  %v4003_v11 = vpop.eup %3090  ;;  %6271 = vst [vmem:[#allocation17_spill] sm:$0xff] %v4030_v40 }
  0x61   : > { %v3972_v18 = vmul.f32 %v972_v52, %v3836_v23  ;;  %v3974_v19 = vmul.f32 %v975_v41, %v972_v52  ;;  %v1169_v3 = vmul.f32 %v3928_v34, %v1168_v42  ;;  %v787_v12 = vmul.f32 %v3934_v37, %v3996_v7  ;;  %v2963_v41 = vld [vmem:[%s3763_s14 + $0xc] sm:$0x3]  ;;  %v4034_v42 = vld [vmem:[%s3763_s14 + $0x2] sm:$0x3]  ;;  %v4039_v52 = vld [vmem:[%s3763_s14 + $0x4] sm:$0x3] }
  0x62   : > { %v3962_v53 = vmul.f32 0.5, %v720_v14  ;;  %v3964_v54 = vmul.f32 0.5, %v722_v15  ;;  %v3966_v56 = vmul.f32 0.5, %v724_v44  ;;  %v979_v22 = vadd.f32 %v3969_v57, %v3955_v49  ;;  %6272 = vst [vmem:[#allocation18_spill] sm:$0xff] %v4039_v52 }
  0x63   : > { %v981_v23 = vadd.f32 %v3972_v18, %v3958_v50  ;;  %v983_v62 = vadd.f32 %v3974_v19, %v3960_v51  ;;  %v788_v13 = vmul.f32 %v3999_v8, %v3937_v38  ;;  %v818_v24 = vmul.f32 %v2964_v1, %v2964_v1 }
  0x64   : > { %v726_v58 = vmul.f32 %v3962_v53, %v3962_v53  ;;  %v727_v60 = vmul.f32 %v3964_v54, %v3964_v54  ;;  %v729_v61 = vmul.f32 %v3966_v56, %v3966_v56  ;;  %v3989_v0 = vmul.f32 0.5, %v979_v22 }
  0x65   : > { %v3993_v2 = vmul.f32 0.5, %v981_v23  ;;  %v4001_v10 = vmul.f32 0.5, %v983_v62  ;;  %v1170_v25 = vmul.f32 0.5, %v1169_v3  ;;  %v789_v32 = vadd.f32 %v788_v13, %v787_v12 }
  0x66   : > { %v728_v63 = vadd.f32 %v727_v60, %v726_v58  ;;  %v985_v16 = vmul.f32 %v3989_v0, %v3989_v0  ;;  %v790_v33 = vmul.f32 %v4014_v20, %v3939_v39  ;;  %v828_v36 = vmul.f32 0.5, %v818_v24 }
  0x67   : > { %v986_v17 = vmul.f32 %v3993_v2, %v3993_v2  ;;  %v988_v5 = vmul.f32 %v4001_v10, %v4001_v10  ;;  %v1193_v6 = vmul.f32 %v4003_v11, %v3946_v43  ;;  %v783_v14 = vadd.f32 %v782_v28, %v781_v26 }
  0x68   : > { %v730_v9 = vadd.f32 %v729_v61, %v728_v63  ;;  %v784_v15 = vmul.f32 %v4014_v20, %v3926_v31  ;;  %v791_v44 = vadd.f32 %v790_v33, %v789_v32  ;;  %v761_v58 = vmul.f32 %v3919_v27, %v4030_v40 }
  0x69   : > { %v987_v48 = vadd.f32 %v986_v17, %v985_v16  ;;  %v762_v60 = vmul.f32 %v4034_v42, %v3924_v30  ;;  %v767_v61 = vmul.f32 %v3934_v37, %v4030_v40  ;;  %v1171_v22 = vsub.f32 1.5, %v1170_v25 }
  0x6a   : > { %v4016_v21 = vadd.f32 1e-12, %v730_v9  ;;  %v764_v23 = vmul.f32 %v4039_v52, %v3926_v31  ;;  %v768_v62 = vmul.f32 %v4034_v42, %v3937_v38  ;;  %v770_v63 = vmul.f32 %v4039_v52, %v3939_v39 }
  0x6b   : > { %v785_v3 = vadd.f32 %v784_v15, %v783_v14  ;;  %v763_v1 = vadd.f32 %v762_v60, %v761_v58  ;;  %v793_v9 = vmax.f32 %v791_v44, 0.001  ;;  %v795_v12 = vmul.f32 %v2963_v41, %v2963_v41 }
  0x6c   : > { %3092 = vrsqrt.f32 %v4016_v21  ;;  %v4053_v13 = vmax.f32 %v828_v36, 0.0001  ;;  %v769_v16 = vadd.f32 %v768_v62, %v767_v61  ;;  %v989_v26 = vadd.f32 %v988_v5, %v987_v48 }
  0x6d   : > { %v786_v17 = vmax.f32 %v785_v3, 0.001  ;;  %v1194_v37 = vmul.f32 %v4003_v11, %v1193_v6  ;;  %v805_v28 = vmul.f32 0.5, %v795_v12  ;;  %v765_v39 = vadd.f32 %v764_v23, %v763_v1 }
  0x6e   : > { %6273 = vst [vmem:[#allocation19_spill] sm:$0xff] %v4053_v13  ;;  %v4057_v32 = vsub.f32 1.0, %v4053_v13  ;;  %v771_v33 = vadd.f32 %v770_v63, %v769_v16  ;;  %v4062_v36 = vadd.f32 1e-12, %v989_v26  ;;  %v718_v5 = vmax.f32 %v3870_v35, 1e-12 }
  0x6f   : > { %v4065_v41 = vmax.f32 %v805_v28, 0.0001  ;;  %v4067_v6 = vmul.f32 %v818_v24, %v818_v24  ;;  %v1172_v58 = vmul.f32 %v3928_v34, %v1171_v22  ;;  %v1195_v60 = vmul.f32 0.5, %v1194_v37 }
  0x70   : > { %6274 = vst [vmem:[#allocation20_spill] sm:$0xff] %v4057_v32  ;;  %v831_v14 = vmul.f32 %v4057_v32, %v793_v9  ;;  %v835_v48 = vmul.f32 %v4057_v32, %v786_v17  ;;  %vm738_vm14 = vweird.f32 %v4016_v21  ;;  %v773_v61 = vmax.f32 %v771_v33, 0.001  ;;  %v2970_v32 = vld [vmem:[%s3769_s15 + $0x8] sm:$0x3] }
  0x71   : > { %6275 = vst [vmem:[#allocation21_spill] sm:$0xff] %v4065_v41  ;;  %v4074_v23 = vsub.f32 1.0, %v4065_v41  ;;  %3094 = vrsqrt.f32 %v4062_v36  ;;  %v766_v24 = vmax.f32 %v765_v39, 0.001  ;;  %v4083_v62 = vmul.f32 %v795_v12, %v795_v12 }
  0x72   : > { %v3093_v25 = vpop.eup %3092  ;;  %6276 = vst [vmem:[#allocation22_spill] sm:$0xff] %v4067_v6  ;;  %v832_v22 = vadd.f32 %v831_v14, %v4053_v13  ;;  %v836_v3 = vadd.f32 %v835_v48, %v4053_v13  ;;  %v1176_v1 = vsel %vm1175_vm15, %v3928_v34, %v1172_v58  ;;  %3096 = vrcp.f32 %v718_v5  ;;  %v2961_v13 = vld [vmem:[%s3763_s14 + $0x6] sm:$0x3] }
  0x73   : > { %v733_v38 = vmul.f32 %v3093_v25, %v4016_v21  ;;  %vm739_vm0 = vweird.f32 %v3093_v25  ;;  %6277 = vst [vmem:[#allocation23_spill] sm:$0xff] %v4083_v62  ;;  %v808_v4 = vmul.f32 %v4074_v23, %v773_v61  ;;  %v4093_v9 = vadd.f32 -1.0, %v4067_v6 }
  0x74   : > { %vm740_vm1 = vmor %vm738_vm14, %vm739_vm0  ;;  %v1179_v16 = vstv %s3853_s11  ;;  %v812_v17 = vmul.f32 %v4074_v23, %v766_v24  ;;  %v833_v26 = vmax.f32 %v832_v22, 0.001  ;;  %v1196_v37 = vsub.f32 1.5, %v1195_v60  ;;  %v4137_v24 = vld [vmem:[%s3769_s15 + $0x12] sm:$0x3]  ;;  %s414_s11 = sadd.s32 6, %s3781_s12 }
  0x75   : > { %v734_v15 = vmul.f32 %v3093_v25, %v733_v38  ;;  %6278 = vst [vmem:[#allocation24_spill] sm:$0xff] %v4093_v9  ;;  %v4099_v34 = vmax.f32 %v771_v33, 0.0  ;;  %v4101_v38 = vmax.f32 %v791_v44, 0.0  ;;  %v4104_v21 = vadd.f32 -1.0, %v4083_v62  ;;  %v4140_v22 = vld [vmem:[%s3769_s15 + $0x14] sm:$0x3] }
  0x76   : > { %v4107_v39 = vmul.f32 %v1176_v1, %v3881_v46  ;;  %v837_v14 = vmax.f32 %v836_v3, 0.001  ;;  %v4113_v48 = vmul.f32 %v1179_v16, %v1176_v1  ;;  %v809_v46 = vadd.f32 %v808_v4, %v4065_v41  ;;  %6285 = vst [vmem:[#allocation31_spill] sm:$0xff] %v4140_v22  ;;  %s4315_s26 = sld [smem:[#allocation4 + %s414_s11]]  ;;  %s448_s11 = sadd.s32 4, %s4369_s13 }
  0x77   : > { %v735_v35 = vmul.f32 0.5, %v734_v15  ;;  %v4097_v28 = vpop.eup %3094  ;;  %6279 = vst [vmem:[#allocation25_spill] sm:$0xff] %v4099_v34  ;;  %v4111_v15 = vmul.f32 %v1176_v1, %v3884_v47  ;;  %v4120_v60 = vadd.f32 %v812_v17, %v4065_v41  ;;  %3098 = vrcp.f32 %v833_v26  ;;  %s4341_s12 = sld [smem:[#allocation4 + %s418_s0]]  ;;  %s450_s0 = sadd.s32 5, %s4369_s13 }
  0x78   : > { %6280 = vst [vmem:[#allocation26_spill] sm:$0xff] %v4101_v38  ;;  %v992_v47 = vmul.f32 %v4097_v28, %v4062_v36  ;;  %v4127_v61 = vpop.eup %3096  ;;  %vm997_vm2 = vweird.f32 %v4062_v36  ;;  %3100 = vrcp.f32 %v837_v14  ;;  %v841_v16 = vstv %s4087_s9  ;;  %s444_s9 = sadd.s32 2, %s4369_s13 }
  0x79   : > { %v736_v63 = vsub.f32 1.5, %v735_v35  ;;  %6281 = vst [vmem:[#allocation27_spill] sm:$0xff] %v4107_v39  ;;  %v810_v26 = vmax.f32 %v809_v46, 0.001  ;;  %vm998_vm3 = vweird.f32 %v4097_v28  ;;  %vm1199_vm6 = vweird.f32 %v4003_v11  ;;  %s4433_s30 = sld [smem:[#allocation4 + %s444_s9]] }
  0x7a   : > { %6282 = vst [vmem:[#allocation28_spill] sm:$0xff] %v4111_v15  ;;  %v993_v14 = vmul.f32 %v4097_v28, %v992_v47  ;;  %vm4215_vm4 = vmor %vm997_vm2, %vm998_vm3  ;;  %s4553_s9 = sld [smem:[#allocation4 + %s435_s8]] }
  0x7b   : > { %v737_v12 = vmul.f32 %v3093_v25, %v736_v63  ;;  %6283 = vst [vmem:[#allocation29_spill] sm:$0xff] %v4113_v48  ;;  %3102 = vrcp.f32 %v810_v26  ;;  %v977_v26 = vmax.f32 %v3878_v45, 1e-12  ;;  %vm1200_vm7 = vmor %vm1198_vm5, %vm1199_vm6 }
  0x7c   : > { %v994_v29 = vmul.f32 0.5, %v993_v14 }
  0x7d   : > { %v741_v5 = vsel %vm740_vm1, %v3093_v25, %v737_v12  ;;  %v4125_v25 = vmul.f32 %v4003_v11, %v1196_v37  ;;  %v4155_v37 = vmul.f32 %v4127_v61, %v841_v16 }
  0x7e   : > { %v742_v33 = vmul.f32 %v741_v5, %v3962_v53  ;;  %v743_v44 = vmul.f32 %v741_v5, %v3964_v54  ;;  %v744_v58 = vmul.f32 %v741_v5, %v3966_v56  ;;  %v4158_v5 = vld [vmem:[%s3769_s15 + $0x16] sm:$0x3]  ;;  %v995_v55 = vsub.f32 1.5, %v994_v29 }
  0x7f   : > { %6284 = vst [vmem:[#allocation30_spill] sm:$0xff] %v4125_v25 }
  0x80   : > { %v745_v53 = vmul.f32 %v742_v33, %v3919_v27  ;;  %v746_v54 = vmul.f32 %v743_v44, %v3924_v30  ;;  %v748_v56 = vmul.f32 %v744_v58, %v3926_v31  ;;  %v755_v35 = vmul.f32 %v742_v33, %v4030_v40  ;;  %v4148_v27 = vld [vmem:[%s3763_s14 + $0x12] sm:$0x3]  ;;  %6286 = vst [vmem:[#allocation32_spill] sm:$0xff] %v4155_v37 }
  0x81   : > { %v756_v63 = vmul.f32 %v4034_v42, %v743_v44  ;;  %v758_v3 = vmul.f32 %v4039_v52, %v744_v58  ;;  %v775_v1 = vmul.f32 %v742_v33, %v3996_v7  ;;  %v776_v4 = vmul.f32 %v3999_v8, %v743_v44  ;;  %6287 = vst [vmem:[#allocation33_spill] sm:$0xff] %v4158_v5 }
  0x82   : > { %v747_v30 = vadd.f32 %v746_v54, %v745_v53  ;;  %v778_v31 = vmul.f32 %v4014_v20, %v744_v58  ;;  %v4161_v44 = vsub.f32 1.0, %v4137_v24  ;;  %v4164_v53 = vsub.f32 1.0, %v4140_v22  ;;  %v4167_v58 = vpop.eup %3098  ;;  %v4170_v54 = vld [vmem:[%s3763_s14 + $0x14] sm:$0x3] }
  0x83   : > { %v757_v12 = vadd.f32 %v756_v63, %v755_v35  ;;  %v777_v17 = vadd.f32 %v776_v4, %v775_v1  ;;  %v814_v63 = vmax.f32 %v4120_v60, 0.001  ;;  %v4185_v60 = vld [vmem:[%s3763_s14 + $0x16] sm:$0x3]  ;;  %v4195_v59 = vsub.f32 1.0, %v4170_v54 }
  0x84   : > { %v749_v33 = vadd.f32 %v748_v56, %v747_v30  ;;  %6288 = vst [vmem:[#allocation34_spill] sm:$0xff] %v4161_v44  ;;  %v4174_v56 = vsub.f32 1.0, %v4148_v27  ;;  %v854_v4 = vmul.f32 0.31830987, %v4161_v44  ;;  %v883_v30 = vmul.f32 0.31830987, %v4164_v53 }
  0x85   : > { %6289 = vst [vmem:[#allocation35_spill] sm:$0xff] %v4164_v53  ;;  %v759_v46 = vadd.f32 %v758_v3, %v757_v12  ;;  %v779_v35 = vadd.f32 %v778_v31, %v777_v17  ;;  %v4180_v3 = vsub.f32 1.0, %v4158_v5  ;;  %v4182_v31 = vpop.eup %3100  ;;  %v879_v25 = vmul.f32 0.31830987, %v4195_v59 }
  0x86   : > { %6290 = vst [vmem:[#allocation36_spill] sm:$0xff] %v4174_v56  ;;  %v750_v1 = vmax.f32 %v749_v33, 0.001  ;;  %v849_v17 = vmul.f32 0.31830987, %v4174_v56  ;;  %v871_v33 = vstv %s4129_s2  ;;  %v996_v37 = vmul.f32 %v4097_v28, %v995_v55  ;;  %s1392_s2 = smul.f32 %s4433_s30, %s4433_s30 }
  0x87   : > { %v760_v47 = vmax.f32 %v759_v46, 0.001  ;;  %v780_v16 = vmax.f32 %v779_v35, 0.001  ;;  %6291 = vst [vmem:[#allocation37_spill] sm:$0xff] %v4180_v3  ;;  %v4190_v46 = vmul.f32 %v4127_v61, %v871_v33  ;;  %v4204_v33 = vsub.f32 1.0, %v4185_v60 }
  0x88   : > { %v751_v12 = vsub.f32 1.0, %v750_v1  ;;  %v2962_v35 = vld [vmem:[%s3769_s15 + $0x6] sm:$0x3]  ;;  %6293 = vst [vmem:[#allocation39_spill] sm:$0xff] %v4195_v59  ;;  %v911_v1 = vmul.f32 0.31830987, %v4180_v3  ;;  %3104 = vrcp.f32 %v814_v63  ;;  %v4227_v55 = vmul.f32 %v2970_v32, %v883_v30 }
  0x89   : > { %v772_v48 = vmul.f32 %v760_v47, %v760_v47  ;;  %v792_v15 = vmul.f32 %v780_v16, %v780_v16  ;;  %6292 = vst [vmem:[#allocation38_spill] sm:$0xff] %v4190_v46  ;;  %v899_v16 = vstv %s4152_s16  ;;  %v907_v36 = vmul.f32 0.31830987, %v4204_v33  ;;  %s4484_s16 = sld [smem:[#allocation4 + %s446_s25]] }
  0x8a   : > { %v752_v39 = vmul.f32 %v751_v12, %v751_v12  ;;  %6294 = vst [vmem:[#allocation40_spill] sm:$0xff] %v4204_v33  ;;  %v4208_v46 = vmul.f32 %v4127_v61, %v899_v16  ;;  %v4225_v16 = vmul.f32 %v2961_v13, %v849_v17  ;;  %3106 = vrcp.f32 %v977_v26 }
  0x8b   : > { %v798_v14 = vmul.f32 %v4104_v21, %v772_v48  ;;  %v821_v47 = vmul.f32 %v4093_v9, %v792_v15  ;;  %v4219_v15 = vpop.eup %3102  ;;  %v2969_v48 = vld [vmem:[%s3763_s14 + $0x8] sm:$0x3]  ;;  %v4223_v9 = vmul.f32 %v2962_v35, %v854_v4  ;;  %6300 = vst [vmem:[#allocation44_spill] sm:$0xff] %v4227_v55  ;;  %v1000_v22 = vsel %vm4215_vm4, %v4097_v28, %v996_v37 }
  0x8c   : > { %v753_v45 = vmul.f32 %v752_v39, %v752_v39  ;;  %6295 = vst [vmem:[#allocation41_spill] sm:$0xff] %v4208_v46  ;;  %v2978_v39 = vld [vmem:[%s3769_s15 + $0xa] sm:$0x3]  ;;  %v2977_v46 = vld [vmem:[%s3763_s14 + $0xa] sm:$0x3]  ;;  %v1020_v13 = vmul.f32 %v3955_v49, %v4030_v40  ;;  %v1021_v32 = vmul.f32 %v4034_v42, %v3958_v50  ;;  %v1003_v29 = vmul.f32 %v1000_v22, %v4001_v10 }
  0x8d   : > { %v799_v34 = vadd.f32 1.0, %v798_v14  ;;  %v822_v38 = vadd.f32 1.0, %v821_v47  ;;  %6298 = vst [vmem:[#allocation42_spill] sm:$0xff] %v4223_v9  ;;  %v4234_v14 = vmul.f32 %v2969_v48, %v879_v25  ;;  %v4236_v63 = vmul.f32 %v2978_v39, %v911_v1 }
  0x8e   : > { %v754_v61 = vmul.f32 %v753_v45, %v751_v12  ;;  %6299 = vst [vmem:[#allocation43_spill] sm:$0xff] %v4225_v16  ;;  %v4250_v37 = vmul.f32 %v2977_v46, %v907_v36  ;;  %v1001_v12 = vmul.f32 %v1000_v22, %v3989_v0  ;;  %v3105_v17 = vpop.eup %3104  ;;  %v1002_v45 = vmul.f32 %v1000_v22, %v3993_v2 }
  0x8f   : > { %v800_v41 = vmax.f32 %v799_v34, 0.001  ;;  %v823_v5 = vmax.f32 %v822_v38, 0.001  ;;  %6301 = vst [vmem:[#allocation45_spill] sm:$0xff] %v4234_v14  ;;  %v1023_v34 = vmul.f32 %v4039_v52, %v3960_v51  ;;  %v1026_v38 = vmul.f32 %v3969_v57, %v4030_v40 }
  0x90   : > { %6302 = vst [vmem:[#allocation46_spill] sm:$0xff] %v4236_v63  ;;  %v844_v28 = vmul.f32 %v4174_v56, %v754_v61  ;;  %v4248_v25 = vmul.f32 %v4161_v44, %v754_v61  ;;  %v874_v1 = vmul.f32 %v4195_v59, %v754_v61  ;;  %v877_v47 = vmul.f32 %v4164_v53, %v754_v61  ;;  %v4259_v44 = vpop.eup %3106 }
  0x91   : > { %v801_v4 = vmul.f32 3.1415927, %v800_v41  ;;  %v824_v30 = vmul.f32 3.1415927, %v823_v5  ;;  %6303 = vst [vmem:[#allocation47_spill] sm:$0xff] %v4250_v37  ;;  %v1004_v48 = vmul.f32 %v1001_v12, %v3955_v49  ;;  %v1014_v39 = vmul.f32 %v1001_v12, %v4030_v40 }
  0x92   : > { %v902_v0 = vmul.f32 %v4204_v33, %v754_v61  ;;  %v1005_v2 = vmul.f32 %v1002_v45, %v3958_v50  ;;  %v1007_v10 = vmul.f32 %v1003_v29, %v3960_v51  ;;  %v1015_v22 = vmul.f32 %v4034_v42, %v1002_v45 }
  0x93   : > { %v802_v26 = vmul.f32 %v801_v4, %v800_v41  ;;  %v825_v35 = vmul.f32 %v824_v30, %v823_v5  ;;  %v1027_v41 = vmul.f32 %v4034_v42, %v3972_v18  ;;  %v1029_v5 = vmul.f32 %v4039_v52, %v3974_v19 }
  0x94   : > { %v1017_v46 = vmul.f32 %v4039_v52, %v1003_v29  ;;  %v1022_v36 = vadd.f32 %v1021_v32, %v1020_v13  ;;  %v1034_v30 = vmul.f32 %v1001_v12, %v3996_v7  ;;  %v1016_v40 = vadd.f32 %v1015_v22, %v1014_v39 }
  0x95   : > { %3108 = vrcp.f32 %v802_v26  ;;  %v1028_v4 = vadd.f32 %v1027_v41, %v1026_v38  ;;  %v1006_v26 = vadd.f32 %v1005_v2, %v1004_v48  ;;  %v1035_v53 = vmul.f32 %v3999_v8, %v1002_v45 }
  0x96   : > { %3110 = vrcp.f32 %v825_v35  ;;  %v1037_v33 = vmul.f32 %v4014_v20, %v1003_v29  ;;  %v905_v35 = vmul.f32 %v4180_v3, %v754_v61  ;;  %v1040_v56 = vmul.f32 %v3955_v49, %v3996_v7 }
  0x97   : > { %v4274_v59 = vadd.f32 %v1029_v5, %v1028_v4  ;;  %v1041_v52 = vmul.f32 %v3999_v8, %v3958_v50  ;;  %v1008_v13 = vadd.f32 %v1007_v10, %v1006_v26  ;;  %v1018_v32 = vadd.f32 %v1017_v46, %v1016_v40  ;;  %v6304_v26 = vld [vmem:[#allocation31_spill] sm:$0xff] }
  0x98   : > { %v1036_v38 = vadd.f32 %v1035_v53, %v1034_v30  ;;  %v1043_v12 = vmul.f32 %v4014_v20, %v3960_v51  ;;  %v1046_v61 = vmul.f32 %v3969_v57, %v3996_v7  ;;  %v1047_v39 = vmul.f32 %v3999_v8, %v3972_v18 }
  0x99   : > { %v1032_v45 = vmax.f32 %v4274_v59, 0.001  ;;  %v1042_v29 = vadd.f32 %v1041_v52, %v1040_v56  ;;  %v1019_v50 = vmax.f32 %v1018_v32, 0.001  ;;  %v1024_v5 = vadd.f32 %v1023_v34, %v1022_v36 }
  0x9a   : > { %v1038_v40 = vadd.f32 %v1037_v33, %v1036_v38  ;;  %v845_v51 = vadd.f32 %v4148_v27, %v844_v28  ;;  %v875_v2 = vadd.f32 %v4170_v54, %v874_v1  ;;  %v1009_v10 = vmax.f32 %v1008_v13, 0.001  ;;  %v6305_v13 = vld [vmem:[#allocation33_spill] sm:$0xff] }
  0x9b   : > { %v3109_v48 = vpop.eup %3108  ;;  %v1031_v56 = vmul.f32 %v1019_v50, %v1019_v50  ;;  %v4292_v57 = vadd.f32 %v1043_v12, %v1042_v29  ;;  %v1048_v22 = vadd.f32 %v1047_v39, %v1046_v61  ;;  %v1049_v34 = vmul.f32 %v4014_v20, %v3974_v19 }
  0x9c   : > { %v3111_v49 = vpop.eup %3110  ;;  %v804_v41 = vmul.f32 %v3109_v48, %v4083_v62  ;;  %v1039_v33 = vmax.f32 %v1038_v40, 0.001  ;;  %v1061_v28 = vmul.f32 %v1032_v45, %v4074_v23  ;;  %v1025_v46 = vmax.f32 %v1024_v5, 0.001  ;;  %v6306_v48 = vld [vmem:[#allocation21_spill] sm:$0xff] }
  0x9d   : > { %v827_v53 = vmul.f32 %v3111_v49, %v4067_v6  ;;  %v1054_v36 = vmul.f32 %v4104_v21, %v1031_v56  ;;  %v848_v30 = vadd.f32 %v4137_v24, %v4248_v25  ;;  %v906_v32 = vadd.f32 %v6305_v13, %v905_v35 }
  0x9e   : > { %v816_v52 = vmul.f32 %v4219_v15, %v804_v41  ;;  %v903_v15 = vadd.f32 %v4185_v60, %v902_v0  ;;  %v4307_v12 = vsub.f32 1.0, %v1009_v10  ;;  %v1045_v45 = vmax.f32 %v4292_v57, 0.001 }
  0x9f   : > { %v839_v18 = vmul.f32 %v4167_v58, %v827_v53  ;;  %v878_v58 = vadd.f32 %v6304_v26, %v877_v47  ;;  %v1055_v19 = vadd.f32 1.0, %v1054_v36  ;;  %v4312_v29 = vadd.f32 %v1049_v34, %v1048_v22 }
  0xa0   : > { %v817_v1 = vmul.f32 %v3105_v17, %v816_v52  ;;  %v1062_v17 = vadd.f32 %v1061_v28, %v6306_v48  ;;  %v1065_v47 = vmul.f32 %v1025_v46, %v4074_v23  ;;  %v1011_v53 = vmul.f32 %v4307_v12, %v4307_v12  ;;  %v6308_v28 = vld [vmem:[#allocation26_spill] sm:$0xff] }
  0xa1   : > { %v840_v4 = vmul.f32 %v4182_v31, %v839_v18  ;;  %v1051_v31 = vmul.f32 %v1039_v33, %v1039_v33  ;;  %v1056_v50 = vmax.f32 %v1055_v19, 0.001  ;;  %v1052_v22 = vmax.f32 %v4312_v29, 0.001  ;;  %v6307_v33 = vld [vmem:[#allocation24_spill] sm:$0xff] }
  0xa2   : > { %v851_v38 = vmul.f32 0.25, %v817_v1  ;;  %v1066_v18 = vadd.f32 %v1065_v47, %v6306_v48  ;;  %v1012_v43 = vmul.f32 %v1011_v53, %v1011_v53 }
  0xa3   : > { %v856_v0 = vmul.f32 0.25, %v840_v4  ;;  %v1057_v56 = vmul.f32 3.1415927, %v1056_v50  ;;  %v1071_v34 = vmul.f32 %v6307_v33, %v1051_v31  ;;  %v6309_v4 = vld [vmem:[#allocation25_spill] sm:$0xff] }
  0xa4   : > { %v852_v61 = vmul.f32 %v851_v38, %v845_v51  ;;  %v881_v25 = vmul.f32 %v875_v2, %v851_v38  ;;  %v909_v39 = vmul.f32 %v903_v15, %v851_v38  ;;  %v1063_v51 = vmax.f32 %v1062_v17, 0.001  ;;  %v6310_v38 = vld [vmem:[#allocation32_spill] sm:$0xff]  ;;  %v6311_v17 = vld [vmem:[#allocation38_spill] sm:$0xff]  ;;  %v6312_v31 = vld [vmem:[#allocation41_spill] sm:$0xff] }
  0xa5   : > { %v857_v35 = vmul.f32 %v856_v0, %v848_v30  ;;  %v885_v49 = vmul.f32 %v878_v58, %v856_v0  ;;  %v913_v41 = vmul.f32 %v906_v32, %v856_v0  ;;  %v1058_v36 = vmul.f32 %v1057_v56, %v1056_v50  ;;  %v6314_v50 = vld [vmem:[#allocation20_spill] sm:$0xff] }
  0xa6   : > { %v853_v5 = vadd.f32 %v852_v61, %v4225_v16  ;;  %v882_v40 = vadd.f32 %v881_v25, %v4234_v14  ;;  %v910_v57 = vadd.f32 %v909_v39, %v4250_v37  ;;  %3112 = vrcp.f32 %v1063_v51  ;;  %v6313_v39 = vld [vmem:[#allocation30_spill] sm:$0xff] }
  0xa7   : > { %v858_v2 = vadd.f32 %v857_v35, %v4223_v9  ;;  %v886_v10 = vadd.f32 %v885_v49, %v4227_v55  ;;  %v914_v52 = vadd.f32 %v913_v41, %v4236_v63  ;;  %v1067_v32 = vmax.f32 %v1066_v18, 0.001 }
  0xa8   : > { %v859_v30 = vmul.f32 %v853_v5, %v6309_v4  ;;  %v887_v58 = vmul.f32 %v882_v40, %v6309_v4  ;;  %3114 = vrcp.f32 %v1058_v36  ;;  %v915_v25 = vmul.f32 %v910_v57, %v6309_v4 }
  0xa9   : > { %v862_v1 = vmul.f32 %v858_v2, %v6308_v28  ;;  %v890_v15 = vmul.f32 %v886_v10, %v6308_v28  ;;  %v918_v46 = vmul.f32 %v914_v52, %v6308_v28  ;;  %3116 = vrcp.f32 %v1067_v32  ;;  %v6315_v52 = vld [vmem:[#allocation19_spill] sm:$0xff] }
  0xaa   : > { %v1201_v47 = vsel %vm1200_vm7, %v4003_v11, %v6313_v39  ;;  %v1078_v5 = vmul.f32 %v1052_v22, %v6314_v50  ;;  %v860_v40 = vmul.f32 %v859_v30, %v6310_v38  ;;  %v1072_v51 = vadd.f32 1.0, %v1071_v34  ;;  %v6317_v39 = vld [vmem:[#allocation34_spill] sm:$0xff] }
  0xab   : > { %v863_v19 = vmul.f32 %v862_v1, %v6310_v38  ;;  %v891_v0 = vmul.f32 %v890_v15, %v6311_v17  ;;  %v919_v61 = vmul.f32 %v918_v46, %v6312_v31  ;;  %v1082_v2 = vmul.f32 %v1045_v45, %v6314_v50 }
  0xac   : > { %v1088_v10 = vstv %s4315_s26  ;;  %v888_v53 = vmul.f32 %v887_v58, %v6311_v17  ;;  %v1079_v56 = vadd.f32 %v1078_v5, %v6315_v52  ;;  %v3113_v57 = vpop.eup %3112  ;;  %v916_v18 = vmul.f32 %v915_v25, %v6312_v31  ;;  %v6319_v5 = vld [vmem:[#allocation40_spill] sm:$0xff]  ;;  %s4497_s26 = sld [smem:[#allocation4 + %s448_s11]] }
  0xad   : > { %v864_v35 = vadd.f32 0.1, %v863_v19  ;;  %v892_v49 = vadd.f32 0.1, %v891_v0  ;;  %v920_v41 = vadd.f32 0.1, %v919_v61  ;;  %v4356_v11 = vmul.f32 %v4259_v44, %v1088_v10 }
  0xae   : > { %v1073_v22 = vmax.f32 %v1072_v51, 0.001  ;;  %v1083_v34 = vadd.f32 %v1082_v2, %v6315_v52  ;;  %v3115_v28 = vpop.eup %3114  ;;  %v1013_v45 = vmul.f32 %v1012_v43, %v4307_v12  ;;  %v1080_v1 = vmax.f32 %v1079_v56, 0.001  ;;  %v6316_v19 = vld [vmem:[#allocation36_spill] sm:$0xff] }
  0xaf   : > { %3118 = vrcp.f32 %v864_v35  ;;  %v1112_v15 = vstv %s4330_s7  ;;  %v3117_v46 = vpop.eup %3116  ;;  %v861_v36 = vadd.f32 0.1, %v860_v40  ;;  %v1060_v4 = vmul.f32 %v3115_v28, %v4083_v62  ;;  %s4531_s7 = smul.u32 9, %s458_s10 }
  0xb0   : > { %3120 = vrcp.f32 %v892_v49  ;;  %v1074_v30 = vmul.f32 3.1415927, %v1073_v22  ;;  %v4365_v58 = vmul.f32 %v4259_v44, %v1112_v15  ;;  %v889_v32 = vadd.f32 0.1, %v888_v53  ;;  %v6318_v49 = vld [vmem:[#allocation39_spill] sm:$0xff]  ;;  %v6320_v53 = vld [vmem:[#allocation14_spill] sm:$0xff] }
  0xb1   : > { %3122 = vrcp.f32 %v920_v41  ;;  %v1084_v38 = vmax.f32 %v1083_v34, 0.001  ;;  %v1090_v17 = vmul.f32 %v1013_v45, %v6316_v19  ;;  %v1134_v0 = vstv %s4341_s12  ;;  %s433_s12 = sadd.s32 6, %s3807_s27  ;;  %s4561_s25 = sld [smem:[#allocation4 + %s4531_s7]] }
  0xb2   : > { %v917_v31 = vadd.f32 0.1, %v916_v18  ;;  %v1069_v61 = vmul.f32 %v3113_v57, %v1060_v4  ;;  %v1075_v12 = vmul.f32 %v1074_v30, %v1073_v22  ;;  %v4372_v25 = vmul.f32 %v4259_v44, %v1134_v0  ;;  %v6321_v22 = vld [vmem:[#allocation15_spill] sm:$0xff]  ;;  %v6323_v30 = vld [vmem:[#allocation28_spill] sm:$0xff] }
  0xb3   : > { %3124 = vrcp.f32 %v1080_v1  ;;  %v1092_v35 = vmul.f32 %v1013_v45, %v6317_v39  ;;  %v1114_v41 = vmul.f32 %v1013_v45, %v6318_v49  ;;  %v1136_v40 = vmul.f32 %v1013_v45, %v6319_v5 }
  0xb4   : > { %v1070_v10 = vmul.f32 %v3117_v46, %v1069_v61  ;;  %3126 = vrcp.f32 %v1075_v12  ;;  %v4378_v56 = vmul.f32 %v1201_v47, %v6320_v53  ;;  %v1091_v18 = vadd.f32 %v4148_v27, %v1090_v17 }
  0xb5   : > { %v3119_v43 = vpop.eup %3118  ;;  %3128 = vrcp.f32 %v1084_v38  ;;  %v4382_v34 = vmul.f32 %v1201_v47, %v6321_v22  ;;  %v1204_v15 = vstv %s3888_s18  ;;  %v1115_v27 = vadd.f32 %v4170_v54, %v1114_v41  ;;  %v6324_v38 = vld [vmem:[#allocation35_spill] sm:$0xff]  ;;  %s4404_s18 = sld [smem:[#allocation4 + %s442_s28]] }
  0xb6   : > { %v3121_v51 = vpop.eup %3120  ;;  %v866_v2 = vmul.f32 %v3119_v43, %v861_v36  ;;  %v1094_v1 = vmul.f32 0.25, %v1070_v10  ;;  %v4389_v46 = vmul.f32 %v1204_v15, %v1201_v47  ;;  %v6322_v36 = vld [vmem:[#allocation27_spill] sm:$0xff]  ;;  %v1116_v17 = vmul.f32 %v1013_v45, %v6324_v38  ;;  %v6325_v47 = vld [vmem:[#allocation29_spill] sm:$0xff]  ;;  %s4547_s28 = sld [smem:[#allocation4 + %s433_s12]]  ;;  %s437_s12 = sadd.s32 8, %s3807_s27 }
  0xb7   : > { %v3123_v44 = vpop.eup %3122  ;;  %v894_v57 = vmul.f32 %v3121_v51, %v889_v32  ;;  %v1208_v4 = vadd.f32 %v4378_v56, %v6322_v36  ;;  %v1210_v32 = vadd.f32 %v4382_v34, %v6323_v30  ;;  %v1137_v0 = vadd.f32 %v4185_v60, %v1136_v40 }
  0xb8   : > { %3130 = vlog2.f32 %v866_v2  ;;  %v922_v28 = vmul.f32 %v3123_v44, %v917_v31  ;;  %v1212_v43 = vadd.f32 %v4389_v46, %v6325_v47  ;;  %v1033_v2 = vmax.f32 %v4274_v59, 0.0 }
  0xb9   : > { %3132 = vlog2.f32 %v894_v57  ;;  %v3125_v31 = vpop.eup %3124  ;;  %v4398_v61 = vmul.f32 0.5, %v1208_v4  ;;  %v4400_v12 = vmul.f32 0.5, %v1210_v32  ;;  %v1095_v10 = vmul.f32 %v1094_v1, %v1091_v18 }
  0xba   : > { %3134 = vlog2.f32 %v922_v28  ;;  %v3127_v51 = vpop.eup %3126  ;;  %v1138_v54 = vmul.f32 %v1013_v45, %v4180_v3  ;;  %v4409_v60 = vmul.f32 0.5, %v1212_v43  ;;  %v1093_v22 = vadd.f32 %v4137_v24, %v1092_v35 }
  0xbb   : > { %v3129_v41 = vpop.eup %3128  ;;  %v1077_v53 = vmul.f32 %v3127_v51, %v4067_v6  ;;  %v1214_v40 = vmul.f32 %v4398_v61, %v4398_v61  ;;  %v1215_v44 = vmul.f32 %v4400_v12, %v4400_v12  ;;  %v1117_v59 = vadd.f32 %v6304_v26, %v1116_v17 }
  0xbc   : > { %v1118_v18 = vmul.f32 %v1115_v27, %v1094_v1  ;;  %v1140_v45 = vmul.f32 %v1137_v0, %v1094_v1  ;;  %v1217_v43 = vmul.f32 %v4409_v60, %v4409_v60  ;;  %v1096_v38 = vadd.f32 %v1095_v10, %v4225_v16 }
  0xbd   : > { %v1086_v4 = vmul.f32 %v3125_v31, %v1077_v53  ;;  %v1216_v32 = vadd.f32 %v1215_v44, %v1214_v40  ;;  %v1139_v6 = vadd.f32 %v6305_v13, %v1138_v54  ;;  %v1385_v5 = vstv %s4385_s6  ;;  %v4425_v40 = vld [vmem:[#allocation7] sm:$0x3]  ;;  %s4543_s6 = sld [smem:[#allocation4 + %s450_s0]]  ;;  %s469_s0 = sadd.s32 5, %s4531_s7 }
  0xbe   : > { %v3131_v57 = vpop.eup %3130  ;;  %v1119_v17 = vadd.f32 %v1118_v18, %v4234_v14  ;;  %v1141_v53 = vadd.f32 %v1140_v45, %v4250_v37  ;;  %v4428_v10 = vsub.f32 %v1385_v5, %v4425_v40  ;;  %v1100_v54 = vmul.f32 %v1096_v38, %v1033_v2 }
  0xbf   : > { %v3133_v28 = vpop.eup %3132  ;;  %v868_v15 = vmul.f32 0.6931472, %v3131_v57  ;;  %v1087_v35 = vmul.f32 %v3129_v41, %v1086_v4  ;;  %v1218_v27 = vadd.f32 %v1217_v43, %v1216_v32  ;;  %v1387_v57 = vstv %s4404_s18  ;;  %v4442_v32 = vld [vmem:[#allocation7 + $0x2] sm:$0x3]  ;;  %s461_s18 = sadd.s32 1, %s4531_s7 }
  0xc0   : > { %v3135_v51 = vpop.eup %3134  ;;  %v896_v3 = vmul.f32 0.6931472, %v3133_v28  ;;  %v1122_v45 = vmul.f32 %v1119_v17, %v1033_v2  ;;  %v4445_v43 = vsub.f32 %v1387_v57, %v4442_v32  ;;  %s4565_s11 = sld [smem:[#allocation4 + %s461_s18]] }
  0xc1   : > { %v869_v24 = vand.u32 2147483647, %v868_v15  ;;  %v924_v26 = vmul.f32 0.6931472, %v3135_v51  ;;  %v1097_v31 = vmul.f32 0.25, %v1087_v35  ;;  %v6326_v35 = vld [vmem:[#allocation17_spill] sm:$0xff] }
  0xc2   : > { %v897_v1 = vand.u32 2147483647, %v896_v3  ;;  %v4430_v44 = vadd.f32 1e-12, %v1218_v27  ;;  %v1053_v3 = vmax.f32 %v4312_v29, 0.0  ;;  %v1101_v29 = vmul.f32 %v1100_v54, %v4356_v11 }
  0xc3   : > { %v925_v0 = vand.u32 2147483647, %v924_v26  ;;  %v1098_v41 = vmul.f32 %v1097_v31, %v1093_v22  ;;  %v1120_v18 = vmul.f32 %v1117_v59, %v1097_v31  ;;  %v1142_v28 = vmul.f32 %v1139_v6, %v1097_v31  ;;  %s1417_s27 = smul.f32 %s4543_s6, %s4543_s6 }
  0xc4   : > { %v898_v13 = vadd.f32 %v897_v1, %v869_v24  ;;  %3136 = vrsqrt.f32 %v4430_v44  ;;  %v1144_v22 = vmul.f32 %v1141_v53, %v1033_v2  ;;  %v1269_v6 = vmul.f32 %v6322_v36, %v3996_v7 }
  0xc5   : > { %v1099_v5 = vadd.f32 %v1098_v41, %v4223_v9  ;;  %v1121_v4 = vadd.f32 %v1120_v18, %v4227_v55  ;;  %v1143_v38 = vadd.f32 %v1142_v28, %v4236_v63  ;;  %v1389_v59 = vmul.f32 %v4428_v10, %v4428_v10 }
  0xc6   : > { %v4436_v15 = vadd.f32 %v925_v0, %v898_v13  ;;  %v1249_v27 = vmul.f32 %v6322_v36, %v6326_v35  ;;  %v1250_v1 = vmul.f32 %v4034_v42, %v6323_v30  ;;  %v1255_v17 = vmul.f32 %v4378_v56, %v6326_v35 }
  0xc7   : > { %v1103_v51 = vmul.f32 %v1099_v5, %v1053_v3  ;;  %v1125_v24 = vmul.f32 %v1121_v4, %v1053_v3  ;;  %v1147_v26 = vmul.f32 %v1143_v38, %v1053_v3  ;;  %v1256_v2 = vmul.f32 %v4034_v42, %v4382_v34 }
  0xc8   : > { %v1270_v0 = vmul.f32 %v3999_v8, %v6323_v30  ;;  %v1390_v54 = vmul.f32 %v4445_v43, %v4445_v43  ;;  %v1123_v3 = vmul.f32 %v1122_v45, %v4365_v58  ;;  %v1272_v18 = vmul.f32 %v4014_v20, %v6325_v47 }
  0xc9   : > { %v1104_v31 = vmul.f32 %v1103_v51, %v4356_v11  ;;  %v1126_v53 = vmul.f32 %v1125_v24, %v4365_v58  ;;  %v1148_v13 = vmul.f32 %v1147_v26, %v4372_v25  ;;  %v1275_v28 = vmul.f32 %v4378_v56, %v3996_v7  ;;  %v6327_v24 = vld [vmem:[#allocation18_spill] sm:$0xff] }
  0xca   : > { %v3137_v57 = vpop.eup %3136  ;;  %v1271_v41 = vadd.f32 %v1270_v0, %v1269_v6  ;;  %v1251_v51 = vadd.f32 %v1250_v1, %v1249_v27  ;;  %v1252_v26 = vmul.f32 %v6327_v24, %v6325_v47  ;;  %v1257_v58 = vadd.f32 %v1256_v2, %v1255_v17 }
  0xcb   : > { %v1105_v5 = vadd.f32 0.1, %v1104_v31  ;;  %v1127_v4 = vadd.f32 0.1, %v1126_v53  ;;  %v1149_v11 = vadd.f32 0.1, %v1148_v13  ;;  %v1221_v38 = vmul.f32 %v3137_v57, %v4430_v44 }
  0xcc   : > { %v1258_v45 = vmul.f32 %v6327_v24, %v4389_v46  ;;  %v1276_v7 = vmul.f32 %v3999_v8, %v4382_v34  ;;  %v1391_v56 = vadd.f32 %v1390_v54, %v1389_v59  ;;  %v1145_v0 = vmul.f32 %v1144_v22, %v4372_v25 }
  0xcd   : > { %3138 = vrcp.f32 %v1105_v5  ;;  %v1222_v6 = vmul.f32 %v3137_v57, %v1221_v38  ;;  %vm1226_vm8 = vweird.f32 %v4430_v44  ;;  %vm1227_vm9 = vweird.f32 %v3137_v57 }
  0xce   : > { %3140 = vrcp.f32 %v1127_v4  ;;  %v1273_v1 = vadd.f32 %v1272_v18, %v1271_v41  ;;  %v1393_v17 = vstv %s1392_s2  ;;  %v1102_v2 = vadd.f32 0.1, %v1101_v29  ;;  %vm1228_vm10 = vmor %vm1226_vm8, %vm1227_vm9  ;;  %s463_s2 = sadd.s32 2, %s4531_s7 }
  0xcf   : > { %3142 = vrcp.f32 %v1149_v11  ;;  %v1223_v27 = vmul.f32 0.5, %v1222_v6  ;;  %v1253_v31 = vadd.f32 %v1252_v26, %v1251_v51  ;;  %v4486_v53 = vadd.f32 %v1258_v45, %v1257_v58  ;;  %s4570_s10 = sld [smem:[#allocation4 + %s463_s2]] }
  0xd0   : > { %v1394_v13 = vadd.f32 %v1393_v17, %v1391_v56  ;;  %v1124_v8 = vadd.f32 0.1, %v1123_v3  ;;  %v1277_v59 = vadd.f32 %v1276_v7, %v1275_v28  ;;  %v1278_v25 = vmul.f32 %v4014_v20, %v4389_v46  ;;  %v4519_v17 = vld [vmem:[%s3769_s15 + $0x2] sm:$0x3]  ;;  %s4589_s2 = sld [smem:[#allocation4 + %s469_s0]] }
  0xd1   : > { %v1224_v34 = vsub.f32 1.5, %v1223_v27  ;;  %v1146_v22 = vadd.f32 0.1, %v1145_v0  ;;  %v1274_v18 = vmax.f32 %v1273_v1, 0.001  ;;  %v1410_v6 = vstv %s4484_s16  ;;  %s465_s16 = sadd.s32 3, %s4531_s7 }
  0xd2   : > { %v4494_v54 = vadd.f32 1e-12, %v1394_v13  ;;  %v1254_v3 = vmax.f32 %v1253_v31, 0.001  ;;  %v1261_v28 = vmax.f32 %v4486_v53, 0.001  ;;  %v4499_v38 = vadd.f32 %v1278_v25, %v1277_v59 }
  0xd3   : > { %v3139_v41 = vpop.eup %3138  ;;  %v1225_v29 = vmul.f32 %v3137_v57, %v1224_v34  ;;  %v1311_v45 = vmul.f32 %v1274_v18, %v6314_v50  ;;  %v1412_v18 = vstv %s4497_s26  ;;  %s467_s26 = sadd.s32 4, %s4531_s7  ;;  %s4577_s8 = sld [smem:[#allocation4 + %s465_s16]] }
  0xd4   : > { %v3141_v5 = vpop.eup %3140  ;;  %v1107_v4 = vmul.f32 %v3139_v41, %v1102_v2  ;;  %3144 = vrsqrt.f32 %v4494_v54  ;;  %v1281_v2 = vmax.f32 %v4499_v38, 0.001  ;;  %v1294_v34 = vmul.f32 %v1254_v3, %v4074_v23  ;;  %s4585_s18 = sld [smem:[#allocation4 + %s467_s26]]  ;;  %s4602_s26 = smul.u32 9, %s477_s1 }
  0xd5   : > { %v3143_v11 = vpop.eup %3142  ;;  %v1129_v20 = vmul.f32 %v3141_v5, %v1124_v8  ;;  %v1229_v46 = vsel %vm1228_vm10, %v3137_v57, %v1225_v29  ;;  %v4535_v59 = vadd.f32 %v1311_v45, %v6315_v52  ;;  %v4539_v29 = vsub.f32 %v1410_v6, %v4425_v40  ;;  %s4594_s16 = sld [smem:[#allocation4 + %s437_s12]]  ;;  %s1621_s1 = smul.f32 %s4570_s10, %s4570_s10 }
  0xd6   : > { %3146 = vlog2.f32 %v1107_v4  ;;  %v1151_v44 = vmul.f32 %v3143_v11, %v1146_v22  ;;  %v1230_v51 = vmul.f32 %v1229_v46, %v4398_v61  ;;  %v1231_v26 = vmul.f32 %v1229_v46, %v4400_v12  ;;  %s482_s0 = sadd.s32 2, %s4602_s26 }
  0xd7   : > { %3148 = vlog2.f32 %v1129_v20  ;;  %v1232_v58 = vmul.f32 %v1229_v46, %v4409_v60  ;;  %v4515_v60 = vld [vmem:[%s3769_s15] sm:$0x3]  ;;  %v1295_v45 = vadd.f32 %v1294_v34, %v6306_v48  ;;  %vm1402_vm11 = vweird.f32 %v4494_v54  ;;  %s4692_s12 = sld [smem:[#allocation4 + %s482_s0]]  ;;  %s496_s0 = sadd.s32 6, %s3775_s17 }
  0xd8   : > { %3150 = vlog2.f32 %v1151_v44  ;;  %v1233_v57 = vmul.f32 %v1230_v51, %v6322_v36  ;;  %v1234_v7 = vmul.f32 %v1231_v26, %v6323_v30  ;;  %v1243_v56 = vmul.f32 %v1230_v51, %v6326_v35  ;;  %v4523_v30 = vld [vmem:[%s3769_s15 + $0x4] sm:$0x3] }
  0xd9   : > { %v1236_v61 = vmul.f32 %v1232_v58, %v6325_v47  ;;  %v1244_v12 = vmul.f32 %v4034_v42, %v1231_v26  ;;  %v1246_v0 = vmul.f32 %v6327_v24, %v1232_v58  ;;  %v1263_v27 = vmul.f32 %v4515_v60, %v1230_v51 }
  0xda   : > { %v1235_v1 = vadd.f32 %v1234_v7, %v1233_v57  ;;  %v1264_v36 = vmul.f32 %v4519_v17, %v1231_v26  ;;  %v1266_v35 = vmul.f32 %v4523_v30, %v1232_v58  ;;  %v1290_v47 = vmul.f32 %v1261_v28, %v4074_v23  ;;  %v4527_v42 = vpop.eup %3144 }
  0xdb   : > { %v1245_v24 = vadd.f32 %v1244_v12, %v1243_v56  ;;  %v1307_v51 = vmul.f32 %v1281_v2, %v6314_v50  ;;  %v1397_v6 = vmul.f32 %v4527_v42, %v4494_v54  ;;  %v6328_v12 = vld [vmem:[#allocation16_spill] sm:$0xff]  ;;  %vm1403_vm12 = vweird.f32 %v4527_v42 }
  0xdc   : > { %v3147_v31 = vpop.eup %3146  ;;  %v1237_v13 = vadd.f32 %v1236_v61, %v1235_v1  ;;  %v1265_v8 = vadd.f32 %v1264_v36, %v1263_v27  ;;  %v1291_v11 = vadd.f32 %v1290_v47, %v6306_v48  ;;  %v4558_v61 = vsub.f32 %v1412_v18, %v4442_v32  ;;  %vm4656_vm13 = vmor %vm1402_vm11, %vm1403_vm12 }
  0xdd   : > { %v3149_v25 = vpop.eup %3148  ;;  %v1109_v22 = vmul.f32 0.6931472, %v3147_v31  ;;  %v1247_v41 = vadd.f32 %v1246_v0, %v1245_v24  ;;  %v1206_v0 = vmax.f32 %v6328_v12, 1e-12  ;;  %v1308_v47 = vadd.f32 %v1307_v51, %v6315_v52 }
  0xde   : > { %v3151_v5 = vpop.eup %3150  ;;  %v1131_v4 = vmul.f32 0.6931472, %v3149_v25  ;;  %v1238_v28 = vmax.f32 %v1237_v13, 0.001  ;;  %v1267_v3 = vadd.f32 %v1266_v35, %v1265_v8  ;;  %v1292_v35 = vmax.f32 %v1291_v11, 0.001 }
  0xdf   : > { %v1110_v20 = vand.u32 2147483647, %v1109_v22  ;;  %v1153_v46 = vmul.f32 0.6931472, %v3151_v5  ;;  %v1248_v44 = vmax.f32 %v1247_v41, 0.001  ;;  %v1398_v13 = vmul.f32 %v4527_v42, %v1397_v6 }
  0xe0   : > { %v1132_v26 = vand.u32 2147483647, %v1131_v4  ;;  %v1268_v58 = vmax.f32 %v1267_v3, 0.001  ;;  %v1239_v27 = vsub.f32 1.0, %v1238_v28  ;;  %v1414_v25 = vmul.f32 %v4539_v29, %v4539_v29 }
  0xe1   : > { %v1111_v57 = vadd.f32 %v1110_v20, %v4436_v15  ;;  %v1154_v7 = vand.u32 2147483647, %v1153_v46  ;;  %v1260_v56 = vmul.f32 %v1248_v44, %v1248_v44  ;;  %v1296_v24 = vmax.f32 %v1295_v45, 0.001 }
  0xe2   : > { %v1280_v1 = vmul.f32 %v1268_v58, %v1268_v58  ;;  %v1313_v31 = vmax.f32 %v4535_v59, 0.001  ;;  %v1415_v22 = vmul.f32 %v4558_v61, %v4558_v61  ;;  %3152 = vrcp.f32 %v1206_v0 }
  0xe3   : > { %v1133_v36 = vadd.f32 %v1132_v26, %v1111_v57  ;;  %v1283_v15 = vmul.f32 %v4104_v21, %v1260_v56  ;;  %v1240_v59 = vmul.f32 %v1239_v27, %v1239_v27  ;;  %v4592_v18 = vmax.f32 %v4486_v53, 0.0 }
  0xe4   : > { %v1300_v2 = vmul.f32 %v6307_v33, %v1280_v1  ;;  %3154 = vrcp.f32 %v1292_v35  ;;  %v1309_v4 = vmax.f32 %v1308_v47, 0.001  ;;  %v1399_v3 = vmul.f32 0.5, %v1398_v13  ;;  %v6334_v33 = vld [vmem:[#allocation37_spill] sm:$0xff] }
  0xe5   : > { %v4579_v8 = vadd.f32 %v1154_v7, %v1133_v36  ;;  %v1284_v34 = vadd.f32 1.0, %v1283_v15  ;;  %3156 = vrcp.f32 %v1296_v24  ;;  %v4599_v20 = vmax.f32 %v4499_v38, 0.0 }
  0xe6   : > { %v1301_v41 = vadd.f32 1.0, %v1300_v2  ;;  %3158 = vrcp.f32 %v1313_v31  ;;  %v1416_v53 = vadd.f32 %v1415_v22, %v1414_v25  ;;  %v1241_v44 = vmul.f32 %v1240_v59, %v1240_v59 }
  0xe7   : > { %v1285_v5 = vmax.f32 %v1284_v34, 0.001  ;;  %v1418_v26 = vstv %s1417_s27  ;;  %v1614_v58 = vstv %s4561_s25  ;;  %3160 = vrcp.f32 %v1309_v4  ;;  %s4633_s25 = sld [smem:[#allocation4 + %s4602_s26]] }
  0xe8   : > { %v1302_v28 = vmax.f32 %v1301_v41, 0.001  ;;  %v1317_v6 = vstv %s4547_s28  ;;  %v3153_v57 = vpop.eup %3152  ;;  %v1341_v7 = vstv %s4553_s9  ;;  %v1400_v56 = vsub.f32 1.5, %v1399_v3  ;;  %s480_s28 = sadd.s32 1, %s4602_s26  ;;  %s1646_s9 = smul.f32 %s4589_s2, %s4589_s2 }
  0xe9   : > { %v1286_v46 = vmul.f32 3.1415927, %v1285_v5  ;;  %v4608_v0 = vadd.f32 %v1418_v26, %v1416_v53  ;;  %v4611_v1 = vsub.f32 %v1614_v58, %v4425_v40  ;;  %v1616_v36 = vstv %s4565_s11  ;;  %s4647_s11 = sld [smem:[#allocation4 + %s480_s28]]  ;;  %s454_s28 = sadd.s32 7, %s4369_s13 }
  0xea   : > { %v1303_v51 = vmul.f32 3.1415927, %v1302_v28  ;;  %v3155_v12 = vpop.eup %3154  ;;  %v1242_v35 = vmul.f32 %v1241_v44, %v1239_v27  ;;  %v4617_v47 = vsub.f32 %v1616_v36, %v4442_v32  ;;  %v1639_v24 = vstv %s4577_s8  ;;  %v6331_v36 = vld [vmem:[#allocation40_spill] sm:$0xff]  ;;  %s1850_s8 = smul.f32 %s4692_s12, %s4692_s12 }
  0xeb   : > { %v1287_v45 = vmul.f32 %v1286_v46, %v1285_v5  ;;  %v3157_v15 = vpop.eup %3156  ;;  %v4622_v31 = vadd.f32 1e-12, %v4608_v0  ;;  %v1618_v13 = vmul.f32 %v4611_v1, %v4611_v1  ;;  %v4627_v34 = vsub.f32 %v1639_v24, %v4425_v40  ;;  %v4687_v44 = vld [vmem:[%s3763_s14 + $0x14] sm:$0x3] }
  0xec   : > { %v1304_v38 = vmul.f32 %v1303_v51, %v1302_v28  ;;  %v3159_v2 = vpop.eup %3158  ;;  %v1641_v25 = vstv %s4585_s18  ;;  %v4635_v27 = vmul.f32 %v3153_v57, %v1317_v6  ;;  %v1363_v22 = vstv %s4594_s16  ;;  %6337 = vst [vmem:[#allocation21_spill] sm:$0xff] %v4687_v44 }
  0xed   : > { %3162 = vrcp.f32 %v1287_v45  ;;  %v1619_v59 = vmul.f32 %v4617_v47, %v4617_v47  ;;  %v4641_v41 = vsub.f32 %v1641_v25, %v4442_v32  ;;  %v3161_v5 = vpop.eup %3160  ;;  %v1401_v4 = vmul.f32 %v4527_v42, %v1400_v56 }
  0xee   : > { %3164 = vrcp.f32 %v1304_v38  ;;  %v1622_v28 = vstv %s1621_s1  ;;  %v1643_v3 = vmul.f32 %v4627_v34, %v4627_v34  ;;  %v1319_v46 = vmul.f32 %v1242_v35, %v6316_v19  ;;  %v6333_v19 = vld [vmem:[#allocation35_spill] sm:$0xff] }
  0xef   : > { %3166 = vrsqrt.f32 %v4622_v31  ;;  %v4650_v53 = vmul.f32 %v3153_v57, %v1341_v7  ;;  %v1620_v51 = vadd.f32 %v1619_v59, %v1618_v13  ;;  %v1644_v26 = vmul.f32 %v4641_v41, %v4641_v41  ;;  %v6332_v59 = vld [vmem:[#allocation22_spill] sm:$0xff] }
  0xf0   : > { %v1321_v45 = vmul.f32 %v1242_v35, %v6317_v39  ;;  %v1343_v6 = vmul.f32 %v1242_v35, %v6318_v49  ;;  %v4664_v38 = vmul.f32 %v3153_v57, %v1363_v22  ;;  %v1647_v7 = vstv %s1646_s9  ;;  %s456_s9 = sadd.s32 8, %s4369_s13 }
  0xf1   : > { %v1365_v24 = vmul.f32 %v1242_v35, %v6331_v36  ;;  %v1623_v13 = vadd.f32 %v1622_v28, %v1620_v51  ;;  %v1645_v25 = vadd.f32 %v1644_v26, %v1643_v3  ;;  %v1345_v39 = vmul.f32 %v1242_v35, %v6333_v19  ;;  %v4705_v51 = vld [vmem:[%s3769_s15 + $0x16] sm:$0x3] }
  0xf2   : > { %v1367_v49 = vmul.f32 %v1242_v35, %v6334_v33  ;;  %v1405_v57 = vsel %vm4656_vm13, %v4527_v42, %v1401_v4  ;;  %v1344_v42 = vadd.f32 %v4687_v44, %v1343_v6  ;;  %6340 = vst [vmem:[#allocation32_spill] sm:$0xff] %v4705_v51  ;;  %vm1427_vm14 = vweird.f32 %v4622_v31 }
  0xf3   : > { %v3163_v58 = vpop.eup %3162  ;;  %v4680_v3 = vadd.f32 %v1647_v7, %v1645_v25  ;;  %v4701_v25 = vld [vmem:[%s3769_s15 + $0x14] sm:$0x3] }
  0xf4   : > { %v3165_v56 = vpop.eup %3164  ;;  %v1289_v54 = vmul.f32 %v3163_v58, %v4083_v62  ;;  %v4676_v58 = vld [vmem:[%s3763_s14 + $0x12] sm:$0x3]  ;;  %6339 = vst [vmem:[#allocation25_spill] sm:$0xff] %v4701_v25  ;;  %v1368_v6 = vadd.f32 %v4705_v51, %v1367_v49 }
  0xf5   : > { %v1306_v11 = vmul.f32 %v3165_v56, %v6332_v59  ;;  %v1320_v28 = vadd.f32 %v4676_v58, %v1319_v46  ;;  %6335 = vst [vmem:[#allocation31_spill] sm:$0xff] %v4680_v3  ;;  %v3167_v26 = vpop.eup %3166  ;;  %v4683_v59 = vld [vmem:[%s3769_s15 + $0x12] sm:$0x3]  ;;  %v4695_v46 = vld [vmem:[%s3763_s14 + $0x16] sm:$0x3] }
  0xf6   : > { %v1298_v22 = vmul.f32 %v3155_v12, %v1289_v54  ;;  %6336 = vst [vmem:[#allocation33_spill] sm:$0xff] %v4683_v59  ;;  %v1322_v35 = vadd.f32 %v4683_v59, %v1321_v45  ;;  %v4690_v12 = vadd.f32 1e-12, %v1623_v13  ;;  %v1366_v7 = vadd.f32 %v4695_v46, %v1365_v24 }
  0xf7   : > { %v1315_v56 = vmul.f32 %v3161_v5, %v1306_v11  ;;  %6338 = vst [vmem:[#allocation26_spill] sm:$0xff] %v4695_v46  ;;  %v1422_v11 = vmul.f32 %v3167_v26, %v4622_v31  ;;  %v1843_v5 = vstv %s4633_s25  ;;  %v1346_v45 = vadd.f32 %v4701_v25, %v1345_v39  ;;  %s4942_s25 = sld [smem:[#allocation4 + %s454_s28]] }
  0xf8   : > { %v1299_v4 = vmul.f32 %v3157_v15, %v1298_v22  ;;  %v4709_v13 = vadd.f32 1e-12, %v4680_v3  ;;  %v1845_v24 = vstv %s4647_s11  ;;  %vm1428_vm15 = vweird.f32 %v3167_v26  ;;  %s4953_s11 = sld [smem:[#allocation4 + %s456_s9]]  ;;  %s475_s9 = sadd.s32 8, %s4531_s7 }
  0xf9   : > { %v1316_v54 = vmul.f32 %v3159_v2, %v1315_v56  ;;  %v1423_v22 = vmul.f32 %v3167_v26, %v1422_v11  ;;  %3168 = vrsqrt.f32 %v4690_v12  ;;  %v4715_v2 = vsub.f32 %v1843_v5, %v4425_v40  ;;  %vm1429_vm0 = vmor %vm1427_vm14, %vm1428_vm15 }
  0xfa   : > { %v1323_v15 = vmul.f32 0.25, %v1299_v4  ;;  %3170 = vrsqrt.f32 %v4709_v13  ;;  %vm1631_vm1 = vweird.f32 %v4690_v12  ;;  %vm1656_vm3 = vweird.f32 %v4709_v13 }
  0xfb   : > { %v1326_v62 = vmul.f32 0.25, %v1316_v54  ;;  %6341 = vst [vmem:[#allocation38_spill] sm:$0xff] %v4715_v2  ;;  %v1424_v25 = vmul.f32 0.5, %v1423_v22  ;;  %v1847_v22 = vmul.f32 %v4715_v2, %v4715_v2 }
  0xfc   : > { %v1324_v39 = vmul.f32 %v1323_v15, %v1320_v28  ;;  %v1347_v56 = vmul.f32 %v1344_v42, %v1323_v15  ;;  %v1369_v46 = vmul.f32 %v1366_v7, %v1323_v15  ;;  %v4732_v7 = vmul.f32 %v1405_v57, %v4445_v43 }
  0xfd   : > { %v1327_v49 = vmul.f32 %v1326_v62, %v1322_v35  ;;  %v1349_v51 = vmul.f32 %v1346_v45, %v1326_v62  ;;  %v1371_v3 = vmul.f32 %v1368_v6, %v1326_v62  ;;  %v1425_v44 = vsub.f32 1.5, %v1424_v25 }
  0xfe   : > { %v1325_v4 = vadd.f32 %v1324_v39, %v4225_v16  ;;  %v1348_v11 = vadd.f32 %v1347_v56, %v4234_v14  ;;  %v1370_v54 = vadd.f32 %v1369_v46, %v4250_v37  ;;  %v4725_v35 = vmul.f32 %v1405_v57, %v4428_v10 }
  0xff   : > { %v1328_v5 = vadd.f32 %v1327_v49, %v4223_v9  ;;  %v1350_v28 = vadd.f32 %v1349_v51, %v4227_v55  ;;  %v1372_v42 = vadd.f32 %v1371_v3, %v4236_v63  ;;  %v1426_v46 = vmul.f32 %v3167_v26, %v1425_v44  ;;  %v4739_v51 = vpop.eup %3168  ;;  %v4871_v63 = vld [vmem:[%s3763_s14 + $0x4] sm:$0x3] }
 0x100   : > { %v1329_v62 = vmul.f32 %v1325_v4, %v4592_v18  ;;  %v4735_v25 = vsub.f32 %v1845_v24, %v4442_v32  ;;  %v6343_v45 = vstv %s4433_s30  ;;  %v1351_v43 = vmul.f32 %v1348_v11, %v4592_v18  ;;  %v4752_v24 = vpop.eup %3170  ;;  %s484_s30 = sadd.s32 3, %s4602_s26  ;;  %6347 = vst [vmem:[#allocation19_spill] sm:$0xff] %v4871_v63 }
 0x101   : > { %v1332_v10 = vmul.f32 %v1328_v5, %v4599_v20  ;;  %v1354_v3 = vmul.f32 %v1350_v28, %v4599_v20  ;;  %v1376_v31 = vmul.f32 %v1372_v42, %v4599_v20  ;;  %v4746_v6 = vmul.f32 %v6343_v45, %v1405_v57  ;;  %s4798_s18 = sld [smem:[#allocation4 + %s484_s30]] }
 0x102   : > { %6342 = vst [vmem:[#allocation41_spill] sm:$0xff] %v4735_v25  ;;  %v1373_v44 = vmul.f32 %v1370_v54, %v4592_v18  ;;  %v1430_v15 = vsel %vm1429_vm0, %v3167_v26, %v1426_v46  ;;  %v1330_v49 = vmul.f32 %v1329_v62, %v4635_v27  ;;  %v1848_v18 = vmul.f32 %v4735_v25, %v4735_v25 }
 0x103   : > { %v1333_v39 = vmul.f32 %v1332_v10, %v4635_v27  ;;  %v1355_v56 = vmul.f32 %v1354_v3, %v4650_v53  ;;  %v1377_v20 = vmul.f32 %v1376_v31, %v4664_v38  ;;  %v4758_v57 = vmul.f32 %v1430_v15, %v4539_v29 }
 0x104   : > { %v4762_v4 = vmul.f32 %v1430_v15, %v4558_v61  ;;  %v1851_v26 = vstv %s1850_s8  ;;  %v6344_v28 = vstv %s4543_s6  ;;  %v1352_v46 = vmul.f32 %v1351_v43, %v4650_v53  ;;  %s486_s6 = sadd.s32 4, %s4602_s26  ;;  %s5081_s8 = smul.u32 9, %s496_s0 }
 0x105   : > { %v1334_v11 = vadd.f32 0.1, %v1333_v39  ;;  %v1356_v54 = vadd.f32 0.1, %v1355_v56  ;;  %v1378_v5 = vadd.f32 0.1, %v1377_v20  ;;  %v4768_v42 = vmul.f32 %v6344_v28, %v1430_v15 }
 0x106   : > { %v1437_v29 = vadd.f32 %v4758_v57, %v4725_v35  ;;  %v1439_v61 = vadd.f32 %v4762_v4, %v4732_v7  ;;  %v1626_v27 = vmul.f32 %v4739_v51, %v4690_v12  ;;  %v1374_v62 = vmul.f32 %v1373_v44, %v4664_v38  ;;  %s4800_s27 = sld [smem:[#allocation4 + %s486_s6]]  ;;  %s499_s30 = sadd.s32 1, %s5081_s8 }
 0x107   : > { %3172 = vrcp.f32 %v1334_v11  ;;  %v1441_v10 = vadd.f32 %v4768_v42, %v4746_v6  ;;  %v1651_v3 = vmul.f32 %v4752_v24, %v4709_v13  ;;  %v1849_v38 = vadd.f32 %v1848_v18, %v1847_v22  ;;  %s5097_s6 = sld [smem:[#allocation4 + %s5081_s8]] }
 0x108   : > { %3174 = vrcp.f32 %v1356_v54  ;;  %v4782_v53 = vmul.f32 0.5, %v1437_v29  ;;  %v4784_v31 = vmul.f32 0.5, %v1439_v61  ;;  %v1627_v45 = vmul.f32 %v4739_v51, %v1626_v27 }
 0x109   : > { %3176 = vrcp.f32 %v1378_v5  ;;  %v4788_v43 = vmul.f32 0.5, %v1441_v10  ;;  %v1652_v15 = vmul.f32 %v4752_v24, %v1651_v3  ;;  %v1331_v44 = vadd.f32 0.1, %v1330_v49 }
 0x10a   : > { %v1443_v39 = vmul.f32 %v4782_v53, %v4782_v53  ;;  %v1444_v56 = vmul.f32 %v4784_v31, %v4784_v31  ;;  %v1628_v20 = vmul.f32 0.5, %v1627_v45  ;;  %v1353_v11 = vadd.f32 0.1, %v1352_v46 }
 0x10b   : > { %v1446_v54 = vmul.f32 %v4788_v43, %v4788_v43  ;;  %v1653_v28 = vmul.f32 0.5, %v1652_v15  ;;  %v1375_v5 = vadd.f32 0.1, %v1374_v62  ;;  %v1852_v49 = vadd.f32 %v1851_v26, %v1849_v38 }
 0x10c   : > { %v1445_v29 = vadd.f32 %v1444_v56, %v1443_v39  ;;  %v1629_v61 = vsub.f32 1.5, %v1628_v20  ;;  %vm1632_vm2 = vweird.f32 %v4739_v51  ;;  %vm1657_vm4 = vweird.f32 %v4752_v24 }
 0x10d   : > { %v3173_v22 = vpop.eup %3172  ;;  %v1654_v46 = vsub.f32 1.5, %v1653_v28  ;;  %vm1633_vm5 = vmor %vm1631_vm1, %vm1632_vm2  ;;  %v4811_v38 = vadd.f32 1e-12, %v1852_v49  ;;  %v1505_v39 = vmul.f32 %v4519_v17, %v4762_v4  ;;  %v1498_v20 = vmul.f32 %v4515_v60, %v4725_v35 }
 0x10e   : > { %v3175_v18 = vpop.eup %3174  ;;  %v1336_v27 = vmul.f32 %v3173_v22, %v1331_v44  ;;  %v1447_v10 = vadd.f32 %v1446_v54, %v1445_v29  ;;  %v1630_v26 = vmul.f32 %v4739_v51, %v1629_v61  ;;  %v1504_v44 = vmul.f32 %v4515_v60, %v4758_v57  ;;  %vm1658_vm6 = vmor %vm1656_vm3, %vm1657_vm4 }
 0x10f   : > { %v3177_v3 = vpop.eup %3176  ;;  %v1358_v45 = vmul.f32 %v3175_v18, %v1353_v11  ;;  %v1655_v56 = vmul.f32 %v4752_v24, %v1654_v46  ;;  %v1499_v12 = vmul.f32 %v4519_v17, %v4732_v7  ;;  %v1637_v54 = vstv %s4570_s10  ;;  %s452_s10 = sadd.s32 6, %s4369_s13 }
 0x110   : > { %3178 = vlog2.f32 %v1336_v27  ;;  %v1380_v62 = vmul.f32 %v3177_v3, %v1375_v5  ;;  %v4806_v15 = vadd.f32 1e-12, %v1447_v10  ;;  %v1634_v11 = vsel %vm1633_vm5, %v4739_v51, %v1630_v26  ;;  %s4903_s16 = sld [smem:[#allocation4 + %s452_s10]] }
 0x111   : > { %3180 = vlog2.f32 %v1358_v45  ;;  %v1868_v28 = vstv %s4798_s18  ;;  %v1435_v5 = vmax.f32 %v4608_v0, 1e-12  ;;  %v1662_v29 = vstv %s4589_s2  ;;  %s488_s2 = sadd.s32 5, %s4602_s26  ;;  %s471_s18 = sadd.s32 6, %s4531_s7 }
 0x112   : > { %3182 = vlog2.f32 %v1380_v62  ;;  %v1870_v61 = vstv %s4800_s27  ;;  %vm1455_vm7 = vweird.f32 %v4806_v15  ;;  %v1506_v49 = vadd.f32 %v1505_v39, %v1504_v44  ;;  %v4844_v62 = vld [vmem:[%s3763_s14] sm:$0x3]  ;;  %v4849_v44 = vld [vmem:[%s3763_s14 + $0x2] sm:$0x3]  ;;  %s4911_s1 = sld [smem:[#allocation4 + %s488_s2]]  ;;  %s473_s27 = sadd.s32 7, %s4531_s7 }
 0x113   : > { %3184 = vrsqrt.f32 %v4806_v15  ;;  %v1507_v13 = vmul.f32 %v4523_v30, %v4768_v42  ;;  %v1659_v18 = vsel %vm1658_vm6, %v4752_v24, %v1655_v56  ;;  %v1500_v10 = vadd.f32 %v1499_v12, %v1498_v20  ;;  %6345 = vst [vmem:[#allocation30_spill] sm:$0xff] %v4844_v62  ;;  %s5105_s10 = sld [smem:[#allocation4 + %s499_s30]]  ;;  %s507_s30 = sadd.s32 5, %s5081_s8 }
 0x114   : > { %3186 = vrsqrt.f32 %v4811_v38  ;;  %v1501_v0 = vmul.f32 %v4523_v30, %v4746_v6  ;;  %v4841_v46 = vmul.f32 %v1634_v11, %v4611_v1  ;;  %v1478_v26 = vmul.f32 %v4844_v62, %v4725_v35  ;;  %6346 = vst [vmem:[#allocation20_spill] sm:$0xff] %v4849_v44  ;;  %s5108_s2 = sld [smem:[#allocation4 + %s471_s18]] }
 0x115   : > { %v1479_v24 = vmul.f32 %v4849_v44, %v4732_v7  ;;  %v1484_v39 = vmul.f32 %v4844_v62, %v4758_v57  ;;  %v1485_v12 = vmul.f32 %v4849_v44, %v4762_v4  ;;  %v4862_v2 = vmul.f32 %v1634_v11, %v4617_v47  ;;  %s5184_s7 = sld [smem:[#allocation4 + %s475_s9]] }
 0x116   : > { %v3179_v22 = vpop.eup %3178  ;;  %v4865_v37 = vmul.f32 %v1659_v18, %v4641_v41  ;;  %v4875_v4 = vmul.f32 %v1637_v54, %v1634_v11  ;;  %v1487_v55 = vmul.f32 %v4871_v63, %v4768_v42  ;;  %v1502_v41 = vadd.f32 %v1501_v0, %v1500_v10 }
 0x117   : > { %v3181_v51 = vpop.eup %3180  ;;  %v1338_v27 = vmul.f32 0.6931472, %v3179_v22  ;;  %v4858_v22 = vmul.f32 %v1659_v18, %v4627_v34  ;;  %v1481_v34 = vmul.f32 %v4871_v63, %v4746_v6  ;;  %v1480_v47 = vadd.f32 %v1479_v24, %v1478_v26 }
 0x118   : > { %v3183_v3 = vpop.eup %3182  ;;  %v1360_v45 = vmul.f32 0.6931472, %v3181_v51  ;;  %v1486_v9 = vadd.f32 %v1485_v12, %v1484_v39  ;;  %v4879_v16 = vmul.f32 %v1662_v29, %v1659_v18  ;;  %v4894_v54 = vsub.f32 %v1868_v28, %v4425_v40  ;;  %s1875_s13 = smul.f32 %s4911_s1, %s4911_s1 }
 0x119   : > { %v3185_v56 = vpop.eup %3184  ;;  %v1339_v20 = vand.u32 2147483647, %v1338_v27  ;;  %v1382_v1 = vmul.f32 0.6931472, %v3183_v3  ;;  %v4897_v29 = vsub.f32 %v1870_v61, %v4442_v32  ;;  %v1482_v10 = vadd.f32 %v1481_v34, %v1480_v47 }
 0x11a   : > { %v1361_v51 = vand.u32 2147483647, %v1360_v45  ;;  %v1450_v25 = vmul.f32 %v3185_v56, %v4806_v15  ;;  %v4867_v57 = vpop.eup %3186  ;;  %vm1456_vm8 = vweird.f32 %v3185_v56  ;;  %6349 = vst [vmem:[#allocation15_spill] sm:$0xff] %v4894_v54  ;;  %3188 = vrcp.f32 %v1435_v5 }
 0x11b   : > { %v1340_v27 = vadd.f32 %v1339_v20, %v4579_v8  ;;  %v1383_v3 = vand.u32 2147483647, %v1382_v1  ;;  %v1666_v8 = vadd.f32 %v4858_v22, %v4841_v46  ;;  %v4884_v1 = vadd.f32 %v1507_v13, %v1506_v49  ;;  %6350 = vst [vmem:[#allocation27_spill] sm:$0xff] %v4897_v29  ;;  %vm1457_vm9 = vmor %vm1455_vm7, %vm1456_vm8 }
 0x11c   : > { %v1451_v45 = vmul.f32 %v3185_v56, %v1450_v25  ;;  %v1668_v25 = vadd.f32 %v4865_v37, %v4862_v2  ;;  %v1670_v49 = vadd.f32 %v4879_v16, %v4875_v4  ;;  %v1503_v40 = vmax.f32 %v1502_v41, 0.001 }
 0x11d   : > { %v1362_v14 = vadd.f32 %v1361_v51, %v1340_v27  ;;  %v4891_v42 = vmul.f32 0.5, %v1666_v8  ;;  %v1510_v61 = vmax.f32 %v4884_v1, 0.001  ;;  %v1872_v15 = vmul.f32 %v4894_v54, %v4894_v54  ;;  %v6358_v54 = vld [vmem:[#allocation26_spill] sm:$0xff] }
 0x11e   : > { %v1452_v20 = vmul.f32 0.5, %v1451_v45  ;;  %v4899_v0 = vmul.f32 0.5, %v1668_v25  ;;  %v4914_v13 = vmul.f32 0.5, %v1670_v49  ;;  %v1483_v26 = vmax.f32 %v1482_v10, 0.001 }
 0x11f   : > { %v4889_v11 = vadd.f32 %v1383_v3, %v1362_v14  ;;  %v4907_v14 = vadd.f32 %v1487_v55, %v1486_v9  ;;  %v1672_v32 = vmul.f32 %v4891_v42, %v4891_v42  ;;  %v1873_v9 = vmul.f32 %v4897_v29, %v4897_v29 }
 0x120   : > { %v1453_v18 = vsub.f32 1.5, %v1452_v20  ;;  %v1673_v5 = vmul.f32 %v4899_v0, %v4899_v0  ;;  %v1675_v39 = vmul.f32 %v4914_v13, %v4914_v13  ;;  %v1536_v34 = vmul.f32 %v1510_v61, %v6314_v50  ;;  %v3189_v41 = vpop.eup %3188 }
 0x121   : > { %6348 = vst [vmem:[#allocation14_spill] sm:$0xff] %v4889_v11  ;;  %v1490_v3 = vmax.f32 %v4907_v14, 0.001  ;;  %v1540_v45 = vmul.f32 %v1503_v40, %v6314_v50  ;;  %v1855_v47 = vmul.f32 %v4867_v57, %v4811_v38  ;;  %vm1860_vm10 = vweird.f32 %v4811_v38 }
 0x122   : > { %v1454_v28 = vmul.f32 %v3185_v56, %v1453_v18  ;;  %v1674_v24 = vadd.f32 %v1673_v5, %v1672_v32  ;;  %vm1861_vm11 = vweird.f32 %v4867_v57 }
 0x123   : > { %vm1862_vm14 = vmor %vm1860_vm10, %vm1861_vm11 }
 0x124   : > { %v1458_v55 = vsel %vm1457_vm9, %v3185_v56, %v1454_v28  ;;  %v1676_v56 = vadd.f32 %v1675_v39, %v1674_v24  ;;  %v1537_v24 = vadd.f32 %v1536_v34, %v6315_v52 }
 0x125   : > { %v1459_v12 = vmul.f32 %v1458_v55, %v4782_v53  ;;  %v1460_v51 = vmul.f32 %v1458_v55, %v4784_v31  ;;  %v1461_v27 = vmul.f32 %v1458_v55, %v4788_v43  ;;  %v1523_v55 = vmul.f32 %v1483_v26, %v4074_v23 }
 0x126   : > { %v4949_v61 = vadd.f32 1e-12, %v1676_v56  ;;  %v1874_v56 = vadd.f32 %v1873_v9, %v1872_v15 }
 0x127   : > { %v1462_v8 = vmul.f32 %v1459_v12, %v4725_v35  ;;  %v1463_v53 = vmul.f32 %v1460_v51, %v4732_v7  ;;  %v1465_v31 = vmul.f32 %v1461_v27, %v4746_v6  ;;  %v1472_v43 = vmul.f32 %v4844_v62, %v1459_v12 }
 0x128   : > { %v1473_v20 = vmul.f32 %v4849_v44, %v1460_v51  ;;  %v1475_v25 = vmul.f32 %v4871_v63, %v1461_v27  ;;  %v1492_v18 = vmul.f32 %v4515_v60, %v1459_v12  ;;  %v1493_v10 = vmul.f32 %v4519_v17, %v1460_v51 }
 0x129   : > { %v1464_v49 = vadd.f32 %v1463_v53, %v1462_v8  ;;  %v1495_v35 = vmul.f32 %v4523_v30, %v1461_v27  ;;  %v1519_v7 = vmul.f32 %v1490_v3, %v4074_v23  ;;  %v1546_v6 = vstv %s4903_s16  ;;  %s5116_s16 = sld [smem:[#allocation4 + %s473_s27]]  ;;  %s515_s27 = sadd.s32 7, %s3775_s17 }
 0x12a   : > { %v1474_v40 = vadd.f32 %v1473_v20, %v1472_v43  ;;  %v1494_v32 = vadd.f32 %v1493_v10, %v1492_v18  ;;  %v4947_v28 = vmul.f32 %v3189_v41, %v1546_v6  ;;  %v1541_v51 = vadd.f32 %v1540_v45, %v6315_v52 }
 0x12b   : > { %v1466_v5 = vadd.f32 %v1465_v31, %v1464_v49  ;;  %3190 = vrsqrt.f32 %v4949_v61  ;;  %v1856_v3 = vmul.f32 %v4867_v57, %v1855_v47  ;;  %v1520_v43 = vadd.f32 %v1519_v7, %v6306_v48  ;;  %v6352_v7 = vld [vmem:[#allocation24_spill] sm:$0xff] }
 0x12c   : > { %v1476_v39 = vadd.f32 %v1475_v25, %v1474_v40  ;;  %v1496_v12 = vadd.f32 %v1495_v35, %v1494_v32  ;;  %v1876_v31 = vstv %s1875_s13  ;;  %v1524_v26 = vadd.f32 %v1523_v55, %v6306_v48 }
 0x12d   : > { %v1467_v27 = vmax.f32 %v1466_v5, 0.001  ;;  %v1538_v18 = vmax.f32 %v1537_v24, 0.001  ;;  %v1542_v45 = vmax.f32 %v1541_v51, 0.001  ;;  %v1570_v49 = vstv %s4942_s25 }
 0x12e   : > { %v1477_v8 = vmax.f32 %v1476_v39, 0.001  ;;  %v1497_v53 = vmax.f32 %v1496_v12, 0.001  ;;  %v1857_v35 = vmul.f32 0.5, %v1856_v3  ;;  %v4963_v6 = vadd.f32 %v1876_v31, %v1874_v56  ;;  %s503_s25 = sadd.s32 3, %s5081_s8 }
 0x12f   : > { %v1468_v20 = vsub.f32 1.0, %v1467_v27  ;;  %v1521_v9 = vmax.f32 %v1520_v43, 0.001  ;;  %v4969_v32 = vmul.f32 %v3189_v41, %v1570_v49  ;;  %v1525_v55 = vmax.f32 %v1524_v26, 0.001  ;;  %s5191_s13 = sld [smem:[#allocation4 + %s503_s25]] }
 0x130   : > { %v1489_v34 = vmul.f32 %v1477_v8, %v1477_v8  ;;  %v1509_v25 = vmul.f32 %v1497_v53, %v1497_v53  ;;  %6351 = vst [vmem:[#allocation28_spill] sm:$0xff] %v4963_v6  ;;  %v1592_v39 = vstv %s4953_s11  ;;  %3192 = vrcp.f32 %v1538_v18 }
 0x131   : > { %v1469_v10 = vmul.f32 %v1468_v20, %v1468_v20  ;;  %v4965_v47 = vpop.eup %3190  ;;  %v4974_v27 = vmul.f32 %v3189_v41, %v1592_v39  ;;  %3194 = vrcp.f32 %v1542_v45  ;;  %v1858_v3 = vsub.f32 1.5, %v1857_v35 }
 0x132   : > { %v1512_v15 = vmul.f32 %v4104_v21, %v1489_v34  ;;  %v1529_v40 = vmul.f32 %v6352_v7, %v1509_v25  ;;  %v1679_v24 = vmul.f32 %v4965_v47, %v4949_v61  ;;  %v4978_v56 = vadd.f32 1e-12, %v4963_v6 }
 0x133   : > { %v1470_v5 = vmul.f32 %v1469_v10, %v1469_v10  ;;  %v4981_v8 = vmax.f32 %v4884_v1, 0.0  ;;  %3196 = vrcp.f32 %v1521_v9  ;;  %v1713_v25 = vmul.f32 %v4844_v62, %v4858_v22  ;;  %v6353_v9 = vld [vmem:[#allocation36_spill] sm:$0xff] }
 0x134   : > { %v1513_v12 = vadd.f32 1.0, %v1512_v15  ;;  %v1530_v51 = vadd.f32 1.0, %v1529_v40  ;;  %3198 = vrcp.f32 %v1525_v55  ;;  %v1680_v26 = vmul.f32 %v4965_v47, %v1679_v24 }
 0x135   : > { %v1471_v31 = vmul.f32 %v1470_v5, %v1468_v20  ;;  %v1714_v18 = vmul.f32 %v4849_v44, %v4865_v37  ;;  %vm1684_vm12 = vweird.f32 %v4949_v61  ;;  %vm1685_vm13 = vweird.f32 %v4965_v47  ;;  %v6354_v5 = vld [vmem:[#allocation34_spill] sm:$0xff] }
 0x136   : > { %v1514_v53 = vmax.f32 %v1513_v12, 0.001  ;;  %v1531_v43 = vmax.f32 %v1530_v51, 0.001  ;;  %v1859_v1 = vmul.f32 %v4867_v57, %v1858_v3  ;;  %3200 = vrsqrt.f32 %v4978_v56  ;;  %v3193_v20 = vpop.eup %3192  ;;  %v6355_v51 = vld [vmem:[#allocation39_spill] sm:$0xff]  ;;  %vm1686_vm15 = vmor %vm1684_vm12, %vm1685_vm13 }
 0x137   : > { %v1707_v49 = vmul.f32 %v4844_v62, %v4841_v46  ;;  %v1708_v35 = vmul.f32 %v4849_v44, %v4862_v2  ;;  %v3195_v15 = vpop.eup %3194  ;;  %v1548_v40 = vmul.f32 %v1471_v31, %v6353_v9  ;;  %v1550_v55 = vmul.f32 %v1471_v31, %v6354_v5 }
 0x138   : > { %v1515_v41 = vmul.f32 3.1415927, %v1514_v53  ;;  %v1532_v34 = vmul.f32 3.1415927, %v1531_v43  ;;  %v1681_v39 = vmul.f32 0.5, %v1680_v26  ;;  %v1716_v24 = vmul.f32 %v4871_v63, %v4879_v16 }
 0x139   : > { %v3197_v12 = vpop.eup %3196  ;;  %v1572_v3 = vmul.f32 %v1471_v31, %v6355_v51  ;;  %v1594_v26 = vmul.f32 %v1471_v31, %v6331_v36  ;;  %v1596_v11 = vmul.f32 %v1471_v31, %v6334_v33  ;;  %v1709_v38 = vadd.f32 %v1708_v35, %v1707_v49  ;;  %v6360_v36 = vld [vmem:[#allocation22_spill] sm:$0xff] }
 0x13a   : > { %v1516_v45 = vmul.f32 %v1515_v41, %v1514_v53  ;;  %v1533_v10 = vmul.f32 %v1532_v34, %v1531_v43  ;;  %v1574_v53 = vmul.f32 %v1471_v31, %v6333_v19  ;;  %v1715_v43 = vadd.f32 %v1714_v18, %v1713_v25  ;;  %v3199_v41 = vpop.eup %3198 }
 0x13b   : > { %v5008_v34 = vmax.f32 %v4907_v14, 0.0  ;;  %v1682_v6 = vsub.f32 1.5, %v1681_v39  ;;  %v5019_v25 = vsel %vm1862_vm14, %v4867_v57, %v1859_v1  ;;  %v1733_v31 = vmul.f32 %v4515_v60, %v4858_v22  ;;  %v6356_v39 = vld [vmem:[#allocation21_spill] sm:$0xff] }
 0x13c   : > { %3202 = vrcp.f32 %v1516_v45  ;;  %v1710_v45 = vmul.f32 %v4871_v63, %v4875_v4  ;;  %v5021_v14 = vpop.eup %3200  ;;  %v1734_v61 = vmul.f32 %v4519_v17, %v4865_v37  ;;  %v1549_v49 = vadd.f32 %v4676_v58, %v1548_v40  ;;  %v6357_v57 = vld [vmem:[#allocation25_spill] sm:$0xff] }
 0x13d   : > { %3204 = vrcp.f32 %v1533_v10  ;;  %v1683_v18 = vmul.f32 %v4965_v47, %v1682_v6  ;;  %v5024_v10 = vadd.f32 %v1716_v24, %v1715_v43  ;;  %v1551_v35 = vadd.f32 %v4683_v59, %v1550_v55 }
 0x13e   : > { %v1573_v29 = vadd.f32 %v6356_v39, %v1572_v3  ;;  %v1575_v1 = vadd.f32 %v6357_v57, %v1574_v53  ;;  %v1595_v33 = vadd.f32 %v6358_v54, %v1594_v26  ;;  %v1727_v24 = vmul.f32 %v4515_v60, %v4841_v46  ;;  %v6359_v57 = vld [vmem:[#allocation23_spill] sm:$0xff] }
 0x13f   : > { %v1687_v6 = vsel %vm1686_vm15, %v4965_v47, %v1683_v18  ;;  %v1728_v22 = vmul.f32 %v4519_v17, %v4862_v2  ;;  %v5043_v3 = vadd.f32 %v1710_v45, %v1709_v38  ;;  %v1719_v47 = vmax.f32 %v5024_v10, 0.001 }
 0x140   : > { %v1688_v37 = vmul.f32 %v1687_v6, %v4891_v42  ;;  %v1689_v40 = vmul.f32 %v1687_v6, %v4899_v0  ;;  %v1690_v55 = vmul.f32 %v1687_v6, %v4914_v13  ;;  %v1735_v26 = vadd.f32 %v1734_v61, %v1733_v31 }
 0x141   : > { %v1736_v18 = vmul.f32 %v4523_v30, %v4879_v16  ;;  %vm1885_vm0 = vweird.f32 %v4978_v56  ;;  %vm1886_vm1 = vweird.f32 %v5021_v14 }
 0x142   : > { %v3203_v43 = vpop.eup %3202  ;;  %v1691_v39 = vmul.f32 %v1688_v37, %v4841_v46  ;;  %v1692_v42 = vmul.f32 %v1689_v40, %v4862_v2  ;;  %v1694_v0 = vmul.f32 %v1690_v55, %v4875_v4  ;;  %v1701_v38 = vmul.f32 %v4844_v62, %v1688_v37  ;;  %vm5152_vm2 = vmor %vm1885_vm0, %vm1886_vm1 }
 0x143   : > { %v3205_v53 = vpop.eup %3204  ;;  %v1518_v54 = vmul.f32 %v3203_v43, %v6359_v57  ;;  %v1702_v45 = vmul.f32 %v4849_v44, %v1689_v40  ;;  %v1704_v6 = vmul.f32 %v4871_v63, %v1690_v55  ;;  %v1721_v61 = vmul.f32 %v4515_v60, %v1688_v37 }
 0x144   : > { %v1535_v19 = vmul.f32 %v3205_v53, %v6360_v36  ;;  %v1693_v31 = vadd.f32 %v1692_v42, %v1691_v39  ;;  %v1722_v16 = vmul.f32 %v4519_v17, %v1689_v40  ;;  %v6361_v36 = vld [vmem:[#allocation32_spill] sm:$0xff]  ;;  %v1730_v2 = vmul.f32 %v4523_v30, %v4875_v4  ;;  %v6362_v39 = vld [vmem:[#allocation31_spill] sm:$0xff] }
 0x145   : > { %v1527_v13 = vmul.f32 %v3197_v12, %v1518_v54  ;;  %v1597_v46 = vadd.f32 %v6361_v36, %v1596_v11  ;;  %v1703_v57 = vadd.f32 %v1702_v45, %v1701_v38  ;;  %v1729_v62 = vadd.f32 %v1728_v22, %v1727_v24 }
 0x146   : > { %v1544_v43 = vmul.f32 %v3193_v20, %v1535_v19  ;;  %v1695_v54 = vadd.f32 %v1694_v0, %v1693_v31  ;;  %v5061_v59 = vadd.f32 %v1736_v18, %v1735_v26  ;;  %v1723_v19 = vadd.f32 %v1722_v16, %v1721_v61  ;;  %v6364_v0 = vld [vmem:[#allocation42_spill] sm:$0xff] }
 0x147   : > { %v1528_v53 = vmul.f32 %v3199_v41, %v1527_v13  ;;  %v1705_v63 = vadd.f32 %v1704_v6, %v1703_v57  ;;  %v1724_v20 = vmul.f32 %v4523_v30, %v1690_v55  ;;  %v1664_v17 = vmax.f32 %v6362_v39, 1e-12  ;;  %v6363_v57 = vld [vmem:[#allocation43_spill] sm:$0xff] }
 0x148   : > { %v1545_v12 = vmul.f32 %v3195_v15, %v1544_v43  ;;  %v1712_v36 = vmax.f32 %v5043_v3, 0.001  ;;  %v1748_v11 = vmul.f32 %v1719_v47, %v4074_v23  ;;  %v1696_v37 = vmax.f32 %v1695_v54, 0.001  ;;  %v6365_v3 = vld [vmem:[#allocation45_spill] sm:$0xff]  ;;  %v6366_v47 = vld [vmem:[#allocation44_spill] sm:$0xff] }
 0x149   : > { %v1552_v44 = vmul.f32 0.25, %v1528_v53  ;;  %v1706_v26 = vmax.f32 %v1705_v63, 0.001  ;;  %v1725_v42 = vadd.f32 %v1724_v20, %v1723_v19  ;;  %v1731_v30 = vadd.f32 %v1730_v2, %v1729_v62 }
 0x14a   : > { %v1555_v60 = vmul.f32 0.25, %v1545_v12  ;;  %v1739_v55 = vmax.f32 %v5061_v59, 0.001  ;;  %v1749_v63 = vadd.f32 %v1748_v11, %v6306_v48  ;;  %v1880_v45 = vmul.f32 %v5021_v14, %v4978_v56  ;;  %v6375_v56 = vld [vmem:[#allocation23_spill] sm:$0xff] }
 0x14b   : > { %v1553_v41 = vmul.f32 %v1552_v44, %v1549_v49  ;;  %v1576_v4 = vmul.f32 %v1573_v29, %v1552_v44  ;;  %v1598_v15 = vmul.f32 %v1595_v33, %v1552_v44  ;;  %v6367_v29 = vld [vmem:[#allocation46_spill] sm:$0xff]  ;;  %v6368_v44 = vld [vmem:[#allocation47_spill] sm:$0xff]  ;;  %v1718_v31 = vmul.f32 %v1706_v26, %v1706_v26 }
 0x14c   : > { %v1556_v24 = vmul.f32 %v1555_v60, %v1551_v35  ;;  %v1578_v22 = vmul.f32 %v1575_v1, %v1555_v60  ;;  %v1600_v40 = vmul.f32 %v1597_v46, %v1555_v60  ;;  %v1697_v1 = vsub.f32 1.0, %v1696_v37 }
 0x14d   : > { %v1554_v18 = vadd.f32 %v1553_v41, %v6363_v57  ;;  %v1577_v38 = vadd.f32 %v1576_v4, %v6365_v3  ;;  %v1599_v35 = vadd.f32 %v1598_v15, %v6368_v44  ;;  %v1726_v16 = vmax.f32 %v1725_v42, 0.001 }
 0x14e   : > { %v1557_v13 = vadd.f32 %v1556_v24, %v6364_v0  ;;  %v1579_v49 = vadd.f32 %v1578_v22, %v6366_v47  ;;  %v1601_v33 = vadd.f32 %v1600_v40, %v6367_v29  ;;  %v1752_v53 = vmul.f32 %v1712_v36, %v4074_v23 }
 0x14f   : > { %v1558_v61 = vmul.f32 %v1554_v18, %v5008_v34  ;;  %v1765_v46 = vmul.f32 %v1739_v55, %v6314_v50  ;;  %v1580_v12 = vmul.f32 %v1577_v38, %v5008_v34  ;;  %v1602_v19 = vmul.f32 %v1599_v35, %v5008_v34 }
 0x150   : > { %v1561_v62 = vmul.f32 %v1557_v13, %v4981_v8  ;;  %v1583_v6 = vmul.f32 %v1579_v49, %v4981_v8  ;;  %v1605_v43 = vmul.f32 %v1601_v33, %v4981_v8  ;;  %v1698_v20 = vmul.f32 %v1697_v1, %v1697_v1 }
 0x151   : > { %v1732_v60 = vmax.f32 %v1731_v30, 0.001  ;;  %v1738_v11 = vmul.f32 %v1726_v16, %v1726_v16  ;;  %v1741_v15 = vmul.f32 %v4104_v21, %v1718_v31  ;;  %v1559_v37 = vmul.f32 %v1558_v61, %v4947_v28 }
 0x152   : > { %v1562_v2 = vmul.f32 %v1561_v62, %v4947_v28  ;;  %v1584_v54 = vmul.f32 %v1583_v6, %v4969_v32  ;;  %v1606_v8 = vmul.f32 %v1605_v43, %v4974_v27  ;;  %v1750_v24 = vmax.f32 %v1749_v63, 0.001  ;;  %v6369_v62 = vld [vmem:[#allocation38_spill] sm:$0xff] }
 0x153   : > { %v1753_v22 = vadd.f32 %v1752_v53, %v6306_v48  ;;  %v1758_v40 = vmul.f32 %v6352_v7, %v1738_v11  ;;  %v1581_v34 = vmul.f32 %v1580_v12, %v4969_v32  ;;  %v1742_v26 = vadd.f32 1.0, %v1741_v15  ;;  %v6370_v12 = vld [vmem:[#allocation41_spill] sm:$0xff] }
 0x154   : > { %v1563_v41 = vadd.f32 0.1, %v1562_v2  ;;  %v1585_v4 = vadd.f32 0.1, %v1584_v54  ;;  %v1607_v36 = vadd.f32 0.1, %v1606_v8  ;;  %v1766_v18 = vadd.f32 %v1765_v46, %v6315_v52 }
 0x155   : > { %v1603_v42 = vmul.f32 %v1602_v19, %v4974_v27  ;;  %v1759_v30 = vadd.f32 1.0, %v1758_v40  ;;  %v1769_v28 = vmul.f32 %v1732_v60, %v6314_v50  ;;  %v1699_v55 = vmul.f32 %v1698_v20, %v1698_v20 }
 0x156   : > { %3206 = vrcp.f32 %v1563_v41  ;;  %v1743_v13 = vmax.f32 %v1742_v26, 0.001  ;;  %v1754_v38 = vmax.f32 %v1753_v22, 0.001  ;;  %v1560_v49 = vadd.f32 0.1, %v1559_v37 }
 0x157   : > { %3208 = vrcp.f32 %v1585_v4  ;;  %v1760_v32 = vmax.f32 %v1759_v30, 0.001  ;;  %v1767_v33 = vmax.f32 %v1766_v18, 0.001  ;;  %v1866_v35 = vstv %s4692_s12  ;;  %s501_s12 = sadd.s32 2, %s5081_s8 }
 0x158   : > { %3210 = vrcp.f32 %v1607_v36  ;;  %v1582_v63 = vadd.f32 0.1, %v1581_v34  ;;  %v1744_v27 = vmul.f32 3.1415927, %v1743_v13  ;;  %v5114_v6 = vmul.f32 %v5019_v25, %v6369_v62  ;;  %v5140_v26 = vld [vmem:[#allocation7] sm:$0x3] }
 0x159   : > { %3212 = vrcp.f32 %v1664_v17  ;;  %v1604_v43 = vadd.f32 0.1, %v1603_v42  ;;  %v1761_v31 = vmul.f32 3.1415927, %v1760_v32  ;;  %v1770_v61 = vadd.f32 %v1769_v28, %v6315_v52  ;;  %s5145_s28 = sld [smem:[#allocation4 + %s501_s12]] }
 0x15a   : > { %3214 = vrcp.f32 %v1750_v24  ;;  %v1700_v53 = vmul.f32 %v1699_v55, %v1697_v1  ;;  %v1745_v46 = vmul.f32 %v1744_v27, %v1743_v13  ;;  %v1881_v39 = vmul.f32 %v5021_v14, %v1880_v45 }
 0x15b   : > { %3216 = vrcp.f32 %v1754_v38  ;;  %v5122_v54 = vmul.f32 %v5019_v25, %v6370_v12  ;;  %v5125_v8 = vmul.f32 %v1866_v35, %v5019_v25  ;;  %v1762_v60 = vmul.f32 %v1761_v31, %v1760_v32  ;;  %v6373_v38 = vld [vmem:[#allocation33_spill] sm:$0xff] }
 0x15c   : > { %v3207_v16 = vpop.eup %3206  ;;  %3218 = vrcp.f32 %v1767_v33  ;;  %v2072_v1 = vstv %s5097_s6  ;;  %v1771_v45 = vmax.f32 %v1770_v61, 0.001  ;;  %v1777_v41 = vmul.f32 %v1700_v53, %v6353_v9  ;;  %v6374_v32 = vld [vmem:[#allocation21_spill] sm:$0xff]  ;;  %v6377_v61 = vld [vmem:[#allocation40_spill] sm:$0xff]  ;;  %s5261_s6 = sld [smem:[#allocation4 + %s507_s30]] }
 0x15d   : > { %v3209_v17 = vpop.eup %3208  ;;  %v1565_v2 = vmul.f32 %v3207_v16, %v1560_v49  ;;  %3220 = vrcp.f32 %v1745_v46  ;;  %v1779_v36 = vmul.f32 %v1700_v53, %v6354_v5  ;;  %v1801_v25 = vmul.f32 %v1700_v53, %v6355_v51 }
 0x15e   : > { %v3211_v19 = vpop.eup %3210  ;;  %v1587_v20 = vmul.f32 %v3209_v17, %v1582_v63  ;;  %v1882_v15 = vmul.f32 0.5, %v1881_v39  ;;  %v2074_v24 = vstv %s5105_s10  ;;  %v5138_v40 = vmax.f32 %v5024_v10, 0.0  ;;  %v5161_v63 = vld [vmem:[#allocation7 + $0x2] sm:$0x3]  ;;  %s5309_s10 = smul.u32 9, %s515_s27 }
 0x15f   : > { %3222 = vlog2.f32 %v1565_v2  ;;  %v1609_v11 = vmul.f32 %v3211_v19, %v1604_v43  ;;  %v5129_v4 = vpop.eup %3212  ;;  %v5143_v18 = vsub.f32 %v2072_v1, %v5140_v26  ;;  %v1775_v30 = vstv %s5108_s2  ;;  %v6376_v43 = vld [vmem:[#allocation35_spill] sm:$0xff]  ;;  %v6378_v2 = vld [vmem:[#allocation37_spill] sm:$0xff]  ;;  %s2079_s0 = smul.f32 %s5145_s28, %s5145_s28 }
 0x160   : > { %3224 = vlog2.f32 %v1587_v20  ;;  %v3215_v37 = vpop.eup %3214  ;;  %v1883_v34 = vsub.f32 1.5, %v1882_v15  ;;  %v1778_v28 = vadd.f32 %v4676_v58, %v1777_v41  ;;  %v1799_v55 = vstv %s5116_s16  ;;  %s518_s2 = sadd.s32 1, %s5309_s10  ;;  %s5323_s16 = sld [smem:[#allocation4 + %s5309_s10]] }
 0x161   : > { %3226 = vlog2.f32 %v1609_v11  ;;  %v3217_v22 = vpop.eup %3216  ;;  %v5157_v49 = vadd.f32 %v6373_v38, %v1779_v36  ;;  %v1802_v33 = vadd.f32 %v6374_v32, %v1801_v25  ;;  %v5164_v58 = vsub.f32 %v2074_v24, %v5161_v63  ;;  %v6380_v36 = vld [vmem:[#allocation27_spill] sm:$0xff]  ;;  %v6381_v38 = vld [vmem:[#allocation22_spill] sm:$0xff]  ;;  %s5335_s12 = sld [smem:[#allocation4 + %s518_s2]]  ;;  %s520_s9 = sadd.s32 2, %s5309_s10 }
 0x162   : > { %3228 = vrcp.f32 %v1762_v60  ;;  %v3219_v42 = vpop.eup %3218  ;;  %v1884_v35 = vmul.f32 %v5021_v14, %v1883_v34  ;;  %v1803_v31 = vmul.f32 %v1700_v53, %v6376_v43  ;;  %v1823_v16 = vmul.f32 %v1700_v53, %v6377_v61  ;;  %s2104_s18 = smul.f32 %s5261_s6, %s5261_s6  ;;  %s522_s25 = sadd.s32 3, %s5309_s10 }
 0x163   : > { %3230 = vrcp.f32 %v1771_v45  ;;  %v3221_v13 = vpop.eup %3220  ;;  %v1891_v46 = vstv %s4911_s1  ;;  %v1825_v12 = vmul.f32 %v1700_v53, %v6378_v2  ;;  %v2076_v20 = vmul.f32 %v5143_v18, %v5143_v18  ;;  %v6379_v45 = vld [vmem:[#allocation15_spill] sm:$0xff]  ;;  %s505_s1 = sadd.s32 4, %s5081_s8  ;;  %s526_s27 = sadd.s32 5, %s5309_s10 }
 0x164   : > { %v1747_v62 = vmul.f32 %v3221_v13, %v6375_v56  ;;  %v1888_v19 = vsel %vm5152_vm2, %v5021_v14, %v1884_v35  ;;  %v2077_v34 = vmul.f32 %v5164_v58, %v5164_v58  ;;  %s5201_s11 = sld [smem:[#allocation4 + %s505_s1]]  ;;  %s524_s1 = sadd.s32 4, %s5309_s10 }
 0x165   : > { %v3223_v27 = vpop.eup %3222  ;;  %v5179_v41 = vmul.f32 %v1888_v19, %v6379_v45  ;;  %v5182_v25 = vmul.f32 %v1888_v19, %v6380_v36  ;;  %v5187_v14 = vmul.f32 %v1891_v46, %v1888_v19  ;;  %v5212_v36 = vld [vmem:[%s3763_s14 + $0x16] sm:$0x3]  ;;  %s5411_s2 = sld [smem:[#allocation4 + %s526_s27]] }
 0x166   : > { %v3225_v39 = vpop.eup %3224  ;;  %v1567_v17 = vmul.f32 0.6931472, %v3223_v27  ;;  %v1756_v11 = vmul.f32 %v3215_v37, %v1747_v62  ;;  %v6382_v27 = vld [vmem:[#allocation14_spill] sm:$0xff]  ;;  %6384 = vst [vmem:[#allocation17_spill] sm:$0xff] %v5212_v36 }
 0x167   : > { %v3227_v60 = vpop.eup %3226  ;;  %v1589_v1 = vmul.f32 0.6931472, %v3225_v39  ;;  %v1895_v35 = vadd.f32 %v5179_v41, %v5114_v6  ;;  %v1897_v46 = vadd.f32 %v5182_v25, %v5122_v54 }
 0x168   : > { %v3229_v15 = vpop.eup %3228  ;;  %v1568_v53 = vand.u32 2147483647, %v1567_v17  ;;  %v1611_v24 = vmul.f32 0.6931472, %v3227_v60  ;;  %v1757_v13 = vmul.f32 %v3217_v22, %v1756_v11  ;;  %v1899_v17 = vadd.f32 %v5187_v14, %v5125_v8  ;;  %v5204_v22 = vld [vmem:[%s3769_s15 + $0x14] sm:$0x3] }
 0x169   : > { %v3231_v10 = vpop.eup %3230  ;;  %v1590_v37 = vand.u32 2147483647, %v1589_v1  ;;  %v1764_v32 = vmul.f32 %v3229_v15, %v6381_v38  ;;  %6383 = vst [vmem:[#allocation29_spill] sm:$0xff] %v5204_v22  ;;  %v1804_v1 = vadd.f32 %v5204_v22, %v1803_v31  ;;  %v5207_v11 = vmul.f32 0.5, %v1895_v35 }
 0x16a   : > { %v1569_v62 = vadd.f32 %v1568_v53, %v6382_v27  ;;  %v1612_v39 = vand.u32 2147483647, %v1611_v24  ;;  %v1781_v60 = vmul.f32 0.25, %v1757_v13  ;;  %v1824_v15 = vadd.f32 %v5212_v36, %v1823_v16 }
 0x16b   : > { %v1773_v19 = vmul.f32 %v3219_v42, %v1764_v32  ;;  %v5215_v53 = vmul.f32 0.5, %v1897_v46  ;;  %v5217_v24 = vmul.f32 0.5, %v1899_v17  ;;  %v5220_v32 = vld [vmem:[%s3769_s15 + $0x16] sm:$0x3]  ;;  %v2078_v35 = vadd.f32 %v2077_v34, %v2076_v20 }
 0x16c   : > { %v1591_v45 = vadd.f32 %v1590_v37, %v1569_v62  ;;  %v1782_v13 = vmul.f32 %v1781_v60, %v1778_v28  ;;  %6385 = vst [vmem:[#allocation18_spill] sm:$0xff] %v5220_v32  ;;  %v1826_v31 = vadd.f32 %v5220_v32, %v1825_v12  ;;  %v1901_v16 = vmul.f32 %v5207_v11, %v5207_v11 }
 0x16d   : > { %v1774_v42 = vmul.f32 %v3231_v10, %v1773_v19  ;;  %v1902_v27 = vmul.f32 %v5215_v53, %v5215_v53  ;;  %v1904_v62 = vmul.f32 %v5217_v24, %v5217_v24  ;;  %v1740_v28 = vmax.f32 %v5061_v59, 0.0 }
 0x16e   : > { %v5223_v37 = vadd.f32 %v1612_v39, %v1591_v45  ;;  %v1805_v46 = vmul.f32 %v1802_v33, %v1781_v60  ;;  %v2080_v17 = vstv %s2079_s0  ;;  %v1776_v12 = vmul.f32 %v5129_v4, %v1775_v30  ;;  %s490_s0 = sadd.s32 6, %s4602_s26 }
 0x16f   : > { %v1784_v10 = vmul.f32 0.25, %v1774_v42  ;;  %v1800_v20 = vmul.f32 %v5129_v4, %v1799_v55  ;;  %v1827_v34 = vmul.f32 %v1824_v15, %v1781_v60  ;;  %v1903_v39 = vadd.f32 %v1902_v27, %v1901_v16 }
 0x170   : > { %v1821_v32 = vstv %s5184_s7  ;;  %v2097_v22 = vstv %s5191_s13  ;;  %v1783_v59 = vadd.f32 %v1782_v13, %v6363_v57  ;;  %v2081_v36 = vadd.f32 %v2080_v17, %v2078_v35  ;;  %s5359_s7 = sld [smem:[#allocation4 + %s520_s9]] }
 0x171   : > { %v1785_v19 = vmul.f32 %v1784_v10, %v5157_v49  ;;  %v1807_v45 = vmul.f32 %v1804_v1, %v1784_v10  ;;  %v1829_v42 = vmul.f32 %v1826_v31, %v1784_v10  ;;  %v1905_v33 = vadd.f32 %v1904_v62, %v1903_v39  ;;  %s5368_s13 = sld [smem:[#allocation4 + %s522_s25]] }
 0x172   : > { %v1806_v30 = vadd.f32 %v1805_v46, %v6365_v3  ;;  %v2099_v61 = vstv %s5201_s11  ;;  %v1822_v55 = vmul.f32 %v5129_v4, %v1821_v32  ;;  %v1828_v49 = vadd.f32 %v1827_v34, %v6368_v44  ;;  %s5373_s11 = sld [smem:[#allocation4 + %s524_s1]]  ;;  %s509_s1 = sadd.s32 6, %s5081_s8 }
 0x173   : > { %v1786_v38 = vadd.f32 %v1785_v19, %v6364_v0  ;;  %v1808_v2 = vadd.f32 %v1807_v45, %v6366_v47  ;;  %v1830_v60 = vadd.f32 %v1829_v42, %v6367_v29  ;;  %v5250_v1 = vadd.f32 1e-12, %v1905_v33  ;;  %v6388_v29 = vld [vmem:[#allocation19_spill] sm:$0xff] }
 0x174   : > { %v5253_v31 = vsub.f32 %v2097_v22, %v5140_v26  ;;  %v1787_v35 = vmul.f32 %v1783_v59, %v5138_v40  ;;  %v5256_v27 = vadd.f32 1e-12, %v2081_v36  ;;  %v5259_v62 = vsub.f32 %v2099_v61, %v5161_v63 }
 0x175   : > { %v1790_v15 = vmul.f32 %v1786_v38, %v1740_v28  ;;  %v1812_v13 = vmul.f32 %v1808_v2, %v1740_v28  ;;  %v1834_v16 = vmul.f32 %v1830_v60, %v1740_v28  ;;  %v1809_v32 = vmul.f32 %v1806_v30, %v5138_v40 }
 0x176   : > { %3232 = vrsqrt.f32 %v5250_v1  ;;  %v1831_v2 = vmul.f32 %v1828_v49, %v5138_v40  ;;  %v1788_v36 = vmul.f32 %v1787_v35, %v1776_v12  ;;  %v2101_v17 = vmul.f32 %v5253_v31, %v5253_v31  ;;  %v5272_v40 = vld [vmem:[%s3769_s15] sm:$0x3]  ;;  %v6386_v49 = vld [vmem:[#allocation30_spill] sm:$0xff]  ;;  %s2308_s30 = smul.f32 %s5359_s7, %s5359_s7 }
 0x177   : > { %v1791_v4 = vmul.f32 %v1790_v15, %v1776_v12  ;;  %v1813_v10 = vmul.f32 %v1812_v13, %v1800_v20  ;;  %v1835_v38 = vmul.f32 %v1834_v16, %v1822_v55  ;;  %3234 = vrsqrt.f32 %v5256_v27  ;;  %v6387_v15 = vld [vmem:[#allocation20_spill] sm:$0xff] }
 0x178   : > { %v1810_v61 = vmul.f32 %v1809_v32, %v1800_v20  ;;  %v2102_v34 = vmul.f32 %v5259_v62, %v5259_v62  ;;  %v1832_v39 = vmul.f32 %v1831_v2, %v1822_v55  ;;  %v1962_v19 = vmul.f32 %v5272_v40, %v5179_v41  ;;  %v5279_v20 = vld [vmem:[%s3769_s15 + $0x2] sm:$0x3] }
 0x179   : > { %v1792_v22 = vadd.f32 0.1, %v1791_v4  ;;  %v1814_v28 = vadd.f32 0.1, %v1813_v10  ;;  %v1836_v46 = vadd.f32 0.1, %v1835_v38  ;;  %v1956_v45 = vmul.f32 %v5272_v40, %v5114_v6 }
 0x17a   : > { %v1957_v59 = vmul.f32 %v5279_v20, %v5122_v54  ;;  %v1963_v42 = vmul.f32 %v5279_v20, %v5182_v25  ;;  %v1789_v33 = vadd.f32 0.1, %v1788_v36  ;;  %v1811_v55 = vadd.f32 0.1, %v1810_v61 }
 0x17b   : > { %3236 = vrcp.f32 %v1792_v22  ;;  %v1936_v60 = vmul.f32 %v6386_v49, %v5114_v6  ;;  %v1937_v13 = vmul.f32 %v6387_v15, %v5122_v54  ;;  %v2103_v35 = vadd.f32 %v2102_v34, %v2101_v17 }
 0x17c   : > { %3238 = vrcp.f32 %v1814_v28  ;;  %v3233_v12 = vpop.eup %3232  ;;  %v1833_v4 = vadd.f32 0.1, %v1832_v39  ;;  %vm1913_vm3 = vweird.f32 %v5250_v1  ;;  %v1942_v10 = vmul.f32 %v6386_v49, %v5179_v41  ;;  %v5301_v28 = vld [vmem:[%s3769_s15 + $0x4] sm:$0x3] }
 0x17d   : > { %3240 = vrcp.f32 %v1836_v46  ;;  %v1908_v30 = vmul.f32 %v3233_v12, %v5250_v1  ;;  %v5292_v16 = vpop.eup %3234  ;;  %v1943_v38 = vmul.f32 %v6387_v15, %v5182_v25  ;;  %v1958_v22 = vadd.f32 %v1957_v59, %v1956_v45 }
 0x17e   : > { %v1959_v36 = vmul.f32 %v5301_v28, %v5125_v8  ;;  %v1964_v46 = vadd.f32 %v1963_v42, %v1962_v19  ;;  %vm1914_vm4 = vweird.f32 %v3233_v12  ;;  %v1965_v39 = vmul.f32 %v5301_v28, %v5187_v14 }
 0x17f   : > { %v1909_v32 = vmul.f32 %v3233_v12, %v1908_v30  ;;  %v1938_v49 = vadd.f32 %v1937_v13, %v1936_v60  ;;  %v1939_v25 = vmul.f32 %v6388_v29, %v5125_v8  ;;  %v2105_v45 = vstv %s2104_s18  ;;  %vm1915_vm5 = vmor %vm1913_vm3, %vm1914_vm4  ;;  %s5401_s18 = sld [smem:[#allocation4 + %s490_s0]]  ;;  %s513_s0 = sadd.s32 8, %s5081_s8 }
 0x180   : > { %v1945_v42 = vmul.f32 %v6388_v29, %v5187_v14  ;;  %v2084_v60 = vmul.f32 %v5292_v16, %v5256_v27  ;;  %v5317_v13 = vadd.f32 %v1965_v39, %v1964_v46  ;;  %vm2089_vm6 = vweird.f32 %v5256_v27 }
 0x181   : > { %v3237_v2 = vpop.eup %3236  ;;  %v1910_v34 = vmul.f32 0.5, %v1909_v32  ;;  %v5319_v32 = vadd.f32 %v2105_v45, %v2103_v35  ;;  %vm2090_vm7 = vweird.f32 %v5292_v16 }
 0x182   : > { %v3239_v61 = vpop.eup %3238  ;;  %v1794_v17 = vmul.f32 %v3237_v2, %v1789_v33  ;;  %v1944_v33 = vadd.f32 %v1943_v38, %v1942_v10  ;;  %v1940_v2 = vadd.f32 %v1939_v25, %v1938_v49  ;;  %v1968_v35 = vmax.f32 %v5317_v13, 0.001  ;;  %v5345_v49 = vld [vmem:[%s3763_s14 + $0x2] sm:$0x3]  ;;  %vm2091_vm9 = vmor %vm2089_vm6, %vm2090_vm7 }
 0x183   : > { %v3241_v41 = vpop.eup %3240  ;;  %v1816_v30 = vmul.f32 %v3239_v61, %v1811_v55  ;;  %v1911_v59 = vsub.f32 1.5, %v1910_v34  ;;  %v1960_v55 = vadd.f32 %v1959_v36, %v1958_v22  ;;  %v2085_v46 = vmul.f32 %v5292_v16, %v2084_v60 }
 0x184   : > { %3242 = vlog2.f32 %v1794_v17  ;;  %v1838_v19 = vmul.f32 %v3241_v41, %v1833_v4  ;;  %v5328_v38 = vadd.f32 %v1945_v42, %v1944_v33  ;;  %v5341_v41 = vld [vmem:[%s3763_s14] sm:$0x3] }
 0x185   : > { %3244 = vlog2.f32 %v1816_v30  ;;  %v1912_v15 = vmul.f32 %v3233_v12, %v1911_v59  ;;  %v1961_v36 = vmax.f32 %v1960_v55, 0.001 }
 0x186   : > { %3246 = vlog2.f32 %v1838_v19 }
 0x187   : > { %v1916_v4 = vsel %vm1915_vm5, %v3233_v12, %v1912_v15  ;;  %v5333_v12 = vadd.f32 1e-12, %v5319_v32 }
 0x188   : > { %v1917_v14 = vmul.f32 %v1916_v4, %v5207_v11  ;;  %v1918_v1 = vmul.f32 %v1916_v4, %v5215_v53  ;;  %v1919_v10 = vmul.f32 %v1916_v4, %v5217_v24 }
 0x189   : > { %3248 = vrsqrt.f32 %v5333_v12  ;;  %vm2114_vm8 = vweird.f32 %v5333_v12 }
 0x18a   : > { %v3243_v22 = vpop.eup %3242  ;;  %v1920_v53 = vmul.f32 %v1917_v14, %v5114_v6  ;;  %v1921_v24 = vmul.f32 %v1918_v1, %v5122_v54  ;;  %v1923_v17 = vmul.f32 %v1919_v10, %v5125_v8  ;;  %v1930_v30 = vmul.f32 %v5341_v41, %v1917_v14 }
 0x18b   : > { %v3245_v61 = vpop.eup %3244  ;;  %v1796_v11 = vmul.f32 0.6931472, %v3243_v22  ;;  %v1931_v25 = vmul.f32 %v5345_v49, %v1918_v1  ;;  %v1933_v45 = vmul.f32 %v6388_v29, %v1919_v10  ;;  %v1950_v54 = vmul.f32 %v5272_v40, %v1917_v14 }
 0x18c   : > { %v3247_v34 = vpop.eup %3246  ;;  %v1818_v39 = vmul.f32 0.6931472, %v3245_v61  ;;  %v1922_v6 = vadd.f32 %v1921_v24, %v1920_v53  ;;  %v1951_v33 = vmul.f32 %v5279_v20, %v1918_v1  ;;  %v1953_v55 = vmul.f32 %v5301_v28, %v1919_v10 }
 0x18d   : > { %v1797_v19 = vand.u32 2147483647, %v1796_v11  ;;  %v1840_v59 = vmul.f32 0.6931472, %v3247_v34  ;;  %v1932_v8 = vadd.f32 %v1931_v25, %v1930_v30  ;;  %v1948_v22 = vmax.f32 %v5328_v38, 0.001 }
 0x18e   : > { %v1819_v42 = vand.u32 2147483647, %v1818_v39  ;;  %v1924_v4 = vadd.f32 %v1923_v17, %v1922_v6  ;;  %v1941_v61 = vmax.f32 %v1940_v2, 0.001  ;;  %v1952_v14 = vadd.f32 %v1951_v33, %v1950_v54 }
 0x18f   : > { %v1798_v60 = vadd.f32 %v1797_v19, %v5223_v37  ;;  %v1841_v15 = vand.u32 2147483647, %v1840_v59  ;;  %v1934_v29 = vadd.f32 %v1933_v45, %v1932_v8  ;;  %v1998_v11 = vmul.f32 %v1961_v36, %v6314_v50  ;;  %v5382_v33 = vpop.eup %3248 }
 0x190   : > { %v1925_v24 = vmax.f32 %v1924_v4, 0.001  ;;  %v1994_v1 = vmul.f32 %v1968_v35, %v6314_v50  ;;  %v1954_v10 = vadd.f32 %v1953_v55, %v1952_v14  ;;  %v2086_v17 = vmul.f32 0.5, %v2085_v46  ;;  %v6390_v55 = vld [vmem:[#allocation28_spill] sm:$0xff] }
 0x191   : > { %v1820_v53 = vadd.f32 %v1819_v42, %v1798_v60  ;;  %v1935_v37 = vmax.f32 %v1934_v29, 0.001  ;;  %v1977_v2 = vmul.f32 %v1948_v22, %v4074_v23  ;;  %v2301_v39 = vstv %s5323_s16  ;;  %s492_s16 = sadd.s32 7, %s4602_s26 }
 0x192   : > { %v2303_v36 = vstv %s5335_s12  ;;  %v1955_v25 = vmax.f32 %v1954_v10, 0.001  ;;  %v1999_v35 = vadd.f32 %v1998_v11, %v6315_v52  ;;  %v1926_v45 = vsub.f32 1.0, %v1925_v24  ;;  %s494_s12 = sadd.s32 8, %s4602_s26  ;;  %s5444_s9 = sld [smem:[#allocation4 + %s492_s16]] }
 0x193   : > { %v5362_v34 = vadd.f32 %v1841_v15, %v1820_v53  ;;  %v1947_v30 = vmul.f32 %v1935_v37, %v1935_v37  ;;  %v1981_v19 = vmul.f32 %v1941_v61, %v4074_v23  ;;  %v1995_v46 = vadd.f32 %v1994_v1, %v6315_v52  ;;  %s5461_s26 = sld [smem:[#allocation4 + %s494_s12]] }
 0x194   : > { %v2095_v59 = vstv %s5145_s28  ;;  %v1967_v6 = vmul.f32 %v1955_v25, %v1955_v25  ;;  %v5377_v42 = vsub.f32 %v2301_v39, %v5140_v26  ;;  %v5380_v8 = vsub.f32 %v2303_v36, %v5161_v63  ;;  %s2333_s28 = smul.f32 %s5411_s2, %s5411_s2 }
 0x195   : > { %v1970_v54 = vmul.f32 %v4104_v21, %v1947_v30  ;;  %v1893_v60 = vmax.f32 %v6390_v55, 1e-12  ;;  %v1978_v15 = vadd.f32 %v1977_v2, %v6306_v48  ;;  %v2087_v4 = vsub.f32 1.5, %v2086_v17 }
 0x196   : > { %6389 = vst [vmem:[#allocation16_spill] sm:$0xff] %v5380_v8  ;;  %v1987_v29 = vmul.f32 %v6352_v7, %v1967_v6  ;;  %v2000_v61 = vmax.f32 %v1999_v35, 0.001  ;;  %v2109_v14 = vmul.f32 %v5382_v33, %v5333_v12  ;;  %v1927_v11 = vmul.f32 %v1926_v45, %v1926_v45 }
 0x197   : > { %v1971_v22 = vadd.f32 1.0, %v1970_v54  ;;  %v1982_v53 = vadd.f32 %v1981_v19, %v6306_v48  ;;  %v1996_v24 = vmax.f32 %v1995_v46, 0.001  ;;  %v2305_v10 = vmul.f32 %v5377_v42, %v5377_v42 }
 0x198   : > { %v1988_v37 = vadd.f32 1.0, %v1987_v29  ;;  %v2306_v17 = vmul.f32 %v5380_v8, %v5380_v8  ;;  %3250 = vrcp.f32 %v1893_v60  ;;  %v1979_v2 = vmax.f32 %v1978_v15, 0.001 }
 0x199   : > { %v1972_v1 = vmax.f32 %v1971_v22, 0.001  ;;  %v2088_v39 = vmul.f32 %v5292_v16, %v2087_v4  ;;  %v2110_v36 = vmul.f32 %v5382_v33, %v2109_v14  ;;  %3252 = vrcp.f32 %v2000_v61 }
 0x19a   : > { %v1989_v25 = vmax.f32 %v1988_v37, 0.001  ;;  %v1928_v35 = vmul.f32 %v1927_v11, %v1927_v11  ;;  %v1983_v19 = vmax.f32 %v1982_v53, 0.001  ;;  %3254 = vrcp.f32 %v1996_v24 }
 0x19b   : > { %v1973_v30 = vmul.f32 3.1415927, %v1972_v1  ;;  %v2326_v46 = vstv %s5368_s13  ;;  %v2307_v55 = vadd.f32 %v2306_v17, %v2305_v10  ;;  %v2328_v60 = vstv %s5373_s11  ;;  %s5595_s13 = sld [smem:[#allocation4 + %s509_s1]]  ;;  %s511_s11 = sadd.s32 7, %s5081_s8 }
 0x19c   : > { %v1990_v54 = vmul.f32 3.1415927, %v1989_v25  ;;  %3256 = vrcp.f32 %v1979_v2  ;;  %v2111_v15 = vmul.f32 0.5, %v2110_v36  ;;  %vm2115_vm10 = vweird.f32 %v5382_v33  ;;  %s5622_s8 = sld [smem:[#allocation4 + %s513_s0]]  ;;  %s530_s0 = sadd.s32 7, %s5309_s10 }
 0x19d   : > { %v1974_v6 = vmul.f32 %v1973_v30, %v1972_v1  ;;  %v2309_v4 = vstv %s2308_s30  ;;  %v2092_v29 = vsel %vm2091_vm9, %v5292_v16, %v2088_v39  ;;  %v5416_v27 = vsub.f32 %v2326_v46, %v5140_v26  ;;  %vm5431_vm11 = vmor %vm2114_vm8, %vm2115_vm10 }
 0x19e   : > { %v1991_v22 = vmul.f32 %v1990_v54, %v1989_v25  ;;  %v5418_v61 = vpop.eup %3250  ;;  %v1929_v14 = vmul.f32 %v1928_v35, %v1926_v45  ;;  %v2112_v11 = vsub.f32 1.5, %v2111_v15  ;;  %v5422_v53 = vsub.f32 %v2328_v60, %v5161_v63  ;;  %v6395_v60 = vld [vmem:[#allocation40_spill] sm:$0xff] }
 0x19f   : > { %3258 = vrcp.f32 %v1974_v6  ;;  %6391 = vst [vmem:[#allocation24_spill] sm:$0xff] %v5416_v27  ;;  %v3253_v24 = vpop.eup %3252  ;;  %v5425_v1 = vmax.f32 %v5328_v38, 0.0  ;;  %v2310_v16 = vadd.f32 %v2309_v4, %v2307_v55  ;;  %v5437_v37 = vmul.f32 %v2092_v29, %v5143_v18  ;;  %v6396_v4 = vld [vmem:[#allocation37_spill] sm:$0xff] }
 0x1a0   : > { %3260 = vrcp.f32 %v1983_v19  ;;  %6392 = vst [vmem:[#allocation25_spill] sm:$0xff] %v5422_v53  ;;  %v3255_v45 = vpop.eup %3254  ;;  %v5440_v63 = vmul.f32 %v2092_v29, %v5164_v58  ;;  %v2113_v38 = vmul.f32 %v5382_v33, %v2112_v11  ;;  %v2120_v10 = vstv %s5261_s6  ;;  %s534_s6 = sadd.s32 8, %s3775_s17 }
 0x1a1   : > { %3262 = vrcp.f32 %v1991_v22  ;;  %v2004_v17 = vstv %s5401_s18  ;;  %v2006_v12 = vmul.f32 %v1929_v14, %v6353_v9  ;;  %v5450_v2 = vmul.f32 %v2095_v59, %v2092_v29  ;;  %v5480_v29 = vld [vmem:[%s3763_s14 + $0x12] sm:$0x3]  ;;  %s5544_s25 = smul.u32 9, %s534_s6  ;;  %s5618_s18 = sld [smem:[#allocation4 + %s511_s11]] }
 0x1a2   : > { %v2330_v39 = vmul.f32 %v5416_v27, %v5416_v27  ;;  %v3257_v36 = vpop.eup %3256  ;;  %v2008_v18 = vmul.f32 %v1929_v14, %v6354_v5  ;;  %v2030_v58 = vmul.f32 %v1929_v14, %v6355_v51  ;;  %v2117_v30 = vsel %vm5431_vm11, %v5382_v33, %v2113_v38  ;;  %6397 = vst [vmem:[#allocation26_spill] sm:$0xff] %v5480_v29 }
 0x1a3   : > { %v2331_v25 = vmul.f32 %v5422_v53, %v5422_v53  ;;  %v5464_v59 = vmul.f32 %v2117_v30, %v5253_v31  ;;  %v5467_v19 = vmul.f32 %v2117_v30, %v5259_v62  ;;  %v5469_v46 = vmul.f32 %v2120_v10, %v2117_v30  ;;  %v6398_v10 = vld [vmem:[#allocation22_spill] sm:$0xff]  ;;  %v5491_v30 = vld [vmem:[%s3763_s14 + $0x14] sm:$0x3]  ;;  %s5562_s17 = sld [smem:[#allocation4 + %s5544_s25]]  ;;  %s537_s30 = sadd.s32 1, %s5544_s25 }
 0x1a4   : > { %v5471_v6 = vadd.f32 1e-12, %v2310_v16  ;;  %v2032_v55 = vmul.f32 %v1929_v14, %v6376_v43  ;;  %v2052_v15 = vmul.f32 %v1929_v14, %v6395_v60  ;;  %v2054_v22 = vmul.f32 %v1929_v14, %v6396_v4  ;;  %6399 = vst [vmem:[#allocation32_spill] sm:$0xff] %v5491_v30  ;;  %s5624_s27 = sld [smem:[#allocation4 + %s537_s30]]  ;;  %s539_s16 = sadd.s32 2, %s5544_s25 }
 0x1a5   : > { %v3259_v35 = vpop.eup %3258  ;;  %v2007_v62 = vadd.f32 %v5480_v29, %v2006_v12  ;;  %v2124_v11 = vadd.f32 %v5464_v59, %v5437_v37  ;;  %v2126_v26 = vadd.f32 %v5467_v19, %v5440_v63  ;;  %v2128_v16 = vadd.f32 %v5469_v46, %v5450_v2  ;;  %s541_s12 = sadd.s32 3, %s5544_s25  ;;  %s532_s30 = sadd.s32 8, %s5309_s10 }
 0x1a6   : > { %v3261_v54 = vpop.eup %3260  ;;  %v1976_v33 = vmul.f32 %v3259_v35, %v6375_v56  ;;  %v2031_v35 = vadd.f32 %v5491_v30, %v2030_v58  ;;  %v2332_v4 = vadd.f32 %v2331_v25, %v2330_v39  ;;  %3264 = vrsqrt.f32 %v5471_v6 }
 0x1a7   : > { %v3263_v31 = vpop.eup %3262  ;;  %v5494_v12 = vmul.f32 0.5, %v2124_v11  ;;  %v5496_v29 = vmul.f32 0.5, %v2126_v26  ;;  %v5498_v43 = vmul.f32 0.5, %v2128_v16  ;;  %v5510_v11 = vld [vmem:[%s3769_s15 + $0x12] sm:$0x3]  ;;  %vm2318_vm15 = vweird.f32 %v5471_v6 }
 0x1a8   : > { %v1985_v38 = vmul.f32 %v3257_v36, %v1976_v33  ;;  %v1993_v14 = vmul.f32 %v3263_v31, %v6398_v10  ;;  %v6400_v36 = vld [vmem:[#allocation17_spill] sm:$0xff]  ;;  %v2334_v31 = vstv %s2333_s28  ;;  %v2028_v10 = vstv %s5444_s9  ;;  %s543_s9 = sadd.s32 4, %s5544_s25  ;;  %s545_s28 = sadd.s32 5, %s5544_s25 }
 0x1a9   : > { %v2053_v33 = vadd.f32 %v6400_v36, %v2052_v15  ;;  %v2130_v51 = vmul.f32 %v5494_v12, %v5494_v12  ;;  %v2131_v39 = vmul.f32 %v5496_v29, %v5496_v29  ;;  %v2133_v58 = vmul.f32 %v5498_v43, %v5498_v43 }
 0x1aa   : > { %v1986_v60 = vmul.f32 %v3261_v54, %v1985_v38  ;;  %v2002_v56 = vmul.f32 %v3255_v45, %v1993_v14  ;;  %v2009_v26 = vadd.f32 %v5510_v11, %v2008_v18  ;;  %v6401_v45 = vld [vmem:[#allocation29_spill] sm:$0xff]  ;;  %v2050_v15 = vstv %s5461_s26  ;;  %v6402_v38 = vld [vmem:[#allocation18_spill] sm:$0xff]  ;;  %s5710_s26 = sld [smem:[#allocation4 + %s543_s9]] }
 0x1ab   : > { %v2033_v16 = vadd.f32 %v6401_v45, %v2032_v55  ;;  %v2055_v14 = vadd.f32 %v6402_v38, %v2054_v22  ;;  %v2132_v36 = vadd.f32 %v2131_v39, %v2130_v51  ;;  %v5516_v30 = vadd.f32 %v2334_v31, %v2332_v4 }
 0x1ac   : > { %v2003_v25 = vmul.f32 %v3253_v24, %v2002_v56  ;;  %v2010_v54 = vmul.f32 0.25, %v1986_v60  ;;  %v5518_v8 = vpop.eup %3264  ;;  %v1969_v56 = vmax.f32 %v5317_v13, 0.0  ;;  %v2005_v24 = vmul.f32 %v5418_v61, %v2004_v17 }
 0x1ad   : > { %v2029_v18 = vmul.f32 %v5418_v61, %v2028_v10  ;;  %v2134_v60 = vadd.f32 %v2133_v58, %v2132_v36  ;;  %v5529_v31 = vadd.f32 1e-12, %v5516_v30  ;;  %v2191_v36 = vmul.f32 %v5272_v40, %v5464_v59 }
 0x1ae   : > { %v2011_v5 = vmul.f32 %v2010_v54, %v2007_v62  ;;  %v2013_v9 = vmul.f32 0.25, %v2003_v25  ;;  %v2034_v53 = vmul.f32 %v2031_v35, %v2010_v54  ;;  %v2056_v27 = vmul.f32 %v2053_v33, %v2010_v54 }
 0x1af   : > { %v2051_v62 = vmul.f32 %v5418_v61, %v2050_v15  ;;  %v5526_v33 = vadd.f32 1e-12, %v2134_v60  ;;  %v6403_v61 = vld [vmem:[#allocation46_spill] sm:$0xff]  ;;  %vm2319_vm0 = vweird.f32 %v5518_v8  ;;  %vm2343_vm1 = vweird.f32 %v5529_v31 }
 0x1b0   : > { %v2012_v55 = vadd.f32 %v2011_v5, %v6363_v57  ;;  %v2014_v22 = vmul.f32 %v2013_v9, %v2009_v26  ;;  %v2035_v51 = vadd.f32 %v2034_v53, %v6365_v3  ;;  %v2036_v4 = vmul.f32 %v2033_v16, %v2013_v9  ;;  %vm5643_vm2 = vmor %vm2318_vm15, %vm2319_vm0 }
 0x1b1   : > { %v2058_v35 = vmul.f32 %v2055_v14, %v2013_v9  ;;  %v2057_v10 = vadd.f32 %v2056_v27, %v6368_v44  ;;  %v2313_v5 = vmul.f32 %v5518_v8, %v5471_v6  ;;  %3266 = vrsqrt.f32 %v5526_v33 }
 0x1b2   : > { %v2015_v13 = vadd.f32 %v2014_v22, %v6364_v0  ;;  %v2037_v17 = vadd.f32 %v2036_v4, %v6366_v47  ;;  %v2016_v53 = vmul.f32 %v2012_v55, %v5425_v1  ;;  %v2038_v39 = vmul.f32 %v2035_v51, %v5425_v1 }
 0x1b3   : > { %v2059_v9 = vadd.f32 %v2058_v35, %v6403_v61  ;;  %3268 = vrsqrt.f32 %v5529_v31  ;;  %v2060_v27 = vmul.f32 %v2057_v10, %v5425_v1  ;;  %v2314_v16 = vmul.f32 %v5518_v8, %v2313_v5 }
 0x1b4   : > { %v2019_v58 = vmul.f32 %v2015_v13, %v1969_v56  ;;  %v2041_v25 = vmul.f32 %v2037_v17, %v1969_v56  ;;  %v2017_v15 = vmul.f32 %v2016_v53, %v2005_v24  ;;  %v2039_v38 = vmul.f32 %v2038_v39, %v2029_v18 }
 0x1b5   : > { %v2063_v26 = vmul.f32 %v2059_v9, %v1969_v56  ;;  %v2165_v56 = vmul.f32 %v5341_v41, %v5437_v37  ;;  %v2166_v1 = vmul.f32 %v5345_v49, %v5440_v63  ;;  %v2122_v4 = vmax.f32 %v5319_v32, 1e-12  ;;  %v5565_v32 = vld [vmem:[%s3763_s14 + $0x4] sm:$0x3] }
 0x1b6   : > { %v2020_v54 = vmul.f32 %v2019_v58, %v2005_v24  ;;  %v2042_v45 = vmul.f32 %v2041_v25, %v2029_v18  ;;  %v2171_v24 = vmul.f32 %v5341_v41, %v5464_v59  ;;  %v2172_v18 = vmul.f32 %v5345_v49, %v5467_v19 }
 0x1b7   : > { %v2064_v14 = vmul.f32 %v2063_v26, %v2051_v62  ;;  %v3267_v22 = vpop.eup %3266  ;;  %v2061_v35 = vmul.f32 %v2060_v27, %v2051_v62  ;;  %vm2142_vm12 = vweird.f32 %v5526_v33  ;;  %v2018_v10 = vadd.f32 0.1, %v2017_v15 }
 0x1b8   : > { %v2021_v60 = vadd.f32 0.1, %v2020_v54  ;;  %v2043_v55 = vadd.f32 0.1, %v2042_v45  ;;  %v2137_v13 = vmul.f32 %v3267_v22, %v5526_v33  ;;  %v2040_v5 = vadd.f32 0.1, %v2039_v38 }
 0x1b9   : > { %v2065_v51 = vadd.f32 0.1, %v2064_v14  ;;  %v5559_v17 = vpop.eup %3268  ;;  %v2168_v59 = vmul.f32 %v5565_v32, %v5450_v2  ;;  %v2167_v39 = vadd.f32 %v2166_v1, %v2165_v56  ;;  %v2192_v62 = vmul.f32 %v5279_v20, %v5467_v19 }
 0x1ba   : > { %3270 = vrcp.f32 %v2021_v60  ;;  %v2138_v53 = vmul.f32 %v3267_v22, %v2137_v13  ;;  %vm2143_vm13 = vweird.f32 %v3267_v22  ;;  %v2173_v9 = vadd.f32 %v2172_v18, %v2171_v24 }
 0x1bb   : > { %3272 = vrcp.f32 %v2043_v55  ;;  %v2174_v58 = vmul.f32 %v5565_v32, %v5469_v46  ;;  %v2185_v25 = vmul.f32 %v5272_v40, %v5437_v37  ;;  %v2186_v54 = vmul.f32 %v5279_v20, %v5440_v63  ;;  %vm2144_vm14 = vmor %vm2142_vm12, %vm2143_vm13 }
 0x1bc   : > { %3274 = vrcp.f32 %v2065_v51  ;;  %v2139_v26 = vmul.f32 0.5, %v2138_v53  ;;  %v2193_v45 = vadd.f32 %v2192_v62, %v2191_v36  ;;  %v2194_v27 = vmul.f32 %v5301_v28, %v5469_v46 }
 0x1bd   : > { %v2062_v15 = vadd.f32 0.1, %v2061_v35  ;;  %3276 = vrcp.f32 %v2122_v4  ;;  %v2315_v14 = vmul.f32 0.5, %v2314_v16  ;;  %v2338_v60 = vmul.f32 %v5559_v17, %v5529_v31 }
 0x1be   : > { %v2140_v19 = vsub.f32 1.5, %v2139_v26  ;;  %v5584_v1 = vadd.f32 %v2168_v59, %v2167_v39  ;;  %v5586_v36 = vadd.f32 %v2174_v58, %v2173_v9  ;;  %v2188_v46 = vmul.f32 %v5301_v28, %v5450_v2 }
 0x1bf   : > { %v2187_v24 = vadd.f32 %v2186_v54, %v2185_v25  ;;  %v5591_v18 = vadd.f32 %v2194_v27, %v2193_v45  ;;  %v2530_v13 = vstv %s5562_s17  ;;  %v2339_v59 = vmul.f32 %v5559_v17, %v2338_v60  ;;  %s5731_s17 = sld [smem:[#allocation4 + %s545_s28]] }
 0x1c0   : > { %v3271_v38 = vpop.eup %3270  ;;  %v2141_v4 = vmul.f32 %v3267_v22, %v2140_v19  ;;  %v2170_v9 = vmax.f32 %v5584_v1, 0.001  ;;  %vm2344_vm3 = vweird.f32 %v5559_v17  ;;  %v2279_v6 = vstv %s5622_s8  ;;  %s547_s8 = sadd.s32 6, %s5544_s25 }
 0x1c1   : > { %v3273_v55 = vpop.eup %3272  ;;  %v2023_v56 = vmul.f32 %v3271_v38, %v2018_v10  ;;  %v2316_v10 = vsub.f32 1.5, %v2315_v14  ;;  %v2189_v58 = vadd.f32 %v2188_v46, %v2187_v24  ;;  %v2197_v25 = vmax.f32 %v5591_v18, 0.001  ;;  %vm2345_vm4 = vmor %vm2343_vm1, %vm2344_vm3 }
 0x1c2   : > { %v3275_v51 = vpop.eup %3274  ;;  %v2045_v16 = vmul.f32 %v3273_v55, %v2040_v5  ;;  %v2145_v33 = vsel %vm2144_vm14, %v3267_v22, %v2141_v4  ;;  %v2177_v22 = vmax.f32 %v5586_v36, 0.001  ;;  %vm2769_vm1 = vcmask 1041408  }
 0x1c3   : > { %3278 = vlog2.f32 %v2023_v56  ;;  %v2067_v35 = vmul.f32 %v3275_v51, %v2062_v15  ;;  %v2146_v5 = vmul.f32 %v2145_v33, %v5494_v12  ;;  %v2147_v53 = vmul.f32 %v2145_v33, %v5496_v29  ;;  %v5601_v62 = vpop.eup %3276 }
 0x1c4   : > { %3280 = vlog2.f32 %v2045_v16  ;;  %v2148_v39 = vmul.f32 %v2145_v33, %v5498_v43  ;;  %v2190_v1 = vmax.f32 %v2189_v58, 0.001  ;;  %v2206_v51 = vmul.f32 %v2177_v22, %v4074_v23 }
 0x1c5   : > { %3282 = vlog2.f32 %v2067_v35  ;;  %v2149_v12 = vmul.f32 %v2146_v5, %v5437_v37  ;;  %v2150_v29 = vmul.f32 %v2147_v53, %v5440_v63  ;;  %v2159_v26 = vmul.f32 %v5341_v41, %v2146_v5  ;;  %s2562_s1 = smul.f32 %s5731_s17, %s5731_s17 }
 0x1c6   : > { %v2152_v43 = vmul.f32 %v2148_v39, %v5450_v2  ;;  %v2160_v54 = vmul.f32 %v5345_v49, %v2147_v53  ;;  %v2162_v45 = vmul.f32 %v5565_v32, %v2148_v39  ;;  %v2179_v27 = vmul.f32 %v5272_v40, %v2146_v5 }
 0x1c7   : > { %v2180_v15 = vmul.f32 %v5279_v20, %v2147_v53  ;;  %v2151_v19 = vadd.f32 %v2150_v29, %v2149_v12  ;;  %v2182_v37 = vmul.f32 %v5301_v28, %v2148_v39  ;;  %v2317_v63 = vmul.f32 %v5518_v8, %v2316_v10 }
 0x1c8   : > { %v2340_v2 = vmul.f32 0.5, %v2339_v59  ;;  %v2161_v55 = vadd.f32 %v2160_v54, %v2159_v26  ;;  %v2223_v28 = vmul.f32 %v2197_v25, %v6314_v50  ;;  %v2233_v59 = vstv %s5595_s13  ;;  %s528_s13 = sadd.s32 6, %s5309_s10  ;;  %s5918_s10 = sld [smem:[#allocation4 + %s532_s30]] }
 0x1c9   : > { %v3279_v38 = vpop.eup %3278  ;;  %v2181_v56 = vadd.f32 %v2180_v15, %v2179_v27  ;;  %v2153_v46 = vadd.f32 %v2152_v43, %v2151_v19  ;;  %v2207_v12 = vadd.f32 %v2206_v51, %v6306_v48  ;;  %v2210_v22 = vmul.f32 %v2170_v9, %v4074_v23  ;;  %s5874_s11 = sld [smem:[#allocation4 + %s528_s13]] }
 0x1ca   : > { %v3281_v14 = vpop.eup %3280  ;;  %v2025_v60 = vmul.f32 0.6931472, %v3279_v38  ;;  %v2163_v24 = vadd.f32 %v2162_v45, %v2161_v55  ;;  %v2227_v25 = vmul.f32 %v2190_v1, %v6314_v50  ;;  %v5635_v29 = vmul.f32 %v5601_v62, %v2233_v59  ;;  %v6408_v59 = vld [vmem:[#allocation25_spill] sm:$0xff] }
 0x1cb   : > { %v3283_v40 = vpop.eup %3282  ;;  %v2047_v20 = vmul.f32 0.6931472, %v3281_v14  ;;  %v2183_v35 = vadd.f32 %v2182_v37, %v2181_v56  ;;  %v2154_v10 = vmax.f32 %v2153_v46, 0.001  ;;  %v2257_v27 = vstv %s5618_s18  ;;  %s5903_s18 = sld [smem:[#allocation4 + %s530_s0]] }
 0x1cc   : > { %v2026_v16 = vand.u32 2147483647, %v2025_v60  ;;  %v2069_v4 = vmul.f32 0.6931472, %v3283_v40  ;;  %v2164_v39 = vmax.f32 %v2163_v24, 0.001  ;;  %v5653_v14 = vmul.f32 %v5601_v62, %v2257_v27 }
 0x1cd   : > { %v2048_v33 = vand.u32 2147483647, %v2047_v20  ;;  %v2184_v58 = vmax.f32 %v2183_v35, 0.001  ;;  %v2155_v45 = vsub.f32 1.0, %v2154_v10  ;;  %v2341_v15 = vsub.f32 1.5, %v2340_v2 }
 0x1ce   : > { %v2027_v5 = vadd.f32 %v2026_v16, %v5362_v34  ;;  %v2070_v53 = vand.u32 2147483647, %v2069_v4  ;;  %v2176_v26 = vmul.f32 %v2164_v39, %v2164_v39  ;;  %v2224_v34 = vadd.f32 %v2223_v28, %v6315_v52 }
 0x1cf   : > { %v2196_v54 = vmul.f32 %v2184_v58, %v2184_v58  ;;  %v2324_v60 = vstv %s5359_s7  ;;  %v2342_v55 = vmul.f32 %v5559_v17, %v2341_v15  ;;  %v2532_v56 = vstv %s5624_s27  ;;  %s5671_s7 = sld [smem:[#allocation4 + %s539_s16]]  ;;  %v5686_v58 = vld [vmem:[#allocation7] sm:$0x3]  ;;  %s549_s27 = sadd.s32 7, %s5544_s25 }
 0x1d0   : > { %v2049_v43 = vadd.f32 %v2048_v33, %v2027_v5  ;;  %v2199_v19 = vmul.f32 %v4104_v21, %v2176_v26  ;;  %v5663_v40 = vmul.f32 %v5601_v62, %v2279_v6  ;;  %v2321_v20 = vsel %vm5643_vm2, %v5518_v8, %v2317_v63  ;;  %v6406_v8 = vld [vmem:[#allocation16_spill] sm:$0xff]  ;;  %s551_s16 = sadd.s32 8, %s5544_s25  ;;  %s369_s25 = scalar_lea.vmem %s6145_s4, %s6449_s21 }
 0x1d1   : > { %v2216_v37 = vmul.f32 %v6352_v7, %v2196_v54  ;;  %v2208_v46 = vmax.f32 %v2207_v12, 0.001  ;;  %v2211_v31 = vadd.f32 %v2210_v22, %v6306_v48  ;;  %v2228_v51 = vadd.f32 %v2227_v25, %v6315_v52  ;;  %v6407_v33 = vld [vmem:[#allocation24_spill] sm:$0xff]  ;;  %v5696_v25 = vld [vmem:[#allocation7 + $0x2] sm:$0x3]  ;;  %s6049_s9 = sld [smem:[#allocation4 + %s551_s16]] }
 0x1d2   : > { %v5648_v38 = vadd.f32 %v2070_v53, %v2049_v43  ;;  %v2200_v2 = vadd.f32 1.0, %v2199_v19  ;;  %v2346_v28 = vsel %vm2345_vm4, %v5559_v17, %v2342_v55  ;;  %v2156_v16 = vmul.f32 %v2155_v45, %v2155_v45 }
 0x1d3   : > { %v2217_v1 = vadd.f32 1.0, %v2216_v37  ;;  %v2225_v35 = vmax.f32 %v2224_v34, 0.001  ;;  %v5674_v62 = vmul.f32 %v2321_v20, %v5377_v42  ;;  %v5677_v63 = vmul.f32 %v2321_v20, %v6406_v8  ;;  %v6413_v8 = vld [vmem:[#allocation39_spill] sm:$0xff] }
 0x1d4   : > { %v2201_v4 = vmax.f32 %v2200_v2, 0.001  ;;  %v5680_v10 = vmul.f32 %v2346_v28, %v6407_v33  ;;  %v5683_v5 = vmul.f32 %v2346_v28, %v6408_v59  ;;  %v2349_v39 = vstv %s5411_s2  ;;  %s5708_s2 = sld [smem:[#allocation4 + %s541_s12]] }
 0x1d5   : > { %v2218_v24 = vmax.f32 %v2217_v1, 0.001  ;;  %v5691_v12 = vsub.f32 %v2530_v13, %v5686_v58  ;;  %3284 = vrcp.f32 %v2208_v46  ;;  %v2212_v42 = vmax.f32 %v2211_v31, 0.001  ;;  %s2537_s6 = smul.f32 %s5671_s7, %s5671_s7  ;;  %v6411_v31 = vld [vmem:[#allocation36_spill] sm:$0xff]  ;;  %s6047_s12 = sld [smem:[#allocation4 + %s549_s27]] }
 0x1d6   : > { %v2202_v17 = vmul.f32 3.1415927, %v2201_v4  ;;  %v5694_v22 = vmul.f32 %v2324_v60, %v2321_v20  ;;  %v5699_v43 = vsub.f32 %v2532_v56, %v5696_v25  ;;  %v2157_v26 = vmul.f32 %v2156_v16, %v2156_v16 }
 0x1d7   : > { %v2219_v53 = vmul.f32 3.1415927, %v2218_v24  ;;  %6409 = vst [vmem:[#allocation31_spill] sm:$0xff] %v5691_v12  ;;  %3286 = vrcp.f32 %v2225_v35  ;;  %v2229_v27 = vmax.f32 %v2228_v51, 0.001  ;;  %v5702_v9 = vmul.f32 %v2349_v39, %v2346_v28 }
 0x1d8   : > { %6410 = vst [vmem:[#allocation43_spill] sm:$0xff] %v5699_v43  ;;  %v2203_v54 = vmul.f32 %v2202_v17, %v2201_v4  ;;  %v2353_v13 = vadd.f32 %v5680_v10, %v5674_v62  ;;  %v2355_v15 = vadd.f32 %v5683_v5, %v5677_v63  ;;  %v2158_v60 = vmul.f32 %v2157_v26, %v2155_v45 }
 0x1d9   : > { %v2220_v34 = vmul.f32 %v2219_v53, %v2218_v24  ;;  %v2357_v6 = vadd.f32 %v5702_v9, %v5694_v22  ;;  %v2534_v55 = vmul.f32 %v5691_v12, %v5691_v12  ;;  %v2535_v56 = vmul.f32 %v5699_v43, %v5699_v43  ;;  %v6412_v24 = vld [vmem:[#allocation34_spill] sm:$0xff]  ;;  %v6414_v53 = vld [vmem:[#allocation23_spill] sm:$0xff] }
 0x1da   : > { %3288 = vrcp.f32 %v2203_v54  ;;  %v5712_v19 = vmul.f32 0.5, %v2353_v13  ;;  %v5714_v37 = vmul.f32 0.5, %v2355_v15  ;;  %v2235_v51 = vmul.f32 %v2158_v60, %v6411_v31  ;;  %v6416_v13 = vld [vmem:[#allocation22_spill] sm:$0xff]  ;;  %v5751_v31 = vld [vmem:[%s3763_s14 + $0x16] sm:$0x3] }
 0x1db   : > { %3290 = vrcp.f32 %v2220_v34  ;;  %v3285_v2 = vpop.eup %3284  ;;  %v5723_v1 = vmul.f32 0.5, %v2357_v6  ;;  %v2237_v35 = vmul.f32 %v2158_v60, %v6412_v24  ;;  %v2259_v33 = vmul.f32 %v2158_v60, %v6413_v8  ;;  %v6417_v6 = vld [vmem:[#allocation35_spill] sm:$0xff]  ;;  %6421 = vst [vmem:[#allocation42_spill] sm:$0xff] %v5751_v31 }
 0x1dc   : > { %3292 = vrcp.f32 %v2212_v42  ;;  %v2359_v20 = vmul.f32 %v5712_v19, %v5712_v19  ;;  %v2360_v46 = vmul.f32 %v5714_v37, %v5714_v37  ;;  %v2536_v59 = vadd.f32 %v2535_v56, %v2534_v55  ;;  %v6415_v42 = vld [vmem:[#allocation40_spill] sm:$0xff]  ;;  %v6419_v55 = vld [vmem:[#allocation26_spill] sm:$0xff] }
 0x1dd   : > { %3294 = vrcp.f32 %v2229_v27  ;;  %v3287_v45 = vpop.eup %3286  ;;  %v2362_v16 = vmul.f32 %v5723_v1, %v5723_v1  ;;  %v2281_v26 = vmul.f32 %v2158_v60, %v6415_v42  ;;  %v2538_v34 = vstv %s2537_s6  ;;  %s374_s6 = scalar_lea.vmem %s6146_s5, %s6449_s21 }
 0x1de   : > { %v2361_v28 = vadd.f32 %v2360_v46, %v2359_v20  ;;  %v2261_v20 = vmul.f32 %v2158_v60, %v6417_v6  ;;  %v6418_v46 = vld [vmem:[#allocation37_spill] sm:$0xff]  ;;  %v2555_v12 = vstv %s5708_s2  ;;  %v2236_v56 = vadd.f32 %v6419_v55, %v2235_v51 }
 0x1df   : > { %v2283_v43 = vmul.f32 %v2158_v60, %v6418_v46  ;;  %v2557_v42 = vstv %s5710_s26  ;;  %v2282_v60 = vadd.f32 %v5751_v31, %v2281_v26  ;;  %vm2781_vm2 = vcmask 0  }
 0x1e0   : > { %v3289_v4 = vpop.eup %3288  ;;  %v2363_v54 = vadd.f32 %v2362_v16, %v2361_v28  ;;  %v2238_v16 = vadd.f32 %v5510_v11, %v2237_v35 }
 0x1e1   : > { %v3291_v17 = vpop.eup %3290  ;;  %v2205_v39 = vmul.f32 %v3289_v4, %v6414_v53  ;;  %v6420_v53 = vld [vmem:[#allocation32_spill] sm:$0xff] }
 0x1e2   : > { %v3293_v27 = vpop.eup %3292  ;;  %v2222_v15 = vmul.f32 %v3291_v17, %v6416_v13  ;;  %v5745_v4 = vadd.f32 1e-12, %v2363_v54  ;;  %v2260_v17 = vadd.f32 %v6420_v53, %v2259_v33  ;;  %v2539_v13 = vadd.f32 %v2538_v34, %v2536_v59  ;;  %v5763_v54 = vld [vmem:[%s3769_s15 + $0x16] sm:$0x3] }
 0x1e3   : > { %v3295_v8 = vpop.eup %3294  ;;  %v2214_v24 = vmul.f32 %v3285_v2, %v2205_v39  ;;  %v5756_v2 = vsub.f32 %v2555_v12, %v5686_v58  ;;  %v5759_v39 = vld [vmem:[%s3769_s15 + $0x14] sm:$0x3]  ;;  %6422 = vst [vmem:[#allocation45_spill] sm:$0xff] %v5763_v54  ;;  %v2284_v35 = vadd.f32 %v5763_v54, %v2283_v43  ;;  %v2178_v59 = vmax.f32 %v5586_v36, 0.0 }
 0x1e4   : > { %v2231_v28 = vmul.f32 %v3287_v45, %v2222_v15  ;;  %3296 = vrsqrt.f32 %v5745_v4  ;;  %v2262_v45 = vadd.f32 %v5759_v39, %v2261_v20  ;;  %v2198_v58 = vmax.f32 %v5591_v18, 0.0 }
 0x1e5   : > { %v2215_v6 = vmul.f32 %v3293_v27, %v2214_v24  ;;  %v5767_v24 = vsub.f32 %v2557_v42, %v5696_v25  ;;  %v2559_v15 = vmul.f32 %v5756_v2, %v5756_v2  ;;  %v2563_v18 = vstv %s2562_s1 }
 0x1e6   : > { %v2232_v51 = vmul.f32 %v3295_v8, %v2231_v28  ;;  %v5773_v8 = vadd.f32 1e-12, %v2539_v13  ;;  %vm2371_vm5 = vweird.f32 %v5745_v4 }
 0x1e7   : > { %v2239_v33 = vmul.f32 0.25, %v2215_v6  ;;  %v2560_v42 = vmul.f32 %v5767_v24, %v5767_v24 }
 0x1e8   : > { %v2242_v12 = vmul.f32 0.25, %v2232_v51  ;;  %3298 = vrsqrt.f32 %v5773_v8  ;;  %vm2547_vm8 = vweird.f32 %v5773_v8 }
 0x1e9   : > { %v2240_v26 = vmul.f32 %v2239_v33, %v2236_v56  ;;  %v2263_v34 = vmul.f32 %v2260_v17, %v2239_v33  ;;  %v2285_v27 = vmul.f32 %v2282_v60, %v2239_v33 }
 0x1ea   : > { %v2243_v43 = vmul.f32 %v2242_v12, %v2238_v16  ;;  %v2265_v20 = vmul.f32 %v2262_v45, %v2242_v12  ;;  %v2287_v25 = vmul.f32 %v2284_v35, %v2242_v12  ;;  %v3297_v6 = vpop.eup %3296  ;;  %v2561_v12 = vadd.f32 %v2560_v42, %v2559_v15 }
 0x1eb   : > { %v2241_v36 = vadd.f32 %v2240_v26, %v6363_v57  ;;  %v2264_v56 = vadd.f32 %v2263_v34, %v6365_v3  ;;  %v2286_v60 = vadd.f32 %v2285_v27, %v6368_v44  ;;  %v2366_v51 = vmul.f32 %v3297_v6, %v5745_v4 }
 0x1ec   : > { %v2244_v13 = vadd.f32 %v2243_v43, %v6364_v0  ;;  %v2266_v28 = vadd.f32 %v2265_v20, %v6366_v47  ;;  %v2288_v17 = vadd.f32 %v2287_v25, %v6403_v61  ;;  %v5789_v43 = vld [vmem:[%s3769_s15] sm:$0x3]  ;;  %v5794_v20 = vld [vmem:[%s3769_s15 + $0x2] sm:$0x3]  ;;  %vm2372_vm6 = vweird.f32 %v3297_v6  ;;  %v5827_v47 = vld [vmem:[%s3769_s15 + $0x4] sm:$0x3] }
 0x1ed   : > { %v2245_v16 = vmul.f32 %v2241_v36, %v2178_v59  ;;  %v2367_v26 = vmul.f32 %v3297_v6, %v2366_v51  ;;  %v2420_v34 = vmul.f32 %v5789_v43, %v5680_v10  ;;  %v2421_v27 = vmul.f32 %v5794_v20, %v5683_v5  ;;  %vm2373_vm7 = vmor %vm2371_vm5, %vm2372_vm6 }
 0x1ee   : > { %v2248_v45 = vmul.f32 %v2244_v13, %v2198_v58  ;;  %v2270_v35 = vmul.f32 %v2266_v28, %v2198_v58  ;;  %v2292_v33 = vmul.f32 %v2288_v17, %v2198_v58  ;;  %v2267_v36 = vmul.f32 %v2264_v56, %v2178_v59  ;;  %v5808_v56 = vpop.eup %3298 }
 0x1ef   : > { %v2246_v15 = vmul.f32 %v2245_v16, %v5635_v29  ;;  %v2289_v42 = vmul.f32 %v2286_v60, %v2178_v59  ;;  %v2394_v28 = vmul.f32 %v5341_v41, %v5674_v62  ;;  %v2400_v17 = vmul.f32 %v5341_v41, %v5680_v10 }
 0x1f0   : > { %v2249_v25 = vmul.f32 %v2248_v45, %v5635_v29  ;;  %v2271_v13 = vmul.f32 %v2270_v35, %v5653_v14  ;;  %v2293_v58 = vmul.f32 %v2292_v33, %v5663_v40  ;;  %v2395_v45 = vmul.f32 %v5345_v49, %v5677_v63 }
 0x1f1   : > { %v2368_v35 = vmul.f32 0.5, %v2367_v26  ;;  %v2401_v29 = vmul.f32 %v5345_v49, %v5683_v5  ;;  %v2403_v59 = vmul.f32 %v5565_v32, %v5702_v9  ;;  %v2268_v10 = vmul.f32 %v2267_v36, %v5653_v14 }
 0x1f2   : > { %v2250_v51 = vadd.f32 0.1, %v2249_v25  ;;  %v2272_v61 = vadd.f32 0.1, %v2271_v13  ;;  %v2294_v44 = vadd.f32 0.1, %v2293_v58  ;;  %v2414_v16 = vmul.f32 %v5789_v43, %v5674_v62 }
 0x1f3   : > { %v2415_v60 = vmul.f32 %v5794_v20, %v5677_v63  ;;  %v2290_v33 = vmul.f32 %v2289_v42, %v5663_v40  ;;  %v2369_v26 = vsub.f32 1.5, %v2368_v35  ;;  %v2402_v25 = vadd.f32 %v2401_v29, %v2400_v17 }
 0x1f4   : > { %3300 = vrcp.f32 %v2250_v51  ;;  %v2247_v13 = vadd.f32 0.1, %v2246_v15  ;;  %v2396_v5 = vadd.f32 %v2395_v45, %v2394_v28  ;;  %v2397_v14 = vmul.f32 %v5565_v32, %v5694_v22 }
 0x1f5   : > { %3302 = vrcp.f32 %v2272_v61  ;;  %v2370_v36 = vmul.f32 %v3297_v6, %v2369_v26  ;;  %v5824_v58 = vadd.f32 %v2403_v59, %v2402_v25  ;;  %v2422_v51 = vadd.f32 %v2421_v27, %v2420_v34 }
 0x1f6   : > { %3304 = vrcp.f32 %v2294_v44  ;;  %v2423_v61 = vmul.f32 %v5827_v47, %v5702_v9  ;;  %v2269_v40 = vadd.f32 0.1, %v2268_v10  ;;  %v2291_v42 = vadd.f32 0.1, %v2290_v33 }
 0x1f7   : > { %v2374_v15 = vsel %vm2373_vm7, %v3297_v6, %v2370_v36  ;;  %v2416_v44 = vadd.f32 %v2415_v60, %v2414_v16  ;;  %v5831_v17 = vadd.f32 %v2563_v18, %v2561_v12  ;;  %v2417_v34 = vmul.f32 %v5827_v47, %v5694_v22 }
 0x1f8   : > { %v2375_v28 = vmul.f32 %v2374_v15, %v5712_v19  ;;  %v2376_v45 = vmul.f32 %v2374_v15, %v5714_v37  ;;  %v2377_v35 = vmul.f32 %v2374_v15, %v5723_v1  ;;  %v2398_v59 = vadd.f32 %v2397_v14, %v2396_v5 }
 0x1f9   : > { %v2406_v9 = vmax.f32 %v5824_v58, 0.001  ;;  %v5839_v10 = vadd.f32 %v2423_v61, %v2422_v51  ;;  %v2542_v14 = vmul.f32 %v5808_v56, %v5773_v8  ;;  %v2418_v51 = vadd.f32 %v2417_v34, %v2416_v44 }
 0x1fa   : > { %v3301_v4 = vpop.eup %3300  ;;  %v2378_v12 = vmul.f32 %v2375_v28, %v5674_v62  ;;  %v2379_v19 = vmul.f32 %v2376_v45, %v5677_v63  ;;  %v2381_v37 = vmul.f32 %v2377_v35, %v5694_v22  ;;  %v2388_v16 = vmul.f32 %v5341_v41, %v2375_v28 }
 0x1fb   : > { %v3303_v27 = vpop.eup %3302  ;;  %v2252_v29 = vmul.f32 %v3301_v4, %v2247_v13  ;;  %v2389_v60 = vmul.f32 %v5345_v49, %v2376_v45  ;;  %v2391_v26 = vmul.f32 %v5565_v32, %v2377_v35  ;;  %v2408_v25 = vmul.f32 %v5789_v43, %v2375_v28 }
 0x1fc   : > { %v3305_v6 = vpop.eup %3304  ;;  %v2274_v18 = vmul.f32 %v3303_v27, %v2269_v40  ;;  %v2380_v33 = vadd.f32 %v2379_v19, %v2378_v12  ;;  %v2409_v62 = vmul.f32 %v5794_v20, %v2376_v45  ;;  %v2411_v63 = vmul.f32 %v5827_v47, %v2377_v35 }
 0x1fd   : > { %3306 = vlog2.f32 %v2252_v29  ;;  %v2296_v1 = vmul.f32 %v3305_v6, %v2291_v42  ;;  %v2390_v13 = vadd.f32 %v2389_v60, %v2388_v16  ;;  %v2399_v22 = vmax.f32 %v2398_v59, 0.001 }
 0x1fe   : > { %3308 = vlog2.f32 %v2274_v18  ;;  %v2382_v5 = vadd.f32 %v2381_v37, %v2380_v33  ;;  %v5853_v41 = vadd.f32 1e-12, %v5831_v17  ;;  %v2410_v36 = vadd.f32 %v2409_v62, %v2408_v25 }
 0x1ff   : > { %3310 = vlog2.f32 %v2296_v1  ;;  %v2392_v49 = vadd.f32 %v2391_v26, %v2390_v13  ;;  %v2426_v61 = vmax.f32 %v5839_v10, 0.001  ;;  %v2435_v40 = vmul.f32 %v2406_v9, %v4074_v23 }
 0x200   : > { %v2383_v15 = vmax.f32 %v2382_v5, 0.001  ;;  %v2412_v28 = vadd.f32 %v2411_v63, %v2410_v36  ;;  %v2439_v27 = vmul.f32 %v2399_v22, %v4074_v23  ;;  %v2543_v29 = vmul.f32 %v5808_v56, %v2542_v14 }
 0x201   : > { %v2393_v4 = vmax.f32 %v2392_v49, 0.001  ;;  %3312 = vrsqrt.f32 %v5853_v41  ;;  %v2419_v34 = vmax.f32 %v2418_v51, 0.001  ;;  %v2436_v9 = vadd.f32 %v2435_v40, %v6306_v48 }
 0x202   : > { %v2413_v44 = vmax.f32 %v2412_v28, 0.001  ;;  %v2452_v37 = vmul.f32 %v2426_v61, %v6314_v50  ;;  %v2384_v16 = vsub.f32 1.0, %v2383_v15  ;;  %v2440_v13 = vadd.f32 %v2439_v27, %v6306_v48 }
 0x203   : > { %v3307_v42 = vpop.eup %3306  ;;  %v2405_v18 = vmul.f32 %v2393_v4, %v2393_v4  ;;  %v2456_v5 = vmul.f32 %v2419_v34, %v6314_v50  ;;  %v2544_v36 = vmul.f32 0.5, %v2543_v29  ;;  %v2437_v40 = vmax.f32 %v2436_v9, 0.001 }
 0x204   : > { %v3309_v45 = vpop.eup %3308  ;;  %v2254_v35 = vmul.f32 0.6931472, %v3307_v42  ;;  %v2425_v60 = vmul.f32 %v2413_v44, %v2413_v44  ;;  %v2453_v49 = vadd.f32 %v2452_v37, %v6315_v52  ;;  %v2385_v51 = vmul.f32 %v2384_v16, %v2384_v16 }
 0x205   : > { %v3311_v59 = vpop.eup %3310  ;;  %v2276_v6 = vmul.f32 0.6931472, %v3309_v45  ;;  %v2428_v33 = vmul.f32 %v4104_v21, %v2405_v18  ;;  %v2441_v15 = vmax.f32 %v2440_v13, 0.001  ;;  %v2457_v45 = vadd.f32 %v2456_v5, %v6315_v52  ;;  %v6424_v5 = vld [vmem:[#allocation34_spill] sm:$0xff] }
 0x206   : > { %v2255_v12 = vand.u32 2147483647, %v2254_v35  ;;  %v2298_v19 = vmul.f32 0.6931472, %v3311_v59  ;;  %v2445_v63 = vmul.f32 %v6352_v7, %v2425_v60  ;;  %v2454_v35 = vmax.f32 %v2453_v49, 0.001 }
 0x207   : > { %v2277_v1 = vand.u32 2147483647, %v2276_v6  ;;  %v2429_v62 = vadd.f32 1.0, %v2428_v33  ;;  %v5867_v22 = vpop.eup %3312  ;;  %v2545_v27 = vsub.f32 1.5, %v2544_v36  ;;  %v2386_v59 = vmul.f32 %v2385_v51, %v2385_v51  ;;  %v6427_v36 = vld [vmem:[#allocation23_spill] sm:$0xff] }
 0x208   : > { %v2256_v26 = vadd.f32 %v2255_v12, %v5648_v38  ;;  %v2299_v25 = vand.u32 2147483647, %v2298_v19  ;;  %v2446_v42 = vadd.f32 1.0, %v2445_v63  ;;  %3314 = vrcp.f32 %v2437_v40 }
 0x209   : > { %v2430_v61 = vmax.f32 %v2429_v62, 0.001  ;;  %3316 = vrcp.f32 %v2441_v15  ;;  %vm2548_vm9 = vweird.f32 %v5808_v56  ;;  %v2567_v18 = vmul.f32 %v5867_v22, %v5853_v41  ;;  %v6423_v62 = vld [vmem:[#allocation36_spill] sm:$0xff] }
 0x20a   : > { %v2278_v14 = vadd.f32 %v2277_v1, %v2256_v26  ;;  %v2447_v28 = vmax.f32 %v2446_v42, 0.001  ;;  %v2458_v34 = vmax.f32 %v2457_v45, 0.001  ;;  %v2351_v12 = vmax.f32 %v5516_v30, 1e-12  ;;  %vm2549_vm10 = vmor %vm2547_vm8, %vm2548_vm9 }
 0x20b   : > { %v2431_v4 = vmul.f32 3.1415927, %v2430_v61  ;;  %v2546_v19 = vmul.f32 %v5808_v56, %v2545_v27  ;;  %v2568_v9 = vmul.f32 %v5867_v22, %v2567_v18  ;;  %v2387_v37 = vmul.f32 %v2386_v59, %v2384_v16  ;;  %v6430_v45 = vld [vmem:[#allocation31_spill] sm:$0xff] }
 0x20c   : > { %v5871_v38 = vadd.f32 %v2299_v25, %v2278_v14  ;;  %v2448_v29 = vmul.f32 3.1415927, %v2447_v28  ;;  %vm2572_vm11 = vweird.f32 %v5853_v41  ;;  %vm2573_vm12 = vweird.f32 %v5867_v22  ;;  %v6431_v41 = vld [vmem:[#allocation43_spill] sm:$0xff] }
 0x20d   : > { %v2432_v6 = vmul.f32 %v2431_v4, %v2430_v61  ;;  %v2569_v8 = vmul.f32 0.5, %v2568_v9  ;;  %v2550_v60 = vsel %vm2549_vm10, %v5808_v56, %v2546_v19  ;;  %v2553_v33 = vstv %s5671_s7  ;;  %vm5899_vm13 = vmor %vm2572_vm11, %vm2573_vm12  ;;  %v6429_v4 = vld [vmem:[#allocation40_spill] sm:$0xff]  ;;  %s6045_s7 = sld [smem:[#allocation4 + %s547_s8]] }
 0x20e   : > { %v2449_v44 = vmul.f32 %v2448_v29, %v2447_v28  ;;  %v3315_v1 = vpop.eup %3314  ;;  %v5890_v16 = vmax.f32 %v5824_v58, 0.0  ;;  %v2462_v13 = vstv %s5874_s11  ;;  %v2464_v63 = vmul.f32 %v2387_v37, %v6423_v62  ;;  %v6428_v58 = vld [vmem:[#allocation39_spill] sm:$0xff]  ;;  %v6432_v29 = vld [vmem:[#allocation22_spill] sm:$0xff] }
 0x20f   : > { %3318 = vrcp.f32 %v2432_v6  ;;  %v3317_v30 = vpop.eup %3316  ;;  %v2570_v26 = vsub.f32 1.5, %v2569_v8  ;;  %v2466_v14 = vmul.f32 %v2387_v37, %v6424_v5  ;;  %v2488_v61 = vmul.f32 %v2387_v37, %v6428_v58 }
 0x210   : > { %3320 = vrcp.f32 %v2454_v35  ;;  %v2578_v42 = vstv %s5731_s17  ;;  %v2510_v28 = vmul.f32 %v2387_v37, %v6429_v4  ;;  %v5911_v35 = vmul.f32 %v2550_v60, %v6430_v45 }
 0x211   : > { %3322 = vrcp.f32 %v2449_v44  ;;  %v2571_v40 = vmul.f32 %v5867_v22, %v2570_v26  ;;  %v5914_v27 = vmul.f32 %v2550_v60, %v6431_v41  ;;  %v5916_v59 = vmul.f32 %v2553_v33, %v2550_v60  ;;  %v6433_v44 = vld [vmem:[#allocation35_spill] sm:$0xff] }
 0x212   : > { %3324 = vrcp.f32 %v2458_v34  ;;  %v2490_v34 = vmul.f32 %v2387_v37, %v6433_v44  ;;  %v2512_v9 = vmul.f32 %v2387_v37, %v6418_v46  ;;  %v2489_v49 = vadd.f32 %v6420_v53, %v2488_v61 }
 0x213   : > { %3326 = vrcp.f32 %v2351_v12  ;;  %v2575_v12 = vsel %vm5899_vm13, %v5867_v22, %v2571_v40  ;;  %v2511_v22 = vadd.f32 %v5751_v31, %v2510_v28  ;;  %v2486_v45 = vstv %s5903_s18  ;;  %v6435_v31 = vld [vmem:[#allocation47_spill] sm:$0xff] }
 0x214   : > { %v5927_v8 = vmul.f32 %v2575_v12, %v5756_v2  ;;  %v5930_v60 = vmul.f32 %v2575_v12, %v5767_v24  ;;  %v5932_v33 = vmul.f32 %v2578_v42, %v2575_v12  ;;  %v2513_v53 = vadd.f32 %v5763_v54, %v2512_v9  ;;  %v6436_v54 = vld [vmem:[#allocation46_spill] sm:$0xff] }
 0x215   : > { %v3319_v25 = vpop.eup %3318  ;;  %v2508_v9 = vstv %s5918_s10 }
 0x216   : > { %v3321_v56 = vpop.eup %3320  ;;  %v2434_v51 = vmul.f32 %v3319_v25, %v6427_v36  ;;  %v2582_v37 = vadd.f32 %v5927_v8, %v5911_v35  ;;  %v2584_v2 = vadd.f32 %v5930_v60, %v5914_v27  ;;  %v2586_v24 = vadd.f32 %v5932_v33, %v5916_v59 }
 0x217   : > { %v3323_v15 = vpop.eup %3322 }
 0x218   : > { %v2443_v6 = vmul.f32 %v3315_v1, %v2434_v51  ;;  %v2451_v18 = vmul.f32 %v3323_v15, %v6432_v29  ;;  %v3325_v19 = vpop.eup %3324  ;;  %v2465_v51 = vadd.f32 %v6419_v55, %v2464_v63  ;;  %v2491_v55 = vadd.f32 %v5759_v39, %v2490_v34 }
 0x219   : > { %v3327_v1 = vpop.eup %3326  ;;  %v5946_v63 = vmul.f32 0.5, %v2582_v37  ;;  %v5948_v61 = vmul.f32 0.5, %v2584_v2  ;;  %v5950_v42 = vmul.f32 0.5, %v2586_v24  ;;  %v2427_v34 = vmax.f32 %v5839_v10, 0.0  ;;  %v6434_v24 = vld [vmem:[#allocation44_spill] sm:$0xff] }
 0x21a   : > { %v2444_v26 = vmul.f32 %v3317_v30, %v2443_v6  ;;  %v2460_v25 = vmul.f32 %v3321_v56, %v2451_v18  ;;  %v2467_v30 = vadd.f32 %v5510_v11, %v2466_v14  ;;  %v2487_v37 = vmul.f32 %v3327_v1, %v2486_v45 }
 0x21b   : > { %v2588_v11 = vmul.f32 %v5946_v63, %v5946_v63  ;;  %v2589_v14 = vmul.f32 %v5948_v61, %v5948_v61  ;;  %v2591_v18 = vmul.f32 %v5950_v42, %v5950_v42 }
 0x21c   : > { %v2461_v40 = vmul.f32 %v3325_v19, %v2460_v25  ;;  %v2468_v56 = vmul.f32 0.25, %v2444_v26  ;;  %v2463_v26 = vmul.f32 %v3327_v1, %v2462_v13 }
 0x21e   : > { %v2469_v15 = vmul.f32 %v2468_v56, %v2465_v51  ;;  %v2471_v28 = vmul.f32 0.25, %v2461_v40  ;;  %v2492_v41 = vmul.f32 %v2489_v49, %v2468_v56  ;;  %v2514_v6 = vmul.f32 %v2511_v22, %v2468_v56 }
 0x21f   : > { %v2590_v49 = vadd.f32 %v2589_v14, %v2588_v11  ;;  %v2509_v56 = vmul.f32 %v3327_v1, %v2508_v9 }
 0x220   : > { %v2472_v12 = vmul.f32 %v2471_v28, %v2467_v30  ;;  %v2494_v19 = vmul.f32 %v2491_v55, %v2471_v28  ;;  %v2470_v25 = vadd.f32 %v2469_v15, %v6363_v57  ;;  %v2516_v51 = vmul.f32 %v2513_v53, %v2471_v28 }
 0x221   : > { %v2493_v2 = vadd.f32 %v2492_v41, %v6365_v3  ;;  %v2515_v29 = vadd.f32 %v2514_v6, %v6435_v31  ;;  %v2592_v30 = vadd.f32 %v2591_v18, %v2590_v49 }
 0x222   : > { %v2473_v22 = vadd.f32 %v2472_v12, %v6364_v0  ;;  %v2495_v40 = vadd.f32 %v2494_v19, %v6434_v24  ;;  %v2517_v10 = vadd.f32 %v2516_v51, %v6436_v54  ;;  %v2474_v13 = vmul.f32 %v2470_v25, %v5890_v16  ;;  %v5973_v25 = vld [vmem:[%s3763_s14] sm:$0x3] }
 0x223   : > { %v2593_v53 = vadd.f32 1e-12, %v2592_v30  ;;  %v2496_v45 = vmul.f32 %v2493_v2, %v5890_v16  ;;  %v2518_v41 = vmul.f32 %v2515_v29, %v5890_v16  ;;  %v5978_v16 = vld [vmem:[%s3763_s14 + $0x2] sm:$0x3] }
 0x224   : > { %v2477_v55 = vmul.f32 %v2473_v22, %v2427_v34  ;;  %v2499_v36 = vmul.f32 %v2495_v40, %v2427_v34  ;;  %v2521_v15 = vmul.f32 %v2517_v10, %v2427_v34  ;;  %v2475_v12 = vmul.f32 %v2474_v13, %v2463_v26 }
 0x225   : > { %3328 = vrsqrt.f32 %v2593_v53  ;;  %v2497_v19 = vmul.f32 %v2496_v45, %v2487_v37  ;;  %v2519_v9 = vmul.f32 %v2518_v41, %v2509_v56  ;;  %v2643_v34 = vmul.f32 %v5789_v43, %v5911_v35 }
 0x226   : > { %v2478_v28 = vmul.f32 %v2477_v55, %v2463_v26  ;;  %v2500_v11 = vmul.f32 %v2499_v36, %v2487_v37  ;;  %v2522_v1 = vmul.f32 %v2521_v15, %v2509_v56  ;;  %v2623_v36 = vmul.f32 %v5973_v25, %v5911_v35 }
 0x227   : > { %v2624_v29 = vmul.f32 %v5978_v16, %v5914_v27  ;;  %v2644_v26 = vmul.f32 %v5794_v20, %v5914_v27  ;;  %v2476_v49 = vadd.f32 0.1, %v2475_v12  ;;  %v2629_v22 = vmul.f32 %v5973_v25, %v5927_v8 }
 0x228   : > { %v2479_v6 = vadd.f32 0.1, %v2478_v28  ;;  %v2501_v14 = vadd.f32 0.1, %v2500_v11  ;;  %v2523_v18 = vadd.f32 0.1, %v2522_v1  ;;  %v2630_v37 = vmul.f32 %v5978_v16, %v5930_v60 }
 0x229   : > { %v2498_v2 = vadd.f32 0.1, %v2497_v19  ;;  %v2649_v56 = vmul.f32 %v5789_v43, %v5927_v8  ;;  %v2650_v10 = vmul.f32 %v5794_v20, %v5930_v60  ;;  %v2520_v30 = vadd.f32 0.1, %v2519_v9 }
 0x22a   : > { %3330 = vrcp.f32 %v2479_v6  ;;  %vm2600_vm14 = vweird.f32 %v2593_v53  ;;  %v2626_v55 = vmul.f32 %v5565_v32, %v5916_v59  ;;  %v2625_v28 = vadd.f32 %v2624_v29, %v2623_v36 }
 0x22b   : > { %3332 = vrcp.f32 %v2501_v14  ;;  %v3329_v51 = vpop.eup %3328  ;;  %v2632_v45 = vmul.f32 %v5565_v32, %v5932_v33  ;;  %v2645_v11 = vadd.f32 %v2644_v26, %v2643_v34  ;;  %v2631_v6 = vadd.f32 %v2630_v37, %v2629_v22 }
 0x22c   : > { %3334 = vrcp.f32 %v2523_v18  ;;  %v2595_v40 = vmul.f32 %v3329_v51, %v2593_v53  ;;  %v2646_v8 = vmul.f32 %v5827_v47, %v5916_v59  ;;  %v2652_v60 = vmul.f32 %v5827_v47, %v5932_v33 }
 0x22d   : > { %vm2601_vm15 = vweird.f32 %v3329_v51  ;;  %v2651_v19 = vadd.f32 %v2650_v10, %v2649_v56  ;;  %v2627_v32 = vadd.f32 %v2626_v55, %v2625_v28  ;;  %v6001_v26 = vadd.f32 %v2632_v45, %v2631_v6 }
 0x22e   : > { %v2596_v15 = vmul.f32 %v3329_v51, %v2595_v40  ;;  %vm2602_vm0 = vmor %vm2600_vm14, %vm2601_vm15  ;;  %v2647_v34 = vadd.f32 %v2646_v8, %v2645_v11  ;;  %v6016_v8 = vld [vmem:[%s3763_s14 + $0x4] sm:$0x3] }
 0x22f   : > { %v2628_v22 = vmax.f32 %v2627_v32, 0.001  ;;  %v2635_v55 = vmax.f32 %v6001_v26, 0.001 }
 0x230   : > { %v3331_v13 = vpop.eup %3330  ;;  %v2597_v18 = vmul.f32 0.5, %v2596_v15  ;;  %v2648_v10 = vmax.f32 %v2647_v34, 0.001 }
 0x231   : > { %v3333_v41 = vpop.eup %3332  ;;  %v2481_v1 = vmul.f32 %v3331_v13, %v2476_v49  ;;  %v6003_v49 = vadd.f32 %v2652_v60, %v2651_v19 }
 0x232   : > { %v3335_v14 = vpop.eup %3334  ;;  %v2503_v12 = vmul.f32 %v3333_v41, %v2498_v2  ;;  %v2598_v36 = vsub.f32 1.5, %v2597_v18 }
 0x233   : > { %3336 = vlog2.f32 %v2481_v1  ;;  %v2525_v9 = vmul.f32 %v3335_v14, %v2520_v30  ;;  %v2655_v13 = vmax.f32 %v6003_v49, 0.001 }
 0x234   : > { %3338 = vlog2.f32 %v2503_v12  ;;  %v2599_v29 = vmul.f32 %v3329_v51, %v2598_v36  ;;  %v2685_v36 = vmul.f32 %v2648_v10, %v6314_v50 }
 0x235   : > { %3340 = vlog2.f32 %v2525_v9  ;;  %v2681_v9 = vmul.f32 %v2655_v13, %v6314_v50 }
 0x236   : > { %v2603_v33 = vsel %vm2602_vm0, %v3329_v51, %v2599_v29  ;;  %v2686_v50 = vadd.f32 %v2685_v36, %v6315_v52 }
 0x237   : > { %v2604_v2 = vmul.f32 %v2603_v33, %v5946_v63  ;;  %v2605_v40 = vmul.f32 %v2603_v33, %v5948_v61  ;;  %v2606_v56 = vmul.f32 %v2603_v33, %v5950_v42  ;;  %v2682_v13 = vadd.f32 %v2681_v9, %v6315_v52 }
 0x239   : > { %v3337_v37 = vpop.eup %3336  ;;  %v2607_v51 = vmul.f32 %v2604_v2, %v5911_v35  ;;  %v2608_v45 = vmul.f32 %v2605_v40, %v5914_v27  ;;  %v2610_v63 = vmul.f32 %v2606_v56, %v5916_v59  ;;  %v2617_v42 = vmul.f32 %v5973_v25, %v2604_v2 }
 0x23a   : > { %v3339_v30 = vpop.eup %3338  ;;  %v2483_v53 = vmul.f32 0.6931472, %v3337_v37  ;;  %v2618_v41 = vmul.f32 %v5978_v16, %v2605_v40  ;;  %v2620_v60 = vmul.f32 %v6016_v8, %v2606_v56  ;;  %v2637_v14 = vmul.f32 %v5789_v43, %v2604_v2  ;;  %v3431_v2 = vld [vmem:[%s3769_s15 + $0x6] sm:$0x3] }
 0x23b   : > { %v3341_v15 = vpop.eup %3340  ;;  %v2505_v28 = vmul.f32 0.6931472, %v3339_v30  ;;  %v2609_v6 = vadd.f32 %v2608_v45, %v2607_v51  ;;  %v2638_v59 = vmul.f32 %v5794_v20, %v2605_v40  ;;  %v2640_v19 = vmul.f32 %v5827_v47, %v2606_v56  ;;  %v6034_v51 = vld [vmem:[%s3769_s15 + $0x12] sm:$0x3] }
 0x23c   : > { %v2484_v11 = vand.u32 2147483647, %v2483_v53  ;;  %v2527_v61 = vmul.f32 0.6931472, %v3341_v15  ;;  %v2619_v12 = vadd.f32 %v2618_v41, %v2617_v42  ;;  %v2664_v37 = vmul.f32 %v2635_v55, %v4074_v23 }
 0x23d   : > { %v2506_v1 = vand.u32 2147483647, %v2505_v28  ;;  %v2611_v18 = vadd.f32 %v2610_v63, %v2609_v6  ;;  %v2639_v29 = vadd.f32 %v2638_v59, %v2637_v14  ;;  %v2668_v56 = vmul.f32 %v2628_v22, %v4074_v23  ;;  %v3433_v6 = vld [vmem:[%s3763_s14 + $0x6] sm:$0x3] }
 0x23e   : > { %v2485_v35 = vadd.f32 %v2484_v11, %v5871_v38  ;;  %v2528_v27 = vand.u32 2147483647, %v2527_v61  ;;  %v2621_v34 = vadd.f32 %v2620_v60, %v2619_v12  ;;  %v566_v38 = vadd.f32 0.01, %v3431_v2 }
 0x23f   : > { %v2612_v33 = vmax.f32 %v2611_v18, 0.001  ;;  %v2641_v40 = vadd.f32 %v2640_v19, %v2639_v29  ;;  %v2665_v55 = vadd.f32 %v2664_v37, %v6306_v48  ;;  %v585_v45 = vadd.f32 0.01, %v6034_v51  ;;  %v3434_v18 = vld [vmem:[%s3769_s15 + $0x8] sm:$0x3] }
 0x240   : > { %v2507_v32 = vadd.f32 %v2506_v1, %v2485_v35  ;;  %v2622_v53 = vmax.f32 %v2621_v34, 0.001  ;;  %3342 = vrcp.f32 %v566_v38  ;;  %v2580_v63 = vmax.f32 %v5831_v17, 1e-12  ;;  %v3435_v29 = vld [vmem:[%s3763_s14 + $0x12] sm:$0x3] }
 0x241   : > { %v2613_v15 = vsub.f32 1.0, %v2612_v33  ;;  %v2642_v28 = vmax.f32 %v2641_v40, 0.001  ;;  %v2669_v11 = vadd.f32 %v2668_v56, %v6306_v48  ;;  %v2683_v61 = vmax.f32 %v2682_v13, 0.001 }
 0x242   : > { %v6027_v30 = vadd.f32 %v2528_v27, %v2507_v32  ;;  %v2634_v10 = vmul.f32 %v2622_v53, %v2622_v53  ;;  %v2687_v42 = vmax.f32 %v2686_v50, 0.001  ;;  %v563_v60 = vadd.f32 0.01, %v3433_v6  ;;  %v3436_v56 = vld [vmem:[%s3769_s15 + $0xa] sm:$0x3] }
 0x243   : > { %v2654_v23 = vmul.f32 %v2642_v28, %v2642_v28  ;;  %v2614_v52 = vmul.f32 %v2613_v15, %v2613_v15  ;;  %3344 = vrcp.f32 %v585_v45  ;;  %v2666_v17 = vmax.f32 %v2665_v55, 0.001 }
 0x244   : > { %v2657_v22 = vmul.f32 %v4104_v21, %v2634_v10  ;;  %3346 = vrcp.f32 %v2580_v63  ;;  %v2670_v48 = vmax.f32 %v2669_v11, 0.001  ;;  %v604_v19 = vadd.f32 0.01, %v3434_v18 }
 0x245   : > { %v2674_v1 = vmul.f32 %v6352_v7, %v2654_v23  ;;  %v2615_v27 = vmul.f32 %v2614_v52, %v2614_v52  ;;  %3348 = vrcp.f32 %v2687_v42  ;;  %v582_v33 = vadd.f32 0.01, %v3435_v29 }
 0x246   : > { %v2658_v41 = vadd.f32 1.0, %v2657_v22  ;;  %v3343_v14 = vpop.eup %3342  ;;  %3350 = vrcp.f32 %v2683_v61  ;;  %v623_v38 = vadd.f32 0.01, %v5759_v39  ;;  %v642_v13 = vadd.f32 0.01, %v3436_v56 }
 0x247   : > { %v2675_v35 = vadd.f32 1.0, %v2674_v1  ;;  %v568_v12 = vmul.f32 %v3343_v14, %v563_v60  ;;  %3352 = vrcp.f32 %v2666_v17  ;;  %v2616_v34 = vmul.f32 %v2615_v27, %v2613_v15  ;;  %v3438_v1 = vld [vmem:[%s3769_s15 + $0xc] sm:$0x3]  ;;  %v3440_v27 = vld [vmem:[%s3763_s14 + $0x14] sm:$0x3] }
 0x248   : > { %v2659_v21 = vmax.f32 %v2658_v41, 0.001  ;;  %3354 = vrcp.f32 %v2670_v48  ;;  %v6060_v50 = vmax.f32 %v6001_v26, 0.0  ;;  %v2691_v10 = vstv %s6045_s7  ;;  %v3437_v26 = vld [vmem:[%s3763_s14 + $0x8] sm:$0x3] }
 0x249   : > { %v2676_v59 = vmax.f32 %v2675_v35, 0.001  ;;  %v3345_v9 = vpop.eup %3344  ;;  %3356 = vlog2.f32 %v568_v12  ;;  %v2693_v28 = vmul.f32 %v2616_v34, %v6423_v62  ;;  %v2695_v45 = vmul.f32 %v2616_v34, %v6424_v5  ;;  %v3439_v5 = vld [vmem:[%s3763_s14 + $0xc] sm:$0x3]  ;;  %v6438_v12 = vld [vmem:[#allocation45_spill] sm:$0xff] }
 0x24a   : > { %v2660_v7 = vmul.f32 3.1415927, %v2659_v21  ;;  %v6053_v37 = vpop.eup %3346  ;;  %v587_v40 = vmul.f32 %v3345_v9, %v582_v33  ;;  %v2715_v63 = vstv %s6047_s12  ;;  %v558_v23 = vsub.f32 %v5973_v25, %v5789_v43  ;;  %v3441_v9 = vld [vmem:[%s3763_s14 + $0xa] sm:$0x3] }
 0x24b   : > { %v2677_v32 = vmul.f32 3.1415927, %v2676_v59  ;;  %v6056_v53 = vpop.eup %3348  ;;  %v2717_v11 = vmul.f32 %v2616_v34, %v6428_v58  ;;  %v2737_v52 = vstv %s6049_s9  ;;  %v601_v61 = vadd.f32 0.01, %v3437_v26 }
 0x24c   : > { %v2661_v36 = vmul.f32 %v2660_v7, %v2659_v21  ;;  %v3351_v15 = vpop.eup %3350  ;;  %v2719_v62 = vmul.f32 %v2616_v34, %v6433_v44  ;;  %v2739_v41 = vmul.f32 %v2616_v34, %v6429_v4  ;;  %v577_v6 = vsub.f32 %v3439_v5, %v3438_v1  ;;  %v6437_v21 = vld [vmem:[#allocation23_spill] sm:$0xff]  ;;  %v2972_v5 = vld [vmem:[%s3769_s15 + $0xe] sm:$0x3] }
 0x24d   : > { %v2678_v2 = vmul.f32 %v2677_v32, %v2676_v59  ;;  %v3353_v55 = vpop.eup %3352  ;;  %v2694_v25 = vadd.f32 %v3435_v29, %v2693_v28  ;;  %v2741_v60 = vmul.f32 %v2616_v34, %v6418_v46  ;;  %v559_v58 = vand.u32 2147483647, %v558_v23  ;;  %v6439_v46 = vld [vmem:[#allocation22_spill] sm:$0xff] }
 0x24e   : > { %3358 = vrcp.f32 %v2661_v36  ;;  %v3355_v22 = vpop.eup %3354  ;;  %v2696_v35 = vadd.f32 %v6034_v51, %v2695_v45  ;;  %v620_v44 = vadd.f32 0.01, %v3440_v27  ;;  %v661_v4 = vadd.f32 0.01, %v6438_v12  ;;  %v6440_v23 = vld [vmem:[#allocation42_spill] sm:$0xff] }
 0x24f   : > { %3360 = vrcp.f32 %v604_v19  ;;  %v3357_v42 = vpop.eup %3356  ;;  %v578_v18 = vand.u32 2147483647, %v577_v6  ;;  %v639_v36 = vadd.f32 0.01, %v3441_v9  ;;  %v2718_v33 = vadd.f32 %v3440_v27, %v2717_v11  ;;  %v2971_v1 = vld [vmem:[%s3763_s14 + $0xe] sm:$0x3] }
 0x250   : > { %3362 = vrcp.f32 %v2678_v2  ;;  %v570_v14 = vmul.f32 0.6931472, %v3357_v42  ;;  %v596_v51 = vsub.f32 %v5978_v16, %v5794_v20  ;;  %v2740_v26 = vadd.f32 %v6440_v23, %v2739_v41 }
 0x251   : > { %3364 = vlog2.f32 %v587_v40  ;;  %v615_v41 = vsub.f32 %v2971_v1, %v2972_v5 }
 0x252   : > { %3366 = vrcp.f32 %v623_v38  ;;  %v571_v59 = vand.u32 2147483647, %v570_v14  ;;  %v2720_v38 = vadd.f32 %v5759_v39, %v2719_v62  ;;  %v597_v16 = vand.u32 2147483647, %v596_v51  ;;  %v2979_v51 = vld [vmem:[%s3763_s14 + $0x10] sm:$0x3] }
 0x253   : > { %3368 = vrcp.f32 %v642_v13 }
 0x254   : > { %v3359_v43 = vpop.eup %3358  ;;  %v572_v40 = vadd.f32 %v571_v59, %v559_v58  ;;  %v616_v59 = vand.u32 2147483647, %v615_v41 }
 0x255   : > { %v3361_v17 = vpop.eup %3360  ;;  %v2663_v48 = vmul.f32 %v3359_v43, %v6437_v21  ;;  %v2692_v21 = vmul.f32 %v6053_v37, %v2691_v10 }
 0x256   : > { %v3363_v7 = vpop.eup %3362  ;;  %v606_v19 = vmul.f32 %v3361_v17, %v601_v61  ;;  %v579_v61 = vadd.f32 %v578_v18, %v572_v40 }
 0x257   : > { %v3365_v32 = vpop.eup %3364  ;;  %v2672_v29 = vmul.f32 %v3353_v55, %v2663_v48  ;;  %v2680_v34 = vmul.f32 %v3363_v7, %v6439_v46  ;;  %v2738_v48 = vmul.f32 %v6053_v37, %v2737_v52 }
 0x258   : > { %v3367_v2 = vpop.eup %3366  ;;  %v589_v56 = vmul.f32 0.6931472, %v3365_v32  ;;  %3370 = vlog2.f32 %v606_v19 }
 0x259   : > { %v3369_v13 = vpop.eup %3368  ;;  %v2673_v28 = vmul.f32 %v3355_v22, %v2672_v29  ;;  %v2689_v45 = vmul.f32 %v3351_v15, %v2680_v34  ;;  %v625_v55 = vmul.f32 %v3367_v2, %v620_v44  ;;  %3372 = vrcp.f32 %v661_v4 }
 0x25a   : > { %v590_v42 = vand.u32 2147483647, %v589_v56  ;;  %v644_v11 = vmul.f32 %v3369_v13, %v639_v36  ;;  %v2656_v22 = vmax.f32 %v6003_v49, 0.0  ;;  %v2742_v15 = vadd.f32 %v6438_v12, %v2741_v60 }
 0x25b   : > { %v2690_v39 = vmul.f32 %v6056_v53, %v2689_v45  ;;  %v2697_v20 = vmul.f32 0.25, %v2673_v28  ;;  %3374 = vlog2.f32 %v625_v55  ;;  %v2716_v53 = vmul.f32 %v6053_v37, %v2715_v63 }
 0x25c   : > { %v591_v62 = vadd.f32 %v590_v42, %v579_v61  ;;  %3376 = vlog2.f32 %v644_v11  ;;  %v658_v44 = vadd.f32 0.01, %v6440_v23 }
 0x25d   : > { %v2698_v6 = vmul.f32 %v2697_v20, %v2694_v25  ;;  %v2700_v43 = vmul.f32 0.25, %v2690_v39  ;;  %v2721_v58 = vmul.f32 %v2718_v33, %v2697_v20  ;;  %v2743_v14 = vmul.f32 %v2740_v26, %v2697_v20 }
 0x25e   : > { %v3371_v17 = vpop.eup %3370  ;;  %v598_v60 = vadd.f32 %v597_v16, %v591_v62 }
 0x25f   : > { %v2701_v49 = vmul.f32 %v2700_v43, %v2696_v35  ;;  %v2723_v27 = vmul.f32 %v2720_v38, %v2700_v43  ;;  %v3373_v25 = vpop.eup %3372  ;;  %v2699_v12 = vadd.f32 %v2698_v6, %v6363_v57  ;;  %v2745_v4 = vmul.f32 %v2742_v15, %v2700_v43 }
 0x260   : > { %v608_v7 = vmul.f32 0.6931472, %v3371_v17  ;;  %v2722_v63 = vadd.f32 %v2721_v58, %v6365_v3  ;;  %v2744_v52 = vadd.f32 %v2743_v14, %v6435_v31  ;;  %v634_v57 = vsub.f32 %v6016_v8, %v5827_v47 }
 0x261   : > { %v3375_v18 = vpop.eup %3374  ;;  %v2702_v10 = vadd.f32 %v2701_v49, %v6364_v0  ;;  %v2724_v37 = vadd.f32 %v2723_v27, %v6434_v24  ;;  %v2746_v35 = vadd.f32 %v2745_v4, %v6436_v54  ;;  %v663_v29 = vmul.f32 %v3373_v25, %v658_v44  ;;  %v2980_v24 = vld [vmem:[%s3769_s15 + $0x10] sm:$0x3] }
 0x262   : > { %v609_v19 = vand.u32 2147483647, %v608_v7  ;;  %v627_v9 = vmul.f32 0.6931472, %v3375_v18  ;;  %v3377_v46 = vpop.eup %3376  ;;  %v2703_v0 = vmul.f32 %v2699_v12, %v6060_v50  ;;  %v2725_v31 = vmul.f32 %v2722_v63, %v6060_v50 }
 0x263   : > { %v2706_v36 = vmul.f32 %v2702_v10, %v2656_v22  ;;  %v2728_v32 = vmul.f32 %v2724_v37, %v2656_v22  ;;  %v2750_v34 = vmul.f32 %v2746_v35, %v2656_v22  ;;  %v2747_v38 = vmul.f32 %v2744_v52, %v6060_v50  ;;  %v2759_v37 = vld [vmem:[#allocation2] sm:$0x3] }
 0x264   : > { %v610_v3 = vadd.f32 %v609_v19, %v598_v60  ;;  %v628_v33 = vand.u32 2147483647, %v627_v9  ;;  %v635_v47 = vand.u32 2147483647, %v634_v57  ;;  %v646_v28 = vmul.f32 0.6931472, %v3377_v46 }
 0x265   : > { %v2707_v2 = vmul.f32 %v2706_v36, %v2692_v21  ;;  %v2729_v54 = vmul.f32 %v2728_v32, %v2716_v53  ;;  %v2751_v40 = vmul.f32 %v2750_v34, %v2738_v48  ;;  %v653_v45 = vsub.f32 %v2979_v51, %v2980_v24 }
 0x266   : > { %v617_v56 = vadd.f32 %v616_v59, %v610_v3  ;;  %v2704_v23 = vmul.f32 %v2703_v0, %v2692_v21  ;;  %3378 = vlog2.f32 %v663_v29  ;;  %v2726_v61 = vmul.f32 %v2725_v31, %v2716_v53  ;;  %v2762_v53 = vld [vmem:[#allocation3] sm:$0x3] }
 0x267   : > { %v2708_v8 = vadd.f32 0.1, %v2707_v2  ;;  %v2730_v13 = vadd.f32 0.1, %v2729_v54  ;;  %v2752_v26 = vadd.f32 0.1, %v2751_v40  ;;  %v2748_v1 = vmul.f32 %v2747_v38, %v2738_v48 }
 0x268   : > { %v629_v55 = vadd.f32 %v628_v33, %v617_v56  ;;  %v647_v42 = vand.u32 2147483647, %v646_v28  ;;  %v654_v11 = vand.u32 2147483647, %v653_v45  ;;  %v2705_v50 = vadd.f32 0.1, %v2704_v23 }
 0x269   : > { %3380 = vrcp.f32 %v2708_v8  ;;  %v2727_v20 = vadd.f32 0.1, %v2726_v61  ;;  %v2749_v22 = vadd.f32 0.1, %v2748_v1 }
 0x26a   : > { %3382 = vrcp.f32 %v2730_v13  ;;  %v636_v5 = vadd.f32 %v635_v47, %v629_v55 }
 0x26b   : > { %3384 = vrcp.f32 %v2752_v26 }
 0x26c   : > { %v648_v39 = vadd.f32 %v647_v42, %v636_v5  ;;  %v3379_v16 = vpop.eup %3378 }
 0x26d   : > { %v665_v41 = vmul.f32 0.6931472, %v3379_v16 }
 0x26e   : > { %v655_v62 = vadd.f32 %v654_v11, %v648_v39 }
 0x26f   : > { %v3381_v15 = vpop.eup %3380  ;;  %v666_v17 = vand.u32 2147483647, %v665_v41 }
 0x270   : > { %v3383_v6 = vpop.eup %3382  ;;  %v2710_v43 = vmul.f32 %v3381_v15, %v2705_v50 }
 0x271   : > { %v3385_v58 = vpop.eup %3384  ;;  %v2732_v14 = vmul.f32 %v3383_v6, %v2727_v20  ;;  %v667_v48 = vadd.f32 %v666_v17, %v655_v62 }
 0x272   : > { %3386 = vlog2.f32 %v2710_v43  ;;  %v2754_v21 = vmul.f32 %v3385_v58, %v2749_v22 }
 0x273   : > { %3388 = vlog2.f32 %v2732_v14  ;;  %v2763_v49 = vadd.f32 %v2762_v53, %v667_v48 }
 0x274   : > { %3390 = vlog2.f32 %v2754_v21 }
 0x275   : > { %2764 = vst [vmem:[#allocation3] sm:$0x3] %v2763_v49 }
 0x278   : > { %v3387_v27 = vpop.eup %3386 }
 0x279   : > { %v3389_v60 = vpop.eup %3388  ;;  %v2712_v44 = vmul.f32 0.6931472, %v3387_v27 }
 0x27a   : > { %v3391_v25 = vpop.eup %3390  ;;  %v2734_v12 = vmul.f32 0.6931472, %v3389_v60 }
 0x27b   : > { %v2713_v4 = vand.u32 2147483647, %v2712_v44  ;;  %v2756_v7 = vmul.f32 0.6931472, %v3391_v25 }
 0x27c   : > { %v2735_v59 = vand.u32 2147483647, %v2734_v12  ;;  %v2783_v57 = vld [vmem:[#allocation3] sm:$0x3] }
 0x27d   : > { %v2714_v18 = vadd.f32 %v2713_v4, %v6027_v30  ;;  %v2757_v10 = vand.u32 2147483647, %v2756_v7  ;;  %v2784_v36 = vsel %vm2769_vm1, %v2783_v57, 0.0 }
 0x27f   : > { %v2736_v63 = vadd.f32 %v2735_v59, %v2714_v18 }
 0x281   : > { %v2758_v52 = vadd.f32 %v2757_v10, %v2736_v63 }
 0x283   : > { %v2760_v35 = vadd.f32 %v2759_v37, %v2758_v52 }
 0x285   : > { %2761 = vst [vmem:[#allocation2] sm:$0x3] %v2760_v35 }
 0x28c   : > { %v2768_v19 = vld [vmem:[#allocation2] sm:$0x3] }
 0x28d   : > { %v2770_v9 = vsel %vm2769_vm1, %v2768_v19, 0.0 }
 0x28e   : > { %2771 = vadd.xlane.f32.xlu0 %v2770_v9 }
 0x296   : > { %2785 = vadd.xlane.f32.xlu0 %v2784_v36 }
 0x301   : > { %v2772_v32 = vpop.xlane.xlu0 %2771 }
 0x302   : > { %v2773_v29 = vrot.slane %v2772_v32, 4 }
 0x304   : > { %v2774_v46 = vadd.f32 %v2773_v29, %v2772_v32 }
 0x306   : > { %v2775_v0 = vrot.slane %v2774_v46, 2 }
 0x308   : > { %v2776_v30 = vadd.f32 %v2775_v0, %v2774_v46 }
 0x309   : > { %v2786_v34 = vpop.xlane.xlu0 %2785 }
 0x30a   : > { %v2777_v3 = vrot.slane %v2776_v30, 1  ;;  %v2787_v33 = vrot.slane %v2786_v34, 4 }
 0x30c   : > { %v2778_v51 = vadd.f32 %v2777_v3, %v2776_v30  ;;  %v2788_v24 = vadd.f32 %v2787_v33, %v2786_v34 }
 0x30e   : > { %2992 = vpush %v2778_v51  ;;  %v2789_v2 = vrot.slane %v2788_v24, 2 }
 0x310   : > { %v2790_v31 = vadd.f32 %v2789_v2, %v2788_v24 }
 0x312   : > { %v2791_v54 = vrot.slane %v2790_v31, 1 }
 0x314   : > { %v2792_v38 = vadd.f32 %v2791_v54, %v2790_v31 }
 0x316   : > { %2994 = vpush %v2792_v38 }
 0x33f   : > { %s2993_s2 = spop %2992 }
 0x340   : > { %v2780_v40 = vstv %s2993_s2 }
 0x341   : > { %2782 = vst.msk [vmem:[%s369_s25] sm:$0x1] %vm2781_vm2, %v2780_v40 }
 0x347   : > { %s2995_s17 = spop %2994 }
 0x348   : > { %v2794_v56 = vstv %s2995_s17 }
 0x349   : > { %2795 = vst.msk [vmem:[%s374_s6] sm:$0x1] %vm2781_vm2, %v2794_v56 }
 0x34a PF: > { %s21_s23 = sadd.s32 1, %s3605_s23   ;;  %s6441_s18 = smov %s3589_s19 }
 0x34b   : > { %p18_p2 = scmp.ge.s32.totalorder %s21_s23, 4   ;;  %s6442_s19 = smov %s3593_s20 }
 0x34c   : > { %s6443_s20 = smov %s3685_s29  ;;  %s6444_s21 = smov %s3601_s22 }
 0x34d   : > { %s6445_s22 = smov %s6447_s24  ;;  %20 = sbr.rel (!%p18_p2) target bundleno = 10 (0xa), region = 141 }
 0x352   :  { %2831 = vsyncpa [#allocation5], 1 }
 0x353   :  { %2833 = vsyncpa [#allocation5 + $0x1], 1 }
 0x354   :  { %2834 = vsyncpa [#allocation9], 1 }
 0x355   :  { %2836 = vsyncpa [#allocation9 + $0x1], 1 }
 0x356   :  { %2837 = vsyncpa [#allocation6], 1 }
 0x357   :  { %2839 = vsyncpa [#allocation6 + $0x1], 1 }

</bundles_post_ra>
